<compile_context>
chip_gen: v7x
topology: tpu7x:2x2x1
jax: 0.10.0
libtpu: 0.0.40
codegen_flags: <defaults>
</compile_context>

<pallas_src>
import functools

import jax
import jax.numpy as jnp
from jax.experimental import pallas as pl
from jax.experimental.pallas import tpu as pltpu

_UNROLL = 8  # rows handled per steady-state loop iteration (one full sublane group)


def _embeddings_kernel(wid_ref,                      # (B, S) int32 input ids, SMEM (prefetch)
                       word_hbm,                     # (V, H) word table, left in HBM
                       tt_tab_ref,                   # (tv_pad, H) token-type table (resident)
                       pos_ref,                      # (T_S, H) position rows of this chunk
                       gamma_ref, beta_ref,          # (1, H) LayerNorm params (resident)
                       tt_ids_ref,                   # (T_S, 1) int32 token-type ids (VMEM)
                       out_ref,                      # (T_S, H) output block (batch squeezed)
                       gbuf, addbuf, sems,           # scratch: gather buf, pos+tt buf, DMA sems
                       *, eps, n_buf, n_types, seq_major):
    if seq_major:
        j = pl.program_id(0)
        b = pl.program_id(1)
    else:
        b = pl.program_id(0)
        j = pl.program_id(1)
    t_s = gbuf.shape[0]
    tv_pad = tt_tab_ref.shape[0]
    base = j * t_s

    def start_row(t, row_id):
        pltpu.make_async_copy(word_hbm.at[row_id], gbuf.at[t], sems.at[t % n_buf]).start()

    def wait_row(t, row_id):
        pltpu.make_async_copy(word_hbm.at[row_id], gbuf.at[t], sems.at[t % n_buf]).wait()

    # ---- prologue: fully unrolled, fill the pipeline with n_buf outstanding row DMAs -----
    for t in range(n_buf):
        start_row(t, wid_ref[b, base + t])

    # ---- build position + token-type block while the word-row DMAs are in flight ---------
    ids = tt_ids_ref[...]                                            # (T_S, 1) int32
    if n_types <= 8:
        # Tiny type vocab (BERT: 2): exact row-select on the VPU.
        tt_blk = tt_tab_ref[pl.ds(0, 1), :].astype(jnp.float32)     # (1, H)
        for v in range(1, n_types):
            row_v = tt_tab_ref[pl.ds(v, 1), :].astype(jnp.float32)
            tt_blk = jnp.where(ids == v, row_v, tt_blk)             # -> (T_S, H)
    else:
        # Larger type vocab: one-hot gather on the otherwise-idle MXU.
        one_hot = (ids == jax.lax.broadcasted_iota(jnp.int32, (t_s, tv_pad), 1)
                   ).astype(jnp.float32)
        tt_blk = jnp.dot(one_hot, tt_tab_ref[...].astype(jnp.float32),
                         preferred_element_type=jnp.float32,
                         precision=jax.lax.Precision.HIGHEST)
    addbuf[...] = pos_ref[...].astype(jnp.float32) + tt_blk

    # ---- steady state: pure wait/start loop, _UNROLL rows per iteration ------------------
    main_rows = t_s - n_buf                                          # static, multiple of 8

    def chunk(c, carry):
        t0 = pl.multiple_of(c * _UNROLL, _UNROLL)
        # Hoist every SMEM scalar read above the first .wait() of this chunk
        # (a DMA wait breaks SMEM sst->sld forwarding even for unrelated addresses).
        wait_ids = [wid_ref[b, base + t0 + u] for u in range(_UNROLL)]
        next_ids = [wid_ref[b, base + t0 + u + n_buf] for u in range(_UNROLL)]
        for u in range(_UNROLL):
            wait_row(t0 + u, wait_ids[u])
            start_row(t0 + u + n_buf, next_ids[u])
        return carry

    jax.lax.fori_loop(0, main_rows // _UNROLL, chunk, 0)

    # ---- epilogue: drain the last n_buf rows (fully unrolled, ids hoisted) ---------------
    tail_ids = [wid_ref[b, base + main_rows + u] for u in range(n_buf)]
    for u in range(n_buf):
        wait_row(main_rows + u, tail_ids[u])

    # ---- fused add + LayerNorm over the whole lane-dense (T_S, H) block ------------------
    e = gbuf[...].astype(jnp.float32) + addbuf[...]
    mean = jnp.mean(e, axis=-1, keepdims=True)
    xc = e - mean
    var = jnp.mean(xc * xc, axis=-1, keepdims=True)
    y = xc * jax.lax.rsqrt(var + eps) * gamma_ref[...] + beta_ref[...]
    out_ref[...] = y.astype(out_ref.dtype)
    # TODO(synk): nn.Dropout is identity in eval mode; training-mode dropout omitted.


def elasticbert_embeddings(input_ids, token_type_ids, word_table, pos_table, tt_table,
                           gamma, beta, *, eps=1e-12, block_seq=512, n_buf=32):
    """input_ids/token_type_ids: (B, S) int. Returns (B, S, H) in the word-table dtype."""
    B, S = input_ids.shape
    V, H = word_table.shape
    assert H % 128 == 0, "hidden_size must be a multiple of 128 (lane width)"
    t_s = min(block_seq, S)
    assert S % t_s == 0 and t_s % _UNROLL == 0, "seq_len must divide into 8-aligned blocks"
    n_j = S // t_s
    n_buf = max(_UNROLL, min(n_buf, t_s))
    n_buf = (n_buf // _UNROLL) * _UNROLL            # keep the main loop trip-count exact

    # Glue: pad tiny token-type table to >=8 sublanes, 2-D LayerNorm params, int32 ids.
    tv = tt_table.shape[0]
    tv_pad = max(8, -(-tv // 8) * 8)
    tt_pad = jnp.zeros((tv_pad, H), tt_table.dtype).at[:tv].set(tt_table)
    gamma2 = gamma.reshape(1, H).astype(jnp.float32)
    beta2 = beta.reshape(1, H).astype(jnp.float32)
    wid = input_ids.astype(jnp.int32)
    tti = token_type_ids.astype(jnp.int32).reshape(B, S, 1)

    # Seq-chunk axis outermost so the position block is reused across the inner batch axis;
    # when there is only one seq chunk the pos index is constant anyway, so put batch first
    # to keep the leading parallel axis >= 2 for megacore sharding.
    seq_major = (n_j >= 2) or (B <= 1)
    grid = (n_j, B) if seq_major else (B, n_j)

    def _bj(g0, g1):
        return (g1, g0) if seq_major else (g0, g1)

    grid_spec = pltpu.PrefetchScalarGridSpec(
        num_scalar_prefetch=1,                                            # input_ids -> SMEM
        grid=grid,
        in_specs=[
            pl.BlockSpec(memory_space=pl.ANY),                            # word table in HBM
            pl.BlockSpec((tv_pad, H), lambda g0, g1, wid: (0, 0)),        # token-type table
            pl.BlockSpec((t_s, H), lambda g0, g1, wid: (_bj(g0, g1)[1], 0)),   # pos rows
            pl.BlockSpec((1, H), lambda g0, g1, wid: (0, 0)),             # gamma (resident)
            pl.BlockSpec((1, H), lambda g0, g1, wid: (0, 0)),             # beta  (resident)
            pl.BlockSpec((None, t_s, 1), lambda g0, g1, wid: (*_bj(g0, g1), 0)),  # tt ids
        ],
        out_specs=pl.BlockSpec((None, t_s, H), lambda g0, g1, wid: (*_bj(g0, g1), 0)),
        scratch_shapes=[
            pltpu.VMEM((t_s, H), word_table.dtype),   # word-row gather buffer
            pltpu.VMEM((t_s, H), jnp.float32),        # position + token-type block
            pltpu.SemaphoreType.DMA((n_buf,)),
        ],
    )

    out_dtype = word_table.dtype
    bytes_accessed = (B * S * H * word_table.dtype.itemsize        # word-row gather reads
                      + S * H * pos_table.dtype.itemsize           # pos reads (reused over B)
                      + B * S * H * jnp.dtype(out_dtype).itemsize  # output writes
                      + 2 * B * S * 4)                             # id reads

    return pl.pallas_call(
        functools.partial(_embeddings_kernel, eps=eps, n_buf=n_buf, n_types=tv,
                          seq_major=seq_major),
        grid_spec=grid_spec,
        out_shape=jax.ShapeDtypeStruct((B, S, H), out_dtype),
        compiler_params=pltpu.CompilerParams(
            dimension_semantics=("parallel", "parallel"),
            vmem_limit_bytes=48 * 1024 * 1024),
        cost_estimate=pl.CostEstimate(
            flops=10 * B * S * H + 2 * B * S * tv_pad * H,
            transcendentals=B * S,
            bytes_accessed=bytes_accessed),
    )(wid, word_table, tt_pad, pos_table, gamma2, beta2, tti)


def _reference(input_ids, token_type_ids, word_table, pos_table, tt_table, gamma, beta, eps):
    S = input_ids.shape[1]
    e = (word_table[input_ids] + tt_table[token_type_ids]
         + pos_table[jnp.arange(S)][None, :, :])
    mu = jnp.mean(e, axis=-1, keepdims=True)
    var = jnp.mean((e - mu) ** 2, axis=-1, keepdims=True)
    return (e - mu) * jax.lax.rsqrt(var + eps) * gamma + beta


if __name__ == "__main__":
    key = jax.random.PRNGKey(0)
    kw, kp, kt, kg, kb, ki, ktt = jax.random.split(key, 7)

    VOCAB, HIDDEN, MAX_POS, TYPE_V = 512, 256, 128, 2      # small, config-consistent shapes
    B, S = 2, 128

    word_table = 0.02 * jax.random.normal(kw, (VOCAB, HIDDEN), jnp.float32)
    pos_table = 0.02 * jax.random.normal(kp, (MAX_POS, HIDDEN), jnp.float32)
    tt_table = 0.02 * jax.random.normal(kt, (TYPE_V, HIDDEN), jnp.float32)
    gamma = 1.0 + 0.1 * jax.random.normal(kg, (HIDDEN,), jnp.float32)
    beta = 0.1 * jax.random.normal(kb, (HIDDEN,), jnp.float32)
    input_ids = jax.random.randint(ki, (B, S), 0, VOCAB, dtype=jnp.int32)
    token_type_ids = jax.random.randint(ktt, (B, S), 0, TYPE_V, dtype=jnp.int32)

    out = elasticbert_embeddings(input_ids, token_type_ids, word_table, pos_table,
                                 tt_table, gamma, beta, eps=1e-12)
    jax.block_until_ready(out)

    ref = _reference(input_ids, token_type_ids, word_table, pos_table, tt_table,
                     gamma, beta, 1e-12)
    assert out.shape == (B, S, HIDDEN)
    assert jnp.allclose(out, ref, atol=1e-4, rtol=1e-4), float(jnp.max(jnp.abs(out - ref)))

    print("KERNEL_OK")
</pallas_src>

<mosaic_0001>
module attributes {stable_mosaic.version = 11 : i64} {
  func.func @_embeddings_kernel(%arg0: i32, %arg1: i32, %arg2: memref<2x128xi32, #tpu.memory_space<smem>>, %arg3: memref<512x256xf32, #tpu.memory_space<any>>, %arg4: memref<8x256xf32, #tpu.memory_space<vmem>>, %arg5: memref<128x256xf32, #tpu.memory_space<vmem>>, %arg6: memref<1x256xf32, #tpu.memory_space<vmem>>, %arg7: memref<1x256xf32, #tpu.memory_space<vmem>>, %arg8: memref<1x128x1xi32, #tpu.memory_space<vmem>>, %arg9: memref<1x128x256xf32, #tpu.memory_space<vmem>>, %arg10: memref<128x256xf32, #tpu.memory_space<vmem>>, %arg11: memref<128x256xf32, #tpu.memory_space<vmem>>, %arg12: memref<32x!tpu.dma_semaphore, #tpu.memory_space<semaphore_mem>>) attributes {dimension_semantics = [#tpu.dimension_semantics<parallel>, #tpu.dimension_semantics<parallel>], iteration_bounds = array<i64: 2, 1>, scalar_prefetch = 1 : i64, scratch_operands = 3 : i64, tpu.core_type = #tpu.core_type<tc>, window_params = [{}, {pipeline_mode = #tpu.pipeline_mode<synchronous>, transform_indices = @transform_1, window_bounds = array<i64: 8, 256>}, {transform_indices = @transform_2, window_bounds = array<i64: 128, 256>}, {pipeline_mode = #tpu.pipeline_mode<synchronous>, transform_indices = @transform_3, window_bounds = array<i64: 1, 256>}, {pipeline_mode = #tpu.pipeline_mode<synchronous>, transform_indices = @transform_4, window_bounds = array<i64: 1, 256>}, {transform_indices = @transform_5, window_bounds = array<i64: 1, 128, 1>}, {transform_indices = @transform_6, window_bounds = array<i64: 1, 128, 256>}]} {
    %c128_i32 = arith.constant 128 : i32
    %0 = arith.muli %arg1, %c128_i32 : i32
    %c0_i32 = arith.constant 0 : i32
    %1 = arith.addi %0, %c0_i32 : i32
    %2 = arith.index_cast %arg0 : i32 to index
    %3 = arith.index_cast %1 : i32 to index
    %4 = memref.load %arg2[%2, %3] : memref<2x128xi32, #tpu.memory_space<smem>>
    %c0_i32_0 = arith.constant 0 : i32
    %c0_i32_1 = arith.constant 0 : i32
    %c0_i32_2 = arith.constant 0 : i32
    %5 = tpu.memref_slice %arg3[%4, %c0_i32_2] : memref<512x256xf32, #tpu.memory_space<any>> -> memref<1x256xf32, #tpu.memory_space<any>>
    %6 = tpu.memref_squeeze %5 : memref<1x256xf32, #tpu.memory_space<any>> -> memref<256xf32, #tpu.memory_space<any>>
    %c0_i32_3 = arith.constant 0 : i32
    %7 = tpu.memref_slice %arg10[%c0_i32_0, %c0_i32_3] : memref<128x256xf32, #tpu.memory_space<vmem>> -> memref<1x256xf32, #tpu.memory_space<vmem>>
    %8 = tpu.memref_squeeze %7 : memref<1x256xf32, #tpu.memory_space<vmem>> -> memref<256xf32, #tpu.memory_space<vmem>>
    %9 = tpu.memref_slice %arg12[%c0_i32_1] : memref<32x!tpu.dma_semaphore, #tpu.memory_space<semaphore_mem>> -> memref<1x!tpu.dma_semaphore, #tpu.memory_space<semaphore_mem>>
    %10 = tpu.memref_squeeze %9 : memref<1x!tpu.dma_semaphore, #tpu.memory_space<semaphore_mem>> -> memref<!tpu.dma_semaphore, #tpu.memory_space<semaphore_mem>>
    tpu.enqueue_dma source(%6 : memref<256xf32, #tpu.memory_space<any>>) target(%8 : memref<256xf32, #tpu.memory_space<vmem>>) target_semaphore(%10 : memref<!tpu.dma_semaphore, #tpu.memory_space<semaphore_mem>>)
    %c1_i32 = arith.constant 1 : i32
    %11 = arith.addi %0, %c1_i32 : i32
    %12 = arith.index_cast %arg0 : i32 to index
    %13 = arith.index_cast %11 : i32 to index
    %14 = memref.load %arg2[%12, %13] : memref<2x128xi32, #tpu.memory_space<smem>>
    %c1_i32_4 = arith.constant 1 : i32
    %c1_i32_5 = arith.constant 1 : i32
    %c0_i32_6 = arith.constant 0 : i32
    %15 = tpu.memref_slice %arg3[%14, %c0_i32_6] : memref<512x256xf32, #tpu.memory_space<any>> -> memref<1x256xf32, #tpu.memory_space<any>>
    %16 = tpu.memref_squeeze %15 : memref<1x256xf32, #tpu.memory_space<any>> -> memref<256xf32, #tpu.memory_space<any>>
    %c0_i32_7 = arith.constant 0 : i32
    %17 = tpu.memref_slice %arg10[%c1_i32_4, %c0_i32_7] : memref<128x256xf32, #tpu.memory_space<vmem>> -> memref<1x256xf32, #tpu.memory_space<vmem>>
    %18 = tpu.memref_squeeze %17 : memref<1x256xf32, #tpu.memory_space<vmem>> -> memref<256xf32, #tpu.memory_space<vmem>>
    %19 = tpu.memref_slice %arg12[%c1_i32_5] : memref<32x!tpu.dma_semaphore, #tpu.memory_space<semaphore_mem>> -> memref<1x!tpu.dma_semaphore, #tpu.memory_space<semaphore_mem>>
    %20 = tpu.memref_squeeze %19 : memref<1x!tpu.dma_semaphore, #tpu.memory_space<semaphore_mem>> -> memref<!tpu.dma_semaphore, #tpu.memory_space<semaphore_mem>>
    tpu.enqueue_dma source(%16 : memref<256xf32, #tpu.memory_space<any>>) target(%18 : memref<256xf32, #tpu.memory_space<vmem>>) target_semaphore(%20 : memref<!tpu.dma_semaphore, #tpu.memory_space<semaphore_mem>>)
    %c2_i32 = arith.constant 2 : i32
    %21 = arith.addi %0, %c2_i32 : i32
    %22 = arith.index_cast %arg0 : i32 to index
    %23 = arith.index_cast %21 : i32 to index
    %24 = memref.load %arg2[%22, %23] : memref<2x128xi32, #tpu.memory_space<smem>>
    %c2_i32_8 = arith.constant 2 : i32
    %c2_i32_9 = arith.constant 2 : i32
    %c0_i32_10 = arith.constant 0 : i32
    %25 = tpu.memref_slice %arg3[%24, %c0_i32_10] : memref<512x256xf32, #tpu.memory_space<any>> -> memref<1x256xf32, #tpu.memory_space<any>>
    %26 = tpu.memref_squeeze %25 : memref<1x256xf32, #tpu.memory_space<any>> -> memref<256xf32, #tpu.memory_space<any>>
    %c0_i32_11 = arith.constant 0 : i32
    %27 = tpu.memref_slice %arg10[%c2_i32_8, %c0_i32_11] : memref<128x256xf32, #tpu.memory_space<vmem>> -> memref<1x256xf32, #tpu.memory_space<vmem>>
    %28 = tpu.memref_squeeze %27 : memref<1x256xf32, #tpu.memory_space<vmem>> -> memref<256xf32, #tpu.memory_space<vmem>>
    %29 = tpu.memref_slice %arg12[%c2_i32_9] : memref<32x!tpu.dma_semaphore, #tpu.memory_space<semaphore_mem>> -> memref<1x!tpu.dma_semaphore, #tpu.memory_space<semaphore_mem>>
    %30 = tpu.memref_squeeze %29 : memref<1x!tpu.dma_semaphore, #tpu.memory_space<semaphore_mem>> -> memref<!tpu.dma_semaphore, #tpu.memory_space<semaphore_mem>>
    tpu.enqueue_dma source(%26 : memref<256xf32, #tpu.memory_space<any>>) target(%28 : memref<256xf32, #tpu.memory_space<vmem>>) target_semaphore(%30 : memref<!tpu.dma_semaphore, #tpu.memory_space<semaphore_mem>>)
    %c3_i32 = arith.constant 3 : i32
    %31 = arith.addi %0, %c3_i32 : i32
    %32 = arith.index_cast %arg0 : i32 to index
    %33 = arith.index_cast %31 : i32 to index
    %34 = memref.load %arg2[%32, %33] : memref<2x128xi32, #tpu.memory_space<smem>>
    %c3_i32_12 = arith.constant 3 : i32
    %c3_i32_13 = arith.constant 3 : i32
    %c0_i32_14 = arith.constant 0 : i32
    %35 = tpu.memref_slice %arg3[%34, %c0_i32_14] : memref<512x256xf32, #tpu.memory_space<any>> -> memref<1x256xf32, #tpu.memory_space<any>>
    %36 = tpu.memref_squeeze %35 : memref<1x256xf32, #tpu.memory_space<any>> -> memref<256xf32, #tpu.memory_space<any>>
    %c0_i32_15 = arith.constant 0 : i32
    %37 = tpu.memref_slice %arg10[%c3_i32_12, %c0_i32_15] : memref<128x256xf32, #tpu.memory_space<vmem>> -> memref<1x256xf32, #tpu.memory_space<vmem>>
    %38 = tpu.memref_squeeze %37 : memref<1x256xf32, #tpu.memory_space<vmem>> -> memref<256xf32, #tpu.memory_space<vmem>>
    %39 = tpu.memref_slice %arg12[%c3_i32_13] : memref<32x!tpu.dma_semaphore, #tpu.memory_space<semaphore_mem>> -> memref<1x!tpu.dma_semaphore, #tpu.memory_space<semaphore_mem>>
    %40 = tpu.memref_squeeze %39 : memref<1x!tpu.dma_semaphore, #tpu.memory_space<semaphore_mem>> -> memref<!tpu.dma_semaphore, #tpu.memory_space<semaphore_mem>>
    tpu.enqueue_dma source(%36 : memref<256xf32, #tpu.memory_space<any>>) target(%38 : memref<256xf32, #tpu.memory_space<vmem>>) target_semaphore(%40 : memref<!tpu.dma_semaphore, #tpu.memory_space<semaphore_mem>>)
    %c4_i32 = arith.constant 4 : i32
    %41 = arith.addi %0, %c4_i32 : i32
    %42 = arith.index_cast %arg0 : i32 to index
    %43 = arith.index_cast %41 : i32 to index
    %44 = memref.load %arg2[%42, %43] : memref<2x128xi32, #tpu.memory_space<smem>>
    %c4_i32_16 = arith.constant 4 : i32
    %c4_i32_17 = arith.constant 4 : i32
    %c0_i32_18 = arith.constant 0 : i32
    %45 = tpu.memref_slice %arg3[%44, %c0_i32_18] : memref<512x256xf32, #tpu.memory_space<any>> -> memref<1x256xf32, #tpu.memory_space<any>>
    %46 = tpu.memref_squeeze %45 : memref<1x256xf32, #tpu.memory_space<any>> -> memref<256xf32, #tpu.memory_space<any>>
    %c0_i32_19 = arith.constant 0 : i32
    %47 = tpu.memref_slice %arg10[%c4_i32_16, %c0_i32_19] : memref<128x256xf32, #tpu.memory_space<vmem>> -> memref<1x256xf32, #tpu.memory_space<vmem>>
    %48 = tpu.memref_squeeze %47 : memref<1x256xf32, #tpu.memory_space<vmem>> -> memref<256xf32, #tpu.memory_space<vmem>>
    %49 = tpu.memref_slice %arg12[%c4_i32_17] : memref<32x!tpu.dma_semaphore, #tpu.memory_space<semaphore_mem>> -> memref<1x!tpu.dma_semaphore, #tpu.memory_space<semaphore_mem>>
    %50 = tpu.memref_squeeze %49 : memref<1x!tpu.dma_semaphore, #tpu.memory_space<semaphore_mem>> -> memref<!tpu.dma_semaphore, #tpu.memory_space<semaphore_mem>>
    tpu.enqueue_dma source(%46 : memref<256xf32, #tpu.memory_space<any>>) target(%48 : memref<256xf32, #tpu.memory_space<vmem>>) target_semaphore(%50 : memref<!tpu.dma_semaphore, #tpu.memory_space<semaphore_mem>>)
    %c5_i32 = arith.constant 5 : i32
    %51 = arith.addi %0, %c5_i32 : i32
    %52 = arith.index_cast %arg0 : i32 to index
    %53 = arith.index_cast %51 : i32 to index
    %54 = memref.load %arg2[%52, %53] : memref<2x128xi32, #tpu.memory_space<smem>>
    %c5_i32_20 = arith.constant 5 : i32
    %c5_i32_21 = arith.constant 5 : i32
    %c0_i32_22 = arith.constant 0 : i32
    %55 = tpu.memref_slice %arg3[%54, %c0_i32_22] : memref<512x256xf32, #tpu.memory_space<any>> -> memref<1x256xf32, #tpu.memory_space<any>>
    %56 = tpu.memref_squeeze %55 : memref<1x256xf32, #tpu.memory_space<any>> -> memref<256xf32, #tpu.memory_space<any>>
    %c0_i32_23 = arith.constant 0 : i32
    %57 = tpu.memref_slice %arg10[%c5_i32_20, %c0_i32_23] : memref<128x256xf32, #tpu.memory_space<vmem>> -> memref<1x256xf32, #tpu.memory_space<vmem>>
    %58 = tpu.memref_squeeze %57 : memref<1x256xf32, #tpu.memory_space<vmem>> -> memref<256xf32, #tpu.memory_space<vmem>>
    %59 = tpu.memref_slice %arg12[%c5_i32_21] : memref<32x!tpu.dma_semaphore, #tpu.memory_space<semaphore_mem>> -> memref<1x!tpu.dma_semaphore, #tpu.memory_space<semaphore_mem>>
    %60 = tpu.memref_squeeze %59 : memref<1x!tpu.dma_semaphore, #tpu.memory_space<semaphore_mem>> -> memref<!tpu.dma_semaphore, #tpu.memory_space<semaphore_mem>>
    tpu.enqueue_dma source(%56 : memref<256xf32, #tpu.memory_space<any>>) target(%58 : memref<256xf32, #tpu.memory_space<vmem>>) target_semaphore(%60 : memref<!tpu.dma_semaphore, #tpu.memory_space<semaphore_mem>>)
    %c6_i32 = arith.constant 6 : i32
    %61 = arith.addi %0, %c6_i32 : i32
    %62 = arith.index_cast %arg0 : i32 to index
    %63 = arith.index_cast %61 : i32 to index
    %64 = memref.load %arg2[%62, %63] : memref<2x128xi32, #tpu.memory_space<smem>>
    %c6_i32_24 = arith.constant 6 : i32
    %c6_i32_25 = arith.constant 6 : i32
    %c0_i32_26 = arith.constant 0 : i32
    %65 = tpu.memref_slice %arg3[%64, %c0_i32_26] : memref<512x256xf32, #tpu.memory_space<any>> -> memref<1x256xf32, #tpu.memory_space<any>>
    %66 = tpu.memref_squeeze %65 : memref<1x256xf32, #tpu.memory_space<any>> -> memref<256xf32, #tpu.memory_space<any>>
    %c0_i32_27 = arith.constant 0 : i32
    %67 = tpu.memref_slice %arg10[%c6_i32_24, %c0_i32_27] : memref<128x256xf32, #tpu.memory_space<vmem>> -> memref<1x256xf32, #tpu.memory_space<vmem>>
    %68 = tpu.memref_squeeze %67 : memref<1x256xf32, #tpu.memory_space<vmem>> -> memref<256xf32, #tpu.memory_space<vmem>>
    %69 = tpu.memref_slice %arg12[%c6_i32_25] : memref<32x!tpu.dma_semaphore, #tpu.memory_space<semaphore_mem>> -> memref<1x!tpu.dma_semaphore, #tpu.memory_space<semaphore_mem>>
    %70 = tpu.memref_squeeze %69 : memref<1x!tpu.dma_semaphore, #tpu.memory_space<semaphore_mem>> -> memref<!tpu.dma_semaphore, #tpu.memory_space<semaphore_mem>>
    tpu.enqueue_dma source(%66 : memref<256xf32, #tpu.memory_space<any>>) target(%68 : memref<256xf32, #tpu.memory_space<vmem>>) target_semaphore(%70 : memref<!tpu.dma_semaphore, #tpu.memory_space<semaphore_mem>>)
    %c7_i32 = arith.constant 7 : i32
    %71 = arith.addi %0, %c7_i32 : i32
    %72 = arith.index_cast %arg0 : i32 to index
    %73 = arith.index_cast %71 : i32 to index
    %74 = memref.load %arg2[%72, %73] : memref<2x128xi32, #tpu.memory_space<smem>>
    %c7_i32_28 = arith.constant 7 : i32
    %c7_i32_29 = arith.constant 7 : i32
    %c0_i32_30 = arith.constant 0 : i32
    %75 = tpu.memref_slice %arg3[%74, %c0_i32_30] : memref<512x256xf32, #tpu.memory_space<any>> -> memref<1x256xf32, #tpu.memory_space<any>>
    %76 = tpu.memref_squeeze %75 : memref<1x256xf32, #tpu.memory_space<any>> -> memref<256xf32, #tpu.memory_space<any>>
    %c0_i32_31 = arith.constant 0 : i32
    %77 = tpu.memref_slice %arg10[%c7_i32_28, %c0_i32_31] : memref<128x256xf32, #tpu.memory_space<vmem>> -> memref<1x256xf32, #tpu.memory_space<vmem>>
    %78 = tpu.memref_squeeze %77 : memref<1x256xf32, #tpu.memory_space<vmem>> -> memref<256xf32, #tpu.memory_space<vmem>>
    %79 = tpu.memref_slice %arg12[%c7_i32_29] : memref<32x!tpu.dma_semaphore, #tpu.memory_space<semaphore_mem>> -> memref<1x!tpu.dma_semaphore, #tpu.memory_space<semaphore_mem>>
    %80 = tpu.memref_squeeze %79 : memref<1x!tpu.dma_semaphore, #tpu.memory_space<semaphore_mem>> -> memref<!tpu.dma_semaphore, #tpu.memory_space<semaphore_mem>>
    tpu.enqueue_dma source(%76 : memref<256xf32, #tpu.memory_space<any>>) target(%78 : memref<256xf32, #tpu.memory_space<vmem>>) target_semaphore(%80 : memref<!tpu.dma_semaphore, #tpu.memory_space<semaphore_mem>>)
    %c8_i32 = arith.constant 8 : i32
    %81 = arith.addi %0, %c8_i32 : i32
    %82 = arith.index_cast %arg0 : i32 to index
    %83 = arith.index_cast %81 : i32 to index
    %84 = memref.load %arg2[%82, %83] : memref<2x128xi32, #tpu.memory_space<smem>>
    %c8_i32_32 = arith.constant 8 : i32
    %c8_i32_33 = arith.constant 8 : i32
    %c0_i32_34 = arith.constant 0 : i32
    %85 = tpu.memref_slice %arg3[%84, %c0_i32_34] : memref<512x256xf32, #tpu.memory_space<any>> -> memref<1x256xf32, #tpu.memory_space<any>>
    %86 = tpu.memref_squeeze %85 : memref<1x256xf32, #tpu.memory_space<any>> -> memref<256xf32, #tpu.memory_space<any>>
    %c0_i32_35 = arith.constant 0 : i32
    %87 = tpu.memref_slice %arg10[%c8_i32_32, %c0_i32_35] : memref<128x256xf32, #tpu.memory_space<vmem>> -> memref<1x256xf32, #tpu.memory_space<vmem>>
    %88 = tpu.memref_squeeze %87 : memref<1x256xf32, #tpu.memory_space<vmem>> -> memref<256xf32, #tpu.memory_space<vmem>>
    %89 = tpu.memref_slice %arg12[%c8_i32_33] : memref<32x!tpu.dma_semaphore, #tpu.memory_space<semaphore_mem>> -> memref<1x!tpu.dma_semaphore, #tpu.memory_space<semaphore_mem>>
    %90 = tpu.memref_squeeze %89 : memref<1x!tpu.dma_semaphore, #tpu.memory_space<semaphore_mem>> -> memref<!tpu.dma_semaphore, #tpu.memory_space<semaphore_mem>>
    tpu.enqueue_dma source(%86 : memref<256xf32, #tpu.memory_space<any>>) target(%88 : memref<256xf32, #tpu.memory_space<vmem>>) target_semaphore(%90 : memref<!tpu.dma_semaphore, #tpu.memory_space<semaphore_mem>>)
    %c9_i32 = arith.constant 9 : i32
    %91 = arith.addi %0, %c9_i32 : i32
    %92 = arith.index_cast %arg0 : i32 to index
    %93 = arith.index_cast %91 : i32 to index
    %94 = memref.load %arg2[%92, %93] : memref<2x128xi32, #tpu.memory_space<smem>>
    %c9_i32_36 = arith.constant 9 : i32
    %c9_i32_37 = arith.constant 9 : i32
    %c0_i32_38 = arith.constant 0 : i32
    %95 = tpu.memref_slice %arg3[%94, %c0_i32_38] : memref<512x256xf32, #tpu.memory_space<any>> -> memref<1x256xf32, #tpu.memory_space<any>>
    %96 = tpu.memref_squeeze %95 : memref<1x256xf32, #tpu.memory_space<any>> -> memref<256xf32, #tpu.memory_space<any>>
    %c0_i32_39 = arith.constant 0 : i32
    %97 = tpu.memref_slice %arg10[%c9_i32_36, %c0_i32_39] : memref<128x256xf32, #tpu.memory_space<vmem>> -> memref<1x256xf32, #tpu.memory_space<vmem>>
    %98 = tpu.memref_squeeze %97 : memref<1x256xf32, #tpu.memory_space<vmem>> -> memref<256xf32, #tpu.memory_space<vmem>>
    %99 = tpu.memref_slice %arg12[%c9_i32_37] : memref<32x!tpu.dma_semaphore, #tpu.memory_space<semaphore_mem>> -> memref<1x!tpu.dma_semaphore, #tpu.memory_space<semaphore_mem>>
    %100 = tpu.memref_squeeze %99 : memref<1x!tpu.dma_semaphore, #tpu.memory_space<semaphore_mem>> -> memref<!tpu.dma_semaphore, #tpu.memory_space<semaphore_mem>>
    tpu.enqueue_dma source(%96 : memref<256xf32, #tpu.memory_space<any>>) target(%98 : memref<256xf32, #tpu.memory_space<vmem>>) target_semaphore(%100 : memref<!tpu.dma_semaphore, #tpu.memory_space<semaphore_mem>>)
    %c10_i32 = arith.constant 10 : i32
    %101 = arith.addi %0, %c10_i32 : i32
    %102 = arith.index_cast %arg0 : i32 to index
    %103 = arith.index_cast %101 : i32 to index
    %104 = memref.load %arg2[%102, %103] : memref<2x128xi32, #tpu.memory_space<smem>>
    %c10_i32_40 = arith.constant 10 : i32
    %c10_i32_41 = arith.constant 10 : i32
    %c0_i32_42 = arith.constant 0 : i32
    %105 = tpu.memref_slice %arg3[%104, %c0_i32_42] : memref<512x256xf32, #tpu.memory_space<any>> -> memref<1x256xf32, #tpu.memory_space<any>>
    %106 = tpu.memref_squeeze %105 : memref<1x256xf32, #tpu.memory_space<any>> -> memref<256xf32, #tpu.memory_space<any>>
    %c0_i32_43 = arith.constant 0 : i32
    %107 = tpu.memref_slice %arg10[%c10_i32_40, %c0_i32_43] : memref<128x256xf32, #tpu.memory_space<vmem>> -> memref<1x256xf32, #tpu.memory_space<vmem>>
    %108 = tpu.memref_squeeze %107 : memref<1x256xf32, #tpu.memory_space<vmem>> -> memref<256xf32, #tpu.memory_space<vmem>>
    %109 = tpu.memref_slice %arg12[%c10_i32_41] : memref<32x!tpu.dma_semaphore, #tpu.memory_space<semaphore_mem>> -> memref<1x!tpu.dma_semaphore, #tpu.memory_space<semaphore_mem>>
    %110 = tpu.memref_squeeze %109 : memref<1x!tpu.dma_semaphore, #tpu.memory_space<semaphore_mem>> -> memref<!tpu.dma_semaphore, #tpu.memory_space<semaphore_mem>>
    tpu.enqueue_dma source(%106 : memref<256xf32, #tpu.memory_space<any>>) target(%108 : memref<256xf32, #tpu.memory_space<vmem>>) target_semaphore(%110 : memref<!tpu.dma_semaphore, #tpu.memory_space<semaphore_mem>>)
    %c11_i32 = arith.constant 11 : i32
    %111 = arith.addi %0, %c11_i32 : i32
    %112 = arith.index_cast %arg0 : i32 to index
    %113 = arith.index_cast %111 : i32 to index
    %114 = memref.load %arg2[%112, %113] : memref<2x128xi32, #tpu.memory_space<smem>>
    %c11_i32_44 = arith.constant 11 : i32
    %c11_i32_45 = arith.constant 11 : i32
    %c0_i32_46 = arith.constant 0 : i32
    %115 = tpu.memref_slice %arg3[%114, %c0_i32_46] : memref<512x256xf32, #tpu.memory_space<any>> -> memref<1x256xf32, #tpu.memory_space<any>>
    %116 = tpu.memref_squeeze %115 : memref<1x256xf32, #tpu.memory_space<any>> -> memref<256xf32, #tpu.memory_space<any>>
    %c0_i32_47 = arith.constant 0 : i32
    %117 = tpu.memref_slice %arg10[%c11_i32_44, %c0_i32_47] : memref<128x256xf32, #tpu.memory_space<vmem>> -> memref<1x256xf32, #tpu.memory_space<vmem>>
    %118 = tpu.memref_squeeze %117 : memref<1x256xf32, #tpu.memory_space<vmem>> -> memref<256xf32, #tpu.memory_space<vmem>>
    %119 = tpu.memref_slice %arg12[%c11_i32_45] : memref<32x!tpu.dma_semaphore, #tpu.memory_space<semaphore_mem>> -> memref<1x!tpu.dma_semaphore, #tpu.memory_space<semaphore_mem>>
    %120 = tpu.memref_squeeze %119 : memref<1x!tpu.dma_semaphore, #tpu.memory_space<semaphore_mem>> -> memref<!tpu.dma_semaphore, #tpu.memory_space<semaphore_mem>>
    tpu.enqueue_dma source(%116 : memref<256xf32, #tpu.memory_space<any>>) target(%118 : memref<256xf32, #tpu.memory_space<vmem>>) target_semaphore(%120 : memref<!tpu.dma_semaphore, #tpu.memory_space<semaphore_mem>>)
    %c12_i32 = arith.constant 12 : i32
    %121 = arith.addi %0, %c12_i32 : i32
    %122 = arith.index_cast %arg0 : i32 to index
    %123 = arith.index_cast %121 : i32 to index
    %124 = memref.load %arg2[%122, %123] : memref<2x128xi32, #tpu.memory_space<smem>>
    %c12_i32_48 = arith.constant 12 : i32
    %c12_i32_49 = arith.constant 12 : i32
    %c0_i32_50 = arith.constant 0 : i32
    %125 = tpu.memref_slice %arg3[%124, %c0_i32_50] : memref<512x256xf32, #tpu.memory_space<any>> -> memref<1x256xf32, #tpu.memory_space<any>>
    %126 = tpu.memref_squeeze %125 : memref<1x256xf32, #tpu.memory_space<any>> -> memref<256xf32, #tpu.memory_space<any>>
    %c0_i32_51 = arith.constant 0 : i32
    %127 = tpu.memref_slice %arg10[%c12_i32_48, %c0_i32_51] : memref<128x256xf32, #tpu.memory_space<vmem>> -> memref<1x256xf32, #tpu.memory_space<vmem>>
    %128 = tpu.memref_squeeze %127 : memref<1x256xf32, #tpu.memory_space<vmem>> -> memref<256xf32, #tpu.memory_space<vmem>>
    %129 = tpu.memref_slice %arg12[%c12_i32_49] : memref<32x!tpu.dma_semaphore, #tpu.memory_space<semaphore_mem>> -> memref<1x!tpu.dma_semaphore, #tpu.memory_space<semaphore_mem>>
    %130 = tpu.memref_squeeze %129 : memref<1x!tpu.dma_semaphore, #tpu.memory_space<semaphore_mem>> -> memref<!tpu.dma_semaphore, #tpu.memory_space<semaphore_mem>>
    tpu.enqueue_dma source(%126 : memref<256xf32, #tpu.memory_space<any>>) target(%128 : memref<256xf32, #tpu.memory_space<vmem>>) target_semaphore(%130 : memref<!tpu.dma_semaphore, #tpu.memory_space<semaphore_mem>>)
    %c13_i32 = arith.constant 13 : i32
    %131 = arith.addi %0, %c13_i32 : i32
    %132 = arith.index_cast %arg0 : i32 to index
    %133 = arith.index_cast %131 : i32 to index
    %134 = memref.load %arg2[%132, %133] : memref<2x128xi32, #tpu.memory_space<smem>>
    %c13_i32_52 = arith.constant 13 : i32
    %c13_i32_53 = arith.constant 13 : i32
    %c0_i32_54 = arith.constant 0 : i32
    %135 = tpu.memref_slice %arg3[%134, %c0_i32_54] : memref<512x256xf32, #tpu.memory_space<any>> -> memref<1x256xf32, #tpu.memory_space<any>>
    %136 = tpu.memref_squeeze %135 : memref<1x256xf32, #tpu.memory_space<any>> -> memref<256xf32, #tpu.memory_space<any>>
    %c0_i32_55 = arith.constant 0 : i32
    %137 = tpu.memref_slice %arg10[%c13_i32_52, %c0_i32_55] : memref<128x256xf32, #tpu.memory_space<vmem>> -> memref<1x256xf32, #tpu.memory_space<vmem>>
    %138 = tpu.memref_squeeze %137 : memref<1x256xf32, #tpu.memory_space<vmem>> -> memref<256xf32, #tpu.memory_space<vmem>>
    %139 = tpu.memref_slice %arg12[%c13_i32_53] : memref<32x!tpu.dma_semaphore, #tpu.memory_space<semaphore_mem>> -> memref<1x!tpu.dma_semaphore, #tpu.memory_space<semaphore_mem>>
    %140 = tpu.memref_squeeze %139 : memref<1x!tpu.dma_semaphore, #tpu.memory_space<semaphore_mem>> -> memref<!tpu.dma_semaphore, #tpu.memory_space<semaphore_mem>>
    tpu.enqueue_dma source(%136 : memref<256xf32, #tpu.memory_space<any>>) target(%138 : memref<256xf32, #tpu.memory_space<vmem>>) target_semaphore(%140 : memref<!tpu.dma_semaphore, #tpu.memory_space<semaphore_mem>>)
    %c14_i32 = arith.constant 14 : i32
    %141 = arith.addi %0, %c14_i32 : i32
    %142 = arith.index_cast %arg0 : i32 to index
    %143 = arith.index_cast %141 : i32 to index
    %144 = memref.load %arg2[%142, %143] : memref<2x128xi32, #tpu.memory_space<smem>>
    %c14_i32_56 = arith.constant 14 : i32
    %c14_i32_57 = arith.constant 14 : i32
    %c0_i32_58 = arith.constant 0 : i32
    %145 = tpu.memref_slice %arg3[%144, %c0_i32_58] : memref<512x256xf32, #tpu.memory_space<any>> -> memref<1x256xf32, #tpu.memory_space<any>>
    %146 = tpu.memref_squeeze %145 : memref<1x256xf32, #tpu.memory_space<any>> -> memref<256xf32, #tpu.memory_space<any>>
    %c0_i32_59 = arith.constant 0 : i32
    %147 = tpu.memref_slice %arg10[%c14_i32_56, %c0_i32_59] : memref<128x256xf32, #tpu.memory_space<vmem>> -> memref<1x256xf32, #tpu.memory_space<vmem>>
    %148 = tpu.memref_squeeze %147 : memref<1x256xf32, #tpu.memory_space<vmem>> -> memref<256xf32, #tpu.memory_space<vmem>>
    %149 = tpu.memref_slice %arg12[%c14_i32_57] : memref<32x!tpu.dma_semaphore, #tpu.memory_space<semaphore_mem>> -> memref<1x!tpu.dma_semaphore, #tpu.memory_space<semaphore_mem>>
    %150 = tpu.memref_squeeze %149 : memref<1x!tpu.dma_semaphore, #tpu.memory_space<semaphore_mem>> -> memref<!tpu.dma_semaphore, #tpu.memory_space<semaphore_mem>>
    tpu.enqueue_dma source(%146 : memref<256xf32, #tpu.memory_space<any>>) target(%148 : memref<256xf32, #tpu.memory_space<vmem>>) target_semaphore(%150 : memref<!tpu.dma_semaphore, #tpu.memory_space<semaphore_mem>>)
    %c15_i32 = arith.constant 15 : i32
    %151 = arith.addi %0, %c15_i32 : i32
    %152 = arith.index_cast %arg0 : i32 to index
    %153 = arith.index_cast %151 : i32 to index
    %154 = memref.load %arg2[%152, %153] : memref<2x128xi32, #tpu.memory_space<smem>>
    %c15_i32_60 = arith.constant 15 : i32
    %c15_i32_61 = arith.constant 15 : i32
    %c0_i32_62 = arith.constant 0 : i32
    %155 = tpu.memref_slice %arg3[%154, %c0_i32_62] : memref<512x256xf32, #tpu.memory_space<any>> -> memref<1x256xf32, #tpu.memory_space<any>>
    %156 = tpu.memref_squeeze %155 : memref<1x256xf32, #tpu.memory_space<any>> -> memref<256xf32, #tpu.memory_space<any>>
    %c0_i32_63 = arith.constant 0 : i32
    %157 = tpu.memref_slice %arg10[%c15_i32_60, %c0_i32_63] : memref<128x256xf32, #tpu.memory_space<vmem>> -> memref<1x256xf32, #tpu.memory_space<vmem>>
    %158 = tpu.memref_squeeze %157 : memref<1x256xf32, #tpu.memory_space<vmem>> -> memref<256xf32, #tpu.memory_space<vmem>>
    %159 = tpu.memref_slice %arg12[%c15_i32_61] : memref<32x!tpu.dma_semaphore, #tpu.memory_space<semaphore_mem>> -> memref<1x!tpu.dma_semaphore, #tpu.memory_space<semaphore_mem>>
    %160 = tpu.memref_squeeze %159 : memref<1x!tpu.dma_semaphore, #tpu.memory_space<semaphore_mem>> -> memref<!tpu.dma_semaphore, #tpu.memory_space<semaphore_mem>>
    tpu.enqueue_dma source(%156 : memref<256xf32, #tpu.memory_space<any>>) target(%158 : memref<256xf32, #tpu.memory_space<vmem>>) target_semaphore(%160 : memref<!tpu.dma_semaphore, #tpu.memory_space<semaphore_mem>>)
    %c16_i32 = arith.constant 16 : i32
    %161 = arith.addi %0, %c16_i32 : i32
    %162 = arith.index_cast %arg0 : i32 to index
    %163 = arith.index_cast %161 : i32 to index
    %164 = memref.load %arg2[%162, %163] : memref<2x128xi32, #tpu.memory_space<smem>>
    %c16_i32_64 = arith.constant 16 : i32
    %c16_i32_65 = arith.constant 16 : i32
    %c0_i32_66 = arith.constant 0 : i32
    %165 = tpu.memref_slice %arg3[%164, %c0_i32_66] : memref<512x256xf32, #tpu.memory_space<any>> -> memref<1x256xf32, #tpu.memory_space<any>>
    %166 = tpu.memref_squeeze %165 : memref<1x256xf32, #tpu.memory_space<any>> -> memref<256xf32, #tpu.memory_space<any>>
    %c0_i32_67 = arith.constant 0 : i32
    %167 = tpu.memref_slice %arg10[%c16_i32_64, %c0_i32_67] : memref<128x256xf32, #tpu.memory_space<vmem>> -> memref<1x256xf32, #tpu.memory_space<vmem>>
    %168 = tpu.memref_squeeze %167 : memref<1x256xf32, #tpu.memory_space<vmem>> -> memref<256xf32, #tpu.memory_space<vmem>>
    %169 = tpu.memref_slice %arg12[%c16_i32_65] : memref<32x!tpu.dma_semaphore, #tpu.memory_space<semaphore_mem>> -> memref<1x!tpu.dma_semaphore, #tpu.memory_space<semaphore_mem>>
    %170 = tpu.memref_squeeze %169 : memref<1x!tpu.dma_semaphore, #tpu.memory_space<semaphore_mem>> -> memref<!tpu.dma_semaphore, #tpu.memory_space<semaphore_mem>>
    tpu.enqueue_dma source(%166 : memref<256xf32, #tpu.memory_space<any>>) target(%168 : memref<256xf32, #tpu.memory_space<vmem>>) target_semaphore(%170 : memref<!tpu.dma_semaphore, #tpu.memory_space<semaphore_mem>>)
    %c17_i32 = arith.constant 17 : i32
    %171 = arith.addi %0, %c17_i32 : i32
    %172 = arith.index_cast %arg0 : i32 to index
    %173 = arith.index_cast %171 : i32 to index
    %174 = memref.load %arg2[%172, %173] : memref<2x128xi32, #tpu.memory_space<smem>>
    %c17_i32_68 = arith.constant 17 : i32
    %c17_i32_69 = arith.constant 17 : i32
    %c0_i32_70 = arith.constant 0 : i32
    %175 = tpu.memref_slice %arg3[%174, %c0_i32_70] : memref<512x256xf32, #tpu.memory_space<any>> -> memref<1x256xf32, #tpu.memory_space<any>>
    %176 = tpu.memref_squeeze %175 : memref<1x256xf32, #tpu.memory_space<any>> -> memref<256xf32, #tpu.memory_space<any>>
    %c0_i32_71 = arith.constant 0 : i32
    %177 = tpu.memref_slice %arg10[%c17_i32_68, %c0_i32_71] : memref<128x256xf32, #tpu.memory_space<vmem>> -> memref<1x256xf32, #tpu.memory_space<vmem>>
    %178 = tpu.memref_squeeze %177 : memref<1x256xf32, #tpu.memory_space<vmem>> -> memref<256xf32, #tpu.memory_space<vmem>>
    %179 = tpu.memref_slice %arg12[%c17_i32_69] : memref<32x!tpu.dma_semaphore, #tpu.memory_space<semaphore_mem>> -> memref<1x!tpu.dma_semaphore, #tpu.memory_space<semaphore_mem>>
    %180 = tpu.memref_squeeze %179 : memref<1x!tpu.dma_semaphore, #tpu.memory_space<semaphore_mem>> -> memref<!tpu.dma_semaphore, #tpu.memory_space<semaphore_mem>>
    tpu.enqueue_dma source(%176 : memref<256xf32, #tpu.memory_space<any>>) target(%178 : memref<256xf32, #tpu.memory_space<vmem>>) target_semaphore(%180 : memref<!tpu.dma_semaphore, #tpu.memory_space<semaphore_mem>>)
    %c18_i32 = arith.constant 18 : i32
    %181 = arith.addi %0, %c18_i32 : i32
    %182 = arith.index_cast %arg0 : i32 to index
    %183 = arith.index_cast %181 : i32 to index
    %184 = memref.load %arg2[%182, %183] : memref<2x128xi32, #tpu.memory_space<smem>>
    %c18_i32_72 = arith.constant 18 : i32
    %c18_i32_73 = arith.constant 18 : i32
    %c0_i32_74 = arith.constant 0 : i32
    %185 = tpu.memref_slice %arg3[%184, %c0_i32_74] : memref<512x256xf32, #tpu.memory_space<any>> -> memref<1x256xf32, #tpu.memory_space<any>>
    %186 = tpu.memref_squeeze %185 : memref<1x256xf32, #tpu.memory_space<any>> -> memref<256xf32, #tpu.memory_space<any>>
    %c0_i32_75 = arith.constant 0 : i32
    %187 = tpu.memref_slice %arg10[%c18_i32_72, %c0_i32_75] : memref<128x256xf32, #tpu.memory_space<vmem>> -> memref<1x256xf32, #tpu.memory_space<vmem>>
    %188 = tpu.memref_squeeze %187 : memref<1x256xf32, #tpu.memory_space<vmem>> -> memref<256xf32, #tpu.memory_space<vmem>>
    %189 = tpu.memref_slice %arg12[%c18_i32_73] : memref<32x!tpu.dma_semaphore, #tpu.memory_space<semaphore_mem>> -> memref<1x!tpu.dma_semaphore, #tpu.memory_space<semaphore_mem>>
    %190 = tpu.memref_squeeze %189 : memref<1x!tpu.dma_semaphore, #tpu.memory_space<semaphore_mem>> -> memref<!tpu.dma_semaphore, #tpu.memory_space<semaphore_mem>>
    tpu.enqueue_dma source(%186 : memref<256xf32, #tpu.memory_space<any>>) target(%188 : memref<256xf32, #tpu.memory_space<vmem>>) target_semaphore(%190 : memref<!tpu.dma_semaphore, #tpu.memory_space<semaphore_mem>>)
    %c19_i32 = arith.constant 19 : i32
    %191 = arith.addi %0, %c19_i32 : i32
    %192 = arith.index_cast %arg0 : i32 to index
    %193 = arith.index_cast %191 : i32 to index
    %194 = memref.load %arg2[%192, %193] : memref<2x128xi32, #tpu.memory_space<smem>>
    %c19_i32_76 = arith.constant 19 : i32
    %c19_i32_77 = arith.constant 19 : i32
    %c0_i32_78 = arith.constant 0 : i32
    %195 = tpu.memref_slice %arg3[%194, %c0_i32_78] : memref<512x256xf32, #tpu.memory_space<any>> -> memref<1x256xf32, #tpu.memory_space<any>>
    %196 = tpu.memref_squeeze %195 : memref<1x256xf32, #tpu.memory_space<any>> -> memref<256xf32, #tpu.memory_space<any>>
    %c0_i32_79 = arith.constant 0 : i32
    %197 = tpu.memref_slice %arg10[%c19_i32_76, %c0_i32_79] : memref<128x256xf32, #tpu.memory_space<vmem>> -> memref<1x256xf32, #tpu.memory_space<vmem>>
    %198 = tpu.memref_squeeze %197 : memref<1x256xf32, #tpu.memory_space<vmem>> -> memref<256xf32, #tpu.memory_space<vmem>>
    %199 = tpu.memref_slice %arg12[%c19_i32_77] : memref<32x!tpu.dma_semaphore, #tpu.memory_space<semaphore_mem>> -> memref<1x!tpu.dma_semaphore, #tpu.memory_space<semaphore_mem>>
    %200 = tpu.memref_squeeze %199 : memref<1x!tpu.dma_semaphore, #tpu.memory_space<semaphore_mem>> -> memref<!tpu.dma_semaphore, #tpu.memory_space<semaphore_mem>>
    tpu.enqueue_dma source(%196 : memref<256xf32, #tpu.memory_space<any>>) target(%198 : memref<256xf32, #tpu.memory_space<vmem>>) target_semaphore(%200 : memref<!tpu.dma_semaphore, #tpu.memory_space<semaphore_mem>>)
    %c20_i32 = arith.constant 20 : i32
    %201 = arith.addi %0, %c20_i32 : i32
    %202 = arith.index_cast %arg0 : i32 to index
    %203 = arith.index_cast %201 : i32 to index
    %204 = memref.load %arg2[%202, %203] : memref<2x128xi32, #tpu.memory_space<smem>>
    %c20_i32_80 = arith.constant 20 : i32
    %c20_i32_81 = arith.constant 20 : i32
    %c0_i32_82 = arith.constant 0 : i32
    %205 = tpu.memref_slice %arg3[%204, %c0_i32_82] : memref<512x256xf32, #tpu.memory_space<any>> -> memref<1x256xf32, #tpu.memory_space<any>>
    %206 = tpu.memref_squeeze %205 : memref<1x256xf32, #tpu.memory_space<any>> -> memref<256xf32, #tpu.memory_space<any>>
    %c0_i32_83 = arith.constant 0 : i32
    %207 = tpu.memref_slice %arg10[%c20_i32_80, %c0_i32_83] : memref<128x256xf32, #tpu.memory_space<vmem>> -> memref<1x256xf32, #tpu.memory_space<vmem>>
    %208 = tpu.memref_squeeze %207 : memref<1x256xf32, #tpu.memory_space<vmem>> -> memref<256xf32, #tpu.memory_space<vmem>>
    %209 = tpu.memref_slice %arg12[%c20_i32_81] : memref<32x!tpu.dma_semaphore, #tpu.memory_space<semaphore_mem>> -> memref<1x!tpu.dma_semaphore, #tpu.memory_space<semaphore_mem>>
    %210 = tpu.memref_squeeze %209 : memref<1x!tpu.dma_semaphore, #tpu.memory_space<semaphore_mem>> -> memref<!tpu.dma_semaphore, #tpu.memory_space<semaphore_mem>>
    tpu.enqueue_dma source(%206 : memref<256xf32, #tpu.memory_space<any>>) target(%208 : memref<256xf32, #tpu.memory_space<vmem>>) target_semaphore(%210 : memref<!tpu.dma_semaphore, #tpu.memory_space<semaphore_mem>>)
    %c21_i32 = arith.constant 21 : i32
    %211 = arith.addi %0, %c21_i32 : i32
    %212 = arith.index_cast %arg0 : i32 to index
    %213 = arith.index_cast %211 : i32 to index
    %214 = memref.load %arg2[%212, %213] : memref<2x128xi32, #tpu.memory_space<smem>>
    %c21_i32_84 = arith.constant 21 : i32
    %c21_i32_85 = arith.constant 21 : i32
    %c0_i32_86 = arith.constant 0 : i32
    %215 = tpu.memref_slice %arg3[%214, %c0_i32_86] : memref<512x256xf32, #tpu.memory_space<any>> -> memref<1x256xf32, #tpu.memory_space<any>>
    %216 = tpu.memref_squeeze %215 : memref<1x256xf32, #tpu.memory_space<any>> -> memref<256xf32, #tpu.memory_space<any>>
    %c0_i32_87 = arith.constant 0 : i32
    %217 = tpu.memref_slice %arg10[%c21_i32_84, %c0_i32_87] : memref<128x256xf32, #tpu.memory_space<vmem>> -> memref<1x256xf32, #tpu.memory_space<vmem>>
    %218 = tpu.memref_squeeze %217 : memref<1x256xf32, #tpu.memory_space<vmem>> -> memref<256xf32, #tpu.memory_space<vmem>>
    %219 = tpu.memref_slice %arg12[%c21_i32_85] : memref<32x!tpu.dma_semaphore, #tpu.memory_space<semaphore_mem>> -> memref<1x!tpu.dma_semaphore, #tpu.memory_space<semaphore_mem>>
    %220 = tpu.memref_squeeze %219 : memref<1x!tpu.dma_semaphore, #tpu.memory_space<semaphore_mem>> -> memref<!tpu.dma_semaphore, #tpu.memory_space<semaphore_mem>>
    tpu.enqueue_dma source(%216 : memref<256xf32, #tpu.memory_space<any>>) target(%218 : memref<256xf32, #tpu.memory_space<vmem>>) target_semaphore(%220 : memref<!tpu.dma_semaphore, #tpu.memory_space<semaphore_mem>>)
    %c22_i32 = arith.constant 22 : i32
    %221 = arith.addi %0, %c22_i32 : i32
    %222 = arith.index_cast %arg0 : i32 to index
    %223 = arith.index_cast %221 : i32 to index
    %224 = memref.load %arg2[%222, %223] : memref<2x128xi32, #tpu.memory_space<smem>>
    %c22_i32_88 = arith.constant 22 : i32
    %c22_i32_89 = arith.constant 22 : i32
    %c0_i32_90 = arith.constant 0 : i32
    %225 = tpu.memref_slice %arg3[%224, %c0_i32_90] : memref<512x256xf32, #tpu.memory_space<any>> -> memref<1x256xf32, #tpu.memory_space<any>>
    %226 = tpu.memref_squeeze %225 : memref<1x256xf32, #tpu.memory_space<any>> -> memref<256xf32, #tpu.memory_space<any>>
    %c0_i32_91 = arith.constant 0 : i32
    %227 = tpu.memref_slice %arg10[%c22_i32_88, %c0_i32_91] : memref<128x256xf32, #tpu.memory_space<vmem>> -> memref<1x256xf32, #tpu.memory_space<vmem>>
    %228 = tpu.memref_squeeze %227 : memref<1x256xf32, #tpu.memory_space<vmem>> -> memref<256xf32, #tpu.memory_space<vmem>>
    %229 = tpu.memref_slice %arg12[%c22_i32_89] : memref<32x!tpu.dma_semaphore, #tpu.memory_space<semaphore_mem>> -> memref<1x!tpu.dma_semaphore, #tpu.memory_space<semaphore_mem>>
    %230 = tpu.memref_squeeze %229 : memref<1x!tpu.dma_semaphore, #tpu.memory_space<semaphore_mem>> -> memref<!tpu.dma_semaphore, #tpu.memory_space<semaphore_mem>>
    tpu.enqueue_dma source(%226 : memref<256xf32, #tpu.memory_space<any>>) target(%228 : memref<256xf32, #tpu.memory_space<vmem>>) target_semaphore(%230 : memref<!tpu.dma_semaphore, #tpu.memory_space<semaphore_mem>>)
    %c23_i32 = arith.constant 23 : i32
    %231 = arith.addi %0, %c23_i32 : i32
    %232 = arith.index_cast %arg0 : i32 to index
    %233 = arith.index_cast %231 : i32 to index
    %234 = memref.load %arg2[%232, %233] : memref<2x128xi32, #tpu.memory_space<smem>>
    %c23_i32_92 = arith.constant 23 : i32
    %c23_i32_93 = arith.constant 23 : i32
    %c0_i32_94 = arith.constant 0 : i32
    %235 = tpu.memref_slice %arg3[%234, %c0_i32_94] : memref<512x256xf32, #tpu.memory_space<any>> -> memref<1x256xf32, #tpu.memory_space<any>>
    %236 = tpu.memref_squeeze %235 : memref<1x256xf32, #tpu.memory_space<any>> -> memref<256xf32, #tpu.memory_space<any>>
    %c0_i32_95 = arith.constant 0 : i32
    %237 = tpu.memref_slice %arg10[%c23_i32_92, %c0_i32_95] : memref<128x256xf32, #tpu.memory_space<vmem>> -> memref<1x256xf32, #tpu.memory_space<vmem>>
    %238 = tpu.memref_squeeze %237 : memref<1x256xf32, #tpu.memory_space<vmem>> -> memref<256xf32, #tpu.memory_space<vmem>>
    %239 = tpu.memref_slice %arg12[%c23_i32_93] : memref<32x!tpu.dma_semaphore, #tpu.memory_space<semaphore_mem>> -> memref<1x!tpu.dma_semaphore, #tpu.memory_space<semaphore_mem>>
    %240 = tpu.memref_squeeze %239 : memref<1x!tpu.dma_semaphore, #tpu.memory_space<semaphore_mem>> -> memref<!tpu.dma_semaphore, #tpu.memory_space<semaphore_mem>>
    tpu.enqueue_dma source(%236 : memref<256xf32, #tpu.memory_space<any>>) target(%238 : memref<256xf32, #tpu.memory_space<vmem>>) target_semaphore(%240 : memref<!tpu.dma_semaphore, #tpu.memory_space<semaphore_mem>>)
    %c24_i32 = arith.constant 24 : i32
    %241 = arith.addi %0, %c24_i32 : i32
    %242 = arith.index_cast %arg0 : i32 to index
    %243 = arith.index_cast %241 : i32 to index
    %244 = memref.load %arg2[%242, %243] : memref<2x128xi32, #tpu.memory_space<smem>>
    %c24_i32_96 = arith.constant 24 : i32
    %c24_i32_97 = arith.constant 24 : i32
    %c0_i32_98 = arith.constant 0 : i32
    %245 = tpu.memref_slice %arg3[%244, %c0_i32_98] : memref<512x256xf32, #tpu.memory_space<any>> -> memref<1x256xf32, #tpu.memory_space<any>>
    %246 = tpu.memref_squeeze %245 : memref<1x256xf32, #tpu.memory_space<any>> -> memref<256xf32, #tpu.memory_space<any>>
    %c0_i32_99 = arith.constant 0 : i32
    %247 = tpu.memref_slice %arg10[%c24_i32_96, %c0_i32_99] : memref<128x256xf32, #tpu.memory_space<vmem>> -> memref<1x256xf32, #tpu.memory_space<vmem>>
    %248 = tpu.memref_squeeze %247 : memref<1x256xf32, #tpu.memory_space<vmem>> -> memref<256xf32, #tpu.memory_space<vmem>>
    %249 = tpu.memref_slice %arg12[%c24_i32_97] : memref<32x!tpu.dma_semaphore, #tpu.memory_space<semaphore_mem>> -> memref<1x!tpu.dma_semaphore, #tpu.memory_space<semaphore_mem>>
    %250 = tpu.memref_squeeze %249 : memref<1x!tpu.dma_semaphore, #tpu.memory_space<semaphore_mem>> -> memref<!tpu.dma_semaphore, #tpu.memory_space<semaphore_mem>>
    tpu.enqueue_dma source(%246 : memref<256xf32, #tpu.memory_space<any>>) target(%248 : memref<256xf32, #tpu.memory_space<vmem>>) target_semaphore(%250 : memref<!tpu.dma_semaphore, #tpu.memory_space<semaphore_mem>>)
    %c25_i32 = arith.constant 25 : i32
    %251 = arith.addi %0, %c25_i32 : i32
    %252 = arith.index_cast %arg0 : i32 to index
    %253 = arith.index_cast %251 : i32 to index
    %254 = memref.load %arg2[%252, %253] : memref<2x128xi32, #tpu.memory_space<smem>>
    %c25_i32_100 = arith.constant 25 : i32
    %c25_i32_101 = arith.constant 25 : i32
    %c0_i32_102 = arith.constant 0 : i32
    %255 = tpu.memref_slice %arg3[%254, %c0_i32_102] : memref<512x256xf32, #tpu.memory_space<any>> -> memref<1x256xf32, #tpu.memory_space<any>>
    %256 = tpu.memref_squeeze %255 : memref<1x256xf32, #tpu.memory_space<any>> -> memref<256xf32, #tpu.memory_space<any>>
    %c0_i32_103 = arith.constant 0 : i32
    %257 = tpu.memref_slice %arg10[%c25_i32_100, %c0_i32_103] : memref<128x256xf32, #tpu.memory_space<vmem>> -> memref<1x256xf32, #tpu.memory_space<vmem>>
    %258 = tpu.memref_squeeze %257 : memref<1x256xf32, #tpu.memory_space<vmem>> -> memref<256xf32, #tpu.memory_space<vmem>>
    %259 = tpu.memref_slice %arg12[%c25_i32_101] : memref<32x!tpu.dma_semaphore, #tpu.memory_space<semaphore_mem>> -> memref<1x!tpu.dma_semaphore, #tpu.memory_space<semaphore_mem>>
    %260 = tpu.memref_squeeze %259 : memref<1x!tpu.dma_semaphore, #tpu.memory_space<semaphore_mem>> -> memref<!tpu.dma_semaphore, #tpu.memory_space<semaphore_mem>>
    tpu.enqueue_dma source(%256 : memref<256xf32, #tpu.memory_space<any>>) target(%258 : memref<256xf32, #tpu.memory_space<vmem>>) target_semaphore(%260 : memref<!tpu.dma_semaphore, #tpu.memory_space<semaphore_mem>>)
    %c26_i32 = arith.constant 26 : i32
    %261 = arith.addi %0, %c26_i32 : i32
    %262 = arith.index_cast %arg0 : i32 to index
    %263 = arith.index_cast %261 : i32 to index
    %264 = memref.load %arg2[%262, %263] : memref<2x128xi32, #tpu.memory_space<smem>>
    %c26_i32_104 = arith.constant 26 : i32
    %c26_i32_105 = arith.constant 26 : i32
    %c0_i32_106 = arith.constant 0 : i32
    %265 = tpu.memref_slice %arg3[%264, %c0_i32_106] : memref<512x256xf32, #tpu.memory_space<any>> -> memref<1x256xf32, #tpu.memory_space<any>>
    %266 = tpu.memref_squeeze %265 : memref<1x256xf32, #tpu.memory_space<any>> -> memref<256xf32, #tpu.memory_space<any>>
    %c0_i32_107 = arith.constant 0 : i32
    %267 = tpu.memref_slice %arg10[%c26_i32_104, %c0_i32_107] : memref<128x256xf32, #tpu.memory_space<vmem>> -> memref<1x256xf32, #tpu.memory_space<vmem>>
    %268 = tpu.memref_squeeze %267 : memref<1x256xf32, #tpu.memory_space<vmem>> -> memref<256xf32, #tpu.memory_space<vmem>>
    %269 = tpu.memref_slice %arg12[%c26_i32_105] : memref<32x!tpu.dma_semaphore, #tpu.memory_space<semaphore_mem>> -> memref<1x!tpu.dma_semaphore, #tpu.memory_space<semaphore_mem>>
    %270 = tpu.memref_squeeze %269 : memref<1x!tpu.dma_semaphore, #tpu.memory_space<semaphore_mem>> -> memref<!tpu.dma_semaphore, #tpu.memory_space<semaphore_mem>>
    tpu.enqueue_dma source(%266 : memref<256xf32, #tpu.memory_space<any>>) target(%268 : memref<256xf32, #tpu.memory_space<vmem>>) target_semaphore(%270 : memref<!tpu.dma_semaphore, #tpu.memory_space<semaphore_mem>>)
    %c27_i32 = arith.constant 27 : i32
    %271 = arith.addi %0, %c27_i32 : i32
    %272 = arith.index_cast %arg0 : i32 to index
    %273 = arith.index_cast %271 : i32 to index
    %274 = memref.load %arg2[%272, %273] : memref<2x128xi32, #tpu.memory_space<smem>>
    %c27_i32_108 = arith.constant 27 : i32
    %c27_i32_109 = arith.constant 27 : i32
    %c0_i32_110 = arith.constant 0 : i32
    %275 = tpu.memref_slice %arg3[%274, %c0_i32_110] : memref<512x256xf32, #tpu.memory_space<any>> -> memref<1x256xf32, #tpu.memory_space<any>>
    %276 = tpu.memref_squeeze %275 : memref<1x256xf32, #tpu.memory_space<any>> -> memref<256xf32, #tpu.memory_space<any>>
    %c0_i32_111 = arith.constant 0 : i32
    %277 = tpu.memref_slice %arg10[%c27_i32_108, %c0_i32_111] : memref<128x256xf32, #tpu.memory_space<vmem>> -> memref<1x256xf32, #tpu.memory_space<vmem>>
    %278 = tpu.memref_squeeze %277 : memref<1x256xf32, #tpu.memory_space<vmem>> -> memref<256xf32, #tpu.memory_space<vmem>>
    %279 = tpu.memref_slice %arg12[%c27_i32_109] : memref<32x!tpu.dma_semaphore, #tpu.memory_space<semaphore_mem>> -> memref<1x!tpu.dma_semaphore, #tpu.memory_space<semaphore_mem>>
    %280 = tpu.memref_squeeze %279 : memref<1x!tpu.dma_semaphore, #tpu.memory_space<semaphore_mem>> -> memref<!tpu.dma_semaphore, #tpu.memory_space<semaphore_mem>>
    tpu.enqueue_dma source(%276 : memref<256xf32, #tpu.memory_space<any>>) target(%278 : memref<256xf32, #tpu.memory_space<vmem>>) target_semaphore(%280 : memref<!tpu.dma_semaphore, #tpu.memory_space<semaphore_mem>>)
    %c28_i32 = arith.constant 28 : i32
    %281 = arith.addi %0, %c28_i32 : i32
    %282 = arith.index_cast %arg0 : i32 to index
    %283 = arith.index_cast %281 : i32 to index
    %284 = memref.load %arg2[%282, %283] : memref<2x128xi32, #tpu.memory_space<smem>>
    %c28_i32_112 = arith.constant 28 : i32
    %c28_i32_113 = arith.constant 28 : i32
    %c0_i32_114 = arith.constant 0 : i32
    %285 = tpu.memref_slice %arg3[%284, %c0_i32_114] : memref<512x256xf32, #tpu.memory_space<any>> -> memref<1x256xf32, #tpu.memory_space<any>>
    %286 = tpu.memref_squeeze %285 : memref<1x256xf32, #tpu.memory_space<any>> -> memref<256xf32, #tpu.memory_space<any>>
    %c0_i32_115 = arith.constant 0 : i32
    %287 = tpu.memref_slice %arg10[%c28_i32_112, %c0_i32_115] : memref<128x256xf32, #tpu.memory_space<vmem>> -> memref<1x256xf32, #tpu.memory_space<vmem>>
    %288 = tpu.memref_squeeze %287 : memref<1x256xf32, #tpu.memory_space<vmem>> -> memref<256xf32, #tpu.memory_space<vmem>>
    %289 = tpu.memref_slice %arg12[%c28_i32_113] : memref<32x!tpu.dma_semaphore, #tpu.memory_space<semaphore_mem>> -> memref<1x!tpu.dma_semaphore, #tpu.memory_space<semaphore_mem>>
    %290 = tpu.memref_squeeze %289 : memref<1x!tpu.dma_semaphore, #tpu.memory_space<semaphore_mem>> -> memref<!tpu.dma_semaphore, #tpu.memory_space<semaphore_mem>>
    tpu.enqueue_dma source(%286 : memref<256xf32, #tpu.memory_space<any>>) target(%288 : memref<256xf32, #tpu.memory_space<vmem>>) target_semaphore(%290 : memref<!tpu.dma_semaphore, #tpu.memory_space<semaphore_mem>>)
    %c29_i32 = arith.constant 29 : i32
    %291 = arith.addi %0, %c29_i32 : i32
    %292 = arith.index_cast %arg0 : i32 to index
    %293 = arith.index_cast %291 : i32 to index
    %294 = memref.load %arg2[%292, %293] : memref<2x128xi32, #tpu.memory_space<smem>>
    %c29_i32_116 = arith.constant 29 : i32
    %c29_i32_117 = arith.constant 29 : i32
    %c0_i32_118 = arith.constant 0 : i32
    %295 = tpu.memref_slice %arg3[%294, %c0_i32_118] : memref<512x256xf32, #tpu.memory_space<any>> -> memref<1x256xf32, #tpu.memory_space<any>>
    %296 = tpu.memref_squeeze %295 : memref<1x256xf32, #tpu.memory_space<any>> -> memref<256xf32, #tpu.memory_space<any>>
    %c0_i32_119 = arith.constant 0 : i32
    %297 = tpu.memref_slice %arg10[%c29_i32_116, %c0_i32_119] : memref<128x256xf32, #tpu.memory_space<vmem>> -> memref<1x256xf32, #tpu.memory_space<vmem>>
    %298 = tpu.memref_squeeze %297 : memref<1x256xf32, #tpu.memory_space<vmem>> -> memref<256xf32, #tpu.memory_space<vmem>>
    %299 = tpu.memref_slice %arg12[%c29_i32_117] : memref<32x!tpu.dma_semaphore, #tpu.memory_space<semaphore_mem>> -> memref<1x!tpu.dma_semaphore, #tpu.memory_space<semaphore_mem>>
    %300 = tpu.memref_squeeze %299 : memref<1x!tpu.dma_semaphore, #tpu.memory_space<semaphore_mem>> -> memref<!tpu.dma_semaphore, #tpu.memory_space<semaphore_mem>>
    tpu.enqueue_dma source(%296 : memref<256xf32, #tpu.memory_space<any>>) target(%298 : memref<256xf32, #tpu.memory_space<vmem>>) target_semaphore(%300 : memref<!tpu.dma_semaphore, #tpu.memory_space<semaphore_mem>>)
    %c30_i32 = arith.constant 30 : i32
    %301 = arith.addi %0, %c30_i32 : i32
    %302 = arith.index_cast %arg0 : i32 to index
    %303 = arith.index_cast %301 : i32 to index
    %304 = memref.load %arg2[%302, %303] : memref<2x128xi32, #tpu.memory_space<smem>>
    %c30_i32_120 = arith.constant 30 : i32
    %c30_i32_121 = arith.constant 30 : i32
    %c0_i32_122 = arith.constant 0 : i32
    %305 = tpu.memref_slice %arg3[%304, %c0_i32_122] : memref<512x256xf32, #tpu.memory_space<any>> -> memref<1x256xf32, #tpu.memory_space<any>>
    %306 = tpu.memref_squeeze %305 : memref<1x256xf32, #tpu.memory_space<any>> -> memref<256xf32, #tpu.memory_space<any>>
    %c0_i32_123 = arith.constant 0 : i32
    %307 = tpu.memref_slice %arg10[%c30_i32_120, %c0_i32_123] : memref<128x256xf32, #tpu.memory_space<vmem>> -> memref<1x256xf32, #tpu.memory_space<vmem>>
    %308 = tpu.memref_squeeze %307 : memref<1x256xf32, #tpu.memory_space<vmem>> -> memref<256xf32, #tpu.memory_space<vmem>>
    %309 = tpu.memref_slice %arg12[%c30_i32_121] : memref<32x!tpu.dma_semaphore, #tpu.memory_space<semaphore_mem>> -> memref<1x!tpu.dma_semaphore, #tpu.memory_space<semaphore_mem>>
    %310 = tpu.memref_squeeze %309 : memref<1x!tpu.dma_semaphore, #tpu.memory_space<semaphore_mem>> -> memref<!tpu.dma_semaphore, #tpu.memory_space<semaphore_mem>>
    tpu.enqueue_dma source(%306 : memref<256xf32, #tpu.memory_space<any>>) target(%308 : memref<256xf32, #tpu.memory_space<vmem>>) target_semaphore(%310 : memref<!tpu.dma_semaphore, #tpu.memory_space<semaphore_mem>>)
    %c31_i32 = arith.constant 31 : i32
    %311 = arith.addi %0, %c31_i32 : i32
    %312 = arith.index_cast %arg0 : i32 to index
    %313 = arith.index_cast %311 : i32 to index
    %314 = memref.load %arg2[%312, %313] : memref<2x128xi32, #tpu.memory_space<smem>>
    %c31_i32_124 = arith.constant 31 : i32
    %c31_i32_125 = arith.constant 31 : i32
    %c0_i32_126 = arith.constant 0 : i32
    %315 = tpu.memref_slice %arg3[%314, %c0_i32_126] : memref<512x256xf32, #tpu.memory_space<any>> -> memref<1x256xf32, #tpu.memory_space<any>>
    %316 = tpu.memref_squeeze %315 : memref<1x256xf32, #tpu.memory_space<any>> -> memref<256xf32, #tpu.memory_space<any>>
    %c0_i32_127 = arith.constant 0 : i32
    %317 = tpu.memref_slice %arg10[%c31_i32_124, %c0_i32_127] : memref<128x256xf32, #tpu.memory_space<vmem>> -> memref<1x256xf32, #tpu.memory_space<vmem>>
    %318 = tpu.memref_squeeze %317 : memref<1x256xf32, #tpu.memory_space<vmem>> -> memref<256xf32, #tpu.memory_space<vmem>>
    %319 = tpu.memref_slice %arg12[%c31_i32_125] : memref<32x!tpu.dma_semaphore, #tpu.memory_space<semaphore_mem>> -> memref<1x!tpu.dma_semaphore, #tpu.memory_space<semaphore_mem>>
    %320 = tpu.memref_squeeze %319 : memref<1x!tpu.dma_semaphore, #tpu.memory_space<semaphore_mem>> -> memref<!tpu.dma_semaphore, #tpu.memory_space<semaphore_mem>>
    tpu.enqueue_dma source(%316 : memref<256xf32, #tpu.memory_space<any>>) target(%318 : memref<256xf32, #tpu.memory_space<vmem>>) target_semaphore(%320 : memref<!tpu.dma_semaphore, #tpu.memory_space<semaphore_mem>>)
    %c0 = arith.constant 0 : index
    %c0_128 = arith.constant 0 : index
    %c0_129 = arith.constant 0 : index
    %321 = vector.load %arg8[%c0, %c0_128, %c0_129] : memref<1x128x1xi32, #tpu.memory_space<vmem>>, vector<1x128x1xi32>
    %322 = vector.shape_cast %321 : vector<1x128x1xi32> to vector<128x1xi32>
    %c0_130 = arith.constant 0 : index
    %c0_131 = arith.constant 0 : index
    %323 = vector.load %arg4[%c0_130, %c0_131] : memref<8x256xf32, #tpu.memory_space<vmem>>, vector<1x256xf32>
    %c1 = arith.constant 1 : index
    %c0_132 = arith.constant 0 : index
    %324 = vector.load %arg4[%c1, %c0_132] : memref<8x256xf32, #tpu.memory_space<vmem>>, vector<1x256xf32>
    %c1_i32_133 = arith.constant 1 : i32
    %325 = vector.broadcast %c1_i32_133 : i32 to vector<128x1xi32>
    %326 = arith.cmpi eq, %322, %325 : vector<128x1xi32>
    %327 = vector.shape_cast %326 : vector<128x1xi1> to vector<128x1xi1>
    %328 = vector.broadcast %327 : vector<128x1xi1> to vector<128x256xi1>
    %329 = vector.shape_cast %324 : vector<1x256xf32> to vector<1x256xf32>
    %330 = vector.broadcast %329 : vector<1x256xf32> to vector<128x256xf32>
    %331 = vector.shape_cast %323 : vector<1x256xf32> to vector<1x256xf32>
    %332 = vector.broadcast %331 : vector<1x256xf32> to vector<128x256xf32>
    %333 = arith.select %328, %330, %332 : vector<128x256xi1>, vector<128x256xf32>
    %c0_134 = arith.constant 0 : index
    %c0_135 = arith.constant 0 : index
    %334 = vector.load %arg5[%c0_134, %c0_135] : memref<128x256xf32, #tpu.memory_space<vmem>>, vector<128x256xf32>
    %335 = arith.addf %334, %333 : vector<128x256xf32>
    %c0_136 = arith.constant 0 : index
    %c0_137 = arith.constant 0 : index
    %336 = vector.load %arg11[%c0_136, %c0_137] : memref<128x256xf32, #tpu.memory_space<vmem>>, vector<128x256xf32>
    tpu.vector_store %arg11[%c0_136, %c0_137], %335 {strides = array<i32>} : memref<128x256xf32, #tpu.memory_space<vmem>>, vector<128x256xf32>,
    %c0_i32_138 = arith.constant 0 : i32
    %c12_i32_139 = arith.constant 12 : i32
    %337 = arith.addi %c0_i32_138, %c12_i32_139 : i32
    %c1_i32_140 = arith.constant 1 : i32
    scf.for %arg13 = %c0_i32_138 to %337 step %c1_i32_140  : i32 {
      %c8_i32_317 = arith.constant 8 : i32
      %718 = arith.muli %arg13, %c8_i32_317 : i32
      %719 = tpu.assume_multiple %718, 8 : i32
      %720 = arith.addi %0, %719 : i32
      %c0_i32_318 = arith.constant 0 : i32
      %721 = arith.addi %720, %c0_i32_318 : i32
      %722 = arith.index_cast %arg0 : i32 to index
      %723 = arith.index_cast %721 : i32 to index
      %724 = memref.load %arg2[%722, %723] : memref<2x128xi32, #tpu.memory_space<smem>>
      %725 = arith.addi %0, %719 : i32
      %c1_i32_319 = arith.constant 1 : i32
      %726 = arith.addi %725, %c1_i32_319 : i32
      %727 = arith.index_cast %arg0 : i32 to index
      %728 = arith.index_cast %726 : i32 to index
      %729 = memref.load %arg2[%727, %728] : memref<2x128xi32, #tpu.memory_space<smem>>
      %730 = arith.addi %0, %719 : i32
      %c2_i32_320 = arith.constant 2 : i32
      %731 = arith.addi %730, %c2_i32_320 : i32
      %732 = arith.index_cast %arg0 : i32 to index
      %733 = arith.index_cast %731 : i32 to index
      %734 = memref.load %arg2[%732, %733] : memref<2x128xi32, #tpu.memory_space<smem>>
      %735 = arith.addi %0, %719 : i32
      %c3_i32_321 = arith.constant 3 : i32
      %736 = arith.addi %735, %c3_i32_321 : i32
      %737 = arith.index_cast %arg0 : i32 to index
      %738 = arith.index_cast %736 : i32 to index
      %739 = memref.load %arg2[%737, %738] : memref<2x128xi32, #tpu.memory_space<smem>>
      %740 = arith.addi %0, %719 : i32
      %c4_i32_322 = arith.constant 4 : i32
      %741 = arith.addi %740, %c4_i32_322 : i32
      %742 = arith.index_cast %arg0 : i32 to index
      %743 = arith.index_cast %741 : i32 to index
      %744 = memref.load %arg2[%742, %743] : memref<2x128xi32, #tpu.memory_space<smem>>
      %745 = arith.addi %0, %719 : i32
      %c5_i32_323 = arith.constant 5 : i32
      %746 = arith.addi %745, %c5_i32_323 : i32
      %747 = arith.index_cast %arg0 : i32 to index
      %748 = arith.index_cast %746 : i32 to index
      %749 = memref.load %arg2[%747, %748] : memref<2x128xi32, #tpu.memory_space<smem>>
      %750 = arith.addi %0, %719 : i32
      %c6_i32_324 = arith.constant 6 : i32
      %751 = arith.addi %750, %c6_i32_324 : i32
      %752 = arith.index_cast %arg0 : i32 to index
      %753 = arith.index_cast %751 : i32 to index
      %754 = memref.load %arg2[%752, %753] : memref<2x128xi32, #tpu.memory_space<smem>>
      %755 = arith.addi %0, %719 : i32
      %c7_i32_325 = arith.constant 7 : i32
      %756 = arith.addi %755, %c7_i32_325 : i32
      %757 = arith.index_cast %arg0 : i32 to index
      %758 = arith.index_cast %756 : i32 to index
      %759 = memref.load %arg2[%757, %758] : memref<2x128xi32, #tpu.memory_space<smem>>
      %760 = arith.addi %0, %719 : i32
      %c0_i32_326 = arith.constant 0 : i32
      %761 = arith.addi %760, %c0_i32_326 : i32
      %c32_i32 = arith.constant 32 : i32
      %762 = arith.addi %761, %c32_i32 : i32
      %763 = arith.index_cast %arg0 : i32 to index
      %764 = arith.index_cast %762 : i32 to index
      %765 = memref.load %arg2[%763, %764] : memref<2x128xi32, #tpu.memory_space<smem>>
      %766 = arith.addi %0, %719 : i32
      %c1_i32_327 = arith.constant 1 : i32
      %767 = arith.addi %766, %c1_i32_327 : i32
      %c32_i32_328 = arith.constant 32 : i32
      %768 = arith.addi %767, %c32_i32_328 : i32
      %769 = arith.index_cast %arg0 : i32 to index
      %770 = arith.index_cast %768 : i32 to index
      %771 = memref.load %arg2[%769, %770] : memref<2x128xi32, #tpu.memory_space<smem>>
      %772 = arith.addi %0, %719 : i32
      %c2_i32_329 = arith.constant 2 : i32
      %773 = arith.addi %772, %c2_i32_329 : i32
      %c32_i32_330 = arith.constant 32 : i32
      %774 = arith.addi %773, %c32_i32_330 : i32
      %775 = arith.index_cast %arg0 : i32 to index
      %776 = arith.index_cast %774 : i32 to index
      %777 = memref.load %arg2[%775, %776] : memref<2x128xi32, #tpu.memory_space<smem>>
      %778 = arith.addi %0, %719 : i32
      %c3_i32_331 = arith.constant 3 : i32
      %779 = arith.addi %778, %c3_i32_331 : i32
      %c32_i32_332 = arith.constant 32 : i32
      %780 = arith.addi %779, %c32_i32_332 : i32
      %781 = arith.index_cast %arg0 : i32 to index
      %782 = arith.index_cast %780 : i32 to index
      %783 = memref.load %arg2[%781, %782] : memref<2x128xi32, #tpu.memory_space<smem>>
      %784 = arith.addi %0, %719 : i32
      %c4_i32_333 = arith.constant 4 : i32
      %785 = arith.addi %784, %c4_i32_333 : i32
      %c32_i32_334 = arith.constant 32 : i32
      %786 = arith.addi %785, %c32_i32_334 : i32
      %787 = arith.index_cast %arg0 : i32 to index
      %788 = arith.index_cast %786 : i32 to index
      %789 = memref.load %arg2[%787, %788] : memref<2x128xi32, #tpu.memory_space<smem>>
      %790 = arith.addi %0, %719 : i32
      %c5_i32_335 = arith.constant 5 : i32
      %791 = arith.addi %790, %c5_i32_335 : i32
      %c32_i32_336 = arith.constant 32 : i32
      %792 = arith.addi %791, %c32_i32_336 : i32
      %793 = arith.index_cast %arg0 : i32 to index
      %794 = arith.index_cast %792 : i32 to index
      %795 = memref.load %arg2[%793, %794] : memref<2x128xi32, #tpu.memory_space<smem>>
      %796 = arith.addi %0, %719 : i32
      %c6_i32_337 = arith.constant 6 : i32
      %797 = arith.addi %796, %c6_i32_337 : i32
      %c32_i32_338 = arith.constant 32 : i32
      %798 = arith.addi %797, %c32_i32_338 : i32
      %799 = arith.index_cast %arg0 : i32 to index
      %800 = arith.index_cast %798 : i32 to index
      %801 = memref.load %arg2[%799, %800] : memref<2x128xi32, #tpu.memory_space<smem>>
      %802 = arith.addi %0, %719 : i32
      %c7_i32_339 = arith.constant 7 : i32
      %803 = arith.addi %802, %c7_i32_339 : i32
      %c32_i32_340 = arith.constant 32 : i32
      %804 = arith.addi %803, %c32_i32_340 : i32
      %805 = arith.index_cast %arg0 : i32 to index
      %806 = arith.index_cast %804 : i32 to index
      %807 = memref.load %arg2[%805, %806] : memref<2x128xi32, #tpu.memory_space<smem>>
      %c0_i32_341 = arith.constant 0 : i32
      %808 = arith.addi %719, %c0_i32_341 : i32
      %c32_i32_342 = arith.constant 32 : i32
      %c0_i32_343 = arith.constant 0 : i32
      %809 = arith.cmpi eq, %c32_i32_342, %c0_i32_343 : i32
      %c1_i32_344 = arith.constant 1 : i32
      %810 = arith.select %809, %c1_i32_344, %c32_i32_342 : i32
      %811 = arith.remsi %808, %810 : i32
      %c0_i32_345 = arith.constant 0 : i32
      %812 = arith.cmpi ne, %811, %c0_i32_345 : i32
      %c0_i32_346 = arith.constant 0 : i32
      %813 = arith.cmpi slt, %811, %c0_i32_346 : i32
      %c0_i32_347 = arith.constant 0 : i32
      %814 = arith.cmpi slt, %810, %c0_i32_347 : i32
      %815 = arith.xori %813, %814 : i1
      %816 = arith.andi %815, %812 : i1
      %817 = arith.addi %811, %810 : i32
      %818 = arith.select %816, %817, %811 : i32
      %c0_i32_348 = arith.constant 0 : i32
      %819 = tpu.memref_slice %arg3[%724, %c0_i32_348] : memref<512x256xf32, #tpu.memory_space<any>> -> memref<1x256xf32, #tpu.memory_space<any>>
      %820 = tpu.memref_squeeze %819 : memref<1x256xf32, #tpu.memory_space<any>> -> memref<256xf32, #tpu.memory_space<any>>
      %c0_i32_349 = arith.constant 0 : i32
      %821 = tpu.memref_slice %arg10[%808, %c0_i32_349] : memref<128x256xf32, #tpu.memory_space<vmem>> -> memref<1x256xf32, #tpu.memory_space<vmem>>
      %822 = tpu.memref_squeeze %821 : memref<1x256xf32, #tpu.memory_space<vmem>> -> memref<256xf32, #tpu.memory_space<vmem>>
      %823 = tpu.memref_slice %arg12[%818] : memref<32x!tpu.dma_semaphore, #tpu.memory_space<semaphore_mem>> -> memref<1x!tpu.dma_semaphore, #tpu.memory_space<semaphore_mem>>
      %824 = tpu.memref_squeeze %823 : memref<1x!tpu.dma_semaphore, #tpu.memory_space<semaphore_mem>> -> memref<!tpu.dma_semaphore, #tpu.memory_space<semaphore_mem>>
      tpu.wait_dma2 semaphore(%824 : memref<!tpu.dma_semaphore, #tpu.memory_space<semaphore_mem>>) src(%820 : memref<256xf32, #tpu.memory_space<any>>) dst(%822 : memref<256xf32, #tpu.memory_space<vmem>>)
      %c0_i32_350 = arith.constant 0 : i32
      %825 = arith.addi %719, %c0_i32_350 : i32
      %c32_i32_351 = arith.constant 32 : i32
      %826 = arith.addi %825, %c32_i32_351 : i32
      %c32_i32_352 = arith.constant 32 : i32
      %c0_i32_353 = arith.constant 0 : i32
      %827 = arith.cmpi eq, %c32_i32_352, %c0_i32_353 : i32
      %c1_i32_354 = arith.constant 1 : i32
      %828 = arith.select %827, %c1_i32_354, %c32_i32_352 : i32
      %829 = arith.remsi %826, %828 : i32
      %c0_i32_355 = arith.constant 0 : i32
      %830 = arith.cmpi ne, %829, %c0_i32_355 : i32
      %c0_i32_356 = arith.constant 0 : i32
      %831 = arith.cmpi slt, %829, %c0_i32_356 : i32
      %c0_i32_357 = arith.constant 0 : i32
      %832 = arith.cmpi slt, %828, %c0_i32_357 : i32
      %833 = arith.xori %831, %832 : i1
      %834 = arith.andi %833, %830 : i1
      %835 = arith.addi %829, %828 : i32
      %836 = arith.select %834, %835, %829 : i32
      %c0_i32_358 = arith.constant 0 : i32
      %837 = tpu.memref_slice %arg3[%765, %c0_i32_358] : memref<512x256xf32, #tpu.memory_space<any>> -> memref<1x256xf32, #tpu.memory_space<any>>
      %838 = tpu.memref_squeeze %837 : memref<1x256xf32, #tpu.memory_space<any>> -> memref<256xf32, #tpu.memory_space<any>>
      %c0_i32_359 = arith.constant 0 : i32
      %839 = tpu.memref_slice %arg10[%826, %c0_i32_359] : memref<128x256xf32, #tpu.memory_space<vmem>> -> memref<1x256xf32, #tpu.memory_space<vmem>>
      %840 = tpu.memref_squeeze %839 : memref<1x256xf32, #tpu.memory_space<vmem>> -> memref<256xf32, #tpu.memory_space<vmem>>
      %841 = tpu.memref_slice %arg12[%836] : memref<32x!tpu.dma_semaphore, #tpu.memory_space<semaphore_mem>> -> memref<1x!tpu.dma_semaphore, #tpu.memory_space<semaphore_mem>>
      %842 = tpu.memref_squeeze %841 : memref<1x!tpu.dma_semaphore, #tpu.memory_space<semaphore_mem>> -> memref<!tpu.dma_semaphore, #tpu.memory_space<semaphore_mem>>
      tpu.enqueue_dma source(%838 : memref<256xf32, #tpu.memory_space<any>>) target(%840 : memref<256xf32, #tpu.memory_space<vmem>>) target_semaphore(%842 : memref<!tpu.dma_semaphore, #tpu.memory_space<semaphore_mem>>)
      %c1_i32_360 = arith.constant 1 : i32
      %843 = arith.addi %719, %c1_i32_360 : i32
      %c32_i32_361 = arith.constant 32 : i32
      %c0_i32_362 = arith.constant 0 : i32
      %844 = arith.cmpi eq, %c32_i32_361, %c0_i32_362 : i32
      %c1_i32_363 = arith.constant 1 : i32
      %845 = arith.select %844, %c1_i32_363, %c32_i32_361 : i32
      %846 = arith.remsi %843, %845 : i32
      %c0_i32_364 = arith.constant 0 : i32
      %847 = arith.cmpi ne, %846, %c0_i32_364 : i32
      %c0_i32_365 = arith.constant 0 : i32
      %848 = arith.cmpi slt, %846, %c0_i32_365 : i32
      %c0_i32_366 = arith.constant 0 : i32
      %849 = arith.cmpi slt, %845, %c0_i32_366 : i32
      %850 = arith.xori %848, %849 : i1
      %851 = arith.andi %850, %847 : i1
      %852 = arith.addi %846, %845 : i32
      %853 = arith.select %851, %852, %846 : i32
      %c0_i32_367 = arith.constant 0 : i32
      %854 = tpu.memref_slice %arg3[%729, %c0_i32_367] : memref<512x256xf32, #tpu.memory_space<any>> -> memref<1x256xf32, #tpu.memory_space<any>>
      %855 = tpu.memref_squeeze %854 : memref<1x256xf32, #tpu.memory_space<any>> -> memref<256xf32, #tpu.memory_space<any>>
      %c0_i32_368 = arith.constant 0 : i32
      %856 = tpu.memref_slice %arg10[%843, %c0_i32_368] : memref<128x256xf32, #tpu.memory_space<vmem>> -> memref<1x256xf32, #tpu.memory_space<vmem>>
      %857 = tpu.memref_squeeze %856 : memref<1x256xf32, #tpu.memory_space<vmem>> -> memref<256xf32, #tpu.memory_space<vmem>>
      %858 = tpu.memref_slice %arg12[%853] : memref<32x!tpu.dma_semaphore, #tpu.memory_space<semaphore_mem>> -> memref<1x!tpu.dma_semaphore, #tpu.memory_space<semaphore_mem>>
      %859 = tpu.memref_squeeze %858 : memref<1x!tpu.dma_semaphore, #tpu.memory_space<semaphore_mem>> -> memref<!tpu.dma_semaphore, #tpu.memory_space<semaphore_mem>>
      tpu.wait_dma2 semaphore(%859 : memref<!tpu.dma_semaphore, #tpu.memory_space<semaphore_mem>>) src(%855 : memref<256xf32, #tpu.memory_space<any>>) dst(%857 : memref<256xf32, #tpu.memory_space<vmem>>)
      %c1_i32_369 = arith.constant 1 : i32
      %860 = arith.addi %719, %c1_i32_369 : i32
      %c32_i32_370 = arith.constant 32 : i32
      %861 = arith.addi %860, %c32_i32_370 : i32
      %c32_i32_371 = arith.constant 32 : i32
      %c0_i32_372 = arith.constant 0 : i32
      %862 = arith.cmpi eq, %c32_i32_371, %c0_i32_372 : i32
      %c1_i32_373 = arith.constant 1 : i32
      %863 = arith.select %862, %c1_i32_373, %c32_i32_371 : i32
      %864 = arith.remsi %861, %863 : i32
      %c0_i32_374 = arith.constant 0 : i32
      %865 = arith.cmpi ne, %864, %c0_i32_374 : i32
      %c0_i32_375 = arith.constant 0 : i32
      %866 = arith.cmpi slt, %864, %c0_i32_375 : i32
      %c0_i32_376 = arith.constant 0 : i32
      %867 = arith.cmpi slt, %863, %c0_i32_376 : i32
      %868 = arith.xori %866, %867 : i1
      %869 = arith.andi %868, %865 : i1
      %870 = arith.addi %864, %863 : i32
      %871 = arith.select %869, %870, %864 : i32
      %c0_i32_377 = arith.constant 0 : i32
      %872 = tpu.memref_slice %arg3[%771, %c0_i32_377] : memref<512x256xf32, #tpu.memory_space<any>> -> memref<1x256xf32, #tpu.memory_space<any>>
      %873 = tpu.memref_squeeze %872 : memref<1x256xf32, #tpu.memory_space<any>> -> memref<256xf32, #tpu.memory_space<any>>
      %c0_i32_378 = arith.constant 0 : i32
      %874 = tpu.memref_slice %arg10[%861, %c0_i32_378] : memref<128x256xf32, #tpu.memory_space<vmem>> -> memref<1x256xf32, #tpu.memory_space<vmem>>
      %875 = tpu.memref_squeeze %874 : memref<1x256xf32, #tpu.memory_space<vmem>> -> memref<256xf32, #tpu.memory_space<vmem>>
      %876 = tpu.memref_slice %arg12[%871] : memref<32x!tpu.dma_semaphore, #tpu.memory_space<semaphore_mem>> -> memref<1x!tpu.dma_semaphore, #tpu.memory_space<semaphore_mem>>
      %877 = tpu.memref_squeeze %876 : memref<1x!tpu.dma_semaphore, #tpu.memory_space<semaphore_mem>> -> memref<!tpu.dma_semaphore, #tpu.memory_space<semaphore_mem>>
      tpu.enqueue_dma source(%873 : memref<256xf32, #tpu.memory_space<any>>) target(%875 : memref<256xf32, #tpu.memory_space<vmem>>) target_semaphore(%877 : memref<!tpu.dma_semaphore, #tpu.memory_space<semaphore_mem>>)
      %c2_i32_379 = arith.constant 2 : i32
      %878 = arith.addi %719, %c2_i32_379 : i32
      %c32_i32_380 = arith.constant 32 : i32
      %c0_i32_381 = arith.constant 0 : i32
      %879 = arith.cmpi eq, %c32_i32_380, %c0_i32_381 : i32
      %c1_i32_382 = arith.constant 1 : i32
      %880 = arith.select %879, %c1_i32_382, %c32_i32_380 : i32
      %881 = arith.remsi %878, %880 : i32
      %c0_i32_383 = arith.constant 0 : i32
      %882 = arith.cmpi ne, %881, %c0_i32_383 : i32
      %c0_i32_384 = arith.constant 0 : i32
      %883 = arith.cmpi slt, %881, %c0_i32_384 : i32
      %c0_i32_385 = arith.constant 0 : i32
      %884 = arith.cmpi slt, %880, %c0_i32_385 : i32
      %885 = arith.xori %883, %884 : i1
      %886 = arith.andi %885, %882 : i1
      %887 = arith.addi %881, %880 : i32
      %888 = arith.select %886, %887, %881 : i32
      %c0_i32_386 = arith.constant 0 : i32
      %889 = tpu.memref_slice %arg3[%734, %c0_i32_386] : memref<512x256xf32, #tpu.memory_space<any>> -> memref<1x256xf32, #tpu.memory_space<any>>
      %890 = tpu.memref_squeeze %889 : memref<1x256xf32, #tpu.memory_space<any>> -> memref<256xf32, #tpu.memory_space<any>>
      %c0_i32_387 = arith.constant 0 : i32
      %891 = tpu.memref_slice %arg10[%878, %c0_i32_387] : memref<128x256xf32, #tpu.memory_space<vmem>> -> memref<1x256xf32, #tpu.memory_space<vmem>>
      %892 = tpu.memref_squeeze %891 : memref<1x256xf32, #tpu.memory_space<vmem>> -> memref<256xf32, #tpu.memory_space<vmem>>
      %893 = tpu.memref_slice %arg12[%888] : memref<32x!tpu.dma_semaphore, #tpu.memory_space<semaphore_mem>> -> memref<1x!tpu.dma_semaphore, #tpu.memory_space<semaphore_mem>>
      %894 = tpu.memref_squeeze %893 : memref<1x!tpu.dma_semaphore, #tpu.memory_space<semaphore_mem>> -> memref<!tpu.dma_semaphore, #tpu.memory_space<semaphore_mem>>
      tpu.wait_dma2 semaphore(%894 : memref<!tpu.dma_semaphore, #tpu.memory_space<semaphore_mem>>) src(%890 : memref<256xf32, #tpu.memory_space<any>>) dst(%892 : memref<256xf32, #tpu.memory_space<vmem>>)
      %c2_i32_388 = arith.constant 2 : i32
      %895 = arith.addi %719, %c2_i32_388 : i32
      %c32_i32_389 = arith.constant 32 : i32
      %896 = arith.addi %895, %c32_i32_389 : i32
      %c32_i32_390 = arith.constant 32 : i32
      %c0_i32_391 = arith.constant 0 : i32
      %897 = arith.cmpi eq, %c32_i32_390, %c0_i32_391 : i32
      %c1_i32_392 = arith.constant 1 : i32
      %898 = arith.select %897, %c1_i32_392, %c32_i32_390 : i32
      %899 = arith.remsi %896, %898 : i32
      %c0_i32_393 = arith.constant 0 : i32
      %900 = arith.cmpi ne, %899, %c0_i32_393 : i32
      %c0_i32_394 = arith.constant 0 : i32
      %901 = arith.cmpi slt, %899, %c0_i32_394 : i32
      %c0_i32_395 = arith.constant 0 : i32
      %902 = arith.cmpi slt, %898, %c0_i32_395 : i32
      %903 = arith.xori %901, %902 : i1
      %904 = arith.andi %903, %900 : i1
      %905 = arith.addi %899, %898 : i32
      %906 = arith.select %904, %905, %899 : i32
      %c0_i32_396 = arith.constant 0 : i32
      %907 = tpu.memref_slice %arg3[%777, %c0_i32_396] : memref<512x256xf32, #tpu.memory_space<any>> -> memref<1x256xf32, #tpu.memory_space<any>>
      %908 = tpu.memref_squeeze %907 : memref<1x256xf32, #tpu.memory_space<any>> -> memref<256xf32, #tpu.memory_space<any>>
      %c0_i32_397 = arith.constant 0 : i32
      %909 = tpu.memref_slice %arg10[%896, %c0_i32_397] : memref<128x256xf32, #tpu.memory_space<vmem>> -> memref<1x256xf32, #tpu.memory_space<vmem>>
      %910 = tpu.memref_squeeze %909 : memref<1x256xf32, #tpu.memory_space<vmem>> -> memref<256xf32, #tpu.memory_space<vmem>>
      %911 = tpu.memref_slice %arg12[%906] : memref<32x!tpu.dma_semaphore, #tpu.memory_space<semaphore_mem>> -> memref<1x!tpu.dma_semaphore, #tpu.memory_space<semaphore_mem>>
      %912 = tpu.memref_squeeze %911 : memref<1x!tpu.dma_semaphore, #tpu.memory_space<semaphore_mem>> -> memref<!tpu.dma_semaphore, #tpu.memory_space<semaphore_mem>>
      tpu.enqueue_dma source(%908 : memref<256xf32, #tpu.memory_space<any>>) target(%910 : memref<256xf32, #tpu.memory_space<vmem>>) target_semaphore(%912 : memref<!tpu.dma_semaphore, #tpu.memory_space<semaphore_mem>>)
      %c3_i32_398 = arith.constant 3 : i32
      %913 = arith.addi %719, %c3_i32_398 : i32
      %c32_i32_399 = arith.constant 32 : i32
      %c0_i32_400 = arith.constant 0 : i32
      %914 = arith.cmpi eq, %c32_i32_399, %c0_i32_400 : i32
      %c1_i32_401 = arith.constant 1 : i32
      %915 = arith.select %914, %c1_i32_401, %c32_i32_399 : i32
      %916 = arith.remsi %913, %915 : i32
      %c0_i32_402 = arith.constant 0 : i32
      %917 = arith.cmpi ne, %916, %c0_i32_402 : i32
      %c0_i32_403 = arith.constant 0 : i32
      %918 = arith.cmpi slt, %916, %c0_i32_403 : i32
      %c0_i32_404 = arith.constant 0 : i32
      %919 = arith.cmpi slt, %915, %c0_i32_404 : i32
      %920 = arith.xori %918, %919 : i1
      %921 = arith.andi %920, %917 : i1
      %922 = arith.addi %916, %915 : i32
      %923 = arith.select %921, %922, %916 : i32
      %c0_i32_405 = arith.constant 0 : i32
      %924 = tpu.memref_slice %arg3[%739, %c0_i32_405] : memref<512x256xf32, #tpu.memory_space<any>> -> memref<1x256xf32, #tpu.memory_space<any>>
      %925 = tpu.memref_squeeze %924 : memref<1x256xf32, #tpu.memory_space<any>> -> memref<256xf32, #tpu.memory_space<any>>
      %c0_i32_406 = arith.constant 0 : i32
      %926 = tpu.memref_slice %arg10[%913, %c0_i32_406] : memref<128x256xf32, #tpu.memory_space<vmem>> -> memref<1x256xf32, #tpu.memory_space<vmem>>
      %927 = tpu.memref_squeeze %926 : memref<1x256xf32, #tpu.memory_space<vmem>> -> memref<256xf32, #tpu.memory_space<vmem>>
      %928 = tpu.memref_slice %arg12[%923] : memref<32x!tpu.dma_semaphore, #tpu.memory_space<semaphore_mem>> -> memref<1x!tpu.dma_semaphore, #tpu.memory_space<semaphore_mem>>
      %929 = tpu.memref_squeeze %928 : memref<1x!tpu.dma_semaphore, #tpu.memory_space<semaphore_mem>> -> memref<!tpu.dma_semaphore, #tpu.memory_space<semaphore_mem>>
      tpu.wait_dma2 semaphore(%929 : memref<!tpu.dma_semaphore, #tpu.memory_space<semaphore_mem>>) src(%925 : memref<256xf32, #tpu.memory_space<any>>) dst(%927 : memref<256xf32, #tpu.memory_space<vmem>>)
      %c3_i32_407 = arith.constant 3 : i32
      %930 = arith.addi %719, %c3_i32_407 : i32
      %c32_i32_408 = arith.constant 32 : i32
      %931 = arith.addi %930, %c32_i32_408 : i32
      %c32_i32_409 = arith.constant 32 : i32
      %c0_i32_410 = arith.constant 0 : i32
      %932 = arith.cmpi eq, %c32_i32_409, %c0_i32_410 : i32
      %c1_i32_411 = arith.constant 1 : i32
      %933 = arith.select %932, %c1_i32_411, %c32_i32_409 : i32
      %934 = arith.remsi %931, %933 : i32
      %c0_i32_412 = arith.constant 0 : i32
      %935 = arith.cmpi ne, %934, %c0_i32_412 : i32
      %c0_i32_413 = arith.constant 0 : i32
      %936 = arith.cmpi slt, %934, %c0_i32_413 : i32
      %c0_i32_414 = arith.constant 0 : i32
      %937 = arith.cmpi slt, %933, %c0_i32_414 : i32
      %938 = arith.xori %936, %937 : i1
      %939 = arith.andi %938, %935 : i1
      %940 = arith.addi %934, %933 : i32
      %941 = arith.select %939, %940, %934 : i32
      %c0_i32_415 = arith.constant 0 : i32
      %942 = tpu.memref_slice %arg3[%783, %c0_i32_415] : memref<512x256xf32, #tpu.memory_space<any>> -> memref<1x256xf32, #tpu.memory_space<any>>
      %943 = tpu.memref_squeeze %942 : memref<1x256xf32, #tpu.memory_space<any>> -> memref<256xf32, #tpu.memory_space<any>>
      %c0_i32_416 = arith.constant 0 : i32
      %944 = tpu.memref_slice %arg10[%931, %c0_i32_416] : memref<128x256xf32, #tpu.memory_space<vmem>> -> memref<1x256xf32, #tpu.memory_space<vmem>>
      %945 = tpu.memref_squeeze %944 : memref<1x256xf32, #tpu.memory_space<vmem>> -> memref<256xf32, #tpu.memory_space<vmem>>
      %946 = tpu.memref_slice %arg12[%941] : memref<32x!tpu.dma_semaphore, #tpu.memory_space<semaphore_mem>> -> memref<1x!tpu.dma_semaphore, #tpu.memory_space<semaphore_mem>>
      %947 = tpu.memref_squeeze %946 : memref<1x!tpu.dma_semaphore, #tpu.memory_space<semaphore_mem>> -> memref<!tpu.dma_semaphore, #tpu.memory_space<semaphore_mem>>
      tpu.enqueue_dma source(%943 : memref<256xf32, #tpu.memory_space<any>>) target(%945 : memref<256xf32, #tpu.memory_space<vmem>>) target_semaphore(%947 : memref<!tpu.dma_semaphore, #tpu.memory_space<semaphore_mem>>)
      %c4_i32_417 = arith.constant 4 : i32
      %948 = arith.addi %719, %c4_i32_417 : i32
      %c32_i32_418 = arith.constant 32 : i32
      %c0_i32_419 = arith.constant 0 : i32
      %949 = arith.cmpi eq, %c32_i32_418, %c0_i32_419 : i32
      %c1_i32_420 = arith.constant 1 : i32
      %950 = arith.select %949, %c1_i32_420, %c32_i32_418 : i32
      %951 = arith.remsi %948, %950 : i32
      %c0_i32_421 = arith.constant 0 : i32
      %952 = arith.cmpi ne, %951, %c0_i32_421 : i32
      %c0_i32_422 = arith.constant 0 : i32
      %953 = arith.cmpi slt, %951, %c0_i32_422 : i32
      %c0_i32_423 = arith.constant 0 : i32
      %954 = arith.cmpi slt, %950, %c0_i32_423 : i32
      %955 = arith.xori %953, %954 : i1
      %956 = arith.andi %955, %952 : i1
      %957 = arith.addi %951, %950 : i32
      %958 = arith.select %956, %957, %951 : i32
      %c0_i32_424 = arith.constant 0 : i32
      %959 = tpu.memref_slice %arg3[%744, %c0_i32_424] : memref<512x256xf32, #tpu.memory_space<any>> -> memref<1x256xf32, #tpu.memory_space<any>>
      %960 = tpu.memref_squeeze %959 : memref<1x256xf32, #tpu.memory_space<any>> -> memref<256xf32, #tpu.memory_space<any>>
      %c0_i32_425 = arith.constant 0 : i32
      %961 = tpu.memref_slice %arg10[%948, %c0_i32_425] : memref<128x256xf32, #tpu.memory_space<vmem>> -> memref<1x256xf32, #tpu.memory_space<vmem>>
      %962 = tpu.memref_squeeze %961 : memref<1x256xf32, #tpu.memory_space<vmem>> -> memref<256xf32, #tpu.memory_space<vmem>>
      %963 = tpu.memref_slice %arg12[%958] : memref<32x!tpu.dma_semaphore, #tpu.memory_space<semaphore_mem>> -> memref<1x!tpu.dma_semaphore, #tpu.memory_space<semaphore_mem>>
      %964 = tpu.memref_squeeze %963 : memref<1x!tpu.dma_semaphore, #tpu.memory_space<semaphore_mem>> -> memref<!tpu.dma_semaphore, #tpu.memory_space<semaphore_mem>>
      tpu.wait_dma2 semaphore(%964 : memref<!tpu.dma_semaphore, #tpu.memory_space<semaphore_mem>>) src(%960 : memref<256xf32, #tpu.memory_space<any>>) dst(%962 : memref<256xf32, #tpu.memory_space<vmem>>)
      %c4_i32_426 = arith.constant 4 : i32
      %965 = arith.addi %719, %c4_i32_426 : i32
      %c32_i32_427 = arith.constant 32 : i32
      %966 = arith.addi %965, %c32_i32_427 : i32
      %c32_i32_428 = arith.constant 32 : i32
      %c0_i32_429 = arith.constant 0 : i32
      %967 = arith.cmpi eq, %c32_i32_428, %c0_i32_429 : i32
      %c1_i32_430 = arith.constant 1 : i32
      %968 = arith.select %967, %c1_i32_430, %c32_i32_428 : i32
      %969 = arith.remsi %966, %968 : i32
      %c0_i32_431 = arith.constant 0 : i32
      %970 = arith.cmpi ne, %969, %c0_i32_431 : i32
      %c0_i32_432 = arith.constant 0 : i32
      %971 = arith.cmpi slt, %969, %c0_i32_432 : i32
      %c0_i32_433 = arith.constant 0 : i32
      %972 = arith.cmpi slt, %968, %c0_i32_433 : i32
      %973 = arith.xori %971, %972 : i1
      %974 = arith.andi %973, %970 : i1
      %975 = arith.addi %969, %968 : i32
      %976 = arith.select %974, %975, %969 : i32
      %c0_i32_434 = arith.constant 0 : i32
      %977 = tpu.memref_slice %arg3[%789, %c0_i32_434] : memref<512x256xf32, #tpu.memory_space<any>> -> memref<1x256xf32, #tpu.memory_space<any>>
      %978 = tpu.memref_squeeze %977 : memref<1x256xf32, #tpu.memory_space<any>> -> memref<256xf32, #tpu.memory_space<any>>
      %c0_i32_435 = arith.constant 0 : i32
      %979 = tpu.memref_slice %arg10[%966, %c0_i32_435] : memref<128x256xf32, #tpu.memory_space<vmem>> -> memref<1x256xf32, #tpu.memory_space<vmem>>
      %980 = tpu.memref_squeeze %979 : memref<1x256xf32, #tpu.memory_space<vmem>> -> memref<256xf32, #tpu.memory_space<vmem>>
      %981 = tpu.memref_slice %arg12[%976] : memref<32x!tpu.dma_semaphore, #tpu.memory_space<semaphore_mem>> -> memref<1x!tpu.dma_semaphore, #tpu.memory_space<semaphore_mem>>
      %982 = tpu.memref_squeeze %981 : memref<1x!tpu.dma_semaphore, #tpu.memory_space<semaphore_mem>> -> memref<!tpu.dma_semaphore, #tpu.memory_space<semaphore_mem>>
      tpu.enqueue_dma source(%978 : memref<256xf32, #tpu.memory_space<any>>) target(%980 : memref<256xf32, #tpu.memory_space<vmem>>) target_semaphore(%982 : memref<!tpu.dma_semaphore, #tpu.memory_space<semaphore_mem>>)
      %c5_i32_436 = arith.constant 5 : i32
      %983 = arith.addi %719, %c5_i32_436 : i32
      %c32_i32_437 = arith.constant 32 : i32
      %c0_i32_438 = arith.constant 0 : i32
      %984 = arith.cmpi eq, %c32_i32_437, %c0_i32_438 : i32
      %c1_i32_439 = arith.constant 1 : i32
      %985 = arith.select %984, %c1_i32_439, %c32_i32_437 : i32
      %986 = arith.remsi %983, %985 : i32
      %c0_i32_440 = arith.constant 0 : i32
      %987 = arith.cmpi ne, %986, %c0_i32_440 : i32
      %c0_i32_441 = arith.constant 0 : i32
      %988 = arith.cmpi slt, %986, %c0_i32_441 : i32
      %c0_i32_442 = arith.constant 0 : i32
      %989 = arith.cmpi slt, %985, %c0_i32_442 : i32
      %990 = arith.xori %988, %989 : i1
      %991 = arith.andi %990, %987 : i1
      %992 = arith.addi %986, %985 : i32
      %993 = arith.select %991, %992, %986 : i32
      %c0_i32_443 = arith.constant 0 : i32
      %994 = tpu.memref_slice %arg3[%749, %c0_i32_443] : memref<512x256xf32, #tpu.memory_space<any>> -> memref<1x256xf32, #tpu.memory_space<any>>
      %995 = tpu.memref_squeeze %994 : memref<1x256xf32, #tpu.memory_space<any>> -> memref<256xf32, #tpu.memory_space<any>>
      %c0_i32_444 = arith.constant 0 : i32
      %996 = tpu.memref_slice %arg10[%983, %c0_i32_444] : memref<128x256xf32, #tpu.memory_space<vmem>> -> memref<1x256xf32, #tpu.memory_space<vmem>>
      %997 = tpu.memref_squeeze %996 : memref<1x256xf32, #tpu.memory_space<vmem>> -> memref<256xf32, #tpu.memory_space<vmem>>
      %998 = tpu.memref_slice %arg12[%993] : memref<32x!tpu.dma_semaphore, #tpu.memory_space<semaphore_mem>> -> memref<1x!tpu.dma_semaphore, #tpu.memory_space<semaphore_mem>>
      %999 = tpu.memref_squeeze %998 : memref<1x!tpu.dma_semaphore, #tpu.memory_space<semaphore_mem>> -> memref<!tpu.dma_semaphore, #tpu.memory_space<semaphore_mem>>
      tpu.wait_dma2 semaphore(%999 : memref<!tpu.dma_semaphore, #tpu.memory_space<semaphore_mem>>) src(%995 : memref<256xf32, #tpu.memory_space<any>>) dst(%997 : memref<256xf32, #tpu.memory_space<vmem>>)
      %c5_i32_445 = arith.constant 5 : i32
      %1000 = arith.addi %719, %c5_i32_445 : i32
      %c32_i32_446 = arith.constant 32 : i32
      %1001 = arith.addi %1000, %c32_i32_446 : i32
      %c32_i32_447 = arith.constant 32 : i32
      %c0_i32_448 = arith.constant 0 : i32
      %1002 = arith.cmpi eq, %c32_i32_447, %c0_i32_448 : i32
      %c1_i32_449 = arith.constant 1 : i32
      %1003 = arith.select %1002, %c1_i32_449, %c32_i32_447 : i32
      %1004 = arith.remsi %1001, %1003 : i32
      %c0_i32_450 = arith.constant 0 : i32
      %1005 = arith.cmpi ne, %1004, %c0_i32_450 : i32
      %c0_i32_451 = arith.constant 0 : i32
      %1006 = arith.cmpi slt, %1004, %c0_i32_451 : i32
      %c0_i32_452 = arith.constant 0 : i32
      %1007 = arith.cmpi slt, %1003, %c0_i32_452 : i32
      %1008 = arith.xori %1006, %1007 : i1
      %1009 = arith.andi %1008, %1005 : i1
      %1010 = arith.addi %1004, %1003 : i32
      %1011 = arith.select %1009, %1010, %1004 : i32
      %c0_i32_453 = arith.constant 0 : i32
      %1012 = tpu.memref_slice %arg3[%795, %c0_i32_453] : memref<512x256xf32, #tpu.memory_space<any>> -> memref<1x256xf32, #tpu.memory_space<any>>
      %1013 = tpu.memref_squeeze %1012 : memref<1x256xf32, #tpu.memory_space<any>> -> memref<256xf32, #tpu.memory_space<any>>
      %c0_i32_454 = arith.constant 0 : i32
      %1014 = tpu.memref_slice %arg10[%1001, %c0_i32_454] : memref<128x256xf32, #tpu.memory_space<vmem>> -> memref<1x256xf32, #tpu.memory_space<vmem>>
      %1015 = tpu.memref_squeeze %1014 : memref<1x256xf32, #tpu.memory_space<vmem>> -> memref<256xf32, #tpu.memory_space<vmem>>
      %1016 = tpu.memref_slice %arg12[%1011] : memref<32x!tpu.dma_semaphore, #tpu.memory_space<semaphore_mem>> -> memref<1x!tpu.dma_semaphore, #tpu.memory_space<semaphore_mem>>
      %1017 = tpu.memref_squeeze %1016 : memref<1x!tpu.dma_semaphore, #tpu.memory_space<semaphore_mem>> -> memref<!tpu.dma_semaphore, #tpu.memory_space<semaphore_mem>>
      tpu.enqueue_dma source(%1013 : memref<256xf32, #tpu.memory_space<any>>) target(%1015 : memref<256xf32, #tpu.memory_space<vmem>>) target_semaphore(%1017 : memref<!tpu.dma_semaphore, #tpu.memory_space<semaphore_mem>>)
      %c6_i32_455 = arith.constant 6 : i32
      %1018 = arith.addi %719, %c6_i32_455 : i32
      %c32_i32_456 = arith.constant 32 : i32
      %c0_i32_457 = arith.constant 0 : i32
      %1019 = arith.cmpi eq, %c32_i32_456, %c0_i32_457 : i32
      %c1_i32_458 = arith.constant 1 : i32
      %1020 = arith.select %1019, %c1_i32_458, %c32_i32_456 : i32
      %1021 = arith.remsi %1018, %1020 : i32
      %c0_i32_459 = arith.constant 0 : i32
      %1022 = arith.cmpi ne, %1021, %c0_i32_459 : i32
      %c0_i32_460 = arith.constant 0 : i32
      %1023 = arith.cmpi slt, %1021, %c0_i32_460 : i32
      %c0_i32_461 = arith.constant 0 : i32
      %1024 = arith.cmpi slt, %1020, %c0_i32_461 : i32
      %1025 = arith.xori %1023, %1024 : i1
      %1026 = arith.andi %1025, %1022 : i1
      %1027 = arith.addi %1021, %1020 : i32
      %1028 = arith.select %1026, %1027, %1021 : i32
      %c0_i32_462 = arith.constant 0 : i32
      %1029 = tpu.memref_slice %arg3[%754, %c0_i32_462] : memref<512x256xf32, #tpu.memory_space<any>> -> memref<1x256xf32, #tpu.memory_space<any>>
      %1030 = tpu.memref_squeeze %1029 : memref<1x256xf32, #tpu.memory_space<any>> -> memref<256xf32, #tpu.memory_space<any>>
      %c0_i32_463 = arith.constant 0 : i32
      %1031 = tpu.memref_slice %arg10[%1018, %c0_i32_463] : memref<128x256xf32, #tpu.memory_space<vmem>> -> memref<1x256xf32, #tpu.memory_space<vmem>>
      %1032 = tpu.memref_squeeze %1031 : memref<1x256xf32, #tpu.memory_space<vmem>> -> memref<256xf32, #tpu.memory_space<vmem>>
      %1033 = tpu.memref_slice %arg12[%1028] : memref<32x!tpu.dma_semaphore, #tpu.memory_space<semaphore_mem>> -> memref<1x!tpu.dma_semaphore, #tpu.memory_space<semaphore_mem>>
      %1034 = tpu.memref_squeeze %1033 : memref<1x!tpu.dma_semaphore, #tpu.memory_space<semaphore_mem>> -> memref<!tpu.dma_semaphore, #tpu.memory_space<semaphore_mem>>
      tpu.wait_dma2 semaphore(%1034 : memref<!tpu.dma_semaphore, #tpu.memory_space<semaphore_mem>>) src(%1030 : memref<256xf32, #tpu.memory_space<any>>) dst(%1032 : memref<256xf32, #tpu.memory_space<vmem>>)
      %c6_i32_464 = arith.constant 6 : i32
      %1035 = arith.addi %719, %c6_i32_464 : i32
      %c32_i32_465 = arith.constant 32 : i32
      %1036 = arith.addi %1035, %c32_i32_465 : i32
      %c32_i32_466 = arith.constant 32 : i32
      %c0_i32_467 = arith.constant 0 : i32
      %1037 = arith.cmpi eq, %c32_i32_466, %c0_i32_467 : i32
      %c1_i32_468 = arith.constant 1 : i32
      %1038 = arith.select %1037, %c1_i32_468, %c32_i32_466 : i32
      %1039 = arith.remsi %1036, %1038 : i32
      %c0_i32_469 = arith.constant 0 : i32
      %1040 = arith.cmpi ne, %1039, %c0_i32_469 : i32
      %c0_i32_470 = arith.constant 0 : i32
      %1041 = arith.cmpi slt, %1039, %c0_i32_470 : i32
      %c0_i32_471 = arith.constant 0 : i32
      %1042 = arith.cmpi slt, %1038, %c0_i32_471 : i32
      %1043 = arith.xori %1041, %1042 : i1
      %1044 = arith.andi %1043, %1040 : i1
      %1045 = arith.addi %1039, %1038 : i32
      %1046 = arith.select %1044, %1045, %1039 : i32
      %c0_i32_472 = arith.constant 0 : i32
      %1047 = tpu.memref_slice %arg3[%801, %c0_i32_472] : memref<512x256xf32, #tpu.memory_space<any>> -> memref<1x256xf32, #tpu.memory_space<any>>
      %1048 = tpu.memref_squeeze %1047 : memref<1x256xf32, #tpu.memory_space<any>> -> memref<256xf32, #tpu.memory_space<any>>
      %c0_i32_473 = arith.constant 0 : i32
      %1049 = tpu.memref_slice %arg10[%1036, %c0_i32_473] : memref<128x256xf32, #tpu.memory_space<vmem>> -> memref<1x256xf32, #tpu.memory_space<vmem>>
      %1050 = tpu.memref_squeeze %1049 : memref<1x256xf32, #tpu.memory_space<vmem>> -> memref<256xf32, #tpu.memory_space<vmem>>
      %1051 = tpu.memref_slice %arg12[%1046] : memref<32x!tpu.dma_semaphore, #tpu.memory_space<semaphore_mem>> -> memref<1x!tpu.dma_semaphore, #tpu.memory_space<semaphore_mem>>
      %1052 = tpu.memref_squeeze %1051 : memref<1x!tpu.dma_semaphore, #tpu.memory_space<semaphore_mem>> -> memref<!tpu.dma_semaphore, #tpu.memory_space<semaphore_mem>>
      tpu.enqueue_dma source(%1048 : memref<256xf32, #tpu.memory_space<any>>) target(%1050 : memref<256xf32, #tpu.memory_space<vmem>>) target_semaphore(%1052 : memref<!tpu.dma_semaphore, #tpu.memory_space<semaphore_mem>>)
      %c7_i32_474 = arith.constant 7 : i32
      %1053 = arith.addi %719, %c7_i32_474 : i32
      %c32_i32_475 = arith.constant 32 : i32
      %c0_i32_476 = arith.constant 0 : i32
      %1054 = arith.cmpi eq, %c32_i32_475, %c0_i32_476 : i32
      %c1_i32_477 = arith.constant 1 : i32
      %1055 = arith.select %1054, %c1_i32_477, %c32_i32_475 : i32
      %1056 = arith.remsi %1053, %1055 : i32
      %c0_i32_478 = arith.constant 0 : i32
      %1057 = arith.cmpi ne, %1056, %c0_i32_478 : i32
      %c0_i32_479 = arith.constant 0 : i32
      %1058 = arith.cmpi slt, %1056, %c0_i32_479 : i32
      %c0_i32_480 = arith.constant 0 : i32
      %1059 = arith.cmpi slt, %1055, %c0_i32_480 : i32
      %1060 = arith.xori %1058, %1059 : i1
      %1061 = arith.andi %1060, %1057 : i1
      %1062 = arith.addi %1056, %1055 : i32
      %1063 = arith.select %1061, %1062, %1056 : i32
      %c0_i32_481 = arith.constant 0 : i32
      %1064 = tpu.memref_slice %arg3[%759, %c0_i32_481] : memref<512x256xf32, #tpu.memory_space<any>> -> memref<1x256xf32, #tpu.memory_space<any>>
      %1065 = tpu.memref_squeeze %1064 : memref<1x256xf32, #tpu.memory_space<any>> -> memref<256xf32, #tpu.memory_space<any>>
      %c0_i32_482 = arith.constant 0 : i32
      %1066 = tpu.memref_slice %arg10[%1053, %c0_i32_482] : memref<128x256xf32, #tpu.memory_space<vmem>> -> memref<1x256xf32, #tpu.memory_space<vmem>>
      %1067 = tpu.memref_squeeze %1066 : memref<1x256xf32, #tpu.memory_space<vmem>> -> memref<256xf32, #tpu.memory_space<vmem>>
      %1068 = tpu.memref_slice %arg12[%1063] : memref<32x!tpu.dma_semaphore, #tpu.memory_space<semaphore_mem>> -> memref<1x!tpu.dma_semaphore, #tpu.memory_space<semaphore_mem>>
      %1069 = tpu.memref_squeeze %1068 : memref<1x!tpu.dma_semaphore, #tpu.memory_space<semaphore_mem>> -> memref<!tpu.dma_semaphore, #tpu.memory_space<semaphore_mem>>
      tpu.wait_dma2 semaphore(%1069 : memref<!tpu.dma_semaphore, #tpu.memory_space<semaphore_mem>>) src(%1065 : memref<256xf32, #tpu.memory_space<any>>) dst(%1067 : memref<256xf32, #tpu.memory_space<vmem>>)
      %c7_i32_483 = arith.constant 7 : i32
      %1070 = arith.addi %719, %c7_i32_483 : i32
      %c32_i32_484 = arith.constant 32 : i32
      %1071 = arith.addi %1070, %c32_i32_484 : i32
      %c32_i32_485 = arith.constant 32 : i32
      %c0_i32_486 = arith.constant 0 : i32
      %1072 = arith.cmpi eq, %c32_i32_485, %c0_i32_486 : i32
      %c1_i32_487 = arith.constant 1 : i32
      %1073 = arith.select %1072, %c1_i32_487, %c32_i32_485 : i32
      %1074 = arith.remsi %1071, %1073 : i32
      %c0_i32_488 = arith.constant 0 : i32
      %1075 = arith.cmpi ne, %1074, %c0_i32_488 : i32
      %c0_i32_489 = arith.constant 0 : i32
      %1076 = arith.cmpi slt, %1074, %c0_i32_489 : i32
      %c0_i32_490 = arith.constant 0 : i32
      %1077 = arith.cmpi slt, %1073, %c0_i32_490 : i32
      %1078 = arith.xori %1076, %1077 : i1
      %1079 = arith.andi %1078, %1075 : i1
      %1080 = arith.addi %1074, %1073 : i32
      %1081 = arith.select %1079, %1080, %1074 : i32
      %c0_i32_491 = arith.constant 0 : i32
      %1082 = tpu.memref_slice %arg3[%807, %c0_i32_491] : memref<512x256xf32, #tpu.memory_space<any>> -> memref<1x256xf32, #tpu.memory_space<any>>
      %1083 = tpu.memref_squeeze %1082 : memref<1x256xf32, #tpu.memory_space<any>> -> memref<256xf32, #tpu.memory_space<any>>
      %c0_i32_492 = arith.constant 0 : i32
      %1084 = tpu.memref_slice %arg10[%1071, %c0_i32_492] : memref<128x256xf32, #tpu.memory_space<vmem>> -> memref<1x256xf32, #tpu.memory_space<vmem>>
      %1085 = tpu.memref_squeeze %1084 : memref<1x256xf32, #tpu.memory_space<vmem>> -> memref<256xf32, #tpu.memory_space<vmem>>
      %1086 = tpu.memref_slice %arg12[%1081] : memref<32x!tpu.dma_semaphore, #tpu.memory_space<semaphore_mem>> -> memref<1x!tpu.dma_semaphore, #tpu.memory_space<semaphore_mem>>
      %1087 = tpu.memref_squeeze %1086 : memref<1x!tpu.dma_semaphore, #tpu.memory_space<semaphore_mem>> -> memref<!tpu.dma_semaphore, #tpu.memory_space<semaphore_mem>>
      tpu.enqueue_dma source(%1083 : memref<256xf32, #tpu.memory_space<any>>) target(%1085 : memref<256xf32, #tpu.memory_space<vmem>>) target_semaphore(%1087 : memref<!tpu.dma_semaphore, #tpu.memory_space<semaphore_mem>>)
    }
    %c12_i32_141 = arith.constant 12 : i32
    %c96_i32 = arith.constant 96 : i32
    %338 = arith.addi %0, %c96_i32 : i32
    %c0_i32_142 = arith.constant 0 : i32
    %339 = arith.addi %338, %c0_i32_142 : i32
    %340 = arith.index_cast %arg0 : i32 to index
    %341 = arith.index_cast %339 : i32 to index
    %342 = memref.load %arg2[%340, %341] : memref<2x128xi32, #tpu.memory_space<smem>>
    %c96_i32_143 = arith.constant 96 : i32
    %343 = arith.addi %0, %c96_i32_143 : i32
    %c1_i32_144 = arith.constant 1 : i32
    %344 = arith.addi %343, %c1_i32_144 : i32
    %345 = arith.index_cast %arg0 : i32 to index
    %346 = arith.index_cast %344 : i32 to index
    %347 = memref.load %arg2[%345, %346] : memref<2x128xi32, #tpu.memory_space<smem>>
    %c96_i32_145 = arith.constant 96 : i32
    %348 = arith.addi %0, %c96_i32_145 : i32
    %c2_i32_146 = arith.constant 2 : i32
    %349 = arith.addi %348, %c2_i32_146 : i32
    %350 = arith.index_cast %arg0 : i32 to index
    %351 = arith.index_cast %349 : i32 to index
    %352 = memref.load %arg2[%350, %351] : memref<2x128xi32, #tpu.memory_space<smem>>
    %c96_i32_147 = arith.constant 96 : i32
    %353 = arith.addi %0, %c96_i32_147 : i32
    %c3_i32_148 = arith.constant 3 : i32
    %354 = arith.addi %353, %c3_i32_148 : i32
    %355 = arith.index_cast %arg0 : i32 to index
    %356 = arith.index_cast %354 : i32 to index
    %357 = memref.load %arg2[%355, %356] : memref<2x128xi32, #tpu.memory_space<smem>>
    %c96_i32_149 = arith.constant 96 : i32
    %358 = arith.addi %0, %c96_i32_149 : i32
    %c4_i32_150 = arith.constant 4 : i32
    %359 = arith.addi %358, %c4_i32_150 : i32
    %360 = arith.index_cast %arg0 : i32 to index
    %361 = arith.index_cast %359 : i32 to index
    %362 = memref.load %arg2[%360, %361] : memref<2x128xi32, #tpu.memory_space<smem>>
    %c96_i32_151 = arith.constant 96 : i32
    %363 = arith.addi %0, %c96_i32_151 : i32
    %c5_i32_152 = arith.constant 5 : i32
    %364 = arith.addi %363, %c5_i32_152 : i32
    %365 = arith.index_cast %arg0 : i32 to index
    %366 = arith.index_cast %364 : i32 to index
    %367 = memref.load %arg2[%365, %366] : memref<2x128xi32, #tpu.memory_space<smem>>
    %c96_i32_153 = arith.constant 96 : i32
    %368 = arith.addi %0, %c96_i32_153 : i32
    %c6_i32_154 = arith.constant 6 : i32
    %369 = arith.addi %368, %c6_i32_154 : i32
    %370 = arith.index_cast %arg0 : i32 to index
    %371 = arith.index_cast %369 : i32 to index
    %372 = memref.load %arg2[%370, %371] : memref<2x128xi32, #tpu.memory_space<smem>>
    %c96_i32_155 = arith.constant 96 : i32
    %373 = arith.addi %0, %c96_i32_155 : i32
    %c7_i32_156 = arith.constant 7 : i32
    %374 = arith.addi %373, %c7_i32_156 : i32
    %375 = arith.index_cast %arg0 : i32 to index
    %376 = arith.index_cast %374 : i32 to index
    %377 = memref.load %arg2[%375, %376] : memref<2x128xi32, #tpu.memory_space<smem>>
    %c96_i32_157 = arith.constant 96 : i32
    %378 = arith.addi %0, %c96_i32_157 : i32
    %c8_i32_158 = arith.constant 8 : i32
    %379 = arith.addi %378, %c8_i32_158 : i32
    %380 = arith.index_cast %arg0 : i32 to index
    %381 = arith.index_cast %379 : i32 to index
    %382 = memref.load %arg2[%380, %381] : memref<2x128xi32, #tpu.memory_space<smem>>
    %c96_i32_159 = arith.constant 96 : i32
    %383 = arith.addi %0, %c96_i32_159 : i32
    %c9_i32_160 = arith.constant 9 : i32
    %384 = arith.addi %383, %c9_i32_160 : i32
    %385 = arith.index_cast %arg0 : i32 to index
    %386 = arith.index_cast %384 : i32 to index
    %387 = memref.load %arg2[%385, %386] : memref<2x128xi32, #tpu.memory_space<smem>>
    %c96_i32_161 = arith.constant 96 : i32
    %388 = arith.addi %0, %c96_i32_161 : i32
    %c10_i32_162 = arith.constant 10 : i32
    %389 = arith.addi %388, %c10_i32_162 : i32
    %390 = arith.index_cast %arg0 : i32 to index
    %391 = arith.index_cast %389 : i32 to index
    %392 = memref.load %arg2[%390, %391] : memref<2x128xi32, #tpu.memory_space<smem>>
    %c96_i32_163 = arith.constant 96 : i32
    %393 = arith.addi %0, %c96_i32_163 : i32
    %c11_i32_164 = arith.constant 11 : i32
    %394 = arith.addi %393, %c11_i32_164 : i32
    %395 = arith.index_cast %arg0 : i32 to index
    %396 = arith.index_cast %394 : i32 to index
    %397 = memref.load %arg2[%395, %396] : memref<2x128xi32, #tpu.memory_space<smem>>
    %c96_i32_165 = arith.constant 96 : i32
    %398 = arith.addi %0, %c96_i32_165 : i32
    %c12_i32_166 = arith.constant 12 : i32
    %399 = arith.addi %398, %c12_i32_166 : i32
    %400 = arith.index_cast %arg0 : i32 to index
    %401 = arith.index_cast %399 : i32 to index
    %402 = memref.load %arg2[%400, %401] : memref<2x128xi32, #tpu.memory_space<smem>>
    %c96_i32_167 = arith.constant 96 : i32
    %403 = arith.addi %0, %c96_i32_167 : i32
    %c13_i32_168 = arith.constant 13 : i32
    %404 = arith.addi %403, %c13_i32_168 : i32
    %405 = arith.index_cast %arg0 : i32 to index
    %406 = arith.index_cast %404 : i32 to index
    %407 = memref.load %arg2[%405, %406] : memref<2x128xi32, #tpu.memory_space<smem>>
    %c96_i32_169 = arith.constant 96 : i32
    %408 = arith.addi %0, %c96_i32_169 : i32
    %c14_i32_170 = arith.constant 14 : i32
    %409 = arith.addi %408, %c14_i32_170 : i32
    %410 = arith.index_cast %arg0 : i32 to index
    %411 = arith.index_cast %409 : i32 to index
    %412 = memref.load %arg2[%410, %411] : memref<2x128xi32, #tpu.memory_space<smem>>
    %c96_i32_171 = arith.constant 96 : i32
    %413 = arith.addi %0, %c96_i32_171 : i32
    %c15_i32_172 = arith.constant 15 : i32
    %414 = arith.addi %413, %c15_i32_172 : i32
    %415 = arith.index_cast %arg0 : i32 to index
    %416 = arith.index_cast %414 : i32 to index
    %417 = memref.load %arg2[%415, %416] : memref<2x128xi32, #tpu.memory_space<smem>>
    %c96_i32_173 = arith.constant 96 : i32
    %418 = arith.addi %0, %c96_i32_173 : i32
    %c16_i32_174 = arith.constant 16 : i32
    %419 = arith.addi %418, %c16_i32_174 : i32
    %420 = arith.index_cast %arg0 : i32 to index
    %421 = arith.index_cast %419 : i32 to index
    %422 = memref.load %arg2[%420, %421] : memref<2x128xi32, #tpu.memory_space<smem>>
    %c96_i32_175 = arith.constant 96 : i32
    %423 = arith.addi %0, %c96_i32_175 : i32
    %c17_i32_176 = arith.constant 17 : i32
    %424 = arith.addi %423, %c17_i32_176 : i32
    %425 = arith.index_cast %arg0 : i32 to index
    %426 = arith.index_cast %424 : i32 to index
    %427 = memref.load %arg2[%425, %426] : memref<2x128xi32, #tpu.memory_space<smem>>
    %c96_i32_177 = arith.constant 96 : i32
    %428 = arith.addi %0, %c96_i32_177 : i32
    %c18_i32_178 = arith.constant 18 : i32
    %429 = arith.addi %428, %c18_i32_178 : i32
    %430 = arith.index_cast %arg0 : i32 to index
    %431 = arith.index_cast %429 : i32 to index
    %432 = memref.load %arg2[%430, %431] : memref<2x128xi32, #tpu.memory_space<smem>>
    %c96_i32_179 = arith.constant 96 : i32
    %433 = arith.addi %0, %c96_i32_179 : i32
    %c19_i32_180 = arith.constant 19 : i32
    %434 = arith.addi %433, %c19_i32_180 : i32
    %435 = arith.index_cast %arg0 : i32 to index
    %436 = arith.index_cast %434 : i32 to index
    %437 = memref.load %arg2[%435, %436] : memref<2x128xi32, #tpu.memory_space<smem>>
    %c96_i32_181 = arith.constant 96 : i32
    %438 = arith.addi %0, %c96_i32_181 : i32
    %c20_i32_182 = arith.constant 20 : i32
    %439 = arith.addi %438, %c20_i32_182 : i32
    %440 = arith.index_cast %arg0 : i32 to index
    %441 = arith.index_cast %439 : i32 to index
    %442 = memref.load %arg2[%440, %441] : memref<2x128xi32, #tpu.memory_space<smem>>
    %c96_i32_183 = arith.constant 96 : i32
    %443 = arith.addi %0, %c96_i32_183 : i32
    %c21_i32_184 = arith.constant 21 : i32
    %444 = arith.addi %443, %c21_i32_184 : i32
    %445 = arith.index_cast %arg0 : i32 to index
    %446 = arith.index_cast %444 : i32 to index
    %447 = memref.load %arg2[%445, %446] : memref<2x128xi32, #tpu.memory_space<smem>>
    %c96_i32_185 = arith.constant 96 : i32
    %448 = arith.addi %0, %c96_i32_185 : i32
    %c22_i32_186 = arith.constant 22 : i32
    %449 = arith.addi %448, %c22_i32_186 : i32
    %450 = arith.index_cast %arg0 : i32 to index
    %451 = arith.index_cast %449 : i32 to index
    %452 = memref.load %arg2[%450, %451] : memref<2x128xi32, #tpu.memory_space<smem>>
    %c96_i32_187 = arith.constant 96 : i32
    %453 = arith.addi %0, %c96_i32_187 : i32
    %c23_i32_188 = arith.constant 23 : i32
    %454 = arith.addi %453, %c23_i32_188 : i32
    %455 = arith.index_cast %arg0 : i32 to index
    %456 = arith.index_cast %454 : i32 to index
    %457 = memref.load %arg2[%455, %456] : memref<2x128xi32, #tpu.memory_space<smem>>
    %c96_i32_189 = arith.constant 96 : i32
    %458 = arith.addi %0, %c96_i32_189 : i32
    %c24_i32_190 = arith.constant 24 : i32
    %459 = arith.addi %458, %c24_i32_190 : i32
    %460 = arith.index_cast %arg0 : i32 to index
    %461 = arith.index_cast %459 : i32 to index
    %462 = memref.load %arg2[%460, %461] : memref<2x128xi32, #tpu.memory_space<smem>>
    %c96_i32_191 = arith.constant 96 : i32
    %463 = arith.addi %0, %c96_i32_191 : i32
    %c25_i32_192 = arith.constant 25 : i32
    %464 = arith.addi %463, %c25_i32_192 : i32
    %465 = arith.index_cast %arg0 : i32 to index
    %466 = arith.index_cast %464 : i32 to index
    %467 = memref.load %arg2[%465, %466] : memref<2x128xi32, #tpu.memory_space<smem>>
    %c96_i32_193 = arith.constant 96 : i32
    %468 = arith.addi %0, %c96_i32_193 : i32
    %c26_i32_194 = arith.constant 26 : i32
    %469 = arith.addi %468, %c26_i32_194 : i32
    %470 = arith.index_cast %arg0 : i32 to index
    %471 = arith.index_cast %469 : i32 to index
    %472 = memref.load %arg2[%470, %471] : memref<2x128xi32, #tpu.memory_space<smem>>
    %c96_i32_195 = arith.constant 96 : i32
    %473 = arith.addi %0, %c96_i32_195 : i32
    %c27_i32_196 = arith.constant 27 : i32
    %474 = arith.addi %473, %c27_i32_196 : i32
    %475 = arith.index_cast %arg0 : i32 to index
    %476 = arith.index_cast %474 : i32 to index
    %477 = memref.load %arg2[%475, %476] : memref<2x128xi32, #tpu.memory_space<smem>>
    %c96_i32_197 = arith.constant 96 : i32
    %478 = arith.addi %0, %c96_i32_197 : i32
    %c28_i32_198 = arith.constant 28 : i32
    %479 = arith.addi %478, %c28_i32_198 : i32
    %480 = arith.index_cast %arg0 : i32 to index
    %481 = arith.index_cast %479 : i32 to index
    %482 = memref.load %arg2[%480, %481] : memref<2x128xi32, #tpu.memory_space<smem>>
    %c96_i32_199 = arith.constant 96 : i32
    %483 = arith.addi %0, %c96_i32_199 : i32
    %c29_i32_200 = arith.constant 29 : i32
    %484 = arith.addi %483, %c29_i32_200 : i32
    %485 = arith.index_cast %arg0 : i32 to index
    %486 = arith.index_cast %484 : i32 to index
    %487 = memref.load %arg2[%485, %486] : memref<2x128xi32, #tpu.memory_space<smem>>
    %c96_i32_201 = arith.constant 96 : i32
    %488 = arith.addi %0, %c96_i32_201 : i32
    %c30_i32_202 = arith.constant 30 : i32
    %489 = arith.addi %488, %c30_i32_202 : i32
    %490 = arith.index_cast %arg0 : i32 to index
    %491 = arith.index_cast %489 : i32 to index
    %492 = memref.load %arg2[%490, %491] : memref<2x128xi32, #tpu.memory_space<smem>>
    %c96_i32_203 = arith.constant 96 : i32
    %493 = arith.addi %0, %c96_i32_203 : i32
    %c31_i32_204 = arith.constant 31 : i32
    %494 = arith.addi %493, %c31_i32_204 : i32
    %495 = arith.index_cast %arg0 : i32 to index
    %496 = arith.index_cast %494 : i32 to index
    %497 = memref.load %arg2[%495, %496] : memref<2x128xi32, #tpu.memory_space<smem>>
    %c96_i32_205 = arith.constant 96 : i32
    %c0_i32_206 = arith.constant 0 : i32
    %c0_i32_207 = arith.constant 0 : i32
    %498 = tpu.memref_slice %arg3[%342, %c0_i32_207] : memref<512x256xf32, #tpu.memory_space<any>> -> memref<1x256xf32, #tpu.memory_space<any>>
    %499 = tpu.memref_squeeze %498 : memref<1x256xf32, #tpu.memory_space<any>> -> memref<256xf32, #tpu.memory_space<any>>
    %c0_i32_208 = arith.constant 0 : i32
    %500 = tpu.memref_slice %arg10[%c96_i32_205, %c0_i32_208] : memref<128x256xf32, #tpu.memory_space<vmem>> -> memref<1x256xf32, #tpu.memory_space<vmem>>
    %501 = tpu.memref_squeeze %500 : memref<1x256xf32, #tpu.memory_space<vmem>> -> memref<256xf32, #tpu.memory_space<vmem>>
    %502 = tpu.memref_slice %arg12[%c0_i32_206] : memref<32x!tpu.dma_semaphore, #tpu.memory_space<semaphore_mem>> -> memref<1x!tpu.dma_semaphore, #tpu.memory_space<semaphore_mem>>
    %503 = tpu.memref_squeeze %502 : memref<1x!tpu.dma_semaphore, #tpu.memory_space<semaphore_mem>> -> memref<!tpu.dma_semaphore, #tpu.memory_space<semaphore_mem>>
    tpu.wait_dma2 semaphore(%503 : memref<!tpu.dma_semaphore, #tpu.memory_space<semaphore_mem>>) src(%499 : memref<256xf32, #tpu.memory_space<any>>) dst(%501 : memref<256xf32, #tpu.memory_space<vmem>>)
    %c97_i32 = arith.constant 97 : i32
    %c1_i32_209 = arith.constant 1 : i32
    %c0_i32_210 = arith.constant 0 : i32
    %504 = tpu.memref_slice %arg3[%347, %c0_i32_210] : memref<512x256xf32, #tpu.memory_space<any>> -> memref<1x256xf32, #tpu.memory_space<any>>
    %505 = tpu.memref_squeeze %504 : memref<1x256xf32, #tpu.memory_space<any>> -> memref<256xf32, #tpu.memory_space<any>>
    %c0_i32_211 = arith.constant 0 : i32
    %506 = tpu.memref_slice %arg10[%c97_i32, %c0_i32_211] : memref<128x256xf32, #tpu.memory_space<vmem>> -> memref<1x256xf32, #tpu.memory_space<vmem>>
    %507 = tpu.memref_squeeze %506 : memref<1x256xf32, #tpu.memory_space<vmem>> -> memref<256xf32, #tpu.memory_space<vmem>>
    %508 = tpu.memref_slice %arg12[%c1_i32_209] : memref<32x!tpu.dma_semaphore, #tpu.memory_space<semaphore_mem>> -> memref<1x!tpu.dma_semaphore, #tpu.memory_space<semaphore_mem>>
    %509 = tpu.memref_squeeze %508 : memref<1x!tpu.dma_semaphore, #tpu.memory_space<semaphore_mem>> -> memref<!tpu.dma_semaphore, #tpu.memory_space<semaphore_mem>>
    tpu.wait_dma2 semaphore(%509 : memref<!tpu.dma_semaphore, #tpu.memory_space<semaphore_mem>>) src(%505 : memref<256xf32, #tpu.memory_space<any>>) dst(%507 : memref<256xf32, #tpu.memory_space<vmem>>)
    %c98_i32 = arith.constant 98 : i32
    %c2_i32_212 = arith.constant 2 : i32
    %c0_i32_213 = arith.constant 0 : i32
    %510 = tpu.memref_slice %arg3[%352, %c0_i32_213] : memref<512x256xf32, #tpu.memory_space<any>> -> memref<1x256xf32, #tpu.memory_space<any>>
    %511 = tpu.memref_squeeze %510 : memref<1x256xf32, #tpu.memory_space<any>> -> memref<256xf32, #tpu.memory_space<any>>
    %c0_i32_214 = arith.constant 0 : i32
    %512 = tpu.memref_slice %arg10[%c98_i32, %c0_i32_214] : memref<128x256xf32, #tpu.memory_space<vmem>> -> memref<1x256xf32, #tpu.memory_space<vmem>>
    %513 = tpu.memref_squeeze %512 : memref<1x256xf32, #tpu.memory_space<vmem>> -> memref<256xf32, #tpu.memory_space<vmem>>
    %514 = tpu.memref_slice %arg12[%c2_i32_212] : memref<32x!tpu.dma_semaphore, #tpu.memory_space<semaphore_mem>> -> memref<1x!tpu.dma_semaphore, #tpu.memory_space<semaphore_mem>>
    %515 = tpu.memref_squeeze %514 : memref<1x!tpu.dma_semaphore, #tpu.memory_space<semaphore_mem>> -> memref<!tpu.dma_semaphore, #tpu.memory_space<semaphore_mem>>
    tpu.wait_dma2 semaphore(%515 : memref<!tpu.dma_semaphore, #tpu.memory_space<semaphore_mem>>) src(%511 : memref<256xf32, #tpu.memory_space<any>>) dst(%513 : memref<256xf32, #tpu.memory_space<vmem>>)
    %c99_i32 = arith.constant 99 : i32
    %c3_i32_215 = arith.constant 3 : i32
    %c0_i32_216 = arith.constant 0 : i32
    %516 = tpu.memref_slice %arg3[%357, %c0_i32_216] : memref<512x256xf32, #tpu.memory_space<any>> -> memref<1x256xf32, #tpu.memory_space<any>>
    %517 = tpu.memref_squeeze %516 : memref<1x256xf32, #tpu.memory_space<any>> -> memref<256xf32, #tpu.memory_space<any>>
    %c0_i32_217 = arith.constant 0 : i32
    %518 = tpu.memref_slice %arg10[%c99_i32, %c0_i32_217] : memref<128x256xf32, #tpu.memory_space<vmem>> -> memref<1x256xf32, #tpu.memory_space<vmem>>
    %519 = tpu.memref_squeeze %518 : memref<1x256xf32, #tpu.memory_space<vmem>> -> memref<256xf32, #tpu.memory_space<vmem>>
    %520 = tpu.memref_slice %arg12[%c3_i32_215] : memref<32x!tpu.dma_semaphore, #tpu.memory_space<semaphore_mem>> -> memref<1x!tpu.dma_semaphore, #tpu.memory_space<semaphore_mem>>
    %521 = tpu.memref_squeeze %520 : memref<1x!tpu.dma_semaphore, #tpu.memory_space<semaphore_mem>> -> memref<!tpu.dma_semaphore, #tpu.memory_space<semaphore_mem>>
    tpu.wait_dma2 semaphore(%521 : memref<!tpu.dma_semaphore, #tpu.memory_space<semaphore_mem>>) src(%517 : memref<256xf32, #tpu.memory_space<any>>) dst(%519 : memref<256xf32, #tpu.memory_space<vmem>>)
    %c100_i32 = arith.constant 100 : i32
    %c4_i32_218 = arith.constant 4 : i32
    %c0_i32_219 = arith.constant 0 : i32
    %522 = tpu.memref_slice %arg3[%362, %c0_i32_219] : memref<512x256xf32, #tpu.memory_space<any>> -> memref<1x256xf32, #tpu.memory_space<any>>
    %523 = tpu.memref_squeeze %522 : memref<1x256xf32, #tpu.memory_space<any>> -> memref<256xf32, #tpu.memory_space<any>>
    %c0_i32_220 = arith.constant 0 : i32
    %524 = tpu.memref_slice %arg10[%c100_i32, %c0_i32_220] : memref<128x256xf32, #tpu.memory_space<vmem>> -> memref<1x256xf32, #tpu.memory_space<vmem>>
    %525 = tpu.memref_squeeze %524 : memref<1x256xf32, #tpu.memory_space<vmem>> -> memref<256xf32, #tpu.memory_space<vmem>>
    %526 = tpu.memref_slice %arg12[%c4_i32_218] : memref<32x!tpu.dma_semaphore, #tpu.memory_space<semaphore_mem>> -> memref<1x!tpu.dma_semaphore, #tpu.memory_space<semaphore_mem>>
    %527 = tpu.memref_squeeze %526 : memref<1x!tpu.dma_semaphore, #tpu.memory_space<semaphore_mem>> -> memref<!tpu.dma_semaphore, #tpu.memory_space<semaphore_mem>>
    tpu.wait_dma2 semaphore(%527 : memref<!tpu.dma_semaphore, #tpu.memory_space<semaphore_mem>>) src(%523 : memref<256xf32, #tpu.memory_space<any>>) dst(%525 : memref<256xf32, #tpu.memory_space<vmem>>)
    %c101_i32 = arith.constant 101 : i32
    %c5_i32_221 = arith.constant 5 : i32
    %c0_i32_222 = arith.constant 0 : i32
    %528 = tpu.memref_slice %arg3[%367, %c0_i32_222] : memref<512x256xf32, #tpu.memory_space<any>> -> memref<1x256xf32, #tpu.memory_space<any>>
    %529 = tpu.memref_squeeze %528 : memref<1x256xf32, #tpu.memory_space<any>> -> memref<256xf32, #tpu.memory_space<any>>
    %c0_i32_223 = arith.constant 0 : i32
    %530 = tpu.memref_slice %arg10[%c101_i32, %c0_i32_223] : memref<128x256xf32, #tpu.memory_space<vmem>> -> memref<1x256xf32, #tpu.memory_space<vmem>>
    %531 = tpu.memref_squeeze %530 : memref<1x256xf32, #tpu.memory_space<vmem>> -> memref<256xf32, #tpu.memory_space<vmem>>
    %532 = tpu.memref_slice %arg12[%c5_i32_221] : memref<32x!tpu.dma_semaphore, #tpu.memory_space<semaphore_mem>> -> memref<1x!tpu.dma_semaphore, #tpu.memory_space<semaphore_mem>>
    %533 = tpu.memref_squeeze %532 : memref<1x!tpu.dma_semaphore, #tpu.memory_space<semaphore_mem>> -> memref<!tpu.dma_semaphore, #tpu.memory_space<semaphore_mem>>
    tpu.wait_dma2 semaphore(%533 : memref<!tpu.dma_semaphore, #tpu.memory_space<semaphore_mem>>) src(%529 : memref<256xf32, #tpu.memory_space<any>>) dst(%531 : memref<256xf32, #tpu.memory_space<vmem>>)
    %c102_i32 = arith.constant 102 : i32
    %c6_i32_224 = arith.constant 6 : i32
    %c0_i32_225 = arith.constant 0 : i32
    %534 = tpu.memref_slice %arg3[%372, %c0_i32_225] : memref<512x256xf32, #tpu.memory_space<any>> -> memref<1x256xf32, #tpu.memory_space<any>>
    %535 = tpu.memref_squeeze %534 : memref<1x256xf32, #tpu.memory_space<any>> -> memref<256xf32, #tpu.memory_space<any>>
    %c0_i32_226 = arith.constant 0 : i32
    %536 = tpu.memref_slice %arg10[%c102_i32, %c0_i32_226] : memref<128x256xf32, #tpu.memory_space<vmem>> -> memref<1x256xf32, #tpu.memory_space<vmem>>
    %537 = tpu.memref_squeeze %536 : memref<1x256xf32, #tpu.memory_space<vmem>> -> memref<256xf32, #tpu.memory_space<vmem>>
    %538 = tpu.memref_slice %arg12[%c6_i32_224] : memref<32x!tpu.dma_semaphore, #tpu.memory_space<semaphore_mem>> -> memref<1x!tpu.dma_semaphore, #tpu.memory_space<semaphore_mem>>
    %539 = tpu.memref_squeeze %538 : memref<1x!tpu.dma_semaphore, #tpu.memory_space<semaphore_mem>> -> memref<!tpu.dma_semaphore, #tpu.memory_space<semaphore_mem>>
    tpu.wait_dma2 semaphore(%539 : memref<!tpu.dma_semaphore, #tpu.memory_space<semaphore_mem>>) src(%535 : memref<256xf32, #tpu.memory_space<any>>) dst(%537 : memref<256xf32, #tpu.memory_space<vmem>>)
    %c103_i32 = arith.constant 103 : i32
    %c7_i32_227 = arith.constant 7 : i32
    %c0_i32_228 = arith.constant 0 : i32
    %540 = tpu.memref_slice %arg3[%377, %c0_i32_228] : memref<512x256xf32, #tpu.memory_space<any>> -> memref<1x256xf32, #tpu.memory_space<any>>
    %541 = tpu.memref_squeeze %540 : memref<1x256xf32, #tpu.memory_space<any>> -> memref<256xf32, #tpu.memory_space<any>>
    %c0_i32_229 = arith.constant 0 : i32
    %542 = tpu.memref_slice %arg10[%c103_i32, %c0_i32_229] : memref<128x256xf32, #tpu.memory_space<vmem>> -> memref<1x256xf32, #tpu.memory_space<vmem>>
    %543 = tpu.memref_squeeze %542 : memref<1x256xf32, #tpu.memory_space<vmem>> -> memref<256xf32, #tpu.memory_space<vmem>>
    %544 = tpu.memref_slice %arg12[%c7_i32_227] : memref<32x!tpu.dma_semaphore, #tpu.memory_space<semaphore_mem>> -> memref<1x!tpu.dma_semaphore, #tpu.memory_space<semaphore_mem>>
    %545 = tpu.memref_squeeze %544 : memref<1x!tpu.dma_semaphore, #tpu.memory_space<semaphore_mem>> -> memref<!tpu.dma_semaphore, #tpu.memory_space<semaphore_mem>>
    tpu.wait_dma2 semaphore(%545 : memref<!tpu.dma_semaphore, #tpu.memory_space<semaphore_mem>>) src(%541 : memref<256xf32, #tpu.memory_space<any>>) dst(%543 : memref<256xf32, #tpu.memory_space<vmem>>)
    %c104_i32 = arith.constant 104 : i32
    %c8_i32_230 = arith.constant 8 : i32
    %c0_i32_231 = arith.constant 0 : i32
    %546 = tpu.memref_slice %arg3[%382, %c0_i32_231] : memref<512x256xf32, #tpu.memory_space<any>> -> memref<1x256xf32, #tpu.memory_space<any>>
    %547 = tpu.memref_squeeze %546 : memref<1x256xf32, #tpu.memory_space<any>> -> memref<256xf32, #tpu.memory_space<any>>
    %c0_i32_232 = arith.constant 0 : i32
    %548 = tpu.memref_slice %arg10[%c104_i32, %c0_i32_232] : memref<128x256xf32, #tpu.memory_space<vmem>> -> memref<1x256xf32, #tpu.memory_space<vmem>>
    %549 = tpu.memref_squeeze %548 : memref<1x256xf32, #tpu.memory_space<vmem>> -> memref<256xf32, #tpu.memory_space<vmem>>
    %550 = tpu.memref_slice %arg12[%c8_i32_230] : memref<32x!tpu.dma_semaphore, #tpu.memory_space<semaphore_mem>> -> memref<1x!tpu.dma_semaphore, #tpu.memory_space<semaphore_mem>>
    %551 = tpu.memref_squeeze %550 : memref<1x!tpu.dma_semaphore, #tpu.memory_space<semaphore_mem>> -> memref<!tpu.dma_semaphore, #tpu.memory_space<semaphore_mem>>
    tpu.wait_dma2 semaphore(%551 : memref<!tpu.dma_semaphore, #tpu.memory_space<semaphore_mem>>) src(%547 : memref<256xf32, #tpu.memory_space<any>>) dst(%549 : memref<256xf32, #tpu.memory_space<vmem>>)
    %c105_i32 = arith.constant 105 : i32
    %c9_i32_233 = arith.constant 9 : i32
    %c0_i32_234 = arith.constant 0 : i32
    %552 = tpu.memref_slice %arg3[%387, %c0_i32_234] : memref<512x256xf32, #tpu.memory_space<any>> -> memref<1x256xf32, #tpu.memory_space<any>>
    %553 = tpu.memref_squeeze %552 : memref<1x256xf32, #tpu.memory_space<any>> -> memref<256xf32, #tpu.memory_space<any>>
    %c0_i32_235 = arith.constant 0 : i32
    %554 = tpu.memref_slice %arg10[%c105_i32, %c0_i32_235] : memref<128x256xf32, #tpu.memory_space<vmem>> -> memref<1x256xf32, #tpu.memory_space<vmem>>
    %555 = tpu.memref_squeeze %554 : memref<1x256xf32, #tpu.memory_space<vmem>> -> memref<256xf32, #tpu.memory_space<vmem>>
    %556 = tpu.memref_slice %arg12[%c9_i32_233] : memref<32x!tpu.dma_semaphore, #tpu.memory_space<semaphore_mem>> -> memref<1x!tpu.dma_semaphore, #tpu.memory_space<semaphore_mem>>
    %557 = tpu.memref_squeeze %556 : memref<1x!tpu.dma_semaphore, #tpu.memory_space<semaphore_mem>> -> memref<!tpu.dma_semaphore, #tpu.memory_space<semaphore_mem>>
    tpu.wait_dma2 semaphore(%557 : memref<!tpu.dma_semaphore, #tpu.memory_space<semaphore_mem>>) src(%553 : memref<256xf32, #tpu.memory_space<any>>) dst(%555 : memref<256xf32, #tpu.memory_space<vmem>>)
    %c106_i32 = arith.constant 106 : i32
    %c10_i32_236 = arith.constant 10 : i32
    %c0_i32_237 = arith.constant 0 : i32
    %558 = tpu.memref_slice %arg3[%392, %c0_i32_237] : memref<512x256xf32, #tpu.memory_space<any>> -> memref<1x256xf32, #tpu.memory_space<any>>
    %559 = tpu.memref_squeeze %558 : memref<1x256xf32, #tpu.memory_space<any>> -> memref<256xf32, #tpu.memory_space<any>>
    %c0_i32_238 = arith.constant 0 : i32
    %560 = tpu.memref_slice %arg10[%c106_i32, %c0_i32_238] : memref<128x256xf32, #tpu.memory_space<vmem>> -> memref<1x256xf32, #tpu.memory_space<vmem>>
    %561 = tpu.memref_squeeze %560 : memref<1x256xf32, #tpu.memory_space<vmem>> -> memref<256xf32, #tpu.memory_space<vmem>>
    %562 = tpu.memref_slice %arg12[%c10_i32_236] : memref<32x!tpu.dma_semaphore, #tpu.memory_space<semaphore_mem>> -> memref<1x!tpu.dma_semaphore, #tpu.memory_space<semaphore_mem>>
    %563 = tpu.memref_squeeze %562 : memref<1x!tpu.dma_semaphore, #tpu.memory_space<semaphore_mem>> -> memref<!tpu.dma_semaphore, #tpu.memory_space<semaphore_mem>>
    tpu.wait_dma2 semaphore(%563 : memref<!tpu.dma_semaphore, #tpu.memory_space<semaphore_mem>>) src(%559 : memref<256xf32, #tpu.memory_space<any>>) dst(%561 : memref<256xf32, #tpu.memory_space<vmem>>)
    %c107_i32 = arith.constant 107 : i32
    %c11_i32_239 = arith.constant 11 : i32
    %c0_i32_240 = arith.constant 0 : i32
    %564 = tpu.memref_slice %arg3[%397, %c0_i32_240] : memref<512x256xf32, #tpu.memory_space<any>> -> memref<1x256xf32, #tpu.memory_space<any>>
    %565 = tpu.memref_squeeze %564 : memref<1x256xf32, #tpu.memory_space<any>> -> memref<256xf32, #tpu.memory_space<any>>
    %c0_i32_241 = arith.constant 0 : i32
    %566 = tpu.memref_slice %arg10[%c107_i32, %c0_i32_241] : memref<128x256xf32, #tpu.memory_space<vmem>> -> memref<1x256xf32, #tpu.memory_space<vmem>>
    %567 = tpu.memref_squeeze %566 : memref<1x256xf32, #tpu.memory_space<vmem>> -> memref<256xf32, #tpu.memory_space<vmem>>
    %568 = tpu.memref_slice %arg12[%c11_i32_239] : memref<32x!tpu.dma_semaphore, #tpu.memory_space<semaphore_mem>> -> memref<1x!tpu.dma_semaphore, #tpu.memory_space<semaphore_mem>>
    %569 = tpu.memref_squeeze %568 : memref<1x!tpu.dma_semaphore, #tpu.memory_space<semaphore_mem>> -> memref<!tpu.dma_semaphore, #tpu.memory_space<semaphore_mem>>
    tpu.wait_dma2 semaphore(%569 : memref<!tpu.dma_semaphore, #tpu.memory_space<semaphore_mem>>) src(%565 : memref<256xf32, #tpu.memory_space<any>>) dst(%567 : memref<256xf32, #tpu.memory_space<vmem>>)
    %c108_i32 = arith.constant 108 : i32
    %c12_i32_242 = arith.constant 12 : i32
    %c0_i32_243 = arith.constant 0 : i32
    %570 = tpu.memref_slice %arg3[%402, %c0_i32_243] : memref<512x256xf32, #tpu.memory_space<any>> -> memref<1x256xf32, #tpu.memory_space<any>>
    %571 = tpu.memref_squeeze %570 : memref<1x256xf32, #tpu.memory_space<any>> -> memref<256xf32, #tpu.memory_space<any>>
    %c0_i32_244 = arith.constant 0 : i32
    %572 = tpu.memref_slice %arg10[%c108_i32, %c0_i32_244] : memref<128x256xf32, #tpu.memory_space<vmem>> -> memref<1x256xf32, #tpu.memory_space<vmem>>
    %573 = tpu.memref_squeeze %572 : memref<1x256xf32, #tpu.memory_space<vmem>> -> memref<256xf32, #tpu.memory_space<vmem>>
    %574 = tpu.memref_slice %arg12[%c12_i32_242] : memref<32x!tpu.dma_semaphore, #tpu.memory_space<semaphore_mem>> -> memref<1x!tpu.dma_semaphore, #tpu.memory_space<semaphore_mem>>
    %575 = tpu.memref_squeeze %574 : memref<1x!tpu.dma_semaphore, #tpu.memory_space<semaphore_mem>> -> memref<!tpu.dma_semaphore, #tpu.memory_space<semaphore_mem>>
    tpu.wait_dma2 semaphore(%575 : memref<!tpu.dma_semaphore, #tpu.memory_space<semaphore_mem>>) src(%571 : memref<256xf32, #tpu.memory_space<any>>) dst(%573 : memref<256xf32, #tpu.memory_space<vmem>>)
    %c109_i32 = arith.constant 109 : i32
    %c13_i32_245 = arith.constant 13 : i32
    %c0_i32_246 = arith.constant 0 : i32
    %576 = tpu.memref_slice %arg3[%407, %c0_i32_246] : memref<512x256xf32, #tpu.memory_space<any>> -> memref<1x256xf32, #tpu.memory_space<any>>
    %577 = tpu.memref_squeeze %576 : memref<1x256xf32, #tpu.memory_space<any>> -> memref<256xf32, #tpu.memory_space<any>>
    %c0_i32_247 = arith.constant 0 : i32
    %578 = tpu.memref_slice %arg10[%c109_i32, %c0_i32_247] : memref<128x256xf32, #tpu.memory_space<vmem>> -> memref<1x256xf32, #tpu.memory_space<vmem>>
    %579 = tpu.memref_squeeze %578 : memref<1x256xf32, #tpu.memory_space<vmem>> -> memref<256xf32, #tpu.memory_space<vmem>>
    %580 = tpu.memref_slice %arg12[%c13_i32_245] : memref<32x!tpu.dma_semaphore, #tpu.memory_space<semaphore_mem>> -> memref<1x!tpu.dma_semaphore, #tpu.memory_space<semaphore_mem>>
    %581 = tpu.memref_squeeze %580 : memref<1x!tpu.dma_semaphore, #tpu.memory_space<semaphore_mem>> -> memref<!tpu.dma_semaphore, #tpu.memory_space<semaphore_mem>>
    tpu.wait_dma2 semaphore(%581 : memref<!tpu.dma_semaphore, #tpu.memory_space<semaphore_mem>>) src(%577 : memref<256xf32, #tpu.memory_space<any>>) dst(%579 : memref<256xf32, #tpu.memory_space<vmem>>)
    %c110_i32 = arith.constant 110 : i32
    %c14_i32_248 = arith.constant 14 : i32
    %c0_i32_249 = arith.constant 0 : i32
    %582 = tpu.memref_slice %arg3[%412, %c0_i32_249] : memref<512x256xf32, #tpu.memory_space<any>> -> memref<1x256xf32, #tpu.memory_space<any>>
    %583 = tpu.memref_squeeze %582 : memref<1x256xf32, #tpu.memory_space<any>> -> memref<256xf32, #tpu.memory_space<any>>
    %c0_i32_250 = arith.constant 0 : i32
    %584 = tpu.memref_slice %arg10[%c110_i32, %c0_i32_250] : memref<128x256xf32, #tpu.memory_space<vmem>> -> memref<1x256xf32, #tpu.memory_space<vmem>>
    %585 = tpu.memref_squeeze %584 : memref<1x256xf32, #tpu.memory_space<vmem>> -> memref<256xf32, #tpu.memory_space<vmem>>
    %586 = tpu.memref_slice %arg12[%c14_i32_248] : memref<32x!tpu.dma_semaphore, #tpu.memory_space<semaphore_mem>> -> memref<1x!tpu.dma_semaphore, #tpu.memory_space<semaphore_mem>>
    %587 = tpu.memref_squeeze %586 : memref<1x!tpu.dma_semaphore, #tpu.memory_space<semaphore_mem>> -> memref<!tpu.dma_semaphore, #tpu.memory_space<semaphore_mem>>
    tpu.wait_dma2 semaphore(%587 : memref<!tpu.dma_semaphore, #tpu.memory_space<semaphore_mem>>) src(%583 : memref<256xf32, #tpu.memory_space<any>>) dst(%585 : memref<256xf32, #tpu.memory_space<vmem>>)
    %c111_i32 = arith.constant 111 : i32
    %c15_i32_251 = arith.constant 15 : i32
    %c0_i32_252 = arith.constant 0 : i32
    %588 = tpu.memref_slice %arg3[%417, %c0_i32_252] : memref<512x256xf32, #tpu.memory_space<any>> -> memref<1x256xf32, #tpu.memory_space<any>>
    %589 = tpu.memref_squeeze %588 : memref<1x256xf32, #tpu.memory_space<any>> -> memref<256xf32, #tpu.memory_space<any>>
    %c0_i32_253 = arith.constant 0 : i32
    %590 = tpu.memref_slice %arg10[%c111_i32, %c0_i32_253] : memref<128x256xf32, #tpu.memory_space<vmem>> -> memref<1x256xf32, #tpu.memory_space<vmem>>
    %591 = tpu.memref_squeeze %590 : memref<1x256xf32, #tpu.memory_space<vmem>> -> memref<256xf32, #tpu.memory_space<vmem>>
    %592 = tpu.memref_slice %arg12[%c15_i32_251] : memref<32x!tpu.dma_semaphore, #tpu.memory_space<semaphore_mem>> -> memref<1x!tpu.dma_semaphore, #tpu.memory_space<semaphore_mem>>
    %593 = tpu.memref_squeeze %592 : memref<1x!tpu.dma_semaphore, #tpu.memory_space<semaphore_mem>> -> memref<!tpu.dma_semaphore, #tpu.memory_space<semaphore_mem>>
    tpu.wait_dma2 semaphore(%593 : memref<!tpu.dma_semaphore, #tpu.memory_space<semaphore_mem>>) src(%589 : memref<256xf32, #tpu.memory_space<any>>) dst(%591 : memref<256xf32, #tpu.memory_space<vmem>>)
    %c112_i32 = arith.constant 112 : i32
    %c16_i32_254 = arith.constant 16 : i32
    %c0_i32_255 = arith.constant 0 : i32
    %594 = tpu.memref_slice %arg3[%422, %c0_i32_255] : memref<512x256xf32, #tpu.memory_space<any>> -> memref<1x256xf32, #tpu.memory_space<any>>
    %595 = tpu.memref_squeeze %594 : memref<1x256xf32, #tpu.memory_space<any>> -> memref<256xf32, #tpu.memory_space<any>>
    %c0_i32_256 = arith.constant 0 : i32
    %596 = tpu.memref_slice %arg10[%c112_i32, %c0_i32_256] : memref<128x256xf32, #tpu.memory_space<vmem>> -> memref<1x256xf32, #tpu.memory_space<vmem>>
    %597 = tpu.memref_squeeze %596 : memref<1x256xf32, #tpu.memory_space<vmem>> -> memref<256xf32, #tpu.memory_space<vmem>>
    %598 = tpu.memref_slice %arg12[%c16_i32_254] : memref<32x!tpu.dma_semaphore, #tpu.memory_space<semaphore_mem>> -> memref<1x!tpu.dma_semaphore, #tpu.memory_space<semaphore_mem>>
    %599 = tpu.memref_squeeze %598 : memref<1x!tpu.dma_semaphore, #tpu.memory_space<semaphore_mem>> -> memref<!tpu.dma_semaphore, #tpu.memory_space<semaphore_mem>>
    tpu.wait_dma2 semaphore(%599 : memref<!tpu.dma_semaphore, #tpu.memory_space<semaphore_mem>>) src(%595 : memref<256xf32, #tpu.memory_space<any>>) dst(%597 : memref<256xf32, #tpu.memory_space<vmem>>)
    %c113_i32 = arith.constant 113 : i32
    %c17_i32_257 = arith.constant 17 : i32
    %c0_i32_258 = arith.constant 0 : i32
    %600 = tpu.memref_slice %arg3[%427, %c0_i32_258] : memref<512x256xf32, #tpu.memory_space<any>> -> memref<1x256xf32, #tpu.memory_space<any>>
    %601 = tpu.memref_squeeze %600 : memref<1x256xf32, #tpu.memory_space<any>> -> memref<256xf32, #tpu.memory_space<any>>
    %c0_i32_259 = arith.constant 0 : i32
    %602 = tpu.memref_slice %arg10[%c113_i32, %c0_i32_259] : memref<128x256xf32, #tpu.memory_space<vmem>> -> memref<1x256xf32, #tpu.memory_space<vmem>>
    %603 = tpu.memref_squeeze %602 : memref<1x256xf32, #tpu.memory_space<vmem>> -> memref<256xf32, #tpu.memory_space<vmem>>
    %604 = tpu.memref_slice %arg12[%c17_i32_257] : memref<32x!tpu.dma_semaphore, #tpu.memory_space<semaphore_mem>> -> memref<1x!tpu.dma_semaphore, #tpu.memory_space<semaphore_mem>>
    %605 = tpu.memref_squeeze %604 : memref<1x!tpu.dma_semaphore, #tpu.memory_space<semaphore_mem>> -> memref<!tpu.dma_semaphore, #tpu.memory_space<semaphore_mem>>
    tpu.wait_dma2 semaphore(%605 : memref<!tpu.dma_semaphore, #tpu.memory_space<semaphore_mem>>) src(%601 : memref<256xf32, #tpu.memory_space<any>>) dst(%603 : memref<256xf32, #tpu.memory_space<vmem>>)
    %c114_i32 = arith.constant 114 : i32
    %c18_i32_260 = arith.constant 18 : i32
    %c0_i32_261 = arith.constant 0 : i32
    %606 = tpu.memref_slice %arg3[%432, %c0_i32_261] : memref<512x256xf32, #tpu.memory_space<any>> -> memref<1x256xf32, #tpu.memory_space<any>>
    %607 = tpu.memref_squeeze %606 : memref<1x256xf32, #tpu.memory_space<any>> -> memref<256xf32, #tpu.memory_space<any>>
    %c0_i32_262 = arith.constant 0 : i32
    %608 = tpu.memref_slice %arg10[%c114_i32, %c0_i32_262] : memref<128x256xf32, #tpu.memory_space<vmem>> -> memref<1x256xf32, #tpu.memory_space<vmem>>
    %609 = tpu.memref_squeeze %608 : memref<1x256xf32, #tpu.memory_space<vmem>> -> memref<256xf32, #tpu.memory_space<vmem>>
    %610 = tpu.memref_slice %arg12[%c18_i32_260] : memref<32x!tpu.dma_semaphore, #tpu.memory_space<semaphore_mem>> -> memref<1x!tpu.dma_semaphore, #tpu.memory_space<semaphore_mem>>
    %611 = tpu.memref_squeeze %610 : memref<1x!tpu.dma_semaphore, #tpu.memory_space<semaphore_mem>> -> memref<!tpu.dma_semaphore, #tpu.memory_space<semaphore_mem>>
    tpu.wait_dma2 semaphore(%611 : memref<!tpu.dma_semaphore, #tpu.memory_space<semaphore_mem>>) src(%607 : memref<256xf32, #tpu.memory_space<any>>) dst(%609 : memref<256xf32, #tpu.memory_space<vmem>>)
    %c115_i32 = arith.constant 115 : i32
    %c19_i32_263 = arith.constant 19 : i32
    %c0_i32_264 = arith.constant 0 : i32
    %612 = tpu.memref_slice %arg3[%437, %c0_i32_264] : memref<512x256xf32, #tpu.memory_space<any>> -> memref<1x256xf32, #tpu.memory_space<any>>
    %613 = tpu.memref_squeeze %612 : memref<1x256xf32, #tpu.memory_space<any>> -> memref<256xf32, #tpu.memory_space<any>>
    %c0_i32_265 = arith.constant 0 : i32
    %614 = tpu.memref_slice %arg10[%c115_i32, %c0_i32_265] : memref<128x256xf32, #tpu.memory_space<vmem>> -> memref<1x256xf32, #tpu.memory_space<vmem>>
    %615 = tpu.memref_squeeze %614 : memref<1x256xf32, #tpu.memory_space<vmem>> -> memref<256xf32, #tpu.memory_space<vmem>>
    %616 = tpu.memref_slice %arg12[%c19_i32_263] : memref<32x!tpu.dma_semaphore, #tpu.memory_space<semaphore_mem>> -> memref<1x!tpu.dma_semaphore, #tpu.memory_space<semaphore_mem>>
    %617 = tpu.memref_squeeze %616 : memref<1x!tpu.dma_semaphore, #tpu.memory_space<semaphore_mem>> -> memref<!tpu.dma_semaphore, #tpu.memory_space<semaphore_mem>>
    tpu.wait_dma2 semaphore(%617 : memref<!tpu.dma_semaphore, #tpu.memory_space<semaphore_mem>>) src(%613 : memref<256xf32, #tpu.memory_space<any>>) dst(%615 : memref<256xf32, #tpu.memory_space<vmem>>)
    %c116_i32 = arith.constant 116 : i32
    %c20_i32_266 = arith.constant 20 : i32
    %c0_i32_267 = arith.constant 0 : i32
    %618 = tpu.memref_slice %arg3[%442, %c0_i32_267] : memref<512x256xf32, #tpu.memory_space<any>> -> memref<1x256xf32, #tpu.memory_space<any>>
    %619 = tpu.memref_squeeze %618 : memref<1x256xf32, #tpu.memory_space<any>> -> memref<256xf32, #tpu.memory_space<any>>
    %c0_i32_268 = arith.constant 0 : i32
    %620 = tpu.memref_slice %arg10[%c116_i32, %c0_i32_268] : memref<128x256xf32, #tpu.memory_space<vmem>> -> memref<1x256xf32, #tpu.memory_space<vmem>>
    %621 = tpu.memref_squeeze %620 : memref<1x256xf32, #tpu.memory_space<vmem>> -> memref<256xf32, #tpu.memory_space<vmem>>
    %622 = tpu.memref_slice %arg12[%c20_i32_266] : memref<32x!tpu.dma_semaphore, #tpu.memory_space<semaphore_mem>> -> memref<1x!tpu.dma_semaphore, #tpu.memory_space<semaphore_mem>>
    %623 = tpu.memref_squeeze %622 : memref<1x!tpu.dma_semaphore, #tpu.memory_space<semaphore_mem>> -> memref<!tpu.dma_semaphore, #tpu.memory_space<semaphore_mem>>
    tpu.wait_dma2 semaphore(%623 : memref<!tpu.dma_semaphore, #tpu.memory_space<semaphore_mem>>) src(%619 : memref<256xf32, #tpu.memory_space<any>>) dst(%621 : memref<256xf32, #tpu.memory_space<vmem>>)
    %c117_i32 = arith.constant 117 : i32
    %c21_i32_269 = arith.constant 21 : i32
    %c0_i32_270 = arith.constant 0 : i32
    %624 = tpu.memref_slice %arg3[%447, %c0_i32_270] : memref<512x256xf32, #tpu.memory_space<any>> -> memref<1x256xf32, #tpu.memory_space<any>>
    %625 = tpu.memref_squeeze %624 : memref<1x256xf32, #tpu.memory_space<any>> -> memref<256xf32, #tpu.memory_space<any>>
    %c0_i32_271 = arith.constant 0 : i32
    %626 = tpu.memref_slice %arg10[%c117_i32, %c0_i32_271] : memref<128x256xf32, #tpu.memory_space<vmem>> -> memref<1x256xf32, #tpu.memory_space<vmem>>
    %627 = tpu.memref_squeeze %626 : memref<1x256xf32, #tpu.memory_space<vmem>> -> memref<256xf32, #tpu.memory_space<vmem>>
    %628 = tpu.memref_slice %arg12[%c21_i32_269] : memref<32x!tpu.dma_semaphore, #tpu.memory_space<semaphore_mem>> -> memref<1x!tpu.dma_semaphore, #tpu.memory_space<semaphore_mem>>
    %629 = tpu.memref_squeeze %628 : memref<1x!tpu.dma_semaphore, #tpu.memory_space<semaphore_mem>> -> memref<!tpu.dma_semaphore, #tpu.memory_space<semaphore_mem>>
    tpu.wait_dma2 semaphore(%629 : memref<!tpu.dma_semaphore, #tpu.memory_space<semaphore_mem>>) src(%625 : memref<256xf32, #tpu.memory_space<any>>) dst(%627 : memref<256xf32, #tpu.memory_space<vmem>>)
    %c118_i32 = arith.constant 118 : i32
    %c22_i32_272 = arith.constant 22 : i32
    %c0_i32_273 = arith.constant 0 : i32
    %630 = tpu.memref_slice %arg3[%452, %c0_i32_273] : memref<512x256xf32, #tpu.memory_space<any>> -> memref<1x256xf32, #tpu.memory_space<any>>
    %631 = tpu.memref_squeeze %630 : memref<1x256xf32, #tpu.memory_space<any>> -> memref<256xf32, #tpu.memory_space<any>>
    %c0_i32_274 = arith.constant 0 : i32
    %632 = tpu.memref_slice %arg10[%c118_i32, %c0_i32_274] : memref<128x256xf32, #tpu.memory_space<vmem>> -> memref<1x256xf32, #tpu.memory_space<vmem>>
    %633 = tpu.memref_squeeze %632 : memref<1x256xf32, #tpu.memory_space<vmem>> -> memref<256xf32, #tpu.memory_space<vmem>>
    %634 = tpu.memref_slice %arg12[%c22_i32_272] : memref<32x!tpu.dma_semaphore, #tpu.memory_space<semaphore_mem>> -> memref<1x!tpu.dma_semaphore, #tpu.memory_space<semaphore_mem>>
    %635 = tpu.memref_squeeze %634 : memref<1x!tpu.dma_semaphore, #tpu.memory_space<semaphore_mem>> -> memref<!tpu.dma_semaphore, #tpu.memory_space<semaphore_mem>>
    tpu.wait_dma2 semaphore(%635 : memref<!tpu.dma_semaphore, #tpu.memory_space<semaphore_mem>>) src(%631 : memref<256xf32, #tpu.memory_space<any>>) dst(%633 : memref<256xf32, #tpu.memory_space<vmem>>)
    %c119_i32 = arith.constant 119 : i32
    %c23_i32_275 = arith.constant 23 : i32
    %c0_i32_276 = arith.constant 0 : i32
    %636 = tpu.memref_slice %arg3[%457, %c0_i32_276] : memref<512x256xf32, #tpu.memory_space<any>> -> memref<1x256xf32, #tpu.memory_space<any>>
    %637 = tpu.memref_squeeze %636 : memref<1x256xf32, #tpu.memory_space<any>> -> memref<256xf32, #tpu.memory_space<any>>
    %c0_i32_277 = arith.constant 0 : i32
    %638 = tpu.memref_slice %arg10[%c119_i32, %c0_i32_277] : memref<128x256xf32, #tpu.memory_space<vmem>> -> memref<1x256xf32, #tpu.memory_space<vmem>>
    %639 = tpu.memref_squeeze %638 : memref<1x256xf32, #tpu.memory_space<vmem>> -> memref<256xf32, #tpu.memory_space<vmem>>
    %640 = tpu.memref_slice %arg12[%c23_i32_275] : memref<32x!tpu.dma_semaphore, #tpu.memory_space<semaphore_mem>> -> memref<1x!tpu.dma_semaphore, #tpu.memory_space<semaphore_mem>>
    %641 = tpu.memref_squeeze %640 : memref<1x!tpu.dma_semaphore, #tpu.memory_space<semaphore_mem>> -> memref<!tpu.dma_semaphore, #tpu.memory_space<semaphore_mem>>
    tpu.wait_dma2 semaphore(%641 : memref<!tpu.dma_semaphore, #tpu.memory_space<semaphore_mem>>) src(%637 : memref<256xf32, #tpu.memory_space<any>>) dst(%639 : memref<256xf32, #tpu.memory_space<vmem>>)
    %c120_i32 = arith.constant 120 : i32
    %c24_i32_278 = arith.constant 24 : i32
    %c0_i32_279 = arith.constant 0 : i32
    %642 = tpu.memref_slice %arg3[%462, %c0_i32_279] : memref<512x256xf32, #tpu.memory_space<any>> -> memref<1x256xf32, #tpu.memory_space<any>>
    %643 = tpu.memref_squeeze %642 : memref<1x256xf32, #tpu.memory_space<any>> -> memref<256xf32, #tpu.memory_space<any>>
    %c0_i32_280 = arith.constant 0 : i32
    %644 = tpu.memref_slice %arg10[%c120_i32, %c0_i32_280] : memref<128x256xf32, #tpu.memory_space<vmem>> -> memref<1x256xf32, #tpu.memory_space<vmem>>
    %645 = tpu.memref_squeeze %644 : memref<1x256xf32, #tpu.memory_space<vmem>> -> memref<256xf32, #tpu.memory_space<vmem>>
    %646 = tpu.memref_slice %arg12[%c24_i32_278] : memref<32x!tpu.dma_semaphore, #tpu.memory_space<semaphore_mem>> -> memref<1x!tpu.dma_semaphore, #tpu.memory_space<semaphore_mem>>
    %647 = tpu.memref_squeeze %646 : memref<1x!tpu.dma_semaphore, #tpu.memory_space<semaphore_mem>> -> memref<!tpu.dma_semaphore, #tpu.memory_space<semaphore_mem>>
    tpu.wait_dma2 semaphore(%647 : memref<!tpu.dma_semaphore, #tpu.memory_space<semaphore_mem>>) src(%643 : memref<256xf32, #tpu.memory_space<any>>) dst(%645 : memref<256xf32, #tpu.memory_space<vmem>>)
    %c121_i32 = arith.constant 121 : i32
    %c25_i32_281 = arith.constant 25 : i32
    %c0_i32_282 = arith.constant 0 : i32
    %648 = tpu.memref_slice %arg3[%467, %c0_i32_282] : memref<512x256xf32, #tpu.memory_space<any>> -> memref<1x256xf32, #tpu.memory_space<any>>
    %649 = tpu.memref_squeeze %648 : memref<1x256xf32, #tpu.memory_space<any>> -> memref<256xf32, #tpu.memory_space<any>>
    %c0_i32_283 = arith.constant 0 : i32
    %650 = tpu.memref_slice %arg10[%c121_i32, %c0_i32_283] : memref<128x256xf32, #tpu.memory_space<vmem>> -> memref<1x256xf32, #tpu.memory_space<vmem>>
    %651 = tpu.memref_squeeze %650 : memref<1x256xf32, #tpu.memory_space<vmem>> -> memref<256xf32, #tpu.memory_space<vmem>>
    %652 = tpu.memref_slice %arg12[%c25_i32_281] : memref<32x!tpu.dma_semaphore, #tpu.memory_space<semaphore_mem>> -> memref<1x!tpu.dma_semaphore, #tpu.memory_space<semaphore_mem>>
    %653 = tpu.memref_squeeze %652 : memref<1x!tpu.dma_semaphore, #tpu.memory_space<semaphore_mem>> -> memref<!tpu.dma_semaphore, #tpu.memory_space<semaphore_mem>>
    tpu.wait_dma2 semaphore(%653 : memref<!tpu.dma_semaphore, #tpu.memory_space<semaphore_mem>>) src(%649 : memref<256xf32, #tpu.memory_space<any>>) dst(%651 : memref<256xf32, #tpu.memory_space<vmem>>)
    %c122_i32 = arith.constant 122 : i32
    %c26_i32_284 = arith.constant 26 : i32
    %c0_i32_285 = arith.constant 0 : i32
    %654 = tpu.memref_slice %arg3[%472, %c0_i32_285] : memref<512x256xf32, #tpu.memory_space<any>> -> memref<1x256xf32, #tpu.memory_space<any>>
    %655 = tpu.memref_squeeze %654 : memref<1x256xf32, #tpu.memory_space<any>> -> memref<256xf32, #tpu.memory_space<any>>
    %c0_i32_286 = arith.constant 0 : i32
    %656 = tpu.memref_slice %arg10[%c122_i32, %c0_i32_286] : memref<128x256xf32, #tpu.memory_space<vmem>> -> memref<1x256xf32, #tpu.memory_space<vmem>>
    %657 = tpu.memref_squeeze %656 : memref<1x256xf32, #tpu.memory_space<vmem>> -> memref<256xf32, #tpu.memory_space<vmem>>
    %658 = tpu.memref_slice %arg12[%c26_i32_284] : memref<32x!tpu.dma_semaphore, #tpu.memory_space<semaphore_mem>> -> memref<1x!tpu.dma_semaphore, #tpu.memory_space<semaphore_mem>>
    %659 = tpu.memref_squeeze %658 : memref<1x!tpu.dma_semaphore, #tpu.memory_space<semaphore_mem>> -> memref<!tpu.dma_semaphore, #tpu.memory_space<semaphore_mem>>
    tpu.wait_dma2 semaphore(%659 : memref<!tpu.dma_semaphore, #tpu.memory_space<semaphore_mem>>) src(%655 : memref<256xf32, #tpu.memory_space<any>>) dst(%657 : memref<256xf32, #tpu.memory_space<vmem>>)
    %c123_i32 = arith.constant 123 : i32
    %c27_i32_287 = arith.constant 27 : i32
    %c0_i32_288 = arith.constant 0 : i32
    %660 = tpu.memref_slice %arg3[%477, %c0_i32_288] : memref<512x256xf32, #tpu.memory_space<any>> -> memref<1x256xf32, #tpu.memory_space<any>>
    %661 = tpu.memref_squeeze %660 : memref<1x256xf32, #tpu.memory_space<any>> -> memref<256xf32, #tpu.memory_space<any>>
    %c0_i32_289 = arith.constant 0 : i32
    %662 = tpu.memref_slice %arg10[%c123_i32, %c0_i32_289] : memref<128x256xf32, #tpu.memory_space<vmem>> -> memref<1x256xf32, #tpu.memory_space<vmem>>
    %663 = tpu.memref_squeeze %662 : memref<1x256xf32, #tpu.memory_space<vmem>> -> memref<256xf32, #tpu.memory_space<vmem>>
    %664 = tpu.memref_slice %arg12[%c27_i32_287] : memref<32x!tpu.dma_semaphore, #tpu.memory_space<semaphore_mem>> -> memref<1x!tpu.dma_semaphore, #tpu.memory_space<semaphore_mem>>
    %665 = tpu.memref_squeeze %664 : memref<1x!tpu.dma_semaphore, #tpu.memory_space<semaphore_mem>> -> memref<!tpu.dma_semaphore, #tpu.memory_space<semaphore_mem>>
    tpu.wait_dma2 semaphore(%665 : memref<!tpu.dma_semaphore, #tpu.memory_space<semaphore_mem>>) src(%661 : memref<256xf32, #tpu.memory_space<any>>) dst(%663 : memref<256xf32, #tpu.memory_space<vmem>>)
    %c124_i32 = arith.constant 124 : i32
    %c28_i32_290 = arith.constant 28 : i32
    %c0_i32_291 = arith.constant 0 : i32
    %666 = tpu.memref_slice %arg3[%482, %c0_i32_291] : memref<512x256xf32, #tpu.memory_space<any>> -> memref<1x256xf32, #tpu.memory_space<any>>
    %667 = tpu.memref_squeeze %666 : memref<1x256xf32, #tpu.memory_space<any>> -> memref<256xf32, #tpu.memory_space<any>>
    %c0_i32_292 = arith.constant 0 : i32
    %668 = tpu.memref_slice %arg10[%c124_i32, %c0_i32_292] : memref<128x256xf32, #tpu.memory_space<vmem>> -> memref<1x256xf32, #tpu.memory_space<vmem>>
    %669 = tpu.memref_squeeze %668 : memref<1x256xf32, #tpu.memory_space<vmem>> -> memref<256xf32, #tpu.memory_space<vmem>>
    %670 = tpu.memref_slice %arg12[%c28_i32_290] : memref<32x!tpu.dma_semaphore, #tpu.memory_space<semaphore_mem>> -> memref<1x!tpu.dma_semaphore, #tpu.memory_space<semaphore_mem>>
    %671 = tpu.memref_squeeze %670 : memref<1x!tpu.dma_semaphore, #tpu.memory_space<semaphore_mem>> -> memref<!tpu.dma_semaphore, #tpu.memory_space<semaphore_mem>>
    tpu.wait_dma2 semaphore(%671 : memref<!tpu.dma_semaphore, #tpu.memory_space<semaphore_mem>>) src(%667 : memref<256xf32, #tpu.memory_space<any>>) dst(%669 : memref<256xf32, #tpu.memory_space<vmem>>)
    %c125_i32 = arith.constant 125 : i32
    %c29_i32_293 = arith.constant 29 : i32
    %c0_i32_294 = arith.constant 0 : i32
    %672 = tpu.memref_slice %arg3[%487, %c0_i32_294] : memref<512x256xf32, #tpu.memory_space<any>> -> memref<1x256xf32, #tpu.memory_space<any>>
    %673 = tpu.memref_squeeze %672 : memref<1x256xf32, #tpu.memory_space<any>> -> memref<256xf32, #tpu.memory_space<any>>
    %c0_i32_295 = arith.constant 0 : i32
    %674 = tpu.memref_slice %arg10[%c125_i32, %c0_i32_295] : memref<128x256xf32, #tpu.memory_space<vmem>> -> memref<1x256xf32, #tpu.memory_space<vmem>>
    %675 = tpu.memref_squeeze %674 : memref<1x256xf32, #tpu.memory_space<vmem>> -> memref<256xf32, #tpu.memory_space<vmem>>
    %676 = tpu.memref_slice %arg12[%c29_i32_293] : memref<32x!tpu.dma_semaphore, #tpu.memory_space<semaphore_mem>> -> memref<1x!tpu.dma_semaphore, #tpu.memory_space<semaphore_mem>>
    %677 = tpu.memref_squeeze %676 : memref<1x!tpu.dma_semaphore, #tpu.memory_space<semaphore_mem>> -> memref<!tpu.dma_semaphore, #tpu.memory_space<semaphore_mem>>
    tpu.wait_dma2 semaphore(%677 : memref<!tpu.dma_semaphore, #tpu.memory_space<semaphore_mem>>) src(%673 : memref<256xf32, #tpu.memory_space<any>>) dst(%675 : memref<256xf32, #tpu.memory_space<vmem>>)
    %c126_i32 = arith.constant 126 : i32
    %c30_i32_296 = arith.constant 30 : i32
    %c0_i32_297 = arith.constant 0 : i32
    %678 = tpu.memref_slice %arg3[%492, %c0_i32_297] : memref<512x256xf32, #tpu.memory_space<any>> -> memref<1x256xf32, #tpu.memory_space<any>>
    %679 = tpu.memref_squeeze %678 : memref<1x256xf32, #tpu.memory_space<any>> -> memref<256xf32, #tpu.memory_space<any>>
    %c0_i32_298 = arith.constant 0 : i32
    %680 = tpu.memref_slice %arg10[%c126_i32, %c0_i32_298] : memref<128x256xf32, #tpu.memory_space<vmem>> -> memref<1x256xf32, #tpu.memory_space<vmem>>
    %681 = tpu.memref_squeeze %680 : memref<1x256xf32, #tpu.memory_space<vmem>> -> memref<256xf32, #tpu.memory_space<vmem>>
    %682 = tpu.memref_slice %arg12[%c30_i32_296] : memref<32x!tpu.dma_semaphore, #tpu.memory_space<semaphore_mem>> -> memref<1x!tpu.dma_semaphore, #tpu.memory_space<semaphore_mem>>
    %683 = tpu.memref_squeeze %682 : memref<1x!tpu.dma_semaphore, #tpu.memory_space<semaphore_mem>> -> memref<!tpu.dma_semaphore, #tpu.memory_space<semaphore_mem>>
    tpu.wait_dma2 semaphore(%683 : memref<!tpu.dma_semaphore, #tpu.memory_space<semaphore_mem>>) src(%679 : memref<256xf32, #tpu.memory_space<any>>) dst(%681 : memref<256xf32, #tpu.memory_space<vmem>>)
    %c127_i32 = arith.constant 127 : i32
    %c31_i32_299 = arith.constant 31 : i32
    %c0_i32_300 = arith.constant 0 : i32
    %684 = tpu.memref_slice %arg3[%497, %c0_i32_300] : memref<512x256xf32, #tpu.memory_space<any>> -> memref<1x256xf32, #tpu.memory_space<any>>
    %685 = tpu.memref_squeeze %684 : memref<1x256xf32, #tpu.memory_space<any>> -> memref<256xf32, #tpu.memory_space<any>>
    %c0_i32_301 = arith.constant 0 : i32
    %686 = tpu.memref_slice %arg10[%c127_i32, %c0_i32_301] : memref<128x256xf32, #tpu.memory_space<vmem>> -> memref<1x256xf32, #tpu.memory_space<vmem>>
    %687 = tpu.memref_squeeze %686 : memref<1x256xf32, #tpu.memory_space<vmem>> -> memref<256xf32, #tpu.memory_space<vmem>>
    %688 = tpu.memref_slice %arg12[%c31_i32_299] : memref<32x!tpu.dma_semaphore, #tpu.memory_space<semaphore_mem>> -> memref<1x!tpu.dma_semaphore, #tpu.memory_space<semaphore_mem>>
    %689 = tpu.memref_squeeze %688 : memref<1x!tpu.dma_semaphore, #tpu.memory_space<semaphore_mem>> -> memref<!tpu.dma_semaphore, #tpu.memory_space<semaphore_mem>>
    tpu.wait_dma2 semaphore(%689 : memref<!tpu.dma_semaphore, #tpu.memory_space<semaphore_mem>>) src(%685 : memref<256xf32, #tpu.memory_space<any>>) dst(%687 : memref<256xf32, #tpu.memory_space<vmem>>)
    %c0_302 = arith.constant 0 : index
    %c0_303 = arith.constant 0 : index
    %690 = vector.load %arg10[%c0_302, %c0_303] : memref<128x256xf32, #tpu.memory_space<vmem>>, vector<128x256xf32>
    %c0_304 = arith.constant 0 : index
    %c0_305 = arith.constant 0 : index
    %691 = vector.load %arg11[%c0_304, %c0_305] : memref<128x256xf32, #tpu.memory_space<vmem>>, vector<128x256xf32>
    %692 = arith.addf %690, %691 : vector<128x256xf32>
    %cst = arith.constant dense<0.000000e+00> : vector<128xf32>
    %693 = vector.multi_reduction <add>, %692, %cst [1] : vector<128x256xf32> to vector<128xf32>
    %694 = vector.shape_cast %693 : vector<128xf32> to vector<128x1xf32>
    %cst_306 = arith.constant 2.560000e+02 : f32
    %695 = vector.broadcast %cst_306 : f32 to vector<128x1xf32>
    %696 = arith.divf %694, %695 : vector<128x1xf32>
    %697 = vector.broadcast %696 : vector<128x1xf32> to vector<128x256xf32>
    %698 = arith.subf %692, %697 : vector<128x256xf32>
    %699 = arith.mulf %698, %698 : vector<128x256xf32>
    %cst_307 = arith.constant dense<0.000000e+00> : vector<128xf32>
    %700 = vector.multi_reduction <add>, %699, %cst_307 [1] : vector<128x256xf32> to vector<128xf32>
    %701 = vector.shape_cast %700 : vector<128xf32> to vector<128x1xf32>
    %cst_308 = arith.constant 2.560000e+02 : f32
    %702 = vector.broadcast %cst_308 : f32 to vector<128x1xf32>
    %703 = arith.divf %701, %702 : vector<128x1xf32>
    %cst_309 = arith.constant 9.99999996E-13 : f32
    %704 = vector.broadcast %cst_309 : f32 to vector<128x1xf32>
    %705 = arith.addf %703, %704 : vector<128x1xf32>
    %706 = math.rsqrt %705 : vector<128x1xf32>
    %707 = vector.broadcast %706 : vector<128x1xf32> to vector<128x256xf32>
    %708 = arith.mulf %698, %707 : vector<128x256xf32>
    %c0_310 = arith.constant 0 : index
    %c0_311 = arith.constant 0 : index
    %709 = vector.load %arg6[%c0_310, %c0_311] : memref<1x256xf32, #tpu.memory_space<vmem>>, vector<1x256xf32>
    %710 = vector.broadcast %709 : vector<1x256xf32> to vector<128x256xf32>
    %711 = arith.mulf %708, %710 : vector<128x256xf32>
    %c0_312 = arith.constant 0 : index
    %c0_313 = arith.constant 0 : index
    %712 = vector.load %arg7[%c0_312, %c0_313] : memref<1x256xf32, #tpu.memory_space<vmem>>, vector<1x256xf32>
    %713 = vector.broadcast %712 : vector<1x256xf32> to vector<128x256xf32>
    %714 = arith.addf %711, %713 : vector<128x256xf32>
    %c0_314 = arith.constant 0 : index
    %c0_315 = arith.constant 0 : index
    %c0_316 = arith.constant 0 : index
    %715 = vector.load %arg9[%c0_314, %c0_315, %c0_316] : memref<1x128x256xf32, #tpu.memory_space<vmem>>, vector<1x128x256xf32>
    %716 = vector.shape_cast %715 : vector<1x128x256xf32> to vector<128x256xf32>
    %717 = vector.shape_cast %714 : vector<128x256xf32> to vector<1x128x256xf32>
    tpu.vector_store %arg9[%c0_314, %c0_315, %c0_316], %717 {strides = array<i32>} : memref<1x128x256xf32, #tpu.memory_space<vmem>>, vector<1x128x256xf32>,
    return
  }
  func.func @transform_1(%arg0: i32, %arg1: i32, %arg2: memref<2x128xi32, #tpu.memory_space<smem>>) -> (i32, i32) {
    %c0_i32 = arith.constant 0 : i32
    %c0_i32_0 = arith.constant 0 : i32
    %c0_i32_1 = arith.constant 0 : i32
    return %c0_i32, %c0_i32_0 : i32, i32
  }
  func.func @transform_2(%arg0: i32, %arg1: i32, %arg2: memref<2x128xi32, #tpu.memory_space<smem>>) -> (i32, i32) {
    %c0_i32 = arith.constant 0 : i32
    %c0_i32_0 = arith.constant 0 : i32
    return %arg1, %c0_i32 : i32, i32
  }
  func.func @transform_3(%arg0: i32, %arg1: i32, %arg2: memref<2x128xi32, #tpu.memory_space<smem>>) -> (i32, i32) {
    %c0_i32 = arith.constant 0 : i32
    %c0_i32_0 = arith.constant 0 : i32
    %c0_i32_1 = arith.constant 0 : i32
    return %c0_i32, %c0_i32_0 : i32, i32
  }
  func.func @transform_4(%arg0: i32, %arg1: i32, %arg2: memref<2x128xi32, #tpu.memory_space<smem>>) -> (i32, i32) {
    %c0_i32 = arith.constant 0 : i32
    %c0_i32_0 = arith.constant 0 : i32
    %c0_i32_1 = arith.constant 0 : i32
    return %c0_i32, %c0_i32_0 : i32, i32
  }
  func.func @transform_5(%arg0: i32, %arg1: i32, %arg2: memref<2x128xi32, #tpu.memory_space<smem>>) -> (i32, i32, i32) {
    %c0_i32 = arith.constant 0 : i32
    %c0_i32_0 = arith.constant 0 : i32
    return %arg0, %arg1, %c0_i32 : i32, i32, i32
  }
  func.func @transform_6(%arg0: i32, %arg1: i32, %arg2: memref<2x128xi32, #tpu.memory_space<smem>>) -> (i32, i32, i32) {
    %c0_i32 = arith.constant 0 : i32
    %c0_i32_0 = arith.constant 0 : i32
    return %arg0, %arg1, %c0_i32 : i32, i32, i32
  }
}

</mosaic_0001>

<bundles_post_ra>
// kernel: tpu_custom_call.1
= control target key start
LH: loop header
LB: loop body
LE: loop exit
PB: predicated region body
PF: predicated region fallthrough
CT: control target
= control target key end

     0   :  { %s6604_s0 = inlined_call_operand.vmem [shape: s32[2,128], index: 0, kind: input, shape index: {}]   ;;  %s6605_s1 = inlined_call_operand.hbm [shape: f32[512,256], index: 1, kind: input, shape index: {}]   ;;  %s6606_s2 = inlined_call_operand.hbm [shape: f32[8,256], index: 2, kind: input, shape index: {}]   ;;  %s6607_s3 = inlined_call_operand.vmem [shape: f32[128,256], index: 3, kind: input, shape index: {}]   ;;  %s6608_s4 = inlined_call_operand.vmem [shape: f32[1,256], index: 4, kind: input, shape index: {}]   ;;  %s6609_s5 = inlined_call_operand.vmem [shape: f32[1,256], index: 5, kind: input, shape index: {}]   ;;  %s6610_s6 = inlined_call_operand.vmem [shape: s32[2,128,1], index: 6, kind: input, shape index: {}]   ;;  %s6611_s7 = inlined_call_operand.hbm [shape: f32[2,128,256], index: 7, kind: output, shape index: {}]  }
   0x1   :  { %6642 = sst [smem:[#allocation110_spill]] %s6606_s2  ;;  %s12_s26 = sshll.u32 %s6604_s0, 4  ;;  %s13_s26 = int_to_ptr.vmem [resolvable:$true] %s12_s26 }
   0x2   :  { %6643 = sst [smem:[#allocation111_spill]] %s6607_s3  ;;  %s3536_s27 = scalar_lea.vmem %s13_s26, 32 }
   0x3   :  { %6644 = sst [smem:[#allocation112_spill]] %s6608_s4  ;;  %p3537_p0 = scmp.ne.s32.totalorder %s13_s26, %s3536_s27 }
   0x4   :  { %6645 = sst [smem:[#allocation113_spill]] %s6609_s5  ;;  %p3541_p1 = scmp.lt.s32.totalorder %s13_s26, %s13_s26 }
   0x5   :  { %6646 = sst [smem:[#allocation114_spill]] %s6610_s6  ;;  %p3542_p2 = scmp.lt.s32.totalorder %s3536_s27, %s3536_s27 }
   0x6   :  { %6647 = sst [smem:[#allocation115_spill]] %s6611_s7 }
   0x7   :  { %p3543_p3 = por %p3542_p2, %p3541_p1 }
   0x9   :  { %p3544_p4 = pnand %p3543_p3, %p3537_p0 }
   0xb   :  { %3547 = shalt.err (!%p3544_p4)  }
   0xc   :  { %s4710_s28 = smov [#allocation6]  }
   0xd   :  { %15 = dma.vmem_to_smem %s13_s26, 32, %s4710_s28, [#allocation5] }
   0xe   :  { %4592 = dma.done.wait [#allocation5], 32 }
   0xf   :  { %4593 = vsyncadd [#allocation5], 4294967264 }
  0x10   :  { %17 = sfence }
  0x11   :  { %18 = vsyncpa [#allocation8], 0 }
  0x12   :  { %19 = vsyncpa [#allocation9], 0 }
  0x13   :  { %21 = vsyncpa [#allocation9 + $0x1], 0  ;;  %s4795_s29 = smov 0   ;;  %s4797_s30 = smov 0  }
  0x14   :  { %s4799_s0 = smov 0   ;;  %s4801_s8 = smov 0  }
  0x15   :  { %s4803_s9 = smov 0   ;;  %s4805_s10 = smov 0  }
  0x16 LB: > { %6648 = sst [smem:[#allocation94_spill]] %s4684_s29  ;;  %s3161_s11 = sadd.s32 4294967295, %s4704_s10   ;;  %s4704_s10 = sphi %s4805_s10, %s27_s10   ;;  %s4700_s9 = sphi %s4803_s9, %s6700_s9   ;;  %s4696_s8 = sphi %s4801_s8, %s6699_s8   ;;  %s4692_s0 = sphi %s4799_s0, %s6698_s0   ;;  %s4688_s30 = sphi %s4797_s30, %s6697_s30   ;;  %s4684_s29 = sphi %s4795_s29, %s6696_s29  }
  0x17   : > { %6649 = sst [smem:[#allocation95_spill]] %s4688_s30  ;;  %s3162_s12 = sadd.s32 4294967294, %s4704_s10  }
  0x18   : > { %6650 = sst [smem:[#allocation96_spill]] %s4692_s0  ;;  %s39_s13 = sadd.s32 1, %s4700_s9 }
  0x19   : > { %6651 = sst [smem:[#allocation97_spill]] %s4700_s9  ;;  %s165_s14 = sadd.s32 1, %s4692_s0 }
  0x1a   : > { %6652 = sst [smem:[#allocation98_spill]] %s4704_s10  ;;  %p41_p5 = scmp.ge.s32.totalorder %s39_s13, 2 }
  0x1b   : > { %p175_p6 = scmp.ne.s32.totalorder %s4692_s0, %s4688_s30  ;;  %p176_p7 = scmp.eq.s32.totalorder %s3161_s11, 1 }
  0x1c   : > { %p181_p8 = scmp.ne.s32.totalorder %s4688_s30, %s4684_s29  ;;  %s6702_s13 = smov (%p41_p5, %s39_s13), 0 }
  0x1d   : > { %6653 = sst [smem:[#allocation99_spill]] %s6702_s13  ;;  %p4835_p9 = por %p176_p7, %p175_p6 }
  0x1e   : > { %p182_p10 = scmp.eq.s32.totalorder %s3162_s12, 1  ;;  %s160_s16 = ssub.s32 %s4700_s9, %s6702_s13 }
  0x1f   : > { %s6654_s15 = scalar_select %p4835_p9, 1, 0 }
  0x20   : > { %p3163_p11 = scmp.ge.s32.totalorder %s4704_s10, 1  ;;  %p163_p12 = scmp.eq.s32.totalorder %s160_s16, 0 }
  0x21   : > { %6655 = sst [smem:[#allocation100_spill]] %s6654_s15  ;;  %p4842_p13 = por %p182_p10, %p181_p8 }
  0x22   : > { %p189_p0 = scmp.lt.s32.totalorder %s4704_s10, 3  ;;  %p4854_p2 = scmp.eq.s32.totalorder %s3161_s11, 0 }
  0x23   : > { %s6656_s17 = scalar_select %p4842_p13, 1, 0 }
  0x24   : > { %s4848_s18 = scalar_select %p163_p12, %s4692_s0, %s165_s14  }
  0x25   : > { %6657 = sst [smem:[#allocation101_spill]] %s6656_s17  ;;  %p4850_p1 = pnand %p3163_p11, %p189_p0 }
  0x26   : > { %6658 = sst [smem:[#allocation102_spill]] %s4848_s18  ;;  %s4711_s21 = smov [#allocation7]  }
  0x27   : > { %s6659_s19 = scalar_select %p4850_p1, 1, 0 }
  0x28   : > { %s6660_s20 = scalar_select %p4854_p2, 1, 0 }
  0x29   : > { %p3394_p3 = pneg %p4850_p1  ;;  %s202_s22 = sshll.u32 %s4711_s21, 4  ;;  %s203_s22 = int_to_ptr.vmem [resolvable:$true] %s202_s22 }
  0x2a   : > { %s6662_s2 = sld [smem:[#allocation110_spill]] }
  0x2b   : > { %p4862_p4 = pnand %p4854_p2, %p3394_p3 }
  0x2d   : > { %p3550_p6 = pneg %p4862_p4 }
  0x30   : > { %s3548_s26 = scalar_lea.hbm %s6662_s2, 256 }
  0x31   : > { %p3549_p5 = scmp.ne.s32.totalorder %s6662_s2, %s3548_s26  ;;  %p3555_p10 = scmp.lt.u32.totalorder %s3548_s26, %s6662_s2 }
  0x33   : > { %p3551_p7 = pnand %p3550_p6, %p3549_p5 }
  0x35   : > { %p3552_p8 = pneg %p3551_p7 }
  0x37   : > { %p3557_p11 = pnand %p3555_p10, %p3552_p8 }
  0x39   : > { %3560 = shalt.err (!%p3557_p11)
}
  0x3a   : > { %s3561_s14 = scalar_lea.vmem %s203_s22, 256  ;;  %p3569_p13 = scmp.lt.s32.totalorder %s203_s22, %s203_s22 }
  0x3b   : > { %p3562_p12 = scmp.ne.s32.totalorder %s203_s22, %s3561_s14  ;;  %p3570_p9 = scmp.lt.s32.totalorder %s3561_s14, %s3561_s14 }
  0x3d   : > { %p3564_p0 = pnand %p3562_p12, %p3550_p6  ;;  %p3571_p2 = por %p3570_p9, %p3569_p13 }
  0x3f   : > { %p3565_p3 = pneg %p3564_p0 }
  0x41   : > { %p3572_p1 = pnand %p3571_p2, %p3565_p3 }
  0x43   : > { %3575 = shalt.err (!%p3572_p1)
}
  0x44   : > { %3397 = dma.hbm_to_vmem [thread:$0]  (!%p4862_p4), %s6662_s2, 256, %s203_s22, [#allocation8]  }
  0x45   : > { %p6663_p5 = scmp.ne.s32.totalorder %s6659_s19, 0 }
  0x47   : > { %244 = sbr.rel (%p6663_p5) target bundleno = 1701 (0x6a5), region = 40 }
  0x4e   : > { %p6664_p7 = scmp.ne.s32.totalorder %s6660_s20, 0 }
  0x50   : > { %4595 = dma.done.wait (%p6664_p7), [#allocation8], 256  }
  0x51   : > { %4597 = vsyncadd (%p6664_p7), [#allocation8], 4294967040  ;;  %p290_p9 = scmp.lt.s32.totalorder %s4696_s8, 1  ;;  %v4712_v0 = vmov 0   ;;  %s4892_s23 = sshll.u32 %s4696_s8, 7 }
  0x52   : > { %3503 = vset.pattern.permute.xlu1 %v4712_v0  ;;  %3502 = vset.pattern.permute.xlu0 %v4712_v0  ;;  %s6665_s6 = sld [smem:[#allocation114_spill]]  ;;  %s327_s27 = sadd.s32 1, %s4892_s23 }
  0x53   : > { %s291_s19 = scalar_select %p290_p9, %s4696_s8, 1 }
  0x54   : > { %s4901_s20 = sld [smem:[#allocation6 + %s4892_s23]]  ;;  %s349_s28 = sadd.s32 2, %s4892_s23 }
  0x55   : > { %s3386_s22 = sshll.u32 %s291_s19, 7  ;;  %s371_s11 = sadd.s32 3, %s4892_s23 }
  0x56   : > { %s4919_s14 = sld [smem:[#allocation6 + %s327_s27]]  ;;  %s6616_s24 = sand.u32 1, %s4688_s30  }
  0x57   : > { %s4922_s21 = sld [smem:[#allocation6 + %s349_s28]]  ;;  %s4934_s27 = sshll.u32 %s6616_s24, 8 }
  0x58   : > { %s4898_s26 = scalar_lea.vmem %s6665_s6, %s3386_s22  ;;  %s4926_s19 = sld [smem:[#allocation6 + %s371_s11]] }
  0x59   : > { %v1004_v1 = vld [vmem:[%s4898_s26 + $0x10] sm:$0xff]  ;;  %v1002_v2 = vld [vmem:[%s4898_s26] sm:$0xff]  ;;  %v1005_v3 = vld [vmem:[%s4898_s26 + $0x18] sm:$0xff] }
  0x5a   : > { %vm1023_vm0 = vcmp.eq.s32.totalorder %v1004_v1, 1  ;;  %vm1021_vm1 = vcmp.eq.s32.totalorder %v1002_v2, 1  ;;  %vm1024_vm2 = vcmp.eq.s32.totalorder %v1005_v3, 1  ;;  %v1003_v4 = vld [vmem:[%s4898_s26 + $0x8] sm:$0xff]  ;;  %v1006_v8 = vld [vmem:[%s4898_s26 + $0x20] sm:$0xff]  ;;  %v1009_v11 = vld [vmem:[%s4898_s26 + $0x38] sm:$0xff] }
  0x5b   : > { %v1039_v5 = vsel %vm1023_vm0, 1, %v4712_v0  ;;  %v1037_v6 = vsel %vm1021_vm1, 1, %v4712_v0  ;;  %vm1022_vm3 = vcmp.eq.s32.totalorder %v1003_v4, 1  ;;  %v1007_v7 = vld [vmem:[%s4898_s26 + $0x28] sm:$0xff]  ;;  %v1040_v9 = vsel %vm1024_vm2, 1, %v4712_v0  ;;  %v1008_v12 = vld [vmem:[%s4898_s26 + $0x30] sm:$0xff] }
  0x5c   : > { %1060 = vperm.xlu1 %3503, %v1039_v5   ;;  %1054 = vperm.xlu0 %3502, %v1037_v6   ;;  %v1038_v10 = vsel %vm1022_vm3, 1, %v4712_v0  ;;  %vm1026_vm4 = vcmp.eq.s32.totalorder %v1007_v7, 1  ;;  %vm1025_vm5 = vcmp.eq.s32.totalorder %v1006_v8, 1  ;;  %s309_s12 = sshrl.u32 %s4901_s20, 3  ;;  %s310_s16 = sand.u32 7, %s4901_s20   ;;  %vm1028_vm6 = vcmp.eq.s32.totalorder %v1009_v11, 1 }
  0x5d   : > { %v1042_v13 = vsel %vm1026_vm4, 1, %v4712_v0  ;;  %v1041_v14 = vsel %vm1025_vm5, 1, %v4712_v0  ;;  %vm1027_vm7 = vcmp.eq.s32.totalorder %v1008_v12, 1  ;;  %s3173_s25 = sshll.u32 %s309_s12, 4  ;;  %v1011_v15 = vld [vmem:[%s4898_s26 + $0x48] sm:$0xff]  ;;  %v1010_v16 = vld [vmem:[%s4898_s26 + $0x40] sm:$0xff] }
  0x5e   : > { %s312_s20 = sadd.s32 %s3173_s25, %s310_s16  ;;  %v1044_v17 = vsel %vm1028_vm6, 1, %v4712_v0  ;;  %v1043_v18 = vsel %vm1027_vm7, 1, %v4712_v0  ;;  %vm1030_vm8 = vcmp.eq.s32.totalorder %v1011_v15, 1  ;;  %vm1029_vm9 = vcmp.eq.s32.totalorder %v1010_v16, 1  ;;  %s4713_s12 = smov [#allocation2]   ;;  %v1013_v19 = vld [vmem:[%s4898_s26 + $0x58] sm:$0xff] }
  0x5f   : > { %s3174_s28 = sshll.u32 %s312_s20, 4  ;;  %s316_s16 = sshll.u32 %s4713_s12, 4  ;;  %v1012_v20 = vld [vmem:[%s4898_s26 + $0x50] sm:$0xff]  ;;  %s4945_s16 = int_to_ptr.vmem [resolvable:$true] %s316_s16 }
  0x60   : > { %1063 = vperm.xlu1 %3503, %v1040_v9   ;;  %1057 = vperm.xlu0 %3502, %v1038_v10   ;;  %s4941_s2 = scalar_lea.hbm %s6605_s1, %s3174_s28  ;;  %s4952_s28 = scalar_lea.hbm %s6605_s1, 16384 }
  0x61   : > { %s3576_s25 = scalar_lea.hbm %s4941_s2, 32  ;;  %p3579_p1 = scmp.lt.u32.totalorder %s4941_s2, %s6605_s1 }
  0x62   : > { %p3577_p13 = scmp.ne.s32.totalorder %s4941_s2, %s3576_s25  ;;  %p3580_p2 = scmp.lt.u32.totalorder %s4952_s28, %s3576_s25 }
  0x63   : > { %p3582_p6 = scmp.lt.u32.totalorder %s3576_s25, %s4941_s2 }
  0x64   : > { %1069 = vperm.xlu1 %3503, %v1042_v13   ;;  %1066 = vperm.xlu0 %3502, %v1041_v14   ;;  %p3581_p4 = por %p3580_p2, %p3579_p1 }
  0x66   : > { %p3583_p8 = por %p3582_p6, %p3581_p4 }
  0x68   : > { %1075 = vperm.xlu1 %3503, %v1044_v17   ;;  %1072 = vperm.xlu0 %3502, %v1043_v18   ;;  %p3584_p10 = pnand %p3583_p8, %p3577_p13 }
  0x6a   : > { %3587 = shalt.err (!%p3584_p10)  }
  0x6b   : > { %s3588_s12 = scalar_lea.vmem %s4945_s16, 32  ;;  %s4963_s20 = scalar_lea.vmem %s4945_s16, 4096 }
  0x6c   : > { %p3589_p11 = scmp.ne.s32.totalorder %s4945_s16, %s3588_s12  ;;  %p3593_p12 = scmp.lt.s32.totalorder %s4945_s16, %s4945_s16 }
  0x6d   : > { %p3594_p0 = scmp.lt.s32.totalorder %s4963_s20, %s3588_s12 }
  0x6f   : > { %p3595_p3 = por %p3594_p0, %p3593_p12 }
  0x71   : > { %p3596_p5 = pnand %p3595_p3, %p3589_p11 }
  0x73   : > { %3599 = shalt.err (!%p3596_p5)  }
  0x74   : > { %s6619_s24 = smov 128   ;;  %s6621_s25 = smov 1   ;;  %v1046_v21 = vsel %vm1030_vm8, 1, %v4712_v0  ;;  %v1045_v22 = vsel %vm1029_vm9, 1, %v4712_v0  ;;  %vm1032_vm10 = vcmp.eq.s32.totalorder %v1013_v19, 1  ;;  %vm1031_vm11 = vcmp.eq.s32.totalorder %v1012_v20, 1 }
  0x75   : > { %319 = dma.hbm_to_vmem [thread:$0]  %s4941_s2, 32, %s4945_s16, [#allocation4], %s6619_s24, %s6619_s24, %s6621_s25  ;;  %1081 = vperm.xlu1 %3503, %v1046_v21   ;;  %1078 = vperm.xlu0 %3502, %v1045_v22   ;;  %v1048_v25 = vsel %vm1032_vm10, 1, %v4712_v0  ;;  %v1047_v26 = vsel %vm1031_vm11, 1, %v4712_v0 }
  0x76   : > { %s329_s22 = sshrl.u32 %s4919_s14, 3  ;;  %s330_s11 = sand.u32 7, %s4919_s14   ;;  %v1015_v23 = vld [vmem:[%s4898_s26 + $0x68] sm:$0xff]  ;;  %v1014_v24 = vld [vmem:[%s4898_s26 + $0x60] sm:$0xff] }
  0x77   : > { %s3176_s12 = sshll.u32 %s329_s22, 4  ;;  %s4716_s13 = smov [#allocation2 + $0x1]   ;;  %vm1034_vm12 = vcmp.eq.s32.totalorder %v1015_v23, 1  ;;  %vm1033_vm13 = vcmp.eq.s32.totalorder %v1014_v24, 1 }
  0x78   : > { %s332_s6 = sadd.s32 %s3176_s12, %s330_s11  ;;  %s338_s9 = sshll.u32 %s4716_s13, 4  ;;  %s339_s9 = int_to_ptr.vmem [resolvable:$true] %s338_s9 }
  0x79   : > { %s3177_s2 = sshll.u32 %s332_s6, 4  ;;  %s351_s18 = sshrl.u32 %s4922_s21, 3 }
  0x7a   : > { %s334_s25 = scalar_lea.hbm %s6605_s1, %s3177_s2 }
  0x7b   : > { %s3600_s22 = scalar_lea.hbm %s334_s25, 32  ;;  %p3603_p9 = scmp.lt.u32.totalorder %s334_s25, %s6605_s1 }
  0x7c   : > { %p3601_p7 = scmp.ne.s32.totalorder %s334_s25, %s3600_s22  ;;  %p3604_p13 = scmp.lt.u32.totalorder %s4952_s28, %s3600_s22 }
  0x7d   : > { %p3606_p2 = scmp.lt.u32.totalorder %s3600_s22, %s334_s25 }
  0x7e   : > { %p3605_p1 = por %p3604_p13, %p3603_p9 }
  0x80   : > { %p3607_p4 = por %p3606_p2, %p3605_p1 }
  0x82   : > { %p3608_p6 = pnand %p3607_p4, %p3601_p7 }
  0x84   : > { %3611 = shalt.err (!%p3608_p6)  }
  0x85   : > { %s3612_s6 = scalar_lea.vmem %s339_s9, 32  ;;  %p3617_p10 = scmp.lt.s32.totalorder %s339_s9, %s4945_s16 }
  0x86   : > { %p3613_p8 = scmp.ne.s32.totalorder %s339_s9, %s3612_s6  ;;  %p3618_p11 = scmp.lt.s32.totalorder %s4963_s20, %s3612_s6 }
  0x88   : > { %p3619_p12 = por %p3618_p11, %p3617_p10 }
  0x8a   : > { %p3620_p0 = pnand %p3619_p12, %p3613_p8 }
  0x8c   : > { %3623 = shalt.err (!%p3620_p0)  }
  0x8d   : > { %s6666_s13 = smov 1   ;;  %s6667_s24 = smov 128   ;;  %v1017_v27 = vld [vmem:[%s4898_s26 + $0x78] sm:$0xff]  ;;  %v1016_v28 = vld [vmem:[%s4898_s26 + $0x70] sm:$0xff]  ;;  %1087 = vperm.xlu1 %3503, %v1048_v25   ;;  %1084 = vperm.xlu0 %3502, %v1047_v26   ;;  %v1050_v29 = vsel %vm1034_vm12, 1, %v4712_v0  ;;  %v1049_v30 = vsel %vm1033_vm13, 1, %v4712_v0 }
  0x8e   : > { %341 = dma.hbm_to_vmem [thread:$0]  %s334_s25, 32, %s339_s9, [#allocation4 + $0x1], %s6667_s24, %s6667_s24, %s6666_s13  ;;  %vm1036_vm14 = vcmp.eq.s32.totalorder %v1017_v27, 1  ;;  %vm1035_vm15 = vcmp.eq.s32.totalorder %v1016_v28, 1 }
  0x8f   : > { %s352_s2 = sand.u32 7, %s4922_s21   ;;  %s3179_s14 = sshll.u32 %s351_s18, 4 }
  0x90   : > { %s354_s22 = sadd.s32 %s3179_s14, %s352_s2  ;;  %s4717_s12 = smov [#allocation2 + $0x2]  }
  0x91   : > { %s3180_s11 = sshll.u32 %s354_s22, 4  ;;  %s360_s6 = sshll.u32 %s4717_s12, 4  ;;  %s361_s6 = int_to_ptr.vmem [resolvable:$true] %s360_s6 }
  0x92   : > { %s356_s26 = scalar_lea.hbm %s6605_s1, %s3180_s11 }
  0x93   : > { %s3624_s18 = scalar_lea.hbm %s356_s26, 32  ;;  %p3627_p5 = scmp.lt.u32.totalorder %s356_s26, %s6605_s1 }
  0x94   : > { %p3625_p3 = scmp.ne.s32.totalorder %s356_s26, %s3624_s18  ;;  %p3628_p7 = scmp.lt.u32.totalorder %s4952_s28, %s3624_s18 }
  0x95   : > { %p3630_p13 = scmp.lt.u32.totalorder %s3624_s18, %s356_s26 }
  0x96   : > { %p3629_p9 = por %p3628_p7, %p3627_p5 }
  0x98   : > { %p3631_p1 = por %p3630_p13, %p3629_p9 }
  0x9a   : > { %p3632_p2 = pnand %p3631_p1, %p3625_p3 }
  0x9c   : > { %3635 = shalt.err (!%p3632_p2)  }
  0x9d   : > { %s3636_s14 = scalar_lea.vmem %s361_s6, 32  ;;  %p3641_p6 = scmp.lt.s32.totalorder %s361_s6, %s4945_s16 }
  0x9e   : > { %p3637_p4 = scmp.ne.s32.totalorder %s361_s6, %s3636_s14  ;;  %p3642_p8 = scmp.lt.s32.totalorder %s4963_s20, %s3636_s14 }
  0xa0   : > { %p3643_p10 = por %p3642_p8, %p3641_p6 }
  0xa2   : > { %p3644_p11 = pnand %p3643_p10, %p3637_p4 }
  0xa4   : > { %3647 = shalt.err (!%p3644_p11)  }
  0xa5   : > { %363 = dma.hbm_to_vmem [thread:$0]  %s356_s26, 32, %s361_s6, [#allocation4 + $0x2], %s6667_s24, %s6667_s24, %s6666_s13  ;;  %1093 = vperm.xlu1 %3503, %v1050_v29   ;;  %1090 = vperm.xlu0 %3502, %v1049_v30   ;;  %v1052_v31 = vsel %vm1036_vm14, 1, %v4712_v0  ;;  %v1051_v32 = vsel %vm1035_vm15, 1, %v4712_v0 }
  0xa6   : > { %s373_s22 = sshrl.u32 %s4926_s19, 3  ;;  %s374_s11 = sand.u32 7, %s4926_s19  }
  0xa7   : > { %s3182_s12 = sshll.u32 %s373_s22, 4  ;;  %s4718_s25 = smov [#allocation2 + $0x3]  }
  0xa8   : > { %s376_s9 = sadd.s32 %s3182_s12, %s374_s11  ;;  %s382_s18 = sshll.u32 %s4718_s25, 4  ;;  %s383_s18 = int_to_ptr.vmem [resolvable:$true] %s382_s18 }
  0xa9   : > { %s3183_s21 = sshll.u32 %s376_s9, 4  ;;  %1099 = vperm.xlu1 %3503, %v1052_v31   ;;  %1096 = vperm.xlu0 %3502, %v1051_v32   ;;  %s6668_s19 = sadd.s32 4, %s4892_s23 }
  0xaa   : > { %s378_s2 = scalar_lea.hbm %s6605_s1, %s3183_s21  ;;  %s5026_s14 = sld [smem:[#allocation6 + %s6668_s19]] }
  0xab   : > { %s3648_s0 = scalar_lea.hbm %s378_s2, 32  ;;  %p3651_p0 = scmp.lt.u32.totalorder %s378_s2, %s6605_s1 }
  0xac   : > { %p3649_p12 = scmp.ne.s32.totalorder %s378_s2, %s3648_s0  ;;  %p3652_p3 = scmp.lt.u32.totalorder %s4952_s28, %s3648_s0 }
  0xad   : > { %p3654_p7 = scmp.lt.u32.totalorder %s3648_s0, %s378_s2 }
  0xae   : > { %p3653_p5 = por %p3652_p3, %p3651_p0 }
  0xb0   : > { %p3655_p9 = por %p3654_p7, %p3653_p5 }
  0xb2   : > { %p3656_p13 = pnand %p3655_p9, %p3649_p12 }
  0xb4   : > { %3659 = shalt.err (!%p3656_p13)  }
  0xb5   : > { %s3660_s22 = scalar_lea.vmem %s383_s18, 32  ;;  %p3665_p2 = scmp.lt.s32.totalorder %s383_s18, %s4945_s16 }
  0xb6   : > { %p3661_p1 = scmp.ne.s32.totalorder %s383_s18, %s3660_s22  ;;  %p3666_p4 = scmp.lt.s32.totalorder %s4963_s20, %s3660_s22 }
  0xb8   : > { %p3667_p6 = por %p3666_p4, %p3665_p2 }
  0xba   : > { %p3668_p8 = pnand %p3667_p6, %p3661_p1 }
  0xbc   : > { %3671 = shalt.err (!%p3668_p8)  }
  0xbd   : > { %385 = dma.hbm_to_vmem [thread:$0]  %s378_s2, 32, %s383_s18, [#allocation4 + $0x3], %s6667_s24, %s6667_s24, %s6666_s13 }
  0xbe   : > { %s415_s29 = sadd.s32 5, %s4892_s23  ;;  %s4719_s0 = smov [#allocation2 + $0x4]  }
  0xbf   : > { %s404_s17 = sshll.u32 %s4719_s0, 4  ;;  %s5038_s11 = sld [smem:[#allocation6 + %s415_s29]]  ;;  %s5040_s17 = int_to_ptr.vmem [resolvable:$true] %s404_s17 }
  0xc0   : > { %s4720_s12 = smov [#allocation2 + $0x5]   ;;  %s437_s25 = sadd.s32 6, %s4892_s23 }
  0xc1   : > { %s426_s9 = sshll.u32 %s4720_s12, 4  ;;  %s395_s21 = sshrl.u32 %s5026_s14, 3  ;;  %s5045_s9 = int_to_ptr.vmem [resolvable:$true] %s426_s9 }
  0xc2   : > { %s396_s6 = sand.u32 7, %s5026_s14   ;;  %s3185_s26 = sshll.u32 %s395_s21, 4 }
  0xc3   : > { %s398_s19 = sadd.s32 %s3185_s26, %s396_s6  ;;  %s5047_s18 = sld [smem:[#allocation6 + %s437_s25]] }
  0xc4   : > { %s3186_s2 = sshll.u32 %s398_s19, 4 }
  0xc5   : > { %s417_s22 = sshrl.u32 %s5038_s11, 3  ;;  %s400_s10 = scalar_lea.hbm %s6605_s1, %s3186_s2 }
  0xc6   : > { %s418_s7 = sand.u32 7, %s5038_s11   ;;  %s3672_s15 = scalar_lea.hbm %s400_s10, 32 }
  0xc7   : > { %p3673_p10 = scmp.ne.s32.totalorder %s400_s10, %s3672_s15  ;;  %p3675_p11 = scmp.lt.u32.totalorder %s400_s10, %s6605_s1 }
  0xc8   : > { %p3676_p12 = scmp.lt.u32.totalorder %s4952_s28, %s3672_s15  ;;  %p3678_p3 = scmp.lt.u32.totalorder %s3672_s15, %s400_s10 }
  0xca   : > { %p3677_p0 = por %p3676_p12, %p3675_p11 }
  0xcc   : > { %p3679_p5 = por %p3678_p3, %p3677_p0 }
  0xce   : > { %p3680_p7 = pnand %p3679_p5, %p3673_p10 }
  0xd0   : > { %3683 = shalt.err (!%p3680_p7)  }
  0xd1   : > { %s3684_s14 = scalar_lea.vmem %s5040_s17, 32  ;;  %p3689_p13 = scmp.lt.s32.totalorder %s5040_s17, %s4945_s16 }
  0xd2   : > { %p3685_p9 = scmp.ne.s32.totalorder %s5040_s17, %s3684_s14  ;;  %p3690_p1 = scmp.lt.s32.totalorder %s4963_s20, %s3684_s14 }
  0xd4   : > { %p3691_p2 = por %p3690_p1, %p3689_p13 }
  0xd6   : > { %p3692_p4 = pnand %p3691_p2, %p3685_p9 }
  0xd8   : > { %3695 = shalt.err (!%p3692_p4)  }
  0xd9   : > { %407 = dma.hbm_to_vmem [thread:$0]  %s400_s10, 32, %s5040_s17, [#allocation4 + $0x4], %s6667_s24, %s6667_s24, %s6666_s13 }
  0xda   : > { %s3188_s30 = sshll.u32 %s417_s22, 4  ;;  %s4721_s11 = smov [#allocation2 + $0x6]  }
  0xdb   : > { %s420_s15 = sadd.s32 %s3188_s30, %s418_s7  ;;  %s448_s25 = sshll.u32 %s4721_s11, 4  ;;  %s449_s25 = int_to_ptr.vmem [resolvable:$true] %s448_s25 }
  0xdc   : > { %s3189_s21 = sshll.u32 %s420_s15, 4  ;;  %s439_s6 = sshrl.u32 %s5047_s18, 3 }
  0xdd   : > { %s422_s2 = scalar_lea.hbm %s6605_s1, %s3189_s21  ;;  %s440_s29 = sand.u32 7, %s5047_s18  }
  0xde   : > { %s3696_s0 = scalar_lea.hbm %s422_s2, 32  ;;  %p3699_p8 = scmp.lt.u32.totalorder %s422_s2, %s6605_s1 }
  0xdf   : > { %p3697_p6 = scmp.ne.s32.totalorder %s422_s2, %s3696_s0  ;;  %p3700_p10 = scmp.lt.u32.totalorder %s4952_s28, %s3696_s0 }
  0xe0   : > { %p3702_p12 = scmp.lt.u32.totalorder %s3696_s0, %s422_s2 }
  0xe1   : > { %p3701_p11 = por %p3700_p10, %p3699_p8 }
  0xe3   : > { %p3703_p0 = por %p3702_p12, %p3701_p11 }
  0xe5   : > { %p3704_p3 = pnand %p3703_p0, %p3697_p6 }
  0xe7   : > { %3707 = shalt.err (!%p3704_p3)  }
  0xe8   : > { %s3708_s7 = scalar_lea.vmem %s5045_s9, 32  ;;  %p3713_p7 = scmp.lt.s32.totalorder %s5045_s9, %s4945_s16 }
  0xe9   : > { %p3709_p5 = scmp.ne.s32.totalorder %s5045_s9, %s3708_s7  ;;  %p3714_p9 = scmp.lt.s32.totalorder %s4963_s20, %s3708_s7 }
  0xeb   : > { %p3715_p13 = por %p3714_p9, %p3713_p7 }
  0xed   : > { %p3716_p1 = pnand %p3715_p13, %p3709_p5 }
  0xef   : > { %3719 = shalt.err (!%p3716_p1)  }
  0xf0   : > { %429 = dma.hbm_to_vmem [thread:$0]  %s422_s2, 32, %s5045_s9, [#allocation4 + $0x5], %s6667_s24, %s6667_s24, %s6666_s13 }
  0xf1   : > { %s3191_s10 = sshll.u32 %s439_s6, 4  ;;  %s459_s18 = sadd.s32 7, %s4892_s23 }
  0xf2   : > { %s442_s17 = sadd.s32 %s3191_s10, %s440_s29  ;;  %s5086_s30 = sld [smem:[#allocation6 + %s459_s18]] }
  0xf3   : > { %s3192_s22 = sshll.u32 %s442_s17, 4 }
  0xf4   : > { %s444_s21 = scalar_lea.hbm %s6605_s1, %s3192_s22 }
  0xf5   : > { %s3720_s26 = scalar_lea.hbm %s444_s21, 32  ;;  %p3723_p4 = scmp.lt.u32.totalorder %s444_s21, %s6605_s1 }
  0xf6   : > { %p3721_p2 = scmp.ne.s32.totalorder %s444_s21, %s3720_s26  ;;  %p3724_p6 = scmp.lt.u32.totalorder %s4952_s28, %s3720_s26 }
  0xf7   : > { %p3726_p10 = scmp.lt.u32.totalorder %s3720_s26, %s444_s21 }
  0xf8   : > { %p3725_p8 = por %p3724_p6, %p3723_p4 }
  0xfa   : > { %p3727_p11 = por %p3726_p10, %p3725_p8 }
  0xfc   : > { %p3728_p12 = pnand %p3727_p11, %p3721_p2 }
  0xfe   : > { %3731 = shalt.err (!%p3728_p12)  }
  0xff   : > { %s3732_s9 = scalar_lea.vmem %s449_s25, 32  ;;  %p3737_p3 = scmp.lt.s32.totalorder %s449_s25, %s4945_s16 }
 0x100   : > { %p3733_p0 = scmp.ne.s32.totalorder %s449_s25, %s3732_s9  ;;  %p3738_p5 = scmp.lt.s32.totalorder %s4963_s20, %s3732_s9 }
 0x102   : > { %p3739_p7 = por %p3738_p5, %p3737_p3 }
 0x104   : > { %p3740_p9 = pnand %p3739_p7, %p3733_p0 }
 0x106   : > { %3743 = shalt.err (!%p3740_p9)  }
 0x107   : > { %451 = dma.hbm_to_vmem [thread:$0]  %s444_s21, 32, %s449_s25, [#allocation4 + $0x6], %s6667_s24, %s6667_s24, %s6666_s13 }
 0x108   : > { %s4722_s6 = smov [#allocation2 + $0x7]   ;;  %s481_s29 = sadd.s32 8, %s4892_s23 }
 0x109   : > { %s470_s2 = sshll.u32 %s4722_s6, 4  ;;  %s5103_s12 = sld [smem:[#allocation6 + %s481_s29]]  ;;  %s5101_s2 = int_to_ptr.vmem [resolvable:$true] %s470_s2 }
 0x10a   : > { %s503_s14 = sadd.s32 9, %s4892_s23  ;;  %s461_s7 = sshrl.u32 %s5086_s30, 3 }
 0x10b   : > { %s462_s10 = sand.u32 7, %s5086_s30   ;;  %s3194_s17 = sshll.u32 %s461_s7, 4 }
 0x10c   : > { %s4723_s18 = smov [#allocation2 + $0x10]   ;;  %s464_s15 = sadd.s32 %s3194_s17, %s462_s10 }
 0x10d   : > { %s492_s22 = sshll.u32 %s4723_s18, 4  ;;  %s3195_s11 = sshll.u32 %s464_s15, 4  ;;  %s5108_s22 = int_to_ptr.vmem [resolvable:$true] %s492_s22 }
 0x10e   : > { %s5110_s25 = sld [smem:[#allocation6 + %s503_s14]]  ;;  %s466_s19 = scalar_lea.hbm %s6605_s1, %s3195_s11 }
 0x10f   : > { %s483_s0 = sshrl.u32 %s5103_s12, 3  ;;  %s3744_s9 = scalar_lea.hbm %s466_s19, 32 }
 0x110   : > { %p3745_p13 = scmp.ne.s32.totalorder %s466_s19, %s3744_s9  ;;  %p3747_p1 = scmp.lt.u32.totalorder %s466_s19, %s6605_s1 }
 0x111   : > { %p3748_p2 = scmp.lt.u32.totalorder %s4952_s28, %s3744_s9  ;;  %p3750_p6 = scmp.lt.u32.totalorder %s3744_s9, %s466_s19 }
 0x113   : > { %p3749_p4 = por %p3748_p2, %p3747_p1 }
 0x115   : > { %p3751_p8 = por %p3750_p6, %p3749_p4 }
 0x117   : > { %p3752_p10 = pnand %p3751_p8, %p3745_p13 }
 0x119   : > { %3755 = shalt.err (!%p3752_p10)  }
 0x11a   : > { %s3756_s30 = scalar_lea.vmem %s5101_s2, 32  ;;  %p3761_p12 = scmp.lt.s32.totalorder %s5101_s2, %s4945_s16 }
 0x11b   : > { %p3757_p11 = scmp.ne.s32.totalorder %s5101_s2, %s3756_s30  ;;  %p3762_p0 = scmp.lt.s32.totalorder %s4963_s20, %s3756_s30 }
 0x11d   : > { %p3763_p3 = por %p3762_p0, %p3761_p12 }
 0x11f   : > { %p3764_p5 = pnand %p3763_p3, %p3757_p11 }
 0x121   : > { %3767 = shalt.err (!%p3764_p5)  }
 0x122   : > { %473 = dma.hbm_to_vmem [thread:$0]  %s466_s19, 32, %s5101_s2, [#allocation4 + $0x7], %s6667_s24, %s6667_s24, %s6666_s13 }
 0x123   : > { %s484_s14 = sand.u32 7, %s5103_s12   ;;  %s3197_s7 = sshll.u32 %s483_s0, 4 }
 0x124   : > { %s486_s10 = sadd.s32 %s3197_s7, %s484_s14  ;;  %s4724_s18 = smov [#allocation2 + $0x11]  }
 0x125   : > { %s3198_s17 = sshll.u32 %s486_s10, 4  ;;  %s514_s15 = sshll.u32 %s4724_s18, 4  ;;  %s515_s15 = int_to_ptr.vmem [resolvable:$true] %s514_s15 }
 0x126   : > { %s488_s26 = scalar_lea.hbm %s6605_s1, %s3198_s17  ;;  %s505_s9 = sshrl.u32 %s5110_s25, 3 }
 0x127   : > { %s3768_s6 = scalar_lea.hbm %s488_s26, 32  ;;  %p3771_p9 = scmp.lt.u32.totalorder %s488_s26, %s6605_s1 }
 0x128   : > { %p3769_p7 = scmp.ne.s32.totalorder %s488_s26, %s3768_s6  ;;  %p3772_p13 = scmp.lt.u32.totalorder %s4952_s28, %s3768_s6 }
 0x129   : > { %p3774_p2 = scmp.lt.u32.totalorder %s3768_s6, %s488_s26 }
 0x12a   : > { %p3773_p1 = por %p3772_p13, %p3771_p9 }
 0x12c   : > { %p3775_p4 = por %p3774_p2, %p3773_p1 }
 0x12e   : > { %p3776_p6 = pnand %p3775_p4, %p3769_p7 }
 0x130   : > { %3779 = shalt.err (!%p3776_p6)  }
 0x131   : > { %s3780_s2 = scalar_lea.vmem %s5108_s22, 32  ;;  %p3785_p10 = scmp.lt.s32.totalorder %s5108_s22, %s4945_s16 }
 0x132   : > { %p3781_p8 = scmp.ne.s32.totalorder %s5108_s22, %s3780_s2  ;;  %p3786_p11 = scmp.lt.s32.totalorder %s4963_s20, %s3780_s2 }
 0x134   : > { %p3787_p12 = por %p3786_p11, %p3785_p10 }
 0x136   : > { %p3788_p0 = pnand %p3787_p12, %p3781_p8 }
 0x138   : > { %3791 = shalt.err (!%p3788_p0)  }
 0x139   : > { %495 = dma.hbm_to_vmem [thread:$0]  %s488_s26, 32, %s5108_s22, [#allocation4 + $0x8], %s6667_s24, %s6667_s24, %s6666_s13 }
 0x13a   : > { %s506_s12 = sand.u32 7, %s5110_s25   ;;  %s3200_s19 = sshll.u32 %s505_s9, 4 }
 0x13b   : > { %s508_s0 = sadd.s32 %s3200_s19, %s506_s12  ;;  %s525_s7 = sadd.s32 10, %s4892_s23 }
 0x13c   : > { %s3201_s14 = sshll.u32 %s508_s0, 4  ;;  %s5152_s11 = sld [smem:[#allocation6 + %s525_s7]] }
 0x13d   : > { %s510_s18 = scalar_lea.hbm %s6605_s1, %s3201_s14 }
 0x13e   : > { %s3792_s21 = scalar_lea.hbm %s510_s18, 32  ;;  %p3795_p5 = scmp.lt.u32.totalorder %s510_s18, %s6605_s1 }
 0x13f   : > { %p3793_p3 = scmp.ne.s32.totalorder %s510_s18, %s3792_s21  ;;  %p3796_p7 = scmp.lt.u32.totalorder %s4952_s28, %s3792_s21 }
 0x140   : > { %p3798_p13 = scmp.lt.u32.totalorder %s3792_s21, %s510_s18 }
 0x141   : > { %p3797_p9 = por %p3796_p7, %p3795_p5 }
 0x143   : > { %p3799_p1 = por %p3798_p13, %p3797_p9 }
 0x145   : > { %p3800_p2 = pnand %p3799_p1, %p3793_p3 }
 0x147   : > { %3803 = shalt.err (!%p3800_p2)  }
 0x148   : > { %s3804_s22 = scalar_lea.vmem %s515_s15, 32  ;;  %p3809_p6 = scmp.lt.s32.totalorder %s515_s15, %s4945_s16 }
 0x149   : > { %p3805_p4 = scmp.ne.s32.totalorder %s515_s15, %s3804_s22  ;;  %p3810_p8 = scmp.lt.s32.totalorder %s4963_s20, %s3804_s22 }
 0x14b   : > { %p3811_p10 = por %p3810_p8, %p3809_p6 }
 0x14d   : > { %p3812_p11 = pnand %p3811_p10, %p3805_p4 }
 0x14f   : > { %3815 = shalt.err (!%p3812_p11)  }
 0x150   : > { %517 = dma.hbm_to_vmem [thread:$0]  %s510_s18, 32, %s515_s15, [#allocation4 + $0x9], %s6667_s24, %s6667_s24, %s6666_s13 }
 0x151   : > { %s547_s25 = sadd.s32 11, %s4892_s23  ;;  %s4725_s26 = smov [#allocation2 + $0x12]  }
 0x152   : > { %s536_s9 = sshll.u32 %s4725_s26, 4  ;;  %s5164_s30 = sld [smem:[#allocation6 + %s547_s25]]  ;;  %s5166_s9 = int_to_ptr.vmem [resolvable:$true] %s536_s9 }
 0x153   : > { %s4726_s2 = smov [#allocation2 + $0x13]   ;;  %s569_s19 = sadd.s32 12, %s4892_s23 }
 0x154   : > { %s558_s12 = sshll.u32 %s4726_s2, 4  ;;  %s527_s0 = sshrl.u32 %s5152_s11, 3  ;;  %s5171_s12 = int_to_ptr.vmem [resolvable:$true] %s558_s12 }
 0x155   : > { %s528_s14 = sand.u32 7, %s5152_s11   ;;  %s3203_s7 = sshll.u32 %s527_s0, 4 }
 0x156   : > { %s530_s10 = sadd.s32 %s3203_s7, %s528_s14  ;;  %s5173_s15 = sld [smem:[#allocation6 + %s569_s19]] }
 0x157   : > { %s3204_s17 = sshll.u32 %s530_s10, 4 }
 0x158   : > { %s549_s18 = sshrl.u32 %s5164_s30, 3  ;;  %s532_s29 = scalar_lea.hbm %s6605_s1, %s3204_s17 }
 0x159   : > { %s550_s22 = sand.u32 7, %s5164_s30   ;;  %s3816_s25 = scalar_lea.hbm %s532_s29, 32 }
 0x15a   : > { %p3817_p12 = scmp.ne.s32.totalorder %s532_s29, %s3816_s25  ;;  %p3819_p0 = scmp.lt.u32.totalorder %s532_s29, %s6605_s1 }
 0x15b   : > { %p3820_p3 = scmp.lt.u32.totalorder %s4952_s28, %s3816_s25  ;;  %p3822_p7 = scmp.lt.u32.totalorder %s3816_s25, %s532_s29 }
 0x15d   : > { %p3821_p5 = por %p3820_p3, %p3819_p0 }
 0x15f   : > { %p3823_p9 = por %p3822_p7, %p3821_p5 }
 0x161   : > { %p3824_p13 = pnand %p3823_p9, %p3817_p12 }
 0x163   : > { %3827 = shalt.err (!%p3824_p13)  }
 0x164   : > { %s3828_s11 = scalar_lea.vmem %s5166_s9, 32  ;;  %p3833_p2 = scmp.lt.s32.totalorder %s5166_s9, %s4945_s16 }
 0x165   : > { %p3829_p1 = scmp.ne.s32.totalorder %s5166_s9, %s3828_s11  ;;  %p3834_p4 = scmp.lt.s32.totalorder %s4963_s20, %s3828_s11 }
 0x167   : > { %p3835_p6 = por %p3834_p4, %p3833_p2 }
 0x169   : > { %p3836_p8 = pnand %p3835_p6, %p3829_p1 }
 0x16b   : > { %3839 = shalt.err (!%p3836_p8)  }
 0x16c   : > { %539 = dma.hbm_to_vmem [thread:$0]  %s532_s29, 32, %s5166_s9, [#allocation4 + $0xa], %s6667_s24, %s6667_s24, %s6666_s13 }
 0x16d   : > { %s3206_s30 = sshll.u32 %s549_s18, 4  ;;  %s4727_s0 = smov [#allocation2 + $0x14]  }
 0x16e   : > { %s552_s19 = sadd.s32 %s3206_s30, %s550_s22  ;;  %s580_s14 = sshll.u32 %s4727_s0, 4  ;;  %s581_s14 = int_to_ptr.vmem [resolvable:$true] %s580_s14 }
 0x16f   : > { %s3207_s7 = sshll.u32 %s552_s19, 4  ;;  %s571_s10 = sshrl.u32 %s5173_s15, 3 }
 0x170   : > { %s554_s6 = scalar_lea.hbm %s6605_s1, %s3207_s7  ;;  %s572_s25 = sand.u32 7, %s5173_s15  }
 0x171   : > { %s3840_s26 = scalar_lea.hbm %s554_s6, 32  ;;  %p3843_p11 = scmp.lt.u32.totalorder %s554_s6, %s6605_s1 }
 0x172   : > { %p3841_p10 = scmp.ne.s32.totalorder %s554_s6, %s3840_s26  ;;  %p3844_p12 = scmp.lt.u32.totalorder %s4952_s28, %s3840_s26 }
 0x173   : > { %p3846_p3 = scmp.lt.u32.totalorder %s3840_s26, %s554_s6 }
 0x174   : > { %p3845_p0 = por %p3844_p12, %p3843_p11 }
 0x176   : > { %p3847_p5 = por %p3846_p3, %p3845_p0 }
 0x178   : > { %p3848_p7 = pnand %p3847_p5, %p3841_p10 }
 0x17a   : > { %3851 = shalt.err (!%p3848_p7)  }
 0x17b   : > { %s3852_s9 = scalar_lea.vmem %s5171_s12, 32  ;;  %p3857_p13 = scmp.lt.s32.totalorder %s5171_s12, %s4945_s16 }
 0x17c   : > { %p3853_p9 = scmp.ne.s32.totalorder %s5171_s12, %s3852_s9  ;;  %p3858_p1 = scmp.lt.s32.totalorder %s4963_s20, %s3852_s9 }
 0x17e   : > { %p3859_p2 = por %p3858_p1, %p3857_p13 }
 0x180   : > { %p3860_p4 = pnand %p3859_p2, %p3853_p9 }
 0x182   : > { %3863 = shalt.err (!%p3860_p4)  }
 0x183   : > { %561 = dma.hbm_to_vmem [thread:$0]  %s554_s6, 32, %s5171_s12, [#allocation4 + $0xb], %s6667_s24, %s6667_s24, %s6666_s13 }
 0x184   : > { %s3209_s15 = sshll.u32 %s571_s10, 4  ;;  %s591_s29 = sadd.s32 13, %s4892_s23 }
 0x185   : > { %s574_s18 = sadd.s32 %s3209_s15, %s572_s25  ;;  %s5212_s30 = sld [smem:[#allocation6 + %s591_s29]] }
 0x186   : > { %s3210_s22 = sshll.u32 %s574_s18, 4 }
 0x187   : > { %s576_s7 = scalar_lea.hbm %s6605_s1, %s3210_s22 }
 0x188   : > { %s3864_s17 = scalar_lea.hbm %s576_s7, 32  ;;  %p3867_p8 = scmp.lt.u32.totalorder %s576_s7, %s6605_s1 }
 0x189   : > { %p3865_p6 = scmp.ne.s32.totalorder %s576_s7, %s3864_s17  ;;  %p3868_p10 = scmp.lt.u32.totalorder %s4952_s28, %s3864_s17 }
 0x18a   : > { %p3870_p12 = scmp.lt.u32.totalorder %s3864_s17, %s576_s7 }
 0x18b   : > { %p3869_p11 = por %p3868_p10, %p3867_p8 }
 0x18d   : > { %p3871_p0 = por %p3870_p12, %p3869_p11 }
 0x18f   : > { %p3872_p3 = pnand %p3871_p0, %p3865_p6 }
 0x191   : > { %3875 = shalt.err (!%p3872_p3)  }
 0x192   : > { %s3876_s12 = scalar_lea.vmem %s581_s14, 32  ;;  %p3881_p7 = scmp.lt.s32.totalorder %s581_s14, %s4945_s16 }
 0x193   : > { %p3877_p5 = scmp.ne.s32.totalorder %s581_s14, %s3876_s12  ;;  %p3882_p9 = scmp.lt.s32.totalorder %s4963_s20, %s3876_s12 }
 0x195   : > { %p3883_p13 = por %p3882_p9, %p3881_p7 }
 0x197   : > { %p3884_p1 = pnand %p3883_p13, %p3877_p5 }
 0x199   : > { %3887 = shalt.err (!%p3884_p1)  }
 0x19a   : > { %583 = dma.hbm_to_vmem [thread:$0]  %s576_s7, 32, %s581_s14, [#allocation4 + $0xc], %s6667_s24, %s6667_s24, %s6666_s13 }
 0x19b   : > { %s4728_s10 = smov [#allocation2 + $0x15]   ;;  %s613_s25 = sadd.s32 14, %s4892_s23 }
 0x19c   : > { %s602_s6 = sshll.u32 %s4728_s10, 4  ;;  %s5229_s2 = sld [smem:[#allocation6 + %s613_s25]]  ;;  %s5227_s6 = int_to_ptr.vmem [resolvable:$true] %s602_s6 }
 0x19d   : > { %s635_s11 = sadd.s32 15, %s4892_s23  ;;  %s593_s9 = sshrl.u32 %s5212_s30, 3 }
 0x19e   : > { %s594_s15 = sand.u32 7, %s5212_s30   ;;  %s3212_s18 = sshll.u32 %s593_s9, 4 }
 0x19f   : > { %s4729_s29 = smov [#allocation2 + $0x16]   ;;  %s596_s19 = sadd.s32 %s3212_s18, %s594_s15 }
 0x1a0   : > { %s624_s22 = sshll.u32 %s4729_s29, 4  ;;  %s3213_s0 = sshll.u32 %s596_s19, 4  ;;  %s5234_s22 = int_to_ptr.vmem [resolvable:$true] %s624_s22 }
 0x1a1   : > { %s5236_s14 = sld [smem:[#allocation6 + %s635_s11]]  ;;  %s598_s21 = scalar_lea.hbm %s6605_s1, %s3213_s0 }
 0x1a2   : > { %s615_s26 = sshrl.u32 %s5229_s2, 3  ;;  %s3888_s12 = scalar_lea.hbm %s598_s21, 32 }
 0x1a3   : > { %p3889_p2 = scmp.ne.s32.totalorder %s598_s21, %s3888_s12  ;;  %p3891_p4 = scmp.lt.u32.totalorder %s598_s21, %s6605_s1 }
 0x1a4   : > { %p3892_p6 = scmp.lt.u32.totalorder %s4952_s28, %s3888_s12  ;;  %p3894_p10 = scmp.lt.u32.totalorder %s3888_s12, %s598_s21 }
 0x1a6   : > { %p3893_p8 = por %p3892_p6, %p3891_p4 }
 0x1a8   : > { %p3895_p11 = por %p3894_p10, %p3893_p8 }
 0x1aa   : > { %p3896_p12 = pnand %p3895_p11, %p3889_p2 }
 0x1ac   : > { %3899 = shalt.err (!%p3896_p12)  }
 0x1ad   : > { %s3900_s30 = scalar_lea.vmem %s5227_s6, 32  ;;  %p3905_p3 = scmp.lt.s32.totalorder %s5227_s6, %s4945_s16 }
 0x1ae   : > { %p3901_p0 = scmp.ne.s32.totalorder %s5227_s6, %s3900_s30  ;;  %p3906_p5 = scmp.lt.s32.totalorder %s4963_s20, %s3900_s30 }
 0x1b0   : > { %p3907_p7 = por %p3906_p5, %p3905_p3 }
 0x1b2   : > { %p3908_p9 = pnand %p3907_p7, %p3901_p0 }
 0x1b4   : > { %3911 = shalt.err (!%p3908_p9)  }
 0x1b5   : > { %605 = dma.hbm_to_vmem [thread:$0]  %s598_s21, 32, %s5227_s6, [#allocation4 + $0xd], %s6667_s24, %s6667_s24, %s6666_s13 }
 0x1b6   : > { %s616_s11 = sand.u32 7, %s5229_s2   ;;  %s3215_s9 = sshll.u32 %s615_s26, 4 }
 0x1b7   : > { %s618_s15 = sadd.s32 %s3215_s9, %s616_s11  ;;  %s4730_s29 = smov [#allocation2 + $0x17]  }
 0x1b8   : > { %s3216_s18 = sshll.u32 %s618_s15, 4  ;;  %s646_s19 = sshll.u32 %s4730_s29, 4  ;;  %s647_s19 = int_to_ptr.vmem [resolvable:$true] %s646_s19 }
 0x1b9   : > { %s620_s17 = scalar_lea.hbm %s6605_s1, %s3216_s18  ;;  %s637_s12 = sshrl.u32 %s5236_s14, 3 }
 0x1ba   : > { %s3912_s10 = scalar_lea.hbm %s620_s17, 32  ;;  %p3915_p1 = scmp.lt.u32.totalorder %s620_s17, %s6605_s1 }
 0x1bb   : > { %p3913_p13 = scmp.ne.s32.totalorder %s620_s17, %s3912_s10  ;;  %p3916_p2 = scmp.lt.u32.totalorder %s4952_s28, %s3912_s10 }
 0x1bc   : > { %p3918_p6 = scmp.lt.u32.totalorder %s3912_s10, %s620_s17 }
 0x1bd   : > { %p3917_p4 = por %p3916_p2, %p3915_p1 }
 0x1bf   : > { %p3919_p8 = por %p3918_p6, %p3917_p4 }
 0x1c1   : > { %p3920_p10 = pnand %p3919_p8, %p3913_p13 }
 0x1c3   : > { %3923 = shalt.err (!%p3920_p10)  }
 0x1c4   : > { %s3924_s6 = scalar_lea.vmem %s5234_s22, 32  ;;  %p3929_p12 = scmp.lt.s32.totalorder %s5234_s22, %s4945_s16 }
 0x1c5   : > { %p3925_p11 = scmp.ne.s32.totalorder %s5234_s22, %s3924_s6  ;;  %p3930_p0 = scmp.lt.s32.totalorder %s4963_s20, %s3924_s6 }
 0x1c7   : > { %p3931_p3 = por %p3930_p0, %p3929_p12 }
 0x1c9   : > { %p3932_p5 = pnand %p3931_p3, %p3925_p11 }
 0x1cb   : > { %3935 = shalt.err (!%p3932_p5)  }
 0x1cc   : > { %627 = dma.hbm_to_vmem [thread:$0]  %s620_s17, 32, %s5234_s22, [#allocation4 + $0xe], %s6667_s24, %s6667_s24, %s6666_s13 }
 0x1cd   : > { %s638_s2 = sand.u32 7, %s5236_s14   ;;  %s3218_s21 = sshll.u32 %s637_s12, 4 }
 0x1ce   : > { %s640_s26 = sadd.s32 %s3218_s21, %s638_s2  ;;  %s657_s9 = sadd.s32 16, %s4892_s23 }
 0x1cf   : > { %s3219_s11 = sshll.u32 %s640_s26, 4  ;;  %s5278_s0 = sld [smem:[#allocation6 + %s657_s9]] }
 0x1d0   : > { %s642_s29 = scalar_lea.hbm %s6605_s1, %s3219_s11 }
 0x1d1   : > { %s3936_s7 = scalar_lea.hbm %s642_s29, 32  ;;  %p3939_p9 = scmp.lt.u32.totalorder %s642_s29, %s6605_s1 }
 0x1d2   : > { %p3937_p7 = scmp.ne.s32.totalorder %s642_s29, %s3936_s7  ;;  %p3940_p13 = scmp.lt.u32.totalorder %s4952_s28, %s3936_s7 }
 0x1d3   : > { %p3942_p2 = scmp.lt.u32.totalorder %s3936_s7, %s642_s29 }
 0x1d4   : > { %p3941_p1 = por %p3940_p13, %p3939_p9 }
 0x1d6   : > { %p3943_p4 = por %p3942_p2, %p3941_p1 }
 0x1d8   : > { %p3944_p6 = pnand %p3943_p4, %p3937_p7 }
 0x1da   : > { %3947 = shalt.err (!%p3944_p6)  }
 0x1db   : > { %s3948_s22 = scalar_lea.vmem %s647_s19, 32  ;;  %p3953_p10 = scmp.lt.s32.totalorder %s647_s19, %s4945_s16 }
 0x1dc   : > { %p3949_p8 = scmp.ne.s32.totalorder %s647_s19, %s3948_s22  ;;  %p3954_p11 = scmp.lt.s32.totalorder %s4963_s20, %s3948_s22 }
 0x1de   : > { %p3955_p12 = por %p3954_p11, %p3953_p10 }
 0x1e0   : > { %p3956_p0 = pnand %p3955_p12, %p3949_p8 }
 0x1e2   : > { %3959 = shalt.err (!%p3956_p0)  }
 0x1e3   : > { %649 = dma.hbm_to_vmem [thread:$0]  %s642_s29, 32, %s647_s19, [#allocation4 + $0xf], %s6667_s24, %s6667_s24, %s6666_s13  ;;  %v1118_v33 = vlaneseq }
 0x1e4   : > { %s679_s14 = sadd.s32 17, %s4892_s23  ;;  %s4731_s17 = smov [#allocation2 + $0x20]  }
 0x1e5   : > { %s668_s12 = sshll.u32 %s4731_s17, 4  ;;  %s5290_s30 = sld [smem:[#allocation6 + %s679_s14]]  ;;  %v1119_v34 = vshrl.u32 %v1118_v33, 7  ;;  %s5292_s12 = int_to_ptr.vmem [resolvable:$true] %s668_s12 }
 0x1e6   : > { %s4732_s6 = smov [#allocation2 + $0x21]   ;;  %s701_s21 = sadd.s32 18, %s4892_s23 }
 0x1e7   : > { %s690_s2 = sshll.u32 %s4732_s6, 4  ;;  %s659_s26 = sshrl.u32 %s5278_s0, 3  ;;  %s5297_s2 = int_to_ptr.vmem [resolvable:$true] %s690_s2 }
 0x1e8   : > { %s660_s11 = sand.u32 7, %s5278_s0   ;;  %s3221_s9 = sshll.u32 %s659_s26, 4 }
 0x1e9   : > { %s662_s19 = sadd.s32 %s3221_s9, %s660_s11  ;;  %s5299_s15 = sld [smem:[#allocation6 + %s701_s21]] }
 0x1ea   : > { %s3222_s18 = sshll.u32 %s662_s19, 4 }
 0x1eb   : > { %s681_s29 = sshrl.u32 %s5290_s30, 3  ;;  %s664_s25 = scalar_lea.hbm %s6605_s1, %s3222_s18 }
 0x1ec   : > { %s682_s22 = sand.u32 7, %s5290_s30   ;;  %s3960_s14 = scalar_lea.hbm %s664_s25, 32 }
 0x1ed   : > { %p3961_p3 = scmp.ne.s32.totalorder %s664_s25, %s3960_s14  ;;  %p3963_p5 = scmp.lt.u32.totalorder %s664_s25, %s6605_s1 }
 0x1ee   : > { %p3964_p7 = scmp.lt.u32.totalorder %s4952_s28, %s3960_s14  ;;  %p3966_p13 = scmp.lt.u32.totalorder %s3960_s14, %s664_s25 }
 0x1f0   : > { %p3965_p9 = por %p3964_p7, %p3963_p5 }
 0x1f2   : > { %p3967_p1 = por %p3966_p13, %p3965_p9 }
 0x1f4   : > { %p3968_p2 = pnand %p3967_p1, %p3961_p3 }
 0x1f6   : > { %3971 = shalt.err (!%p3968_p2)  }
 0x1f7   : > { %s3972_s0 = scalar_lea.vmem %s5292_s12, 32  ;;  %p3977_p6 = scmp.lt.s32.totalorder %s5292_s12, %s4945_s16 }
 0x1f8   : > { %p3973_p4 = scmp.ne.s32.totalorder %s5292_s12, %s3972_s0  ;;  %p3978_p8 = scmp.lt.s32.totalorder %s4963_s20, %s3972_s0 }
 0x1fa   : > { %p3979_p10 = por %p3978_p8, %p3977_p6 }
 0x1fc   : > { %p3980_p11 = pnand %p3979_p10, %p3973_p4 }
 0x1fe   : > { %3983 = shalt.err (!%p3980_p11)  }
 0x1ff   : > { %671 = dma.hbm_to_vmem [thread:$0]  %s664_s25, 32, %s5292_s12, [#allocation4 + $0x10], %s6667_s24, %s6667_s24, %s6666_s13  ;;  %v1018_v35 = vld [vmem:[#allocation7] ss:$8 sm:$0x3]  ;;  %v5322_v36 = vsub.s32 0, %v1119_v34 }
 0x200   : > { %s3224_s30 = sshll.u32 %s681_s29, 4  ;;  %s4733_s26 = smov [#allocation2 + $0x22]   ;;  %v5324_v37 = vsub.s32 1, %v1119_v34  ;;  %v1020_v38 = vld [vmem:[#allocation7 + $0x1] ss:$8 sm:$0x3] }
 0x201   : > { %s684_s21 = sadd.s32 %s3224_s30, %s682_s22  ;;  %s5319_s11 = sshll.u32 %s4733_s26, 4  ;;  %s5344_s11 = int_to_ptr.vmem [resolvable:$true] %s5319_s11 }
 0x202   : > { %s3225_s9 = sshll.u32 %s684_s21, 4  ;;  %s703_s19 = sshrl.u32 %s5299_s15, 3 }
 0x203   : > { %s686_s10 = scalar_lea.hbm %s6605_s1, %s3225_s9  ;;  %s704_s14 = sand.u32 7, %s5299_s15  }
 0x204   : > { %s3984_s12 = scalar_lea.hbm %s686_s10, 32  ;;  %p3987_p0 = scmp.lt.u32.totalorder %s686_s10, %s6605_s1 }
 0x205   : > { %p3985_p12 = scmp.ne.s32.totalorder %s686_s10, %s3984_s12  ;;  %p3988_p3 = scmp.lt.u32.totalorder %s4952_s28, %s3984_s12 }
 0x206   : > { %p3990_p7 = scmp.lt.u32.totalorder %s3984_s12, %s686_s10 }
 0x207   : > { %p3989_p5 = por %p3988_p3, %p3987_p0 }
 0x209   : > { %p3991_p9 = por %p3990_p7, %p3989_p5 }
 0x20b   : > { %p3992_p13 = pnand %p3991_p9, %p3985_p12 }
 0x20d   : > { %3995 = shalt.err (!%p3992_p13)  }
 0x20e   : > { %s3996_s22 = scalar_lea.vmem %s5297_s2, 32  ;;  %p4001_p2 = scmp.lt.s32.totalorder %s5297_s2, %s4945_s16 }
 0x20f   : > { %p3997_p1 = scmp.ne.s32.totalorder %s5297_s2, %s3996_s22  ;;  %p4002_p4 = scmp.lt.s32.totalorder %s4963_s20, %s3996_s22 }
 0x211   : > { %p4003_p6 = por %p4002_p4, %p4001_p2 }
 0x213   : > { %p4004_p8 = pnand %p4003_p6, %p3997_p1 }
 0x215   : > { %4007 = shalt.err (!%p4004_p8)  }
 0x216   : > { %693 = dma.hbm_to_vmem [thread:$0]  %s686_s10, 32, %s5297_s2, [#allocation4 + $0x11], %s6667_s24, %s6667_s24, %s6666_s13  ;;  %v5348_v39 = vrot.slane %v1020_v38, %v5322_v36  ;;  %v5351_v40 = vrot.slane %v1020_v38, %v5324_v37  ;;  %v5354_v41 = vrot.slane %v1018_v35, %v5322_v36  ;;  %v5357_v42 = vrot.slane %v1018_v35, %v5324_v37  ;;  %v1061_v47 = vpop.permute.xlu1 %1060  ;;  %v1055_v48 = vpop.permute.xlu0 %1054 }
 0x217   : > { %s3227_s15 = sshll.u32 %s703_s19, 4  ;;  %s723_s6 = sadd.s32 19, %s4892_s23 }
 0x218   : > { %s706_s17 = sadd.s32 %s3227_s15, %s704_s14  ;;  %s6669_s3 = sld [smem:[#allocation111_spill]] }
 0x219   : > { %s3228_s30 = sshll.u32 %s706_s17, 4  ;;  %s5362_s21 = sld [smem:[#allocation6 + %s723_s6]] }
 0x21a   : > { %s708_s29 = scalar_lea.hbm %s6605_s1, %s3228_s30 }
 0x21b   : > { %s4008_s25 = scalar_lea.hbm %s708_s29, 32  ;;  %p4011_p11 = scmp.lt.u32.totalorder %s708_s29, %s6605_s1 }
 0x21c   : > { %p4009_p10 = scmp.ne.s32.totalorder %s708_s29, %s4008_s25  ;;  %p4012_p12 = scmp.lt.u32.totalorder %s4952_s28, %s4008_s25 }
 0x21d   : > { %p4014_p3 = scmp.lt.u32.totalorder %s4008_s25, %s708_s29 }
 0x21e   : > { %v1175_v43 = vld [vmem:[%s6669_s3 + $0x20] sm:$0xff]  ;;  %v1176_v44 = vld [vmem:[%s6669_s3 + $0x28] sm:$0xff]  ;;  %p4013_p0 = por %p4012_p12, %p4011_p11 }
 0x21f   : > { %v1171_v45 = vld [vmem:[%s6669_s3] sm:$0xff]  ;;  %v1172_v46 = vld [vmem:[%s6669_s3 + $0x8] sm:$0xff] }
 0x220   : > { %p4015_p5 = por %p4014_p3, %p4013_p0 }
 0x222   : > { %p4016_p7 = pnand %p4015_p5, %p4009_p10 }
 0x224   : > { %4019 = shalt.err (!%p4016_p7)  }
 0x225   : > { %s4020_s17 = scalar_lea.vmem %s5344_s11, 32  ;;  %p4025_p13 = scmp.lt.s32.totalorder %s5344_s11, %s4945_s16 }
 0x226   : > { %p4021_p9 = scmp.ne.s32.totalorder %s5344_s11, %s4020_s17  ;;  %p4026_p1 = scmp.lt.s32.totalorder %s4963_s20, %s4020_s17 }
 0x228   : > { %p4027_p2 = por %p4026_p1, %p4025_p13 }
 0x22a   : > { %p4028_p4 = pnand %p4027_p2, %p4021_p9 }
 0x22c   : > { %4031 = shalt.err (!%p4028_p4)  }
 0x22d   : > { %715 = dma.hbm_to_vmem [thread:$0]  %s708_s29, 32, %s5344_s11, [#allocation4 + $0x12], %s6667_s24, %s6667_s24, %s6666_s13  ;;  %vm1103_vm0 = vcmp.eq.s32.totalorder %v1061_v47, 1  ;;  %vm1101_vm1 = vcmp.eq.s32.totalorder %v1055_v48, 1  ;;  %v1064_v59 = vpop.permute.xlu1 %1063  ;;  %v1058_v62 = vpop.permute.xlu0 %1057 }
 0x22e   : > { %s4734_s6 = smov [#allocation2 + $0x23]   ;;  %s745_s2 = sadd.s32 20, %s4892_s23  ;;  %v1143_v49 = vsel %vm1103_vm0, %v5348_v39, %v5354_v41  ;;  %v1144_v50 = vsel %vm1103_vm0, %v5351_v40, %v5357_v42  ;;  %v1139_v51 = vsel %vm1101_vm1, %v5348_v39, %v5354_v41  ;;  %v1140_v52 = vsel %vm1101_vm1, %v5351_v40, %v5357_v42  ;;  %v1177_v57 = vld [vmem:[%s6669_s3 + $0x30] sm:$0xff]  ;;  %v1178_v58 = vld [vmem:[%s6669_s3 + $0x38] sm:$0xff]  ;;  %v1179_v10 = vld [vmem:[%s6669_s3 + $0x40] sm:$0xff] }
 0x22f   : > { %s734_s0 = sshll.u32 %s4734_s6, 4  ;;  %s5400_s11 = sld [smem:[#allocation6 + %s745_s2]]  ;;  %v1207_v53 = vadd.f32 %v1175_v43, %v1143_v49  ;;  %v1208_v54 = vadd.f32 %v1176_v44, %v1144_v50  ;;  %v1203_v55 = vadd.f32 %v1171_v45, %v1139_v51  ;;  %v1204_v56 = vadd.f32 %v1172_v46, %v1140_v52  ;;  %v1173_v60 = vld [vmem:[%s6669_s3 + $0x10] sm:$0xff]  ;;  %v1174_v61 = vld [vmem:[%s6669_s3 + $0x18] sm:$0xff]  ;;  %v1180_v11 = vld [vmem:[%s6669_s3 + $0x48] sm:$0xff]  ;;  %s5398_s0 = int_to_ptr.vmem [resolvable:$true] %s734_s0 }
 0x230   : > { %s767_s9 = sadd.s32 21, %s4892_s23  ;;  %s725_s29 = sshrl.u32 %s5362_s21, 3  ;;  %vm1104_vm2 = vcmp.eq.s32.totalorder %v1064_v59, 1  ;;  %vm1102_vm3 = vcmp.eq.s32.totalorder %v1058_v62, 1  ;;  %v1181_v7 = vld [vmem:[%s6669_s3 + $0x50] sm:$0xff]  ;;  %v1182_v8 = vld [vmem:[%s6669_s3 + $0x58] sm:$0xff] }
 0x231   : > { %s726_s25 = sand.u32 7, %s5362_s21   ;;  %1239 = vst [vmem:[#allocation3 + $0x20] sm:$0xff] %v1207_v53  ;;  %1240 = vst [vmem:[#allocation3 + $0x28] sm:$0xff] %v1208_v54  ;;  %s3230_s22 = sshll.u32 %s725_s29, 4  ;;  %v1145_v63 = vsel %vm1104_vm2, %v5348_v39, %v5354_v41  ;;  %v1146_v0 = vsel %vm1104_vm2, %v5351_v40, %v5357_v42  ;;  %v1141_v1 = vsel %vm1102_vm3, %v5348_v39, %v5354_v41  ;;  %v1070_v9 = vpop.permute.xlu1 %1069  ;;  %v1067_v12 = vpop.permute.xlu0 %1066 }
 0x232   : > { %1235 = vst [vmem:[#allocation3] sm:$0xff] %v1203_v55  ;;  %1236 = vst [vmem:[#allocation3 + $0x8] sm:$0xff] %v1204_v56  ;;  %s4735_s15 = smov [#allocation2 + $0x24]   ;;  %v1142_v2 = vsel %vm1102_vm3, %v5351_v40, %v5357_v42  ;;  %s728_s21 = sadd.s32 %s3230_s22, %s726_s25  ;;  %v1209_v3 = vadd.f32 %v1177_v57, %v1145_v63  ;;  %v1210_v4 = vadd.f32 %v1178_v58, %v1146_v0  ;;  %vm1106_vm4 = vcmp.eq.s32.totalorder %v1070_v9, 1 }
 0x233   : > { %s756_s17 = sshll.u32 %s4735_s15, 4  ;;  %v1205_v5 = vadd.f32 %v1173_v60, %v1141_v1  ;;  %v1206_v6 = vadd.f32 %v1174_v61, %v1142_v2  ;;  %s3231_s30 = sshll.u32 %s728_s21, 4  ;;  %vm1105_vm5 = vcmp.eq.s32.totalorder %v1067_v12, 1  ;;  %s5425_s17 = int_to_ptr.vmem [resolvable:$true] %s756_s17 }
 0x234   : > { %s5430_s26 = sld [smem:[#allocation6 + %s767_s9]]  ;;  %s730_s9 = scalar_lea.hbm %s6605_s1, %s3231_s30  ;;  %1241 = vst [vmem:[#allocation3 + $0x30] sm:$0xff] %v1209_v3  ;;  %1242 = vst [vmem:[#allocation3 + $0x38] sm:$0xff] %v1210_v4 }
 0x235   : > { %s747_s22 = sshrl.u32 %s5400_s11, 3  ;;  %1237 = vst [vmem:[#allocation3 + $0x10] sm:$0xff] %v1205_v5  ;;  %1238 = vst [vmem:[#allocation3 + $0x18] sm:$0xff] %v1206_v6  ;;  %s4032_s15 = scalar_lea.hbm %s730_s9, 32 }
 0x236   : > { %p4033_p6 = scmp.ne.s32.totalorder %s730_s9, %s4032_s15  ;;  %p4035_p8 = scmp.lt.u32.totalorder %s730_s9, %s6605_s1 }
 0x237   : > { %p4036_p10 = scmp.lt.u32.totalorder %s4952_s28, %s4032_s15  ;;  %p4038_p12 = scmp.lt.u32.totalorder %s4032_s15, %s730_s9 }
 0x239   : > { %p4037_p11 = por %p4036_p10, %p4035_p8 }
 0x23b   : > { %p4039_p0 = por %p4038_p12, %p4037_p11 }
 0x23d   : > { %p4040_p3 = pnand %p4039_p0, %p4033_p6 }
 0x23f   : > { %4043 = shalt.err (!%p4040_p3)  }
 0x240   : > { %s4044_s2 = scalar_lea.vmem %s5398_s0, 32  ;;  %p4049_p7 = scmp.lt.s32.totalorder %s5398_s0, %s4945_s16 }
 0x241   : > { %p4045_p5 = scmp.ne.s32.totalorder %s5398_s0, %s4044_s2  ;;  %p4050_p9 = scmp.lt.s32.totalorder %s4963_s20, %s4044_s2 }
 0x243   : > { %p4051_p13 = por %p4050_p9, %p4049_p7 }
 0x245   : > { %p4052_p1 = pnand %p4051_p13, %p4045_p5 }
 0x247   : > { %4055 = shalt.err (!%p4052_p1)  }
 0x248   : > { %737 = dma.hbm_to_vmem [thread:$0]  %s730_s9, 32, %s5398_s0, [#allocation4 + $0x13], %s6667_s24, %s6667_s24, %s6666_s13  ;;  %v1149_v13 = vsel %vm1106_vm4, %v5348_v39, %v5354_v41  ;;  %v1150_v14 = vsel %vm1106_vm4, %v5351_v40, %v5357_v42  ;;  %v1147_v15 = vsel %vm1105_vm5, %v5348_v39, %v5354_v41  ;;  %v1148_v16 = vsel %vm1105_vm5, %v5351_v40, %v5357_v42  ;;  %v1076_v23 = vpop.permute.xlu1 %1075  ;;  %v1073_v26 = vpop.permute.xlu0 %1072 }
 0x249   : > { %s748_s30 = sand.u32 7, %s5400_s11   ;;  %s3233_s19 = sshll.u32 %s747_s22, 4  ;;  %v1213_v17 = vadd.f32 %v1181_v7, %v1149_v13  ;;  %v1214_v18 = vadd.f32 %v1182_v8, %v1150_v14  ;;  %v1211_v19 = vadd.f32 %v1179_v10, %v1147_v15  ;;  %v1212_v20 = vadd.f32 %v1180_v11, %v1148_v16  ;;  %v1185_v21 = vld [vmem:[%s6669_s3 + $0x70] sm:$0xff]  ;;  %v1186_v22 = vld [vmem:[%s6669_s3 + $0x78] sm:$0xff]  ;;  %v1183_v24 = vld [vmem:[%s6669_s3 + $0x60] sm:$0xff] }
 0x24a   : > { %s750_s7 = sadd.s32 %s3233_s19, %s748_s30  ;;  %v1184_v25 = vld [vmem:[%s6669_s3 + $0x68] sm:$0xff]  ;;  %s4736_s22 = smov [#allocation2 + $0x25]   ;;  %vm1108_vm6 = vcmp.eq.s32.totalorder %v1076_v23, 1  ;;  %vm1107_vm7 = vcmp.eq.s32.totalorder %v1073_v26, 1 }
 0x24b   : > { %s3234_s9 = sshll.u32 %s750_s7, 4  ;;  %s5483_s15 = sshll.u32 %s4736_s22, 4  ;;  %1245 = vst [vmem:[#allocation3 + $0x50] sm:$0xff] %v1213_v17  ;;  %1246 = vst [vmem:[#allocation3 + $0x58] sm:$0xff] %v1214_v18  ;;  %v1153_v27 = vsel %vm1108_vm6, %v5348_v39, %v5354_v41  ;;  %v1154_v28 = vsel %vm1108_vm6, %v5351_v40, %v5357_v42  ;;  %v1151_v29 = vsel %vm1107_vm7, %v5348_v39, %v5354_v41  ;;  %s5524_s15 = int_to_ptr.vmem [resolvable:$true] %s5483_s15 }
 0x24c   : > { %1243 = vst [vmem:[#allocation3 + $0x40] sm:$0xff] %v1211_v19  ;;  %1244 = vst [vmem:[#allocation3 + $0x48] sm:$0xff] %v1212_v20  ;;  %s752_s2 = scalar_lea.hbm %s6605_s1, %s3234_s9  ;;  %s769_s30 = sshrl.u32 %s5430_s26, 3  ;;  %v1152_v30 = vsel %vm1107_vm7, %v5351_v40, %v5357_v42 }
 0x24d   : > { %s4056_s19 = scalar_lea.hbm %s752_s2, 32  ;;  %p4059_p4 = scmp.lt.u32.totalorder %s752_s2, %s6605_s1 }
 0x24e   : > { %p4057_p2 = scmp.ne.s32.totalorder %s752_s2, %s4056_s19  ;;  %p4060_p6 = scmp.lt.u32.totalorder %s4952_s28, %s4056_s19 }
 0x24f   : > { %p4062_p10 = scmp.lt.u32.totalorder %s4056_s19, %s752_s2 }
 0x250   : > { %p4061_p8 = por %p4060_p6, %p4059_p4 }
 0x252   : > { %p4063_p11 = por %p4062_p10, %p4061_p8 }
 0x254   : > { %p4064_p12 = pnand %p4063_p11, %p4057_p2 }
 0x256   : > { %4067 = shalt.err (!%p4064_p12)  }
 0x257   : > { %s4068_s7 = scalar_lea.vmem %s5425_s17, 32  ;;  %p4073_p3 = scmp.lt.s32.totalorder %s5425_s17, %s4945_s16 }
 0x258   : > { %p4069_p0 = scmp.ne.s32.totalorder %s5425_s17, %s4068_s7  ;;  %p4074_p5 = scmp.lt.s32.totalorder %s4963_s20, %s4068_s7 }
 0x25a   : > { %p4075_p7 = por %p4074_p5, %p4073_p3 }
 0x25c   : > { %p4076_p9 = pnand %p4075_p7, %p4069_p0 }
 0x25e   : > { %4079 = shalt.err (!%p4076_p9)  }
 0x25f   : > { %759 = dma.hbm_to_vmem [thread:$0]  %s752_s2, 32, %s5425_s17, [#allocation4 + $0x14], %s6667_s24, %s6667_s24, %s6666_s13  ;;  %v1217_v31 = vadd.f32 %v1185_v21, %v1153_v27  ;;  %v1218_v32 = vadd.f32 %v1186_v22, %v1154_v28  ;;  %v1215_v33 = vadd.f32 %v1183_v24, %v1151_v29  ;;  %v1216_v34 = vadd.f32 %v1184_v25, %v1152_v30  ;;  %v1082_v43 = vpop.permute.xlu1 %1081  ;;  %v1079_v46 = vpop.permute.xlu0 %1078 }
 0x260   : > { %v1189_v35 = vld [vmem:[%s6669_s3 + $0x90] sm:$0xff]  ;;  %s770_s12 = sand.u32 7, %s5430_s26   ;;  %s3236_s29 = sshll.u32 %s769_s30, 4  ;;  %v1190_v38 = vld [vmem:[%s6669_s3 + $0x98] sm:$0xff]  ;;  %v1187_v44 = vld [vmem:[%s6669_s3 + $0x80] sm:$0xff]  ;;  %vm1110_vm8 = vcmp.eq.s32.totalorder %v1082_v43, 1 }
 0x261   : > { %v1188_v45 = vld [vmem:[%s6669_s3 + $0x88] sm:$0xff]  ;;  %s772_s6 = sadd.s32 %s3236_s29, %s770_s12  ;;  %1249 = vst [vmem:[#allocation3 + $0x70] sm:$0xff] %v1217_v31  ;;  %1250 = vst [vmem:[#allocation3 + $0x78] sm:$0xff] %v1218_v32  ;;  %vm1109_vm9 = vcmp.eq.s32.totalorder %v1079_v46, 1  ;;  %s789_s2 = sadd.s32 22, %s4892_s23  ;;  %v1157_v47 = vsel %vm1110_vm8, %v5348_v39, %v5354_v41  ;;  %v1158_v48 = vsel %vm1110_vm8, %v5351_v40, %v5357_v42  ;;  %v1193_v51 = vld [vmem:[%s6669_s3 + $0xb0] sm:$0xff] }
 0x262   : > { %1247 = vst [vmem:[#allocation3 + $0x60] sm:$0xff] %v1215_v33  ;;  %1248 = vst [vmem:[#allocation3 + $0x68] sm:$0xff] %v1216_v34  ;;  %s3237_s26 = sshll.u32 %s772_s6, 4  ;;  %v1155_v49 = vsel %vm1109_vm9, %v5348_v39, %v5354_v41  ;;  %v1156_v50 = vsel %vm1109_vm9, %v5351_v40, %v5357_v42  ;;  %s5541_s10 = sld [smem:[#allocation6 + %s789_s2]]  ;;  %v1221_v52 = vadd.f32 %v1189_v35, %v1157_v47 }
 0x263   : > { %s774_s7 = scalar_lea.hbm %s6605_s1, %s3237_s26  ;;  %v1222_v53 = vadd.f32 %v1190_v38, %v1158_v48  ;;  %v1219_v54 = vadd.f32 %v1187_v44, %v1155_v49  ;;  %v1220_v55 = vadd.f32 %v1188_v45, %v1156_v50 }
 0x264   : > { %s4080_s14 = scalar_lea.hbm %s774_s7, 32  ;;  %p4083_p1 = scmp.lt.u32.totalorder %s774_s7, %s6605_s1 }
 0x265   : > { %p4081_p13 = scmp.ne.s32.totalorder %s774_s7, %s4080_s14  ;;  %p4084_p2 = scmp.lt.u32.totalorder %s4952_s28, %s4080_s14 }
 0x266   : > { %p4086_p6 = scmp.lt.u32.totalorder %s4080_s14, %s774_s7 }
 0x267   : > { %p4085_p4 = por %p4084_p2, %p4083_p1 }
 0x269   : > { %p4087_p8 = por %p4086_p6, %p4085_p4 }
 0x26b   : > { %p4088_p10 = pnand %p4087_p8, %p4081_p13 }
 0x26d   : > { %4091 = shalt.err (!%p4088_p10)  }
 0x26e   : > { %s4092_s11 = scalar_lea.vmem %s5524_s15, 32  ;;  %p4097_p12 = scmp.lt.s32.totalorder %s5524_s15, %s4945_s16 }
 0x26f   : > { %p4093_p11 = scmp.ne.s32.totalorder %s5524_s15, %s4092_s11  ;;  %p4098_p0 = scmp.lt.s32.totalorder %s4963_s20, %s4092_s11 }
 0x271   : > { %p4099_p3 = por %p4098_p0, %p4097_p12 }
 0x273   : > { %p4100_p5 = pnand %p4099_p3, %p4093_p11 }
 0x275   : > { %4103 = shalt.err (!%p4100_p5)  }
 0x276   : > { %781 = dma.hbm_to_vmem [thread:$0]  %s774_s7, 32, %s5524_s15, [#allocation4 + $0x15], %s6667_s24, %s6667_s24, %s6666_s13  ;;  %v1088_v57 = vpop.permute.xlu1 %1087  ;;  %v1085_v60 = vpop.permute.xlu0 %1084  ;;  %1253 = vst [vmem:[#allocation3 + $0x90] sm:$0xff] %v1221_v52  ;;  %1254 = vst [vmem:[#allocation3 + $0x98] sm:$0xff] %v1222_v53 }
 0x277   : > { %v1194_v56 = vld [vmem:[%s6669_s3 + $0xb8] sm:$0xff]  ;;  %v1191_v58 = vld [vmem:[%s6669_s3 + $0xa0] sm:$0xff]  ;;  %v1192_v59 = vld [vmem:[%s6669_s3 + $0xa8] sm:$0xff]  ;;  %s811_s26 = sadd.s32 23, %s4892_s23  ;;  %1251 = vst [vmem:[#allocation3 + $0x80] sm:$0xff] %v1219_v54  ;;  %vm1112_vm10 = vcmp.eq.s32.totalorder %v1088_v57, 1 }
 0x278   : > { %1252 = vst [vmem:[#allocation3 + $0x88] sm:$0xff] %v1220_v55  ;;  %vm1111_vm11 = vcmp.eq.s32.totalorder %v1085_v60, 1  ;;  %s4737_s15 = smov [#allocation2 + $0x26]   ;;  %s5566_s30 = sld [smem:[#allocation6 + %s811_s26]]  ;;  %v1161_v61 = vsel %vm1112_vm10, %v5348_v39, %v5354_v41  ;;  %v1162_v62 = vsel %vm1112_vm10, %v5351_v40, %v5357_v42  ;;  %v1197_v5 = vld [vmem:[%s6669_s3 + $0xd0] sm:$0xff]  ;;  %v1198_v6 = vld [vmem:[%s6669_s3 + $0xd8] sm:$0xff] }
 0x279   : > { %s800_s2 = sshll.u32 %s4737_s15, 4  ;;  %v1159_v63 = vsel %vm1111_vm11, %v5348_v39, %v5354_v41  ;;  %v1160_v0 = vsel %vm1111_vm11, %v5351_v40, %v5357_v42  ;;  %v1225_v1 = vadd.f32 %v1193_v51, %v1161_v61  ;;  %v1226_v2 = vadd.f32 %v1194_v56, %v1162_v62  ;;  %s4738_s18 = smov [#allocation2 + $0x27]   ;;  %v1195_v8 = vld [vmem:[%s6669_s3 + $0xc0] sm:$0xff]  ;;  %v1196_v9 = vld [vmem:[%s6669_s3 + $0xc8] sm:$0xff]  ;;  %v1201_v19 = vld [vmem:[%s6669_s3 + $0xf0] sm:$0xff]  ;;  %s5576_s2 = int_to_ptr.vmem [resolvable:$true] %s800_s2 }
 0x27a   : > { %v1223_v3 = vadd.f32 %v1191_v58, %v1159_v63  ;;  %v1224_v4 = vadd.f32 %v1192_v59, %v1160_v0  ;;  %s822_s7 = sshll.u32 %s4738_s18, 4  ;;  %s833_s14 = sadd.s32 24, %s4892_s23  ;;  %v1094_v7 = vpop.permute.xlu1 %1093  ;;  %v1091_v10 = vpop.permute.xlu0 %1090  ;;  %v1202_v20 = vld [vmem:[%s6669_s3 + $0xf8] sm:$0xff]  ;;  %v1199_v22 = vld [vmem:[%s6669_s3 + $0xe0] sm:$0xff]  ;;  %v1200_v23 = vld [vmem:[%s6669_s3 + $0xe8] sm:$0xff]  ;;  %s5593_s7 = int_to_ptr.vmem [resolvable:$true] %s822_s7 }
 0x27b   : > { %s791_s17 = sshrl.u32 %s5541_s10, 3  ;;  %s792_s21 = sand.u32 7, %s5541_s10   ;;  %1257 = vst [vmem:[#allocation3 + $0xb0] sm:$0xff] %v1225_v1  ;;  %1258 = vst [vmem:[#allocation3 + $0xb8] sm:$0xff] %v1226_v2  ;;  %vm1114_vm12 = vcmp.eq.s32.totalorder %v1094_v7, 1  ;;  %vm1113_vm13 = vcmp.eq.s32.totalorder %v1091_v10, 1 }
 0x27c   : > { %1255 = vst [vmem:[#allocation3 + $0xa0] sm:$0xff] %v1223_v3  ;;  %1256 = vst [vmem:[#allocation3 + $0xa8] sm:$0xff] %v1224_v4  ;;  %s3239_s6 = sshll.u32 %s791_s17, 4  ;;  %v1165_v11 = vsel %vm1114_vm12, %v5348_v39, %v5354_v41  ;;  %v1166_v12 = vsel %vm1114_vm12, %v5351_v40, %v5357_v42  ;;  %v1163_v13 = vsel %vm1113_vm13, %v5348_v39, %v5354_v41  ;;  %s5603_s26 = sld [smem:[#allocation6 + %s833_s14]] }
 0x27d   : > { %v1164_v14 = vsel %vm1113_vm13, %v5351_v40, %v5357_v42  ;;  %s794_s10 = sadd.s32 %s3239_s6, %s792_s21  ;;  %v1229_v15 = vadd.f32 %v1197_v5, %v1165_v11  ;;  %v1230_v16 = vadd.f32 %v1198_v6, %v1166_v12  ;;  %v1227_v17 = vadd.f32 %v1195_v8, %v1163_v13 }
 0x27e   : > { %v1228_v18 = vadd.f32 %v1196_v9, %v1164_v14  ;;  %s3240_s15 = sshll.u32 %s794_s10, 4  ;;  %s813_s19 = sshrl.u32 %s5566_s30, 3  ;;  %v1100_v21 = vpop.permute.xlu1 %1099  ;;  %v1097_v24 = vpop.permute.xlu0 %1096 }
 0x27f   : > { %s5612_s11 = scalar_lea.hbm %s6605_s1, %s3240_s15  ;;  %s814_s14 = sand.u32 7, %s5566_s30   ;;  %1261 = vst [vmem:[#allocation3 + $0xd0] sm:$0xff] %v1229_v15  ;;  %1262 = vst [vmem:[#allocation3 + $0xd8] sm:$0xff] %v1230_v16 }
 0x280   : > { %1259 = vst [vmem:[#allocation3 + $0xc0] sm:$0xff] %v1227_v17  ;;  %1260 = vst [vmem:[#allocation3 + $0xc8] sm:$0xff] %v1228_v18  ;;  %s4104_s10 = scalar_lea.hbm %s5612_s11, 32  ;;  %p4107_p9 = scmp.lt.u32.totalorder %s5612_s11, %s6605_s1 }
 0x281   : > { %p4105_p7 = scmp.ne.s32.totalorder %s5612_s11, %s4104_s10  ;;  %p4108_p13 = scmp.lt.u32.totalorder %s4952_s28, %s4104_s10 }
 0x282   : > { %p4110_p2 = scmp.lt.u32.totalorder %s4104_s10, %s5612_s11 }
 0x283   : > { %p4109_p1 = por %p4108_p13, %p4107_p9 }
 0x285   : > { %p4111_p4 = por %p4110_p2, %p4109_p1 }
 0x287   : > { %p4112_p6 = pnand %p4111_p4, %p4105_p7 }
 0x289   : > { %4115 = shalt.err (!%p4112_p6)  }
 0x28a   : > { %s4116_s18 = scalar_lea.vmem %s5576_s2, 32  ;;  %p4121_p10 = scmp.lt.s32.totalorder %s5576_s2, %s4945_s16 }
 0x28b   : > { %p4117_p8 = scmp.ne.s32.totalorder %s5576_s2, %s4116_s18  ;;  %p4122_p11 = scmp.lt.s32.totalorder %s4963_s20, %s4116_s18 }
 0x28d   : > { %p4123_p12 = por %p4122_p11, %p4121_p10 }
 0x28f   : > { %p4124_p0 = pnand %p4123_p12, %p4117_p8 }
 0x291   : > { %4127 = shalt.err (!%p4124_p0)  }
 0x292   : > { %803 = dma.hbm_to_vmem [thread:$0]  %s5612_s11, 32, %s5576_s2, [#allocation4 + $0x16], %s6667_s24, %s6667_s24, %s6666_s13  ;;  %vm1116_vm14 = vcmp.eq.s32.totalorder %v1100_v21, 1  ;;  %vm1115_vm15 = vcmp.eq.s32.totalorder %v1097_v24, 1 }
 0x293   : > { %s3242_s12 = sshll.u32 %s813_s19, 4  ;;  %v1169_v25 = vsel %vm1116_vm14, %v5348_v39, %v5354_v41  ;;  %v1170_v26 = vsel %vm1116_vm14, %v5351_v40, %v5357_v42  ;;  %v1167_v27 = vsel %vm1115_vm15, %v5348_v39, %v5354_v41  ;;  %v1168_v28 = vsel %vm1115_vm15, %v5351_v40, %v5357_v42  ;;  %s4739_s29 = smov [#allocation2 + $0x30]  }
 0x294   : > { %s816_s2 = sadd.s32 %s3242_s12, %s814_s14  ;;  %s5654_s11 = sshll.u32 %s4739_s29, 4  ;;  %v1233_v29 = vadd.f32 %v1201_v19, %v1169_v25  ;;  %v1234_v30 = vadd.f32 %v1202_v20, %v1170_v26  ;;  %v1231_v31 = vadd.f32 %v1199_v22, %v1167_v27  ;;  %v1232_v32 = vadd.f32 %v1200_v23, %v1168_v28  ;;  %s845_s11 = int_to_ptr.vmem [resolvable:$true] %s5654_s11 }
 0x295   : > { %s3243_s19 = sshll.u32 %s816_s2, 4  ;;  %s835_s25 = sshrl.u32 %s5603_s26, 3 }
 0x296   : > { %s818_s17 = scalar_lea.hbm %s6605_s1, %s3243_s19  ;;  %s836_s21 = sand.u32 7, %s5603_s26   ;;  %1265 = vst [vmem:[#allocation3 + $0xf0] sm:$0xff] %v1233_v29  ;;  %1266 = vst [vmem:[#allocation3 + $0xf8] sm:$0xff] %v1234_v30 }
 0x297   : > { %1263 = vst [vmem:[#allocation3 + $0xe0] sm:$0xff] %v1231_v31  ;;  %1264 = vst [vmem:[#allocation3 + $0xe8] sm:$0xff] %v1232_v32  ;;  %s4128_s30 = scalar_lea.hbm %s818_s17, 32  ;;  %p4131_p5 = scmp.lt.u32.totalorder %s818_s17, %s6605_s1 }
 0x298   : > { %p4129_p3 = scmp.ne.s32.totalorder %s818_s17, %s4128_s30  ;;  %p4132_p7 = scmp.lt.u32.totalorder %s4952_s28, %s4128_s30 }
 0x299   : > { %p4134_p13 = scmp.lt.u32.totalorder %s4128_s30, %s818_s17 }
 0x29a   : > { %p4133_p9 = por %p4132_p7, %p4131_p5 }
 0x29c   : > { %p4135_p1 = por %p4134_p13, %p4133_p9 }
 0x29e   : > { %p4136_p2 = pnand %p4135_p1, %p4129_p3 }
 0x2a0   : > { %4139 = shalt.err (!%p4136_p2)  }
 0x2a1   : > { %s4140_s26 = scalar_lea.vmem %s5593_s7, 32  ;;  %p4145_p6 = scmp.lt.s32.totalorder %s5593_s7, %s4945_s16 }
 0x2a2   : > { %p4141_p4 = scmp.ne.s32.totalorder %s5593_s7, %s4140_s26  ;;  %p4146_p8 = scmp.lt.s32.totalorder %s4963_s20, %s4140_s26 }
 0x2a4   : > { %p4147_p10 = por %p4146_p8, %p4145_p6 }
 0x2a6   : > { %p4148_p11 = pnand %p4147_p10, %p4141_p4 }
 0x2a8   : > { %4151 = shalt.err (!%p4148_p11)  }
 0x2a9   : > { %825 = dma.hbm_to_vmem [thread:$0]  %s818_s17, 32, %s5593_s7, [#allocation4 + $0x17], %s6667_s24, %s6667_s24, %s6666_s13 }
 0x2aa   : > { %s3245_s10 = sshll.u32 %s835_s25, 4  ;;  %s855_s0 = sadd.s32 25, %s4892_s23 }
 0x2ab   : > { %s838_s15 = sadd.s32 %s3245_s10, %s836_s21  ;;  %s5676_s12 = sld [smem:[#allocation6 + %s855_s0]] }
 0x2ac   : > { %s3246_s18 = sshll.u32 %s838_s15, 4 }
 0x2ad   : > { %s840_s19 = scalar_lea.hbm %s6605_s1, %s3246_s18 }
 0x2ae   : > { %s4152_s9 = scalar_lea.hbm %s840_s19, 32  ;;  %p4155_p0 = scmp.lt.u32.totalorder %s840_s19, %s6605_s1 }
 0x2af   : > { %p4153_p12 = scmp.ne.s32.totalorder %s840_s19, %s4152_s9  ;;  %p4156_p3 = scmp.lt.u32.totalorder %s4952_s28, %s4152_s9 }
 0x2b0   : > { %p4158_p7 = scmp.lt.u32.totalorder %s4152_s9, %s840_s19 }
 0x2b1   : > { %p4157_p5 = por %p4156_p3, %p4155_p0 }
 0x2b3   : > { %p4159_p9 = por %p4158_p7, %p4157_p5 }
 0x2b5   : > { %p4160_p13 = pnand %p4159_p9, %p4153_p12 }
 0x2b7   : > { %4163 = shalt.err (!%p4160_p13)  }
 0x2b8   : > { %s4164_s7 = scalar_lea.vmem %s845_s11, 32  ;;  %p4169_p2 = scmp.lt.s32.totalorder %s845_s11, %s4945_s16 }
 0x2b9   : > { %p4165_p1 = scmp.ne.s32.totalorder %s845_s11, %s4164_s7  ;;  %p4170_p4 = scmp.lt.s32.totalorder %s4963_s20, %s4164_s7 }
 0x2bb   : > { %p4171_p6 = por %p4170_p4, %p4169_p2 }
 0x2bd   : > { %p4172_p8 = pnand %p4171_p6, %p4165_p1 }
 0x2bf   : > { %4175 = shalt.err (!%p4172_p8)  }
 0x2c0   : > { %847 = dma.hbm_to_vmem [thread:$0]  %s840_s19, 32, %s845_s11, [#allocation4 + $0x18], %s6667_s24, %s6667_s24, %s6666_s13 }
 0x2c1   : > { %s4740_s25 = smov [#allocation2 + $0x31]   ;;  %s877_s21 = sadd.s32 26, %s4892_s23 }
 0x2c2   : > { %s866_s17 = sshll.u32 %s4740_s25, 4  ;;  %s5693_s14 = sld [smem:[#allocation6 + %s877_s21]]  ;;  %s5691_s17 = int_to_ptr.vmem [resolvable:$true] %s866_s17 }
 0x2c3   : > { %s899_s6 = sadd.s32 27, %s4892_s23  ;;  %s857_s26 = sshrl.u32 %s5676_s12, 3 }
 0x2c4   : > { %s858_s10 = sand.u32 7, %s5676_s12   ;;  %s3248_s15 = sshll.u32 %s857_s26, 4 }
 0x2c5   : > { %s4741_s0 = smov [#allocation2 + $0x32]   ;;  %s860_s2 = sadd.s32 %s3248_s15, %s858_s10 }
 0x2c6   : > { %s888_s18 = sshll.u32 %s4741_s0, 4  ;;  %s3249_s29 = sshll.u32 %s860_s2, 4  ;;  %s5698_s18 = int_to_ptr.vmem [resolvable:$true] %s888_s18 }
 0x2c7   : > { %s5700_s11 = sld [smem:[#allocation6 + %s899_s6]]  ;;  %s862_s22 = scalar_lea.hbm %s6605_s1, %s3249_s29 }
 0x2c8   : > { %s879_s30 = sshrl.u32 %s5693_s14, 3  ;;  %s4176_s7 = scalar_lea.hbm %s862_s22, 32 }
 0x2c9   : > { %p4177_p10 = scmp.ne.s32.totalorder %s862_s22, %s4176_s7  ;;  %p4179_p11 = scmp.lt.u32.totalorder %s862_s22, %s6605_s1 }
 0x2ca   : > { %p4180_p12 = scmp.lt.u32.totalorder %s4952_s28, %s4176_s7  ;;  %p4182_p3 = scmp.lt.u32.totalorder %s4176_s7, %s862_s22 }
 0x2cc   : > { %p4181_p0 = por %p4180_p12, %p4179_p11 }
 0x2ce   : > { %p4183_p5 = por %p4182_p3, %p4181_p0 }
 0x2d0   : > { %p4184_p7 = pnand %p4183_p5, %p4177_p10 }
 0x2d2   : > { %4187 = shalt.err (!%p4184_p7)  }
 0x2d3   : > { %s4188_s12 = scalar_lea.vmem %s5691_s17, 32  ;;  %p4193_p13 = scmp.lt.s32.totalorder %s5691_s17, %s4945_s16 }
 0x2d4   : > { %p4189_p9 = scmp.ne.s32.totalorder %s5691_s17, %s4188_s12  ;;  %p4194_p1 = scmp.lt.s32.totalorder %s4963_s20, %s4188_s12 }
 0x2d6   : > { %p4195_p2 = por %p4194_p1, %p4193_p13 }
 0x2d8   : > { %p4196_p4 = pnand %p4195_p2, %p4189_p9 }
 0x2da   : > { %4199 = shalt.err (!%p4196_p4)  }
 0x2db   : > { %869 = dma.hbm_to_vmem [thread:$0]  %s862_s22, 32, %s5691_s17, [#allocation4 + $0x19], %s6667_s24, %s6667_s24, %s6666_s13 }
 0x2dc   : > { %s880_s6 = sand.u32 7, %s5693_s14   ;;  %s3251_s26 = sshll.u32 %s879_s30, 4 }
 0x2dd   : > { %s882_s10 = sadd.s32 %s3251_s26, %s880_s6  ;;  %s4742_s0 = smov [#allocation2 + $0x33]  }
 0x2de   : > { %s3252_s15 = sshll.u32 %s882_s10, 4  ;;  %s910_s2 = sshll.u32 %s4742_s0, 4  ;;  %s911_s2 = int_to_ptr.vmem [resolvable:$true] %s910_s2 }
 0x2df   : > { %s884_s9 = scalar_lea.hbm %s6605_s1, %s3252_s15  ;;  %s901_s7 = sshrl.u32 %s5700_s11, 3 }
 0x2e0   : > { %s4200_s25 = scalar_lea.hbm %s884_s9, 32  ;;  %p4203_p8 = scmp.lt.u32.totalorder %s884_s9, %s6605_s1 }
 0x2e1   : > { %p4201_p6 = scmp.ne.s32.totalorder %s884_s9, %s4200_s25  ;;  %p4204_p10 = scmp.lt.u32.totalorder %s4952_s28, %s4200_s25 }
 0x2e2   : > { %p4206_p12 = scmp.lt.u32.totalorder %s4200_s25, %s884_s9 }
 0x2e3   : > { %p4205_p11 = por %p4204_p10, %p4203_p8 }
 0x2e5   : > { %p4207_p0 = por %p4206_p12, %p4205_p11 }
 0x2e7   : > { %p4208_p3 = pnand %p4207_p0, %p4201_p6 }
 0x2e9   : > { %4211 = shalt.err (!%p4208_p3)  }
 0x2ea   : > { %s4212_s17 = scalar_lea.vmem %s5698_s18, 32  ;;  %p4217_p7 = scmp.lt.s32.totalorder %s5698_s18, %s4945_s16 }
 0x2eb   : > { %p4213_p5 = scmp.ne.s32.totalorder %s5698_s18, %s4212_s17  ;;  %p4218_p9 = scmp.lt.s32.totalorder %s4963_s20, %s4212_s17 }
 0x2ed   : > { %p4219_p13 = por %p4218_p9, %p4217_p7 }
 0x2ef   : > { %p4220_p1 = pnand %p4219_p13, %p4213_p5 }
 0x2f1   : > { %4223 = shalt.err (!%p4220_p1)  }
 0x2f2   : > { %891 = dma.hbm_to_vmem [thread:$0]  %s884_s9, 32, %s5698_s18, [#allocation4 + $0x1a], %s6667_s24, %s6667_s24, %s6666_s13 }
 0x2f3   : > { %s902_s14 = sand.u32 7, %s5700_s11   ;;  %s3254_s22 = sshll.u32 %s901_s7, 4 }
 0x2f4   : > { %s904_s30 = sadd.s32 %s3254_s22, %s902_s14  ;;  %s921_s26 = sadd.s32 28, %s4892_s23 }
 0x2f5   : > { %s3255_s6 = sshll.u32 %s904_s30, 4  ;;  %s5742_s29 = sld [smem:[#allocation6 + %s921_s26]] }
 0x2f6   : > { %s906_s0 = scalar_lea.hbm %s6605_s1, %s3255_s6 }
 0x2f7   : > { %s4224_s19 = scalar_lea.hbm %s906_s0, 32  ;;  %p4227_p4 = scmp.lt.u32.totalorder %s906_s0, %s6605_s1 }
 0x2f8   : > { %p4225_p2 = scmp.ne.s32.totalorder %s906_s0, %s4224_s19  ;;  %p4228_p6 = scmp.lt.u32.totalorder %s4952_s28, %s4224_s19 }
 0x2f9   : > { %p4230_p10 = scmp.lt.u32.totalorder %s4224_s19, %s906_s0 }
 0x2fa   : > { %p4229_p8 = por %p4228_p6, %p4227_p4 }
 0x2fc   : > { %p4231_p11 = por %p4230_p10, %p4229_p8 }
 0x2fe   : > { %p4232_p12 = pnand %p4231_p11, %p4225_p2 }
 0x300   : > { %4235 = shalt.err (!%p4232_p12)  }
 0x301   : > { %s4236_s18 = scalar_lea.vmem %s911_s2, 32  ;;  %p4241_p3 = scmp.lt.s32.totalorder %s911_s2, %s4945_s16 }
 0x302   : > { %p4237_p0 = scmp.ne.s32.totalorder %s911_s2, %s4236_s18  ;;  %p4242_p5 = scmp.lt.s32.totalorder %s4963_s20, %s4236_s18 }
 0x304   : > { %p4243_p7 = por %p4242_p5, %p4241_p3 }
 0x306   : > { %p4244_p9 = pnand %p4243_p7, %p4237_p0 }
 0x308   : > { %4247 = shalt.err (!%p4244_p9)  }
 0x309   : > { %913 = dma.hbm_to_vmem [thread:$0]  %s906_s0, 32, %s911_s2, [#allocation4 + $0x1b], %s6667_s24, %s6667_s24, %s6666_s13 }
 0x30a   : > { %s943_s11 = sadd.s32 29, %s4892_s23  ;;  %s4743_s9 = smov [#allocation2 + $0x34]  }
 0x30b   : > { %s932_s7 = sshll.u32 %s4743_s9, 4  ;;  %s5754_s12 = sld [smem:[#allocation6 + %s943_s11]]  ;;  %s5756_s7 = int_to_ptr.vmem [resolvable:$true] %s932_s7 }
 0x30c   : > { %s4744_s17 = smov [#allocation2 + $0x35]   ;;  %s965_s22 = sadd.s32 30, %s4892_s23 }
 0x30d   : > { %s954_s14 = sshll.u32 %s4744_s17, 4  ;;  %s923_s30 = sshrl.u32 %s5742_s29, 3  ;;  %s5761_s14 = int_to_ptr.vmem [resolvable:$true] %s954_s14 }
 0x30e   : > { %s924_s6 = sand.u32 7, %s5742_s29   ;;  %s3257_s26 = sshll.u32 %s923_s30, 4 }
 0x30f   : > { %s926_s10 = sadd.s32 %s3257_s26, %s924_s6  ;;  %s5763_s2 = sld [smem:[#allocation6 + %s965_s22]] }
 0x310   : > { %s3258_s15 = sshll.u32 %s926_s10, 4 }
 0x311   : > { %s945_s0 = sshrl.u32 %s5754_s12, 3  ;;  %s928_s21 = scalar_lea.hbm %s6605_s1, %s3258_s15 }
 0x312   : > { %s946_s18 = sand.u32 7, %s5754_s12   ;;  %s4248_s11 = scalar_lea.hbm %s928_s21, 32 }
 0x313   : > { %p4249_p13 = scmp.ne.s32.totalorder %s928_s21, %s4248_s11  ;;  %p4251_p1 = scmp.lt.u32.totalorder %s928_s21, %s6605_s1 }
 0x314   : > { %p4252_p2 = scmp.lt.u32.totalorder %s4952_s28, %s4248_s11  ;;  %p4254_p6 = scmp.lt.u32.totalorder %s4248_s11, %s928_s21 }
 0x316   : > { %p4253_p4 = por %p4252_p2, %p4251_p1 }
 0x318   : > { %p4255_p8 = por %p4254_p6, %p4253_p4 }
 0x31a   : > { %p4256_p10 = pnand %p4255_p8, %p4249_p13 }
 0x31c   : > { %4259 = shalt.err (!%p4256_p10)  }
 0x31d   : > { %s4260_s29 = scalar_lea.vmem %s5756_s7, 32  ;;  %p4265_p12 = scmp.lt.s32.totalorder %s5756_s7, %s4945_s16 }
 0x31e   : > { %p4261_p11 = scmp.ne.s32.totalorder %s5756_s7, %s4260_s29  ;;  %p4266_p0 = scmp.lt.s32.totalorder %s4963_s20, %s4260_s29 }
 0x320   : > { %p4267_p3 = por %p4266_p0, %p4265_p12 }
 0x322   : > { %p4268_p5 = pnand %p4267_p3, %p4261_p11 }
 0x324   : > { %4271 = shalt.err (!%p4268_p5)  }
 0x325   : > { %935 = dma.hbm_to_vmem [thread:$0]  %s928_s21, 32, %s5756_s7, [#allocation4 + $0x1c], %s6667_s24, %s6667_s24, %s6666_s13 }
 0x326   : > { %s3260_s12 = sshll.u32 %s945_s0, 4  ;;  %s4745_s30 = smov [#allocation2 + $0x36]  }
 0x327   : > { %s948_s22 = sadd.s32 %s3260_s12, %s946_s18  ;;  %s976_s6 = sshll.u32 %s4745_s30, 4  ;;  %s977_s6 = int_to_ptr.vmem [resolvable:$true] %s976_s6 }
 0x328   : > { %s3261_s26 = sshll.u32 %s948_s22, 4  ;;  %s967_s10 = sshrl.u32 %s5763_s2, 3 }
 0x329   : > { %s950_s25 = scalar_lea.hbm %s6605_s1, %s3261_s26  ;;  %s968_s11 = sand.u32 7, %s5763_s2  }
 0x32a   : > { %s4272_s9 = scalar_lea.hbm %s950_s25, 32  ;;  %p4275_p9 = scmp.lt.u32.totalorder %s950_s25, %s6605_s1 }
 0x32b   : > { %p4273_p7 = scmp.ne.s32.totalorder %s950_s25, %s4272_s9  ;;  %p4276_p13 = scmp.lt.u32.totalorder %s4952_s28, %s4272_s9 }
 0x32c   : > { %p4278_p2 = scmp.lt.u32.totalorder %s4272_s9, %s950_s25 }
 0x32d   : > { %p4277_p1 = por %p4276_p13, %p4275_p9 }
 0x32f   : > { %p4279_p4 = por %p4278_p2, %p4277_p1 }
 0x331   : > { %p4280_p6 = pnand %p4279_p4, %p4273_p7 }
 0x333   : > { %4283 = shalt.err (!%p4280_p6)  }
 0x334   : > { %s4284_s7 = scalar_lea.vmem %s5761_s14, 32  ;;  %p4289_p10 = scmp.lt.s32.totalorder %s5761_s14, %s4945_s16 }
 0x335   : > { %p4285_p8 = scmp.ne.s32.totalorder %s5761_s14, %s4284_s7  ;;  %p4290_p11 = scmp.lt.s32.totalorder %s4963_s20, %s4284_s7 }
 0x337   : > { %p4291_p12 = por %p4290_p11, %p4289_p10 }
 0x339   : > { %p4292_p0 = pnand %p4291_p12, %p4285_p8 }
 0x33b   : > { %4295 = shalt.err (!%p4292_p0)  }
 0x33c   : > { %957 = dma.hbm_to_vmem [thread:$0]  %s950_s25, 32, %s5761_s14, [#allocation4 + $0x1d], %s6667_s24, %s6667_s24, %s6666_s13 }
 0x33d   : > { %s3263_s2 = sshll.u32 %s967_s10, 4  ;;  %s987_s21 = sadd.s32 31, %s4892_s23 }
 0x33e   : > { %s970_s0 = sadd.s32 %s3263_s2, %s968_s11  ;;  %s988_s12 = sld [smem:[#allocation6 + %s987_s21]] }
 0x33f   : > { %s3264_s18 = sshll.u32 %s970_s0, 4 }
 0x340   : > { %s972_s26 = scalar_lea.hbm %s6605_s1, %s3264_s18 }
 0x341   : > { %s4296_s15 = scalar_lea.hbm %s972_s26, 32  ;;  %p4299_p5 = scmp.lt.u32.totalorder %s972_s26, %s6605_s1 }
 0x342   : > { %p4297_p3 = scmp.ne.s32.totalorder %s972_s26, %s4296_s15  ;;  %p4300_p7 = scmp.lt.u32.totalorder %s4952_s28, %s4296_s15 }
 0x343   : > { %p4302_p13 = scmp.lt.u32.totalorder %s4296_s15, %s972_s26 }
 0x344   : > { %p4301_p9 = por %p4300_p7, %p4299_p5 }
 0x346   : > { %p4303_p1 = por %p4302_p13, %p4301_p9 }
 0x348   : > { %p4304_p2 = pnand %p4303_p1, %p4297_p3 }
 0x34a   : > { %4307 = shalt.err (!%p4304_p2)  }
 0x34b   : > { %s4308_s14 = scalar_lea.vmem %s977_s6, 32  ;;  %p4313_p6 = scmp.lt.s32.totalorder %s977_s6, %s4945_s16 }
 0x34c   : > { %p4309_p4 = scmp.ne.s32.totalorder %s977_s6, %s4308_s14  ;;  %p4314_p8 = scmp.lt.s32.totalorder %s4963_s20, %s4308_s14 }
 0x34e   : > { %p4315_p10 = por %p4314_p8, %p4313_p6 }
 0x350   : > { %p4316_p11 = pnand %p4315_p10, %p4309_p4 }
 0x352   : > { %4319 = shalt.err (!%p4316_p11)  }
 0x353   : > { %979 = dma.hbm_to_vmem [thread:$0]  %s972_s26, 32, %s977_s6, [#allocation4 + $0x1e], %s6667_s24, %s6667_s24, %s6666_s13 }
 0x354   : > { %s4746_s23 = smov [#allocation2 + $0x37]   ;;  %s989_s25 = sshrl.u32 %s988_s12, 3 }
 0x355   : > { %s998_s10 = sshll.u32 %s4746_s23, 4  ;;  %s990_s11 = sand.u32 7, %s988_s12   ;;  %s999_s10 = int_to_ptr.vmem [resolvable:$true] %s998_s10 }
 0x356   : > { %s3266_s17 = sshll.u32 %s989_s25, 4 }
 0x357   : > { %s992_s29 = sadd.s32 %s3266_s17, %s990_s11 }
 0x358   : > { %s3267_s7 = sshll.u32 %s992_s29, 4 }
 0x359   : > { %s994_s21 = scalar_lea.hbm %s6605_s1, %s3267_s7 }
 0x35a   : > { %s4320_s18 = scalar_lea.hbm %s994_s21, 32  ;;  %p4323_p0 = scmp.lt.u32.totalorder %s994_s21, %s6605_s1 }
 0x35b   : > { %p4321_p12 = scmp.ne.s32.totalorder %s994_s21, %s4320_s18  ;;  %p4324_p3 = scmp.lt.u32.totalorder %s4952_s28, %s4320_s18 }
 0x35c   : > { %p4326_p7 = scmp.lt.u32.totalorder %s4320_s18, %s994_s21 }
 0x35d   : > { %p4325_p5 = por %p4324_p3, %p4323_p0 }
 0x35f   : > { %p4327_p9 = por %p4326_p7, %p4325_p5 }
 0x361   : > { %p4328_p13 = pnand %p4327_p9, %p4321_p12 }
 0x363   : > { %4331 = shalt.err (!%p4328_p13)  }
 0x364   : > { %s4332_s6 = scalar_lea.vmem %s999_s10, 32  ;;  %p4337_p2 = scmp.lt.s32.totalorder %s999_s10, %s4945_s16 }
 0x365   : > { %p4333_p1 = scmp.ne.s32.totalorder %s999_s10, %s4332_s6  ;;  %p4338_p4 = scmp.lt.s32.totalorder %s4963_s20, %s4332_s6 }
 0x367   : > { %p4339_p6 = por %p4338_p4, %p4337_p2 }
 0x369   : > { %p4340_p8 = pnand %p4339_p6, %p4333_p1 }
 0x36b   : > { %4343 = shalt.err (!%p4340_p8)  }
 0x36c   : > { %1001 = dma.hbm_to_vmem [thread:$0]  %s994_s21, 32, %s999_s10, [#allocation4 + $0x1f], %s6667_s24, %s6667_s24, %s6666_s13 }
 0x36d   : > { %s5827_s12 = scalar_lea.vmem [#allocation10], %s4934_s27  ;;  %s5829_s26 = smov 0  }
 0x36e   : > { %6670 = sst [smem:[#allocation103_spill]] %s5827_s12 }
 0x36f LB: >> { %6671 = sst [smem:[#allocation104_spill]] %s4708_s26  ;;  %s5835_s15 = sshll.u32 %s4708_s26, 3  ;;  %s4708_s26 = sphi %s5829_s26, %s1272_s26  }
 0x370   : >> { %s5838_s19 = sadd.s32 32, %s5835_s15  ;;  %s5841_s27 = sadd.s32 33, %s5835_s15 }
 0x371   : >> { %s1347_s13 = sshra.s32 %s5838_s19, 7  ;;  %s1352_s24 = sand.u32 127, %s5838_s19 }
 0x372   : >> { %s1349_s9 = sadd.s32 %s4696_s8, %s1347_s13  ;;  %s1356_s14 = sshra.s32 %s5841_s27, 7 }
 0x373   : >> { %s3269_s23 = sshll.u32 %s1349_s9, 7  ;;  %s1358_s10 = sadd.s32 %s4696_s8, %s1356_s14 }
 0x374   : >> { %s1353_s25 = sadd.s32 %s3269_s23, %s1352_s24  ;;  %s3270_s11 = sshll.u32 %s1358_s10, 7 }
 0x375   : >> { %s5848_s17 = sld [smem:[#allocation6 + %s1353_s25]]  ;;  %s1361_s29 = sand.u32 127, %s5841_s27 }
 0x376   : >> { %s1362_s7 = sadd.s32 %s3270_s11, %s1361_s29  ;;  %s5852_s2 = sadd.s32 34, %s5835_s15 }
 0x377   : >> { %s5854_s0 = sld [smem:[#allocation6 + %s1362_s7]]  ;;  %s1365_s21 = sshra.s32 %s5852_s2, 7 }
 0x378   : >> { %s1367_s18 = sadd.s32 %s4696_s8, %s1365_s21  ;;  %s1370_s22 = sand.u32 127, %s5852_s2 }
 0x379   : >> { %s3271_s30 = sshll.u32 %s1367_s18, 7  ;;  %s5860_s6 = sadd.s32 35, %s5835_s15 }
 0x37a   : >> { %s1371_s13 = sadd.s32 %s3271_s30, %s1370_s22  ;;  %s1374_s24 = sshra.s32 %s5860_s6, 7 }
 0x37b   : >> { %s5863_s9 = sld [smem:[#allocation6 + %s1371_s13]]  ;;  %s1376_s14 = sadd.s32 %s4696_s8, %s1374_s24 }
 0x37c   : >> { %s3272_s23 = sshll.u32 %s1376_s14, 7  ;;  %s1379_s10 = sand.u32 127, %s5860_s6 }
 0x37d   : >> { %s1380_s25 = sadd.s32 %s3272_s23, %s1379_s10  ;;  %s5868_s11 = sadd.s32 36, %s5835_s15 }
 0x37e   : >> { %6672 = sst [smem:[#allocation105_spill]] %s5868_s11  ;;  %s1383_s7 = sshra.s32 %s5868_s11, 7 }
 0x37f   : >> { %s5870_s29 = sld [smem:[#allocation6 + %s1380_s25]]  ;;  %s1385_s21 = sadd.s32 %s4696_s8, %s1383_s7 }
 0x380   : >> { %s1388_s18 = sand.u32 127, %s5868_s11  ;;  %s3273_s22 = sshll.u32 %s1385_s21, 7 }
 0x381   : >> { %s5876_s30 = sadd.s32 37, %s5835_s15  ;;  %s1389_s13 = sadd.s32 %s3273_s22, %s1388_s18 }
 0x382   : >> { %6673 = sst [smem:[#allocation106_spill]] %s5876_s30  ;;  %s1392_s24 = sshra.s32 %s5876_s30, 7 }
 0x383   : >> { %s5879_s14 = sld [smem:[#allocation6 + %s1389_s13]]  ;;  %s1394_s23 = sadd.s32 %s4696_s8, %s1392_s24 }
 0x384   : >> { %s3274_s10 = sshll.u32 %s1394_s23, 7  ;;  %s1397_s3 = sand.u32 127, %s5876_s30 }
 0x385   : >> { %s1398_s25 = sadd.s32 %s3274_s10, %s1397_s3  ;;  %s5884_s12 = sadd.s32 38, %s5835_s15 }
 0x386   : >> { %6675 = sst [smem:[#allocation108_spill]] %s5884_s12  ;;  %s1401_s21 = sshra.s32 %s5884_s12, 7 }
 0x387   : >> { %s5886_s7 = sld [smem:[#allocation6 + %s1398_s25]]  ;;  %s1403_s5 = sadd.s32 %s4696_s8, %s1401_s21 }
 0x388   : >> { %s1406_s18 = sand.u32 127, %s5884_s12  ;;  %s3275_s22 = sshll.u32 %s1403_s5, 7 }
 0x389   : >> { %6674 = sst [smem:[#allocation107_spill]] %s5879_s14  ;;  %s5892_s4 = sadd.s32 39, %s5835_s15 }
 0x38a   : >> { %s1407_s13 = sadd.s32 %s3275_s22, %s1406_s18  ;;  %s1410_s24 = sshra.s32 %s5892_s4, 7 }
 0x38b   : >> { %s5895_s23 = sld [smem:[#allocation6 + %s1407_s13]]  ;;  %s1412_s3 = sadd.s32 %s4696_s8, %s1410_s24 }
 0x38c   : >> { %s3276_s10 = sshll.u32 %s1412_s3, 7  ;;  %s1415_s26 = sand.u32 127, %s5892_s4 }
 0x38d   : >> { %6676 = sst [smem:[#allocation109_spill]] %s5886_s7  ;;  %s1416_s30 = sadd.s32 %s3276_s10, %s1415_s26 }
 0x38e   : >> { %p1418_p10 = scmp.lt.s32.totalorder %s5835_s15, 0  ;;  %s5900_s25 = sld [smem:[#allocation6 + %s1416_s30]] }
 0x38f   : >> { %s1419_s7 = ssub.s32 0, %s5835_s15 }
 0x390   : >> { %s3277_s14 = smin.u32 %s5835_s15, %s1419_s7 }
 0x391   : >> { %s1421_s21 = sand.u32 31, %s3277_s14  }
 0x392   : >> { %s1422_s12 = ssub.s32 0, %s1421_s21 }
 0x393   : >> { %s6704_s12 = smov (!%p1418_p10, %s1422_s12), %s1421_s21 }
 0x394   : >> { %p3279_p11 = scmp.lt.s32.totalorder %s6704_s12, 0  ;;  %s1428_s5 = sadd.s32 32, %s6704_s12 }
 0x396   : >> { %s6706_s5 = smov (!%p3279_p11, %s1428_s5), %s6704_s12 }
 0x397   : >> { %s1430_s11 = scalar_lea.sflag [#allocation4], %s6706_s5 }
 0x398   : >> { %4598 = dma.done.wait %s1430_s11, 32 }
 0x399   : >> { %4599 = vsyncadd %s1430_s11, 4294967264  ;;  %p1434_p12 = scmp.lt.s32.totalorder %s5838_s19, 0  ;;  %s1435_s26 = ssub.s32 0, %s5838_s19 }
 0x39a   : >> { %s3280_s30 = smin.u32 %s1435_s26, %s5838_s19  ;;  %s1446_s7 = sshrl.u32 %s5848_s17, 3 }
 0x39b   : >> { %s1437_s14 = sand.u32 31, %s3280_s30   ;;  %s1447_s18 = sand.u32 7, %s5848_s17  }
 0x39c   : >> { %s1438_s22 = ssub.s32 0, %s1437_s14  ;;  %s3283_s13 = sshll.u32 %s1446_s7, 4 }
 0x39d   : >> { %s6708_s22 = smov (!%p1434_p12, %s1438_s22), %s1437_s14  ;;  %s1449_s12 = sadd.s32 %s3283_s13, %s1447_s18 }
 0x39e   : >> { %s1452_s24 = sshrl.u32 %s5838_s19, 3  ;;  %p3282_p0 = scmp.lt.s32.totalorder %s6708_s22, 0 }
 0x39f   : >> { %s1444_s11 = sadd.s32 32, %s6708_s22  ;;  %s3284_s3 = sshll.u32 %s1449_s12, 4 }
 0x3a0   : >> { %s1453_s10 = sand.u32 7, %s5838_s19   ;;  %s6710_s11 = smov (!%p3282_p0, %s1444_s11), %s6708_s22 }
 0x3a1   : >> { %s5916_s26 = scalar_lea.hbm %s6605_s1, %s3284_s3  ;;  %s3285_s17 = sshll.u32 %s1452_s24, 4 }
 0x3a2   : >> { %s1455_s30 = sadd.s32 %s3285_s17, %s1453_s10  ;;  %s1463_s18 = sadd.s32 1, %s5835_s15 }
 0x3a3   : >> { %s1456_s7 = scalar_lea.vmem [#allocation2], %s1455_s30  ;;  %s1457_s13 = scalar_lea.sflag [#allocation4], %s6710_s11 }
 0x3a4   : >> { %s1459_s14 = sshll.u32 %s1456_s7, 4  ;;  %s4344_s19 = scalar_lea.hbm %s5916_s26, 32  ;;  %s1460_s14 = int_to_ptr.vmem [resolvable:$true] %s1459_s14 }
 0x3a5   : >> { %p4345_p3 = scmp.ne.s32.totalorder %s5916_s26, %s4344_s19  ;;  %p4347_p5 = scmp.lt.u32.totalorder %s5916_s26, %s6605_s1 }
 0x3a6   : >> { %p4348_p7 = scmp.lt.u32.totalorder %s4952_s28, %s4344_s19  ;;  %p4350_p13 = scmp.lt.u32.totalorder %s4344_s19, %s5916_s26 }
 0x3a8   : >> { %p4349_p9 = por %p4348_p7, %p4347_p5 }
 0x3aa   : >> { %p4351_p1 = por %p4350_p13, %p4349_p9 }
 0x3ac   : >> { %p4352_p2 = pnand %p4351_p1, %p4345_p3 }
 0x3ae   : >> { %4355 = shalt.err (!%p4352_p2)  }
 0x3af   : >> { %s4356_s3 = scalar_lea.vmem %s1460_s14, 32  ;;  %p4361_p6 = scmp.lt.s32.totalorder %s1460_s14, %s4945_s16 }
 0x3b0   : >> { %p4357_p4 = scmp.ne.s32.totalorder %s1460_s14, %s4356_s3  ;;  %p4362_p8 = scmp.lt.s32.totalorder %s4963_s20, %s4356_s3 }
 0x3b2   : >> { %p4363_p10 = por %p4362_p8, %p4361_p6 }
 0x3b4   : >> { %p4364_p11 = pnand %p4363_p10, %p4357_p4 }
 0x3b6   : >> { %4367 = shalt.err (!%p4364_p11)  }
 0x3b7   : >> { %s4747_s24 = smov 128   ;;  %s4748_s11 = smov 1  }
 0x3b8   : >> { %1462 = dma.hbm_to_vmem [thread:$0]  %s5916_s26, 32, %s1460_s14, %s1457_s13, %s4747_s24, %s4747_s24, %s4748_s11 }
 0x3b9   : >> { %p1464_p12 = scmp.lt.s32.totalorder %s1463_s18, 0  ;;  %s1465_s10 = ssub.s32 0, %s1463_s18 }
 0x3ba   : >> { %s3286_s21 = smin.u32 %s1465_s10, %s1463_s18 }
 0x3bb   : >> { %s1467_s5 = sand.u32 31, %s3286_s21  }
 0x3bc   : >> { %s1468_s17 = ssub.s32 0, %s1467_s5 }
 0x3bd   : >> { %s6712_s17 = smov (!%p1464_p12, %s1468_s17), %s1467_s5 }
 0x3be   : >> { %p3288_p0 = scmp.lt.s32.totalorder %s6712_s17, 0  ;;  %s1474_s30 = sadd.s32 32, %s6712_s17 }
 0x3c0   : >> { %s6714_s30 = smov (!%p3288_p0, %s1474_s30), %s6712_s17 }
 0x3c1   : >> { %s1476_s7 = scalar_lea.sflag [#allocation4], %s6714_s30 }
 0x3c2   : >> { %4600 = dma.done.wait %s1476_s7, 32 }
 0x3c3   : >> { %4601 = vsyncadd %s1476_s7, 4294967264  ;;  %p1480_p3 = scmp.lt.s32.totalorder %s5841_s27, 0  ;;  %s1481_s26 = ssub.s32 0, %s5841_s27 }
 0x3c4   : >> { %s3289_s14 = smin.u32 %s1481_s26, %s5841_s27  ;;  %s1492_s18 = sshrl.u32 %s5854_s0, 3 }
 0x3c5   : >> { %s1483_s13 = sand.u32 31, %s3289_s14   ;;  %s1493_s19 = sand.u32 7, %s5854_s0  }
 0x3c6   : >> { %s1484_s22 = ssub.s32 0, %s1483_s13  ;;  %s3292_s12 = sshll.u32 %s1492_s18, 4 }
 0x3c7   : >> { %s6716_s22 = smov (!%p1480_p3, %s1484_s22), %s1483_s13  ;;  %s1495_s3 = sadd.s32 %s3292_s12, %s1493_s19 }
 0x3c8   : >> { %s1498_s10 = sshrl.u32 %s5841_s27, 3  ;;  %p3291_p5 = scmp.lt.s32.totalorder %s6716_s22, 0 }
 0x3c9   : >> { %s1490_s21 = sadd.s32 32, %s6716_s22  ;;  %s3293_s5 = sshll.u32 %s1495_s3, 4 }
 0x3ca   : >> { %s1499_s17 = sand.u32 7, %s5841_s27   ;;  %s6718_s21 = smov (!%p3291_p5, %s1490_s21), %s6716_s22 }
 0x3cb   : >> { %s5946_s26 = scalar_lea.hbm %s6605_s1, %s3293_s5  ;;  %s3294_s0 = sshll.u32 %s1498_s10, 4 }
 0x3cc   : >> { %s1501_s14 = sadd.s32 %s3294_s0, %s1499_s17  ;;  %s1509_s18 = sadd.s32 2, %s5835_s15 }
 0x3cd   : >> { %s1502_s13 = scalar_lea.vmem [#allocation2], %s1501_s14  ;;  %p1510_p7 = scmp.lt.s32.totalorder %s1509_s18, 0 }
 0x3ce   : >> { %s1505_s19 = sshll.u32 %s1502_s13, 4  ;;  %s1511_s27 = ssub.s32 0, %s1509_s18  ;;  %s1506_s19 = int_to_ptr.vmem [resolvable:$true] %s1505_s19 }
 0x3cf   : >> { %s1503_s22 = scalar_lea.sflag [#allocation4], %s6718_s21  ;;  %s4368_s12 = scalar_lea.hbm %s5946_s26, 32 }
 0x3d0   : >> { %p4369_p9 = scmp.ne.s32.totalorder %s5946_s26, %s4368_s12  ;;  %p4371_p13 = scmp.lt.u32.totalorder %s5946_s26, %s6605_s1 }
 0x3d1   : >> { %p4372_p1 = scmp.lt.u32.totalorder %s4952_s28, %s4368_s12  ;;  %p4374_p4 = scmp.lt.u32.totalorder %s4368_s12, %s5946_s26 }
 0x3d3   : >> { %p4373_p2 = por %p4372_p1, %p4371_p13 }
 0x3d5   : >> { %p4375_p6 = por %p4374_p4, %p4373_p2 }
 0x3d7   : >> { %p4376_p8 = pnand %p4375_p6, %p4369_p9 }
 0x3d9   : >> { %4379 = shalt.err (!%p4376_p8)  }
 0x3da   : >> { %s4380_s10 = scalar_lea.vmem %s1506_s19, 32  ;;  %p4385_p11 = scmp.lt.s32.totalorder %s1506_s19, %s4945_s16 }
 0x3db   : >> { %p4381_p10 = scmp.ne.s32.totalorder %s1506_s19, %s4380_s10  ;;  %p4386_p12 = scmp.lt.s32.totalorder %s4963_s20, %s4380_s10 }
 0x3dd   : >> { %p4387_p0 = por %p4386_p12, %p4385_p11 }
 0x3df   : >> { %p4388_p3 = pnand %p4387_p0, %p4381_p10 }
 0x3e1   : >> { %4391 = shalt.err (!%p4388_p3)  }
 0x3e2   : >> { %1508 = dma.hbm_to_vmem [thread:$0]  %s5946_s26, 32, %s1506_s19, %s1503_s22, %s4747_s24, %s4747_s24, %s4748_s11 }
 0x3e3   : >> { %s3295_s21 = smin.u32 %s1511_s27, %s1509_s18 }
 0x3e4   : >> { %s1513_s5 = sand.u32 31, %s3295_s21  }
 0x3e5   : >> { %s1514_s17 = ssub.s32 0, %s1513_s5 }
 0x3e6   : >> { %s6720_s17 = smov (!%p1510_p7, %s1514_s17), %s1513_s5 }
 0x3e7   : >> { %p3297_p5 = scmp.lt.s32.totalorder %s6720_s17, 0  ;;  %s1520_s7 = sadd.s32 32, %s6720_s17 }
 0x3e9   : >> { %s6722_s7 = smov (!%p3297_p5, %s1520_s7), %s6720_s17 }
 0x3ea   : >> { %s1522_s0 = scalar_lea.sflag [#allocation4], %s6722_s7 }
 0x3eb   : >> { %4602 = dma.done.wait %s1522_s0, 32 }
 0x3ec   : >> { %4603 = vsyncadd %s1522_s0, 4294967264  ;;  %p1526_p9 = scmp.lt.s32.totalorder %s5852_s2, 0  ;;  %s1527_s26 = ssub.s32 0, %s5852_s2 }
 0x3ed   : >> { %s3298_s14 = smin.u32 %s1527_s26, %s5852_s2  ;;  %s1538_s13 = sshrl.u32 %s5863_s9, 3 }
 0x3ee   : >> { %s1529_s18 = sand.u32 31, %s3298_s14   ;;  %s1539_s19 = sand.u32 7, %s5863_s9  }
 0x3ef   : >> { %s1530_s27 = ssub.s32 0, %s1529_s18  ;;  %s3301_s22 = sshll.u32 %s1538_s13, 4 }
 0x3f0   : >> { %s6724_s27 = smov (!%p1526_p9, %s1530_s27), %s1529_s18  ;;  %s1541_s12 = sadd.s32 %s3301_s22, %s1539_s19 }
 0x3f1   : >> { %s1544_s3 = sshrl.u32 %s5852_s2, 3  ;;  %p3300_p7 = scmp.lt.s32.totalorder %s6724_s27, 0 }
 0x3f2   : >> { %s1536_s30 = sadd.s32 32, %s6724_s27  ;;  %s3302_s10 = sshll.u32 %s1541_s12, 4 }
 0x3f3   : >> { %s1545_s21 = sand.u32 7, %s5852_s2   ;;  %s6726_s30 = smov (!%p3300_p7, %s1536_s30), %s6724_s27 }
 0x3f4   : >> { %s5977_s7 = scalar_lea.hbm %s6605_s1, %s3302_s10  ;;  %s3303_s9 = sshll.u32 %s1544_s3, 4 }
 0x3f5   : >> { %s1547_s0 = sadd.s32 %s3303_s9, %s1545_s21  ;;  %s1555_s26 = sadd.s32 3, %s5835_s15 }
 0x3f6   : >> { %s1548_s14 = scalar_lea.vmem [#allocation2], %s1547_s0  ;;  %p1556_p13 = scmp.lt.s32.totalorder %s1555_s26, 0 }
 0x3f7   : >> { %s1551_s13 = sshll.u32 %s1548_s14, 4  ;;  %s1557_s2 = ssub.s32 0, %s1555_s26  ;;  %s1552_s13 = int_to_ptr.vmem [resolvable:$true] %s1551_s13 }
 0x3f8   : >> { %s1549_s18 = scalar_lea.sflag [#allocation4], %s6726_s30  ;;  %s4392_s19 = scalar_lea.hbm %s5977_s7, 32 }
 0x3f9   : >> { %p4393_p1 = scmp.ne.s32.totalorder %s5977_s7, %s4392_s19  ;;  %p4395_p2 = scmp.lt.u32.totalorder %s5977_s7, %s6605_s1 }
 0x3fa   : >> { %p4396_p4 = scmp.lt.u32.totalorder %s4952_s28, %s4392_s19  ;;  %p4398_p8 = scmp.lt.u32.totalorder %s4392_s19, %s5977_s7 }
 0x3fc   : >> { %p4397_p6 = por %p4396_p4, %p4395_p2 }
 0x3fe   : >> { %p4399_p10 = por %p4398_p8, %p4397_p6 }
 0x400   : >> { %p4400_p11 = pnand %p4399_p10, %p4393_p1 }
 0x402   : >> { %4403 = shalt.err (!%p4400_p11)  }
 0x403   : >> { %s4404_s12 = scalar_lea.vmem %s1552_s13, 32  ;;  %p4409_p0 = scmp.lt.s32.totalorder %s1552_s13, %s4945_s16 }
 0x404   : >> { %p4405_p12 = scmp.ne.s32.totalorder %s1552_s13, %s4404_s12  ;;  %p4410_p3 = scmp.lt.s32.totalorder %s4963_s20, %s4404_s12 }
 0x406   : >> { %p4411_p5 = por %p4410_p3, %p4409_p0 }
 0x408   : >> { %p4412_p9 = pnand %p4411_p5, %p4405_p12 }
 0x40a   : >> { %4415 = shalt.err (!%p4412_p9)  }
 0x40b   : >> { %1554 = dma.hbm_to_vmem [thread:$0]  %s5977_s7, 32, %s1552_s13, %s1549_s18, %s4747_s24, %s4747_s24, %s4748_s11 }
 0x40c   : >> { %s3304_s3 = smin.u32 %s1557_s2, %s1555_s26 }
 0x40d   : >> { %s1559_s30 = sand.u32 31, %s3304_s3  }
 0x40e   : >> { %s1560_s10 = ssub.s32 0, %s1559_s30 }
 0x40f   : >> { %s6728_s10 = smov (!%p1556_p13, %s1560_s10), %s1559_s30 }
 0x410   : >> { %p3306_p7 = scmp.lt.s32.totalorder %s6728_s10, 0  ;;  %s1566_s21 = sadd.s32 32, %s6728_s10 }
 0x412   : >> { %s6730_s21 = smov (!%p3306_p7, %s1566_s21), %s6728_s10 }
 0x413   : >> { %s1568_s5 = scalar_lea.sflag [#allocation4], %s6730_s21 }
 0x414   : >> { %4604 = dma.done.wait %s1568_s5, 32 }
 0x415   : >> { %4605 = vsyncadd %s1568_s5, 4294967264  ;;  %p1572_p1 = scmp.lt.s32.totalorder %s5860_s6, 0  ;;  %s1573_s17 = ssub.s32 0, %s5860_s6 }
 0x416   : >> { %s3307_s7 = smin.u32 %s1573_s17, %s5860_s6  ;;  %s1584_s9 = sshrl.u32 %s5870_s29, 3 }
 0x417   : >> { %s1575_s0 = sand.u32 31, %s3307_s7   ;;  %s1585_s26 = sand.u32 7, %s5870_s29  }
 0x418   : >> { %s1576_s14 = ssub.s32 0, %s1575_s0  ;;  %s3310_s13 = sshll.u32 %s1584_s9, 4 }
 0x419   : >> { %s6732_s14 = smov (!%p1572_p1, %s1576_s14), %s1575_s0  ;;  %s1587_s2 = sadd.s32 %s3310_s13, %s1585_s26 }
 0x41a   : >> { %s1590_s18 = sshrl.u32 %s5860_s6, 3  ;;  %p3309_p13 = scmp.lt.s32.totalorder %s6732_s14, 0 }
 0x41b   : >> { %s1582_s19 = sadd.s32 32, %s6732_s14  ;;  %s3311_s27 = sshll.u32 %s1587_s2, 4 }
 0x41c   : >> { %s1591_s22 = sand.u32 7, %s5860_s6   ;;  %s6734_s19 = smov (!%p3309_p13, %s1582_s19), %s6732_s14 }
 0x41d   : >> { %s6008_s30 = scalar_lea.hbm %s6605_s1, %s3311_s27  ;;  %s3312_s29 = sshll.u32 %s1590_s18, 4 }
 0x41e   : >> { %s1593_s10 = sadd.s32 %s3312_s29, %s1591_s22  ;;  %s1601_s21 = sadd.s32 4, %s5835_s15 }
 0x41f   : >> { %s1594_s5 = scalar_lea.vmem [#allocation2], %s1593_s10  ;;  %p1602_p2 = scmp.lt.s32.totalorder %s1601_s21, 0 }
 0x420   : >> { %s1597_s17 = sshll.u32 %s1594_s5, 4  ;;  %s1603_s6 = ssub.s32 0, %s1601_s21  ;;  %s1598_s17 = int_to_ptr.vmem [resolvable:$true] %s1597_s17 }
 0x421   : >> { %s1595_s7 = scalar_lea.sflag [#allocation4], %s6734_s19  ;;  %s4416_s9 = scalar_lea.hbm %s6008_s30, 32 }
 0x422   : >> { %p4417_p4 = scmp.ne.s32.totalorder %s6008_s30, %s4416_s9  ;;  %p4419_p6 = scmp.lt.u32.totalorder %s6008_s30, %s6605_s1 }
 0x423   : >> { %p4420_p8 = scmp.lt.u32.totalorder %s4952_s28, %s4416_s9  ;;  %p4422_p11 = scmp.lt.u32.totalorder %s4416_s9, %s6008_s30 }
 0x425   : >> { %p4421_p10 = por %p4420_p8, %p4419_p6 }
 0x427   : >> { %p4423_p12 = por %p4422_p11, %p4421_p10 }
 0x429   : >> { %p4424_p0 = pnand %p4423_p12, %p4417_p4 }
 0x42b   : >> { %4427 = shalt.err (!%p4424_p0)  }
 0x42c   : >> { %s4428_s14 = scalar_lea.vmem %s1598_s17, 32  ;;  %p4433_p5 = scmp.lt.s32.totalorder %s1598_s17, %s4945_s16 }
 0x42d   : >> { %p4429_p3 = scmp.ne.s32.totalorder %s1598_s17, %s4428_s14  ;;  %p4434_p9 = scmp.lt.s32.totalorder %s4963_s20, %s4428_s14 }
 0x42f   : >> { %p4435_p7 = por %p4434_p9, %p4433_p5 }
 0x431   : >> { %p4436_p1 = pnand %p4435_p7, %p4429_p3 }
 0x433   : >> { %4439 = shalt.err (!%p4436_p1)  }
 0x434   : >> { %1600 = dma.hbm_to_vmem [thread:$0]  %s6008_s30, 32, %s1598_s17, %s1595_s7, %s4747_s24, %s4747_s24, %s4748_s11 }
 0x435   : >> { %s3313_s13 = smin.u32 %s1603_s6, %s1601_s21 }
 0x436   : >> { %s1605_s2 = sand.u32 31, %s3313_s13  }
 0x437   : >> { %s1606_s18 = ssub.s32 0, %s1605_s2 }
 0x438   : >> { %s6736_s18 = smov (!%p1602_p2, %s1606_s18), %s1605_s2 }
 0x439   : >> { %p3315_p13 = scmp.lt.s32.totalorder %s6736_s18, 0  ;;  %s1612_s19 = sadd.s32 32, %s6736_s18 }
 0x43b   : >> { %s6738_s19 = smov (!%p3315_p13, %s1612_s19), %s6736_s18 }
 0x43c   : >> { %s1614_s27 = scalar_lea.sflag [#allocation4], %s6738_s19 }
 0x43d   : >> { %4606 = dma.done.wait %s1614_s27, 32 }
 0x43e   : >> { %4607 = vsyncadd %s1614_s27, 4294967264  ;;  %s6677_s22 = sld [smem:[#allocation105_spill]]  ;;  %s6678_s12 = sld [smem:[#allocation107_spill]] }
 0x43f   : >> { %s1647_s27 = sadd.s32 5, %s5835_s15 }
 0x440   : >> { %p1648_p6 = scmp.lt.s32.totalorder %s1647_s27, 0 }
 0x444   : >> { %p1618_p4 = scmp.lt.s32.totalorder %s6677_s22, 0  ;;  %s1619_s3 = ssub.s32 0, %s6677_s22 }
 0x445   : >> { %s3316_s30 = smin.u32 %s1619_s3, %s6677_s22  ;;  %s1630_s29 = sshrl.u32 %s6678_s12, 3 }
 0x446   : >> { %s1621_s10 = sand.u32 31, %s3316_s30   ;;  %s1631_s21 = sand.u32 7, %s6678_s12  }
 0x447   : >> { %s1622_s5 = ssub.s32 0, %s1621_s10  ;;  %s3319_s17 = sshll.u32 %s1630_s29, 4 }
 0x448   : >> { %s6740_s5 = smov (!%p1618_p4, %s1622_s5), %s1621_s10  ;;  %s1633_s6 = sadd.s32 %s3319_s17, %s1631_s21 }
 0x449   : >> { %s1636_s7 = sshrl.u32 %s6677_s22, 3  ;;  %p3318_p2 = scmp.lt.s32.totalorder %s6740_s5, 0 }
 0x44a   : >> { %s1628_s9 = sadd.s32 32, %s6740_s5  ;;  %s3320_s0 = sshll.u32 %s1633_s6, 4 }
 0x44b   : >> { %s1637_s26 = sand.u32 7, %s6677_s22   ;;  %s6742_s9 = smov (!%p3318_p2, %s1628_s9), %s6740_s5 }
 0x44c   : >> { %s6039_s2 = scalar_lea.hbm %s6605_s1, %s3320_s0  ;;  %s3321_s18 = sshll.u32 %s1636_s7, 4 }
 0x44d   : >> { %s1639_s19 = sadd.s32 %s3321_s18, %s1637_s26  ;;  %s1649_s22 = ssub.s32 0, %s1647_s27 }
 0x44e   : >> { %s1640_s12 = scalar_lea.vmem [#allocation2], %s1639_s19  ;;  %s1641_s30 = scalar_lea.sflag [#allocation4], %s6742_s9 }
 0x44f   : >> { %s1643_s3 = sshll.u32 %s1640_s12, 4  ;;  %s4440_s29 = scalar_lea.hbm %s6039_s2, 32  ;;  %s1644_s3 = int_to_ptr.vmem [resolvable:$true] %s1643_s3 }
 0x450   : >> { %p4441_p8 = scmp.ne.s32.totalorder %s6039_s2, %s4440_s29  ;;  %p4443_p10 = scmp.lt.u32.totalorder %s6039_s2, %s6605_s1 }
 0x451   : >> { %p4444_p11 = scmp.lt.u32.totalorder %s4952_s28, %s4440_s29  ;;  %p4446_p0 = scmp.lt.u32.totalorder %s4440_s29, %s6039_s2 }
 0x453   : >> { %p4445_p12 = por %p4444_p11, %p4443_p10 }
 0x455   : >> { %p4447_p3 = por %p4446_p0, %p4445_p12 }
 0x457   : >> { %p4448_p5 = pnand %p4447_p3, %p4441_p8 }
 0x459   : >> { %4451 = shalt.err (!%p4448_p5)  }
 0x45a   : >> { %s4452_s5 = scalar_lea.vmem %s1644_s3, 32  ;;  %p4457_p7 = scmp.lt.s32.totalorder %s1644_s3, %s4945_s16 }
 0x45b   : >> { %p4453_p9 = scmp.ne.s32.totalorder %s1644_s3, %s4452_s5  ;;  %p4458_p1 = scmp.lt.s32.totalorder %s4963_s20, %s4452_s5 }
 0x45d   : >> { %p4459_p13 = por %p4458_p1, %p4457_p7 }
 0x45f   : >> { %p4460_p4 = pnand %p4459_p13, %p4453_p9 }
 0x461   : >> { %4463 = shalt.err (!%p4460_p4)  }
 0x462   : >> { %1646 = dma.hbm_to_vmem [thread:$0]  %s6039_s2, 32, %s1644_s3, %s1641_s30, %s4747_s24, %s4747_s24, %s4748_s11 }
 0x463   : >> { %s3322_s17 = smin.u32 %s1649_s22, %s1647_s27 }
 0x464   : >> { %s1651_s6 = sand.u32 31, %s3322_s17  }
 0x465   : >> { %s1652_s7 = ssub.s32 0, %s1651_s6 }
 0x466   : >> { %s6744_s7 = smov (!%p1648_p6, %s1652_s7), %s1651_s6 }
 0x467   : >> { %p3324_p2 = scmp.lt.s32.totalorder %s6744_s7, 0  ;;  %s1658_s9 = sadd.s32 32, %s6744_s7 }
 0x469   : >> { %s6746_s9 = smov (!%p3324_p2, %s1658_s9), %s6744_s7 }
 0x46a   : >> { %s1660_s0 = scalar_lea.sflag [#allocation4], %s6746_s9 }
 0x46b   : >> { %4608 = dma.done.wait %s1660_s0, 32 }
 0x46c   : >> { %4609 = vsyncadd %s1660_s0, 4294967264  ;;  %s6679_s26 = sld [smem:[#allocation106_spill]]  ;;  %s6680_s14 = sld [smem:[#allocation109_spill]] }
 0x46d   : >> { %s1693_s0 = sadd.s32 6, %s5835_s15 }
 0x46e   : >> { %p1694_p10 = scmp.lt.s32.totalorder %s1693_s0, 0 }
 0x472   : >> { %p1664_p8 = scmp.lt.s32.totalorder %s6679_s26, 0  ;;  %s1665_s13 = ssub.s32 0, %s6679_s26 }
 0x473   : >> { %s3325_s2 = smin.u32 %s1665_s13, %s6679_s26  ;;  %s1676_s18 = sshrl.u32 %s6680_s14, 3 }
 0x474   : >> { %s1667_s19 = sand.u32 31, %s3325_s2   ;;  %s1677_s27 = sand.u32 7, %s6680_s14  }
 0x475   : >> { %s1668_s12 = ssub.s32 0, %s1667_s19  ;;  %s3328_s3 = sshll.u32 %s1676_s18, 4 }
 0x476   : >> { %s6748_s12 = smov (!%p1664_p8, %s1668_s12), %s1667_s19  ;;  %s1679_s22 = sadd.s32 %s3328_s3, %s1677_s27 }
 0x477   : >> { %s1682_s30 = sshrl.u32 %s6679_s26, 3  ;;  %p3327_p6 = scmp.lt.s32.totalorder %s6748_s12, 0 }
 0x478   : >> { %s1674_s29 = sadd.s32 32, %s6748_s12  ;;  %s3329_s10 = sshll.u32 %s1679_s22, 4 }
 0x479   : >> { %s1683_s21 = sand.u32 7, %s6679_s26   ;;  %s6750_s29 = smov (!%p3327_p6, %s1674_s29), %s6748_s12 }
 0x47a   : >> { %s6070_s6 = scalar_lea.hbm %s6605_s1, %s3329_s10  ;;  %s3330_s7 = sshll.u32 %s1682_s30, 4 }
 0x47b   : >> { %s1685_s9 = sadd.s32 %s3330_s7, %s1683_s21  ;;  %s1695_s26 = ssub.s32 0, %s1693_s0 }
 0x47c   : >> { %s1686_s14 = scalar_lea.vmem [#allocation2], %s1685_s9  ;;  %s1687_s2 = scalar_lea.sflag [#allocation4], %s6750_s29 }
 0x47d   : >> { %s1689_s13 = sshll.u32 %s1686_s14, 4  ;;  %s4464_s18 = scalar_lea.hbm %s6070_s6, 32  ;;  %s1690_s13 = int_to_ptr.vmem [resolvable:$true] %s1689_s13 }
 0x47e   : >> { %p4465_p11 = scmp.ne.s32.totalorder %s6070_s6, %s4464_s18  ;;  %p4467_p12 = scmp.lt.u32.totalorder %s6070_s6, %s6605_s1 }
 0x47f   : >> { %p4468_p0 = scmp.lt.u32.totalorder %s4952_s28, %s4464_s18  ;;  %p4470_p5 = scmp.lt.u32.totalorder %s4464_s18, %s6070_s6 }
 0x481   : >> { %p4469_p3 = por %p4468_p0, %p4467_p12 }
 0x483   : >> { %p4471_p9 = por %p4470_p5, %p4469_p3 }
 0x485   : >> { %p4472_p7 = pnand %p4471_p9, %p4465_p11 }
 0x487   : >> { %4475 = shalt.err (!%p4472_p7)  }
 0x488   : >> { %s4476_s12 = scalar_lea.vmem %s1690_s13, 32  ;;  %p4481_p13 = scmp.lt.s32.totalorder %s1690_s13, %s4945_s16 }
 0x489   : >> { %p4477_p1 = scmp.ne.s32.totalorder %s1690_s13, %s4476_s12  ;;  %p4482_p4 = scmp.lt.s32.totalorder %s4963_s20, %s4476_s12 }
 0x48b   : >> { %p4483_p2 = por %p4482_p4, %p4481_p13 }
 0x48d   : >> { %p4484_p8 = pnand %p4483_p2, %p4477_p1 }
 0x48f   : >> { %4487 = shalt.err (!%p4484_p8)  }
 0x490   : >> { %1692 = dma.hbm_to_vmem [thread:$0]  %s6070_s6, 32, %s1690_s13, %s1687_s2, %s4747_s24, %s4747_s24, %s4748_s11 }
 0x491   : >> { %s3331_s3 = smin.u32 %s1695_s26, %s1693_s0 }
 0x492   : >> { %s1697_s22 = sand.u32 31, %s3331_s3  }
 0x493   : >> { %s1698_s30 = ssub.s32 0, %s1697_s22 }
 0x494   : >> { %s6752_s30 = smov (!%p1694_p10, %s1698_s30), %s1697_s22 }
 0x495   : >> { %p3333_p6 = scmp.lt.s32.totalorder %s6752_s30, 0  ;;  %s1704_s29 = sadd.s32 32, %s6752_s30 }
 0x497   : >> { %s6754_s29 = smov (!%p3333_p6, %s1704_s29), %s6752_s30 }
 0x498   : >> { %s1706_s10 = scalar_lea.sflag [#allocation4], %s6754_s29 }
 0x499   : >> { %4610 = dma.done.wait %s1706_s10, 32 }
 0x49a   : >> { %4611 = vsyncadd %s1706_s10, 4294967264  ;;  %s6681_s21 = sld [smem:[#allocation108_spill]]  ;;  %s1722_s6 = sshrl.u32 %s5895_s23, 3 }
 0x49b   : >> { %s1723_s9 = sand.u32 7, %s5895_s23   ;;  %s3337_s14 = sshll.u32 %s1722_s6, 4 }
 0x49c   : >> { %s1725_s13 = sadd.s32 %s3337_s14, %s1723_s9  ;;  %s1739_s30 = sadd.s32 7, %s5835_s15 }
 0x49d   : >> { %s3338_s18 = sshll.u32 %s1725_s13, 4  ;;  %p1740_p12 = scmp.lt.s32.totalorder %s1739_s30, 0 }
 0x49e   : >> { %s6101_s3 = scalar_lea.hbm %s6605_s1, %s3338_s18 }
 0x49f   : >> { %p4491_p3 = scmp.lt.u32.totalorder %s6101_s3, %s6605_s1 }
 0x4a0   : >> { %p1710_p11 = scmp.lt.s32.totalorder %s6681_s21, 0  ;;  %s1711_s5 = ssub.s32 0, %s6681_s21 }
 0x4a1   : >> { %s3334_s17 = smin.u32 %s1711_s5, %s6681_s21  ;;  %s1728_s26 = sshrl.u32 %s6681_s21, 3 }
 0x4a2   : >> { %s1713_s7 = sand.u32 31, %s3334_s17   ;;  %s1729_s19 = sand.u32 7, %s6681_s21  }
 0x4a3   : >> { %s1714_s0 = ssub.s32 0, %s1713_s7  ;;  %s3339_s23 = sshll.u32 %s1728_s26, 4 }
 0x4a4   : >> { %s6756_s0 = smov (!%p1710_p11, %s1714_s0), %s1713_s7  ;;  %s1731_s22 = sadd.s32 %s3339_s23, %s1729_s19 }
 0x4a5   : >> { %p3336_p10 = scmp.lt.s32.totalorder %s6756_s0, 0  ;;  %s1720_s2 = sadd.s32 32, %s6756_s0 }
 0x4a6   : >> { %s1732_s29 = scalar_lea.vmem [#allocation2], %s1731_s22  ;;  %s1741_s21 = ssub.s32 0, %s1739_s30 }
 0x4a7   : >> { %s6758_s2 = smov (!%p3336_p10, %s1720_s2), %s6756_s0  ;;  %s1735_s10 = sshll.u32 %s1732_s29, 4  ;;  %s1736_s10 = int_to_ptr.vmem [resolvable:$true] %s1735_s10 }
 0x4a8   : >> { %s1733_s5 = scalar_lea.sflag [#allocation4], %s6758_s2  ;;  %s4488_s17 = scalar_lea.hbm %s6101_s3, 32 }
 0x4a9   : >> { %p4489_p0 = scmp.ne.s32.totalorder %s6101_s3, %s4488_s17  ;;  %p4492_p5 = scmp.lt.u32.totalorder %s4952_s28, %s4488_s17 }
 0x4aa   : >> { %p4494_p7 = scmp.lt.u32.totalorder %s4488_s17, %s6101_s3 }
 0x4ab   : >> { %p4493_p9 = por %p4492_p5, %p4491_p3 }
 0x4ad   : >> { %p4495_p1 = por %p4494_p7, %p4493_p9 }
 0x4af   : >> { %p4496_p13 = pnand %p4495_p1, %p4489_p0 }
 0x4b1   : >> { %4499 = shalt.err (!%p4496_p13)  }
 0x4b2   : >> { %s4500_s9 = scalar_lea.vmem %s1736_s10, 32  ;;  %p4505_p2 = scmp.lt.s32.totalorder %s1736_s10, %s4945_s16 }
 0x4b3   : >> { %p4501_p4 = scmp.ne.s32.totalorder %s1736_s10, %s4500_s9  ;;  %p4506_p8 = scmp.lt.s32.totalorder %s4963_s20, %s4500_s9 }
 0x4b5   : >> { %p4507_p6 = por %p4506_p8, %p4505_p2 }
 0x4b7   : >> { %p4508_p11 = pnand %p4507_p6, %p4501_p4 }
 0x4b9   : >> { %4511 = shalt.err (!%p4508_p11)  }
 0x4ba   : >> { %1738 = dma.hbm_to_vmem [thread:$0]  %s6101_s3, 32, %s1736_s10, %s1733_s5, %s4747_s24, %s4747_s24, %s4748_s11 }
 0x4bb   : >> { %s3340_s15 = smin.u32 %s1741_s21, %s1739_s30 }
 0x4bc   : >> { %s1743_s0 = sand.u32 31, %s3340_s15  }
 0x4bd   : >> { %s1744_s14 = ssub.s32 0, %s1743_s0 }
 0x4be   : >> { %s6760_s14 = smov (!%p1740_p12, %s1744_s14), %s1743_s0 }
 0x4bf   : >> { %p3342_p10 = scmp.lt.s32.totalorder %s6760_s14, 0  ;;  %s1750_s13 = sadd.s32 32, %s6760_s14 }
 0x4c1   : >> { %s6762_s13 = smov (!%p3342_p10, %s1750_s13), %s6760_s14 }
 0x4c2   : >> { %s1752_s26 = scalar_lea.sflag [#allocation4], %s6762_s13 }
 0x4c3   : >> { %4612 = dma.done.wait %s1752_s26, 32 }
 0x4c4   : >> { %4613 = vsyncadd %s1752_s26, 4294967264  ;;  %p1756_p0 = scmp.lt.s32.totalorder %s5892_s4, 0  ;;  %s1757_s2 = ssub.s32 0, %s5892_s4 }
 0x4c5   : >> { %s3343_s18 = smin.u32 %s1757_s2, %s5892_s4  ;;  %s1768_s19 = sshrl.u32 %s5900_s25, 3 }
 0x4c6   : >> { %s1759_s27 = sand.u32 31, %s3343_s18   ;;  %s1769_s12 = sand.u32 7, %s5900_s25  }
 0x4c7   : >> { %s1760_s3 = ssub.s32 0, %s1759_s27  ;;  %s3346_s23 = sshll.u32 %s1768_s19, 4 }
 0x4c8   : >> { %s6764_s3 = smov (!%p1756_p0, %s1760_s3), %s1759_s27  ;;  %s1771_s22 = sadd.s32 %s3346_s23, %s1769_s12 }
 0x4c9   : >> { %s1774_s30 = sshrl.u32 %s5892_s4, 3  ;;  %p3345_p12 = scmp.lt.s32.totalorder %s6764_s3, 0 }
 0x4ca   : >> { %s1766_s29 = sadd.s32 32, %s6764_s3  ;;  %s3347_s10 = sshll.u32 %s1771_s22, 4 }
 0x4cb   : >> { %s1775_s21 = sand.u32 7, %s5892_s4   ;;  %s6766_s29 = smov (!%p3345_p12, %s1766_s29), %s6764_s3 }
 0x4cc   : >> { %s3348_s5 = sshll.u32 %s1774_s30, 4  ;;  %s1773_s7 = scalar_lea.hbm %s6605_s1, %s3347_s10 }
 0x4cd   : >> { %s1777_s9 = sadd.s32 %s3348_s5, %s1775_s21  ;;  %s1779_s0 = scalar_lea.sflag [#allocation4], %s6766_s29 }
 0x4ce   : >> { %s1778_s25 = scalar_lea.vmem [#allocation2], %s1777_s9  ;;  %s4512_s14 = scalar_lea.hbm %s1773_s7, 32 }
 0x4cf   : >> { %s1781_s15 = sshll.u32 %s1778_s25, 4  ;;  %p4513_p3 = scmp.ne.s32.totalorder %s1773_s7, %s4512_s14  ;;  %s1782_s15 = int_to_ptr.vmem [resolvable:$true] %s1781_s15 }
 0x4d0   : >> { %p4515_p5 = scmp.lt.u32.totalorder %s1773_s7, %s6605_s1  ;;  %p4516_p9 = scmp.lt.u32.totalorder %s4952_s28, %s4512_s14 }
 0x4d1   : >> { %p4518_p1 = scmp.lt.u32.totalorder %s4512_s14, %s1773_s7 }
 0x4d2   : >> { %p4517_p7 = por %p4516_p9, %p4515_p5 }
 0x4d4   : >> { %p4519_p13 = por %p4518_p1, %p4517_p7 }
 0x4d6   : >> { %p4520_p4 = pnand %p4519_p13, %p4513_p3 }
 0x4d8   : >> { %4523 = shalt.err (!%p4520_p4)  }
 0x4d9   : >> { %s4524_s4 = scalar_lea.vmem %s1782_s15, 32  ;;  %p4529_p8 = scmp.lt.s32.totalorder %s1782_s15, %s4945_s16 }
 0x4da   : >> { %p4525_p2 = scmp.ne.s32.totalorder %s1782_s15, %s4524_s4  ;;  %p4530_p6 = scmp.lt.s32.totalorder %s4963_s20, %s4524_s4 }
 0x4dc   : >> { %p4531_p11 = por %p4530_p6, %p4529_p8 }
 0x4de   : >> { %p4532_p10 = pnand %p4531_p11, %p4525_p2 }
 0x4e0   : >> { %4535 = shalt.err (!%p4532_p10)  }
 0x4e1   : >> { %1784 = dma.hbm_to_vmem [thread:$0]  %s1773_s7, 32, %s1782_s15, %s1779_s0, %s4747_s24, %s4747_s24, %s4748_s11 }
 0x4e2   : >> { %s6682_s2 = sld [smem:[#allocation104_spill]] }
 0x4e8   : >> { %s1272_s26 = sadd.s32 1, %s6682_s2  }
 0x4e9   : >> { %p1269_p0 = scmp.ge.s32.totalorder %s1272_s26, 12  }
 0x4eb   : > { %1271 = sbr.rel (!%p1269_p0) target bundleno = 879 (0x36f), region = 248 }
 0x4f2   : > { %4614 = dma.done.wait [#allocation4], 32 }
 0x4f3   : > { %4615 = vsyncadd [#allocation4], 4294967264 }
 0x4f4   : > { %4616 = dma.done.wait [#allocation4 + $0x1], 32 }
 0x4f5   : > { %4617 = vsyncadd [#allocation4 + $0x1], 4294967264 }
 0x4f6   : > { %4618 = dma.done.wait [#allocation4 + $0x2], 32 }
 0x4f7   : > { %4619 = vsyncadd [#allocation4 + $0x2], 4294967264 }
 0x4f8   : > { %4620 = dma.done.wait [#allocation4 + $0x3], 32 }
 0x4f9   : > { %4621 = vsyncadd [#allocation4 + $0x3], 4294967264 }
 0x4fa   : > { %4622 = dma.done.wait [#allocation4 + $0x4], 32 }
 0x4fb   : > { %4623 = vsyncadd [#allocation4 + $0x4], 4294967264 }
 0x4fc   : > { %4624 = dma.done.wait [#allocation4 + $0x5], 32 }
 0x4fd   : > { %4625 = vsyncadd [#allocation4 + $0x5], 4294967264 }
 0x4fe   : > { %4626 = dma.done.wait [#allocation4 + $0x6], 32 }
 0x4ff   : > { %4627 = vsyncadd [#allocation4 + $0x6], 4294967264 }
 0x500   : > { %4628 = dma.done.wait [#allocation4 + $0x7], 32 }
 0x501   : > { %4629 = vsyncadd [#allocation4 + $0x7], 4294967264 }
 0x502   : > { %4630 = dma.done.wait [#allocation4 + $0x8], 32 }
 0x503   : > { %4631 = vsyncadd [#allocation4 + $0x8], 4294967264 }
 0x504   : > { %4632 = dma.done.wait [#allocation4 + $0x9], 32 }
 0x505   : > { %4633 = vsyncadd [#allocation4 + $0x9], 4294967264 }
 0x506   : > { %4634 = dma.done.wait [#allocation4 + $0xa], 32 }
 0x507   : > { %4635 = vsyncadd [#allocation4 + $0xa], 4294967264 }
 0x508   : > { %4636 = dma.done.wait [#allocation4 + $0xb], 32 }
 0x509   : > { %4637 = vsyncadd [#allocation4 + $0xb], 4294967264 }
 0x50a   : > { %4638 = dma.done.wait [#allocation4 + $0xc], 32 }
 0x50b   : > { %4639 = vsyncadd [#allocation4 + $0xc], 4294967264 }
 0x50c   : > { %4640 = dma.done.wait [#allocation4 + $0xd], 32 }
 0x50d   : > { %4641 = vsyncadd [#allocation4 + $0xd], 4294967264 }
 0x50e   : > { %4642 = dma.done.wait [#allocation4 + $0xe], 32 }
 0x50f   : > { %4643 = vsyncadd [#allocation4 + $0xe], 4294967264 }
 0x510   : > { %4644 = dma.done.wait [#allocation4 + $0xf], 32 }
 0x511   : > { %4645 = vsyncadd [#allocation4 + $0xf], 4294967264 }
 0x512   : > { %4646 = dma.done.wait [#allocation4 + $0x10], 32 }
 0x513   : > { %4647 = vsyncadd [#allocation4 + $0x10], 4294967264 }
 0x514   : > { %4648 = dma.done.wait [#allocation4 + $0x11], 32 }
 0x515   : > { %4649 = vsyncadd [#allocation4 + $0x11], 4294967264 }
 0x516   : > { %4650 = dma.done.wait [#allocation4 + $0x12], 32 }
 0x517   : > { %4651 = vsyncadd [#allocation4 + $0x12], 4294967264 }
 0x518   : > { %4652 = dma.done.wait [#allocation4 + $0x13], 32 }
 0x519   : > { %4653 = vsyncadd [#allocation4 + $0x13], 4294967264 }
 0x51a   : > { %4654 = dma.done.wait [#allocation4 + $0x14], 32 }
 0x51b   : > { %4655 = vsyncadd [#allocation4 + $0x14], 4294967264 }
 0x51c   : > { %4656 = dma.done.wait [#allocation4 + $0x15], 32 }
 0x51d   : > { %4657 = vsyncadd [#allocation4 + $0x15], 4294967264 }
 0x51e   : > { %4658 = dma.done.wait [#allocation4 + $0x16], 32 }
 0x51f   : > { %4659 = vsyncadd [#allocation4 + $0x16], 4294967264 }
 0x520   : > { %4660 = dma.done.wait [#allocation4 + $0x17], 32 }
 0x521   : > { %4661 = vsyncadd [#allocation4 + $0x17], 4294967264 }
 0x522   : > { %4662 = dma.done.wait [#allocation4 + $0x18], 32 }
 0x523   : > { %4663 = vsyncadd [#allocation4 + $0x18], 4294967264 }
 0x524   : > { %4664 = dma.done.wait [#allocation4 + $0x19], 32 }
 0x525   : > { %4665 = vsyncadd [#allocation4 + $0x19], 4294967264 }
 0x526   : > { %4666 = dma.done.wait [#allocation4 + $0x1a], 32 }
 0x527   : > { %4667 = vsyncadd [#allocation4 + $0x1a], 4294967264 }
 0x528   : > { %4668 = dma.done.wait [#allocation4 + $0x1b], 32 }
 0x529   : > { %4669 = vsyncadd [#allocation4 + $0x1b], 4294967264 }
 0x52a   : > { %4670 = dma.done.wait [#allocation4 + $0x1c], 32 }
 0x52b   : > { %4671 = vsyncadd [#allocation4 + $0x1c], 4294967264 }
 0x52c   : > { %4672 = dma.done.wait [#allocation4 + $0x1d], 32 }
 0x52d   : > { %4673 = vsyncadd [#allocation4 + $0x1d], 4294967264 }
 0x52e   : > { %4674 = dma.done.wait [#allocation4 + $0x1e], 32 }
 0x52f   : > { %4675 = vsyncadd [#allocation4 + $0x1e], 4294967264 }
 0x530   : > { %4676 = dma.done.wait [#allocation4 + $0x1f], 32 }
 0x531   : > { %4677 = vsyncadd [#allocation4 + $0x1f], 4294967264  ;;  %v2137_v39 = vld [vmem:[#allocation2] sm:$0xff]  ;;  %v2138_v40 = vld [vmem:[#allocation2 + $0x8] sm:$0xff]  ;;  %s6683_s20 = sld [smem:[#allocation112_spill]]  ;;  %s6684_s18 = sld [smem:[#allocation113_spill]] }
 0x532   : > { %v2169_v41 = vld [vmem:[#allocation3] sm:$0xff]  ;;  %v2170_v42 = vld [vmem:[#allocation3 + $0x8] sm:$0xff]  ;;  %v2139_v45 = vld [vmem:[#allocation2 + $0x10] sm:$0xff]  ;;  %s6685_s19 = sld [smem:[#allocation103_spill]]  ;;  %s6686_s27 = sld [smem:[#allocation95_spill]] }
 0x533   : > { %v6145_v33 = vadd.f32 %v2169_v41, %v2137_v39  ;;  %v2141_v34 = vld [vmem:[#allocation2 + $0x20] sm:$0xff]  ;;  %v2142_v35 = vld [vmem:[#allocation2 + $0x28] sm:$0xff]  ;;  %v6147_v38 = vadd.f32 %v2170_v42, %v2138_v40  ;;  %v2140_v48 = vld [vmem:[#allocation2 + $0x18] sm:$0xff]  ;;  %s3387_s12 = sshll.u32 %s4696_s8, 12  ;;  %s6687_s23 = sld [smem:[#allocation100_spill]] }
 0x534   : > { %v2173_v43 = vld [vmem:[#allocation3 + $0x20] sm:$0xff]  ;;  %v2174_v44 = vld [vmem:[#allocation3 + $0x28] sm:$0xff]  ;;  %v2171_v49 = vld [vmem:[#allocation3 + $0x10] sm:$0xff]  ;;  %s6688_s29 = sld [smem:[#allocation115_spill]]  ;;  %s4749_s6 = smov [#allocation10]  }
 0x535   : > { %v6149_v46 = vadd.f32 %v2173_v43, %v2141_v34  ;;  %v6151_v47 = vadd.f32 %v2174_v44, %v2142_v35  ;;  %v2172_v50 = vld [vmem:[#allocation3 + $0x18] sm:$0xff]  ;;  %v2233_v51 = vadd.f32 %v6147_v38, %v6145_v33  ;;  %v6155_v52 = vadd.f32 %v2171_v49, %v2139_v45  ;;  %v2143_v54 = vld [vmem:[#allocation2 + $0x30] sm:$0xff]  ;;  %v2145_v60 = vld [vmem:[#allocation2 + $0x40] sm:$0xff]  ;;  %s4540_s7 = sshll.u32 %s4749_s6, 4  ;;  %s4541_s7 = int_to_ptr.vmem [resolvable:$false] %s4540_s7 }
 0x536   : > { %v6157_v53 = vadd.f32 %v2172_v50, %v2140_v48  ;;  %v2144_v55 = vld [vmem:[#allocation2 + $0x38] sm:$0xff]  ;;  %v2175_v56 = vld [vmem:[#allocation3 + $0x30] sm:$0xff]  ;;  %v2146_v61 = vld [vmem:[#allocation2 + $0x48] sm:$0xff]  ;;  %s4542_s9 = scalar_lea.vmem %s4541_s7, 8192 }
 0x537   : > { %v2239_v57 = vadd.f32 %v6151_v47, %v6149_v46  ;;  %v2176_v58 = vld [vmem:[#allocation3 + $0x38] sm:$0xff]  ;;  %v6161_v59 = vadd.f32 %v2175_v56, %v2143_v54  ;;  %2234 = vadd.xlane.f32.xlu0 %v2233_v51  ;;  %v2177_v0 = vld [vmem:[#allocation3 + $0x40] sm:$0xff]  ;;  %v2178_v1 = vld [vmem:[#allocation3 + $0x48] sm:$0xff] }
 0x538   : > { %v2236_v62 = vadd.f32 %v6157_v53, %v6155_v52  ;;  %v6165_v63 = vadd.f32 %v2176_v58, %v2144_v55  ;;  %v2147_v2 = vld [vmem:[#allocation2 + $0x50] sm:$0xff]  ;;  %v6167_v3 = vadd.f32 %v2177_v0, %v2145_v60  ;;  %v6169_v4 = vadd.f32 %v2178_v1, %v2146_v61  ;;  %v2148_v5 = vld [vmem:[#allocation2 + $0x58] sm:$0xff]  ;;  %v2149_v11 = vld [vmem:[#allocation2 + $0x60] sm:$0xff]  ;;  %s2627_s3 = sshll.u32 %s6685_s19, 4  ;;  %s6690_s8 = sand.u32 1, %s6686_s27   ;;  %s6548_s3 = int_to_ptr.vmem [resolvable:$true] %s2627_s3 }
 0x539   : > { %2240 = vadd.xlane.f32.xlu1 %v2239_v57  ;;  %v2179_v6 = vld [vmem:[#allocation3 + $0x50] sm:$0xff]  ;;  %v2180_v7 = vld [vmem:[#allocation3 + $0x58] sm:$0xff]  ;;  %v2150_v12 = vld [vmem:[#allocation2 + $0x68] sm:$0xff]  ;;  %s6558_s5 = scalar_lea.sflag [#allocation9], %s6690_s8  ;;  %s4536_s17 = scalar_lea.vmem %s6548_s3, 4096 }
 0x53a   : > { %v2242_v8 = vadd.f32 %v6165_v63, %v6161_v59  ;;  %v6173_v9 = vadd.f32 %v2179_v6, %v2147_v2  ;;  %v6175_v10 = vadd.f32 %v2180_v7, %v2148_v5  ;;  %v2181_v13 = vld [vmem:[#allocation3 + $0x60] sm:$0xff]  ;;  %v2182_v14 = vld [vmem:[#allocation3 + $0x68] sm:$0xff]  ;;  %v2151_v15 = vld [vmem:[#allocation2 + $0x70] sm:$0xff]  ;;  %v2245_v17 = vadd.f32 %v6169_v4, %v6167_v3  ;;  %s6689_s21 = smov %s6688_s29  ;;  %s6546_s10 = scalar_lea.hbm %s6688_s29, %s3387_s12 }
 0x53b   : > { %v2152_v16 = vld [vmem:[#allocation2 + $0x78] sm:$0xff]  ;;  %2237 = vadd.xlane.f32.xlu0 %v2236_v62  ;;  %v6179_v18 = vadd.f32 %v2181_v13, %v2149_v11  ;;  %v6181_v19 = vadd.f32 %v2182_v14, %v2150_v12  ;;  %v2183_v20 = vld [vmem:[#allocation3 + $0x70] sm:$0xff]  ;;  %v2153_v22 = vld [vmem:[#allocation2 + $0x80] sm:$0xff]  ;;  %p4537_p12 = scmp.ne.s32.totalorder %s6548_s3, %s4536_s17  ;;  %p6691_p3 = scmp.ne.s32.totalorder %s6687_s23, 0 }
 0x53c   : > { %v2184_v21 = vld [vmem:[#allocation3 + $0x78] sm:$0xff]  ;;  %v2248_v23 = vadd.f32 %v6175_v10, %v6173_v9  ;;  %v6185_v24 = vadd.f32 %v2183_v20, %v2151_v15  ;;  %v2154_v26 = vld [vmem:[#allocation2 + $0x88] sm:$0xff]  ;;  %v2185_v27 = vld [vmem:[#allocation3 + $0x80] sm:$0xff]  ;;  %p4543_p7 = scmp.lt.s32.totalorder %s6548_s3, %s4541_s7  ;;  %p4544_p1 = scmp.lt.s32.totalorder %s4542_s9, %s4536_s17 }
 0x53d   : > { %2243 = vadd.xlane.f32.xlu1 %v2242_v8  ;;  %v6187_v25 = vadd.f32 %v2184_v21, %v2152_v16  ;;  %v2186_v28 = vld [vmem:[#allocation3 + $0x88] sm:$0xff]  ;;  %v2155_v29 = vld [vmem:[#allocation2 + $0x90] sm:$0xff]  ;;  %v2156_v30 = vld [vmem:[#allocation2 + $0x98] sm:$0xff]  ;;  %v2251_v39 = vadd.f32 %v6181_v19, %v6179_v18  ;;  %v6191_v40 = vadd.f32 %v2185_v27, %v2153_v22  ;;  %p4538_p5 = pnand %p4537_p12, %p6691_p3 }
 0x53e   : > { %v2187_v31 = vld [vmem:[#allocation3 + $0x90] sm:$0xff]  ;;  %v2188_v32 = vld [vmem:[#allocation3 + $0x98] sm:$0xff]  ;;  %v6193_v41 = vadd.f32 %v2186_v28, %v2154_v26  ;;  %v2157_v42 = vld [vmem:[#allocation2 + $0xa0] sm:$0xff]  ;;  %p4545_p13 = por %p4544_p1, %p4543_p7 }
 0x53f   : > { %2246 = vadd.xlane.f32.xlu0 %v2245_v17  ;;  %v2158_v34 = vld [vmem:[#allocation2 + $0xa8] sm:$0xff]  ;;  %v2254_v35 = vadd.f32 %v6187_v25, %v6185_v24  ;;  %v6197_v43 = vadd.f32 %v2187_v31, %v2155_v29  ;;  %v6199_v44 = vadd.f32 %v2188_v32, %v2156_v30  ;;  %v2189_v45 = vld [vmem:[#allocation3 + $0xa0] sm:$0xff]  ;;  %v2159_v49 = vld [vmem:[#allocation2 + $0xb0] sm:$0xff]  ;;  %p4539_p9 = pneg %p4538_p5 }
 0x540   : > { %v2190_v48 = vld [vmem:[#allocation3 + $0xa8] sm:$0xff]  ;;  %v2160_v50 = vld [vmem:[#allocation2 + $0xb8] sm:$0xff]  ;;  %v2191_v51 = vld [vmem:[#allocation3 + $0xb0] sm:$0xff]  ;;  %v2257_v55 = vadd.f32 %v6193_v41, %v6191_v40  ;;  %v6203_v56 = vadd.f32 %v2189_v45, %v2157_v42 }
 0x541   : > { %2249 = vadd.xlane.f32.xlu1 %v2248_v23  ;;  %v2192_v54 = vld [vmem:[#allocation3 + $0xb8] sm:$0xff]  ;;  %v6205_v57 = vadd.f32 %v2190_v48, %v2158_v34  ;;  %v2161_v58 = vld [vmem:[#allocation2 + $0xc0] sm:$0xff]  ;;  %v2162_v60 = vld [vmem:[#allocation2 + $0xc8] sm:$0xff]  ;;  %v2260_v61 = vadd.f32 %v6199_v44, %v6197_v43  ;;  %v6209_v62 = vadd.f32 %v2191_v51, %v2159_v49  ;;  %p4546_p4 = pnand %p4545_p13, %p4539_p9 }
 0x542   : > { %v6211_v0 = vadd.f32 %v2192_v54, %v2160_v50  ;;  %v2193_v1 = vld [vmem:[#allocation3 + $0xc0] sm:$0xff]  ;;  %v2194_v2 = vld [vmem:[#allocation3 + $0xc8] sm:$0xff]  ;;  %v2163_v5 = vld [vmem:[#allocation2 + $0xd0] sm:$0xff] }
 0x543   : > { %2252 = vadd.xlane.f32.xlu0 %v2251_v39  ;;  %v2164_v6 = vld [vmem:[#allocation2 + $0xd8] sm:$0xff]  ;;  %v2195_v7 = vld [vmem:[#allocation3 + $0xd0] sm:$0xff]  ;;  %v2263_v11 = vadd.f32 %v6205_v57, %v6203_v56  ;;  %v6215_v12 = vadd.f32 %v2193_v1, %v2161_v58  ;;  %v6217_v13 = vadd.f32 %v2194_v2, %v2162_v60  ;;  %v2165_v14 = vld [vmem:[#allocation2 + $0xe0] sm:$0xff] }
 0x544   : > { %v2196_v8 = vld [vmem:[#allocation3 + $0xd8] sm:$0xff]  ;;  %v2166_v15 = vld [vmem:[#allocation2 + $0xe8] sm:$0xff]  ;;  %v2266_v16 = vadd.f32 %v6211_v0, %v6209_v62  ;;  %v6221_v17 = vadd.f32 %v2195_v7, %v2163_v5  ;;  %v2197_v21 = vld [vmem:[#allocation3 + $0xe0] sm:$0xff] }
 0x545   : > { %2255 = vadd.xlane.f32.xlu1 %v2254_v35  ;;  %v6223_v20 = vadd.f32 %v2196_v8, %v2164_v6  ;;  %v2198_v22 = vld [vmem:[#allocation3 + $0xe8] sm:$0xff]  ;;  %v2167_v23 = vld [vmem:[#allocation2 + $0xf0] sm:$0xff]  ;;  %v2168_v26 = vld [vmem:[#allocation2 + $0xf8] sm:$0xff]  ;;  %v2269_v29 = vadd.f32 %v6217_v13, %v6215_v12  ;;  %v6227_v30 = vadd.f32 %v2197_v21, %v2165_v14 }
 0x546   : > { %v2199_v27 = vld [vmem:[#allocation3 + $0xf0] sm:$0xff]  ;;  %v2200_v28 = vld [vmem:[#allocation3 + $0xf8] sm:$0xff]  ;;  %v6229_v31 = vadd.f32 %v2198_v22, %v2166_v15 }
 0x547   : > { %2258 = vadd.xlane.f32.xlu0 %v2257_v55  ;;  %v2272_v32 = vadd.f32 %v6223_v20, %v6221_v17  ;;  %v6233_v39 = vadd.f32 %v2199_v27, %v2167_v23  ;;  %v6235_v42 = vadd.f32 %v2200_v28, %v2168_v26 }
 0x548   : > { %v2275_v34 = vadd.f32 %v6229_v31, %v6227_v30 }
 0x549   : > { %2261 = vadd.xlane.f32.xlu1 %v2260_v61  ;;  %v2278_v35 = vadd.f32 %v6235_v42, %v6233_v39 }
 0x54b   : > { %2264 = vadd.xlane.f32.xlu0 %v2263_v11 }
 0x54d   : > { %2267 = vadd.xlane.f32.xlu1 %v2266_v16 }
 0x54f   : > { %2270 = vadd.xlane.f32.xlu0 %v2269_v29 }
 0x551   : > { %2273 = vadd.xlane.f32.xlu1 %v2272_v32 }
 0x553   : > { %2276 = vadd.xlane.f32.xlu0 %v2275_v34 }
 0x555   : > { %2279 = vadd.xlane.f32.xlu1 %v2278_v35 }
 0x5c4   : > { %v2235_v45 = vpop.xlane.xlu0 %2234 }
 0x5c5   : > { %v2282_v48 = vmul.f32 0.00390625, %v2235_v45 }
 0x5c6   : > { %v2241_v49 = vpop.xlane.xlu1 %2240 }
 0x5c7   : > { %v2284_v50 = vmul.f32 0.00390625, %v2241_v49  ;;  %v6242_v51 = vsub.f32 %v6145_v33, %v2282_v48  ;;  %v6245_v54 = vsub.f32 %v6147_v38, %v2282_v48 }
 0x5c8   : > { %v2238_v60 = vpop.xlane.xlu0 %2237 }
 0x5c9   : > { %v6248_v55 = vsub.f32 %v6149_v46, %v2284_v50  ;;  %v6251_v58 = vsub.f32 %v6151_v47, %v2284_v50  ;;  %v2283_v61 = vmul.f32 0.00390625, %v2238_v60  ;;  %v2330_v2 = vmul.f32 %v6242_v51, %v6242_v51 }
 0x5ca   : > { %v2244_v1 = vpop.xlane.xlu1 %2243  ;;  %v2331_v5 = vmul.f32 %v6245_v54, %v6245_v54 }
 0x5cb   : > { %v2285_v33 = vmul.f32 0.00390625, %v2244_v1  ;;  %v2334_v38 = vmul.f32 %v6248_v55, %v6248_v55  ;;  %v2335_v46 = vmul.f32 %v6251_v58, %v6251_v58  ;;  %v6262_v6 = vsub.f32 %v6155_v52, %v2283_v61 }
 0x5cc   : > { %v6265_v47 = vsub.f32 %v6157_v53, %v2283_v61  ;;  %v2362_v7 = vadd.f32 %v2331_v5, %v2330_v2  ;;  %v2247_v14 = vpop.xlane.xlu0 %2246 }
 0x5cd   : > { %v6268_v8 = vsub.f32 %v6161_v59, %v2285_v33  ;;  %v6271_v11 = vsub.f32 %v6165_v63, %v2285_v33  ;;  %v2286_v15 = vmul.f32 0.00390625, %v2247_v14  ;;  %v2368_v21 = vadd.f32 %v2335_v46, %v2334_v38 }
 0x5ce   : > { %2363 = vadd.xlane.f32.xlu0 %v2362_v7  ;;  %v2250_v16 = vpop.xlane.xlu1 %2249  ;;  %v2332_v22 = vmul.f32 %v6262_v6, %v6262_v6  ;;  %v2333_v52 = vmul.f32 %v6265_v47, %v6265_v47 }
 0x5cf   : > { %v2287_v53 = vmul.f32 0.00390625, %v2250_v16  ;;  %v2336_v23 = vmul.f32 %v6268_v8, %v6268_v8  ;;  %v2337_v59 = vmul.f32 %v6271_v11, %v6271_v11  ;;  %v6282_v63 = vsub.f32 %v6167_v3, %v2286_v15 }
 0x5d0   : > { %v6285_v26 = vsub.f32 %v6169_v4, %v2286_v15  ;;  %v2365_v27 = vadd.f32 %v2333_v52, %v2332_v22  ;;  %v2253_v32 = vpop.xlane.xlu0 %2252 }
 0x5d1   : > { %v6288_v28 = vsub.f32 %v6173_v9, %v2287_v53  ;;  %v6291_v29 = vsub.f32 %v6175_v10, %v2287_v53  ;;  %v2288_v34 = vmul.f32 0.00390625, %v2253_v32  ;;  %v2371_v45 = vadd.f32 %v2337_v59, %v2336_v23 }
 0x5d2   : > { %2369 = vadd.xlane.f32.xlu0 %v2368_v21  ;;  %2366 = vadd.xlane.f32.xlu1 %v2365_v27  ;;  %v2256_v35 = vpop.xlane.xlu1 %2255  ;;  %v2338_v3 = vmul.f32 %v6282_v63, %v6282_v63  ;;  %v2339_v4 = vmul.f32 %v6285_v26, %v6285_v26 }
 0x5d3   : > { %v2289_v48 = vmul.f32 0.00390625, %v2256_v35  ;;  %v2340_v9 = vmul.f32 %v6288_v28, %v6288_v28  ;;  %v2341_v10 = vmul.f32 %v6291_v29, %v6291_v29  ;;  %v6302_v49 = vsub.f32 %v6179_v18, %v2288_v34 }
 0x5d4   : > { %v6305_v50 = vsub.f32 %v6181_v19, %v2288_v34  ;;  %v2374_v60 = vadd.f32 %v2339_v4, %v2338_v3  ;;  %v2259_v2 = vpop.xlane.xlu0 %2258 }
 0x5d5   : > { %v6308_v61 = vsub.f32 %v6185_v24, %v2289_v48  ;;  %v6311_v1 = vsub.f32 %v6187_v25, %v2289_v48  ;;  %v2290_v5 = vmul.f32 0.00390625, %v2259_v2  ;;  %v2377_v38 = vadd.f32 %v2341_v10, %v2340_v9 }
 0x5d6   : > { %2372 = vadd.xlane.f32.xlu1 %v2371_v45  ;;  %2375 = vadd.xlane.f32.xlu0 %v2374_v60  ;;  %v2262_v33 = vpop.xlane.xlu1 %2261  ;;  %v2342_v18 = vmul.f32 %v6302_v49, %v6302_v49  ;;  %v2343_v19 = vmul.f32 %v6305_v50, %v6305_v50 }
 0x5d7   : > { %v2291_v46 = vmul.f32 0.00390625, %v2262_v33  ;;  %v2344_v24 = vmul.f32 %v6308_v61, %v6308_v61  ;;  %v2345_v25 = vmul.f32 %v6311_v1, %v6311_v1  ;;  %v6322_v7 = vsub.f32 %v6191_v40, %v2290_v5 }
 0x5d8   : > { %v6325_v14 = vsub.f32 %v6193_v41, %v2290_v5  ;;  %v2380_v15 = vadd.f32 %v2343_v19, %v2342_v18  ;;  %v2265_v22 = vpop.xlane.xlu0 %2264 }
 0x5d9   : > { %v6328_v16 = vsub.f32 %v6197_v43, %v2291_v46  ;;  %v6331_v21 = vsub.f32 %v6199_v44, %v2291_v46  ;;  %v2292_v52 = vmul.f32 0.00390625, %v2265_v22  ;;  %v2383_v23 = vadd.f32 %v2345_v25, %v2344_v24 }
 0x5da   : > { %2378 = vadd.xlane.f32.xlu1 %v2377_v38  ;;  %2381 = vadd.xlane.f32.xlu0 %v2380_v15  ;;  %v2268_v53 = vpop.xlane.xlu1 %2267  ;;  %v2346_v40 = vmul.f32 %v6322_v7, %v6322_v7  ;;  %v2347_v41 = vmul.f32 %v6325_v14, %v6325_v14 }
 0x5db   : > { %v2293_v59 = vmul.f32 0.00390625, %v2268_v53  ;;  %v2348_v43 = vmul.f32 %v6328_v16, %v6328_v16  ;;  %v2349_v44 = vmul.f32 %v6331_v21, %v6331_v21  ;;  %v6342_v27 = vsub.f32 %v6203_v56, %v2292_v52 }
 0x5dc   : > { %v6345_v32 = vsub.f32 %v6205_v57, %v2292_v52  ;;  %v2386_v34 = vadd.f32 %v2347_v41, %v2346_v40  ;;  %v2271_v3 = vpop.xlane.xlu0 %2270 }
 0x5dd   : > { %v6348_v35 = vsub.f32 %v6209_v62, %v2293_v59  ;;  %v6351_v45 = vsub.f32 %v6211_v0, %v2293_v59  ;;  %v2294_v4 = vmul.f32 0.00390625, %v2271_v3  ;;  %v2389_v9 = vadd.f32 %v2349_v44, %v2348_v43 }
 0x5de   : > { %2384 = vadd.xlane.f32.xlu1 %v2383_v23  ;;  %2387 = vadd.xlane.f32.xlu0 %v2386_v34  ;;  %v2274_v48 = vpop.xlane.xlu1 %2273  ;;  %v2350_v56 = vmul.f32 %v6342_v27, %v6342_v27  ;;  %v2351_v57 = vmul.f32 %v6345_v32, %v6345_v32 }
 0x5df   : > { %v2295_v10 = vmul.f32 0.00390625, %v2274_v48  ;;  %v2352_v62 = vmul.f32 %v6348_v35, %v6348_v35  ;;  %v2353_v0 = vmul.f32 %v6351_v45, %v6351_v45  ;;  %v6362_v60 = vsub.f32 %v6215_v12, %v2294_v4 }
 0x5e0   : > { %v6365_v2 = vsub.f32 %v6217_v13, %v2294_v4  ;;  %v2392_v5 = vadd.f32 %v2351_v57, %v2350_v56  ;;  %v2277_v18 = vpop.xlane.xlu0 %2276 }
 0x5e1   : > { %v6368_v33 = vsub.f32 %v6221_v17, %v2295_v10  ;;  %v6371_v38 = vsub.f32 %v6223_v20, %v2295_v10  ;;  %v2296_v19 = vmul.f32 0.00390625, %v2277_v18  ;;  %v2395_v24 = vadd.f32 %v2353_v0, %v2352_v62  ;;  %v2490_v18 = vld [vmem:[%s6683_s20] sm:$0x3] }
 0x5e2   : > { %2390 = vadd.xlane.f32.xlu1 %v2389_v9  ;;  %2393 = vadd.xlane.f32.xlu0 %v2392_v5  ;;  %v2280_v46 = vpop.xlane.xlu1 %2279  ;;  %v2354_v12 = vmul.f32 %v6362_v60, %v6362_v60  ;;  %v2355_v13 = vmul.f32 %v6365_v2, %v6365_v2 }
 0x5e3   : > { %v2297_v25 = vmul.f32 0.00390625, %v2280_v46  ;;  %v2356_v17 = vmul.f32 %v6368_v33, %v6368_v33  ;;  %v2357_v20 = vmul.f32 %v6371_v38, %v6371_v38  ;;  %v6382_v15 = vsub.f32 %v6227_v30, %v2296_v19 }
 0x5e4   : > { %v6385_v22 = vsub.f32 %v6229_v31, %v2296_v19  ;;  %v2398_v52 = vadd.f32 %v2355_v13, %v2354_v12  ;;  %v2534_v13 = vld [vmem:[%s6684_s18] sm:$0x3] }
 0x5e5   : > { %v6388_v53 = vsub.f32 %v6233_v39, %v2297_v25  ;;  %v6391_v23 = vsub.f32 %v6235_v42, %v2297_v25  ;;  %v2401_v40 = vadd.f32 %v2357_v20, %v2356_v17  ;;  %v2358_v41 = vmul.f32 %v6382_v15, %v6382_v15 }
 0x5e6   : > { %2396 = vadd.xlane.f32.xlu1 %v2395_v24  ;;  %2399 = vadd.xlane.f32.xlu0 %v2398_v52  ;;  %v2359_v30 = vmul.f32 %v6385_v22, %v6385_v22  ;;  %v6408_v20 = vrot.slane %v2490_v18, %v5322_v36  ;;  %v6411_v52 = vrot.slane %v2490_v18, %v5324_v37 }
 0x5e7   : > { %v2360_v31 = vmul.f32 %v6388_v53, %v6388_v53  ;;  %v2361_v59 = vmul.f32 %v6391_v23, %v6391_v23 }
 0x5e8   : > { %v2404_v39 = vadd.f32 %v2359_v30, %v2358_v41 }
 0x5e9   : > { %v2407_v42 = vadd.f32 %v2361_v59, %v2360_v31  ;;  %v6414_v31 = vrot.slane %v2534_v13, %v5322_v36  ;;  %v6417_v59 = vrot.slane %v2534_v13, %v5324_v37 }
 0x5ea   : > { %2402 = vadd.xlane.f32.xlu1 %v2401_v40  ;;  %2405 = vadd.xlane.f32.xlu0 %v2404_v39 }
 0x5ee   : > { %2408 = vadd.xlane.f32.xlu1 %v2407_v42 }
 0x65b   : > { %v2364_v43 = vpop.xlane.xlu0 %2363 }
 0x65c   : > { %v2410_v44 = vmul.f32 0.00390625, %v2364_v43 }
 0x65e   : > { %v2426_v34 = vadd.f32 1e-12, %v2410_v44 }
 0x65f   : > { %v2367_v3 = vpop.xlane.xlu1 %2366  ;;  %v2370_v4 = vpop.xlane.xlu0 %2369 }
 0x660   : > { %3504 = vrsqrt.f32 %v2426_v34  ;;  %v2411_v48 = vmul.f32 0.00390625, %v2367_v3  ;;  %v2412_v9 = vmul.f32 0.00390625, %v2370_v4 }
 0x662   : > { %v2427_v56 = vadd.f32 1e-12, %v2411_v48  ;;  %v2428_v57 = vadd.f32 1e-12, %v2412_v9 }
 0x663   : > { %v2373_v10 = vpop.xlane.xlu1 %2372  ;;  %v2376_v62 = vpop.xlane.xlu0 %2375 }
 0x664   : > { %3506 = vrsqrt.f32 %v2427_v56  ;;  %v2413_v0 = vmul.f32 0.00390625, %v2373_v10  ;;  %v2414_v5 = vmul.f32 0.00390625, %v2376_v62 }
 0x665   : > { %3508 = vrsqrt.f32 %v2428_v57 }
 0x666   : > { %v2429_v19 = vadd.f32 1e-12, %v2413_v0  ;;  %v2430_v46 = vadd.f32 1e-12, %v2414_v5 }
 0x667   : > { %v2379_v24 = vpop.xlane.xlu1 %2378  ;;  %v2382_v12 = vpop.xlane.xlu0 %2381 }
 0x668   : > { %3510 = vrsqrt.f32 %v2429_v19  ;;  %v2415_v25 = vmul.f32 0.00390625, %v2379_v24  ;;  %v2416_v17 = vmul.f32 0.00390625, %v2382_v12 }
 0x669   : > { %3512 = vrsqrt.f32 %v2430_v46 }
 0x66a   : > { %v3505_v40 = vpop.eup %3504  ;;  %v2431_v41 = vadd.f32 1e-12, %v2415_v25  ;;  %v2432_v30 = vadd.f32 1e-12, %v2416_v17 }
 0x66b   : > { %v2458_v39 = vmul.f32 %v3505_v40, %v6242_v51  ;;  %v2459_v42 = vmul.f32 %v3505_v40, %v6245_v54  ;;  %v2385_v43 = vpop.xlane.xlu1 %2384  ;;  %v2388_v44 = vpop.xlane.xlu0 %2387 }
 0x66c   : > { %3514 = vrsqrt.f32 %v2431_v41  ;;  %v2417_v34 = vmul.f32 0.00390625, %v2385_v43  ;;  %v2418_v3 = vmul.f32 0.00390625, %v2388_v44 }
 0x66d   : > { %v2502_v4 = vmul.f32 %v6408_v20, %v2458_v39  ;;  %v2503_v48 = vmul.f32 %v6411_v52, %v2459_v42  ;;  %3516 = vrsqrt.f32 %v2432_v30 }
 0x66e   : > { %v3507_v36 = vpop.eup %3506  ;;  %v2433_v9 = vadd.f32 1e-12, %v2417_v34  ;;  %v2434_v37 = vadd.f32 1e-12, %v2418_v3 }
 0x66f   : > { %v3509_v56 = vpop.eup %3508  ;;  %v2546_v51 = vadd.f32 %v6414_v31, %v2502_v4  ;;  %v2547_v54 = vadd.f32 %v6417_v59, %v2503_v48  ;;  %v2460_v57 = vmul.f32 %v3507_v36, %v6262_v6  ;;  %v2461_v10 = vmul.f32 %v3507_v36, %v6265_v47  ;;  %v2391_v62 = vpop.xlane.xlu1 %2390 }
 0x670   : > { %v2394_v0 = vpop.xlane.xlu0 %2393  ;;  %v2462_v5 = vmul.f32 %v3509_v56, %v6248_v55  ;;  %v2463_v18 = vmul.f32 %v3509_v56, %v6251_v58  ;;  %3518 = vrsqrt.f32 %v2433_v9  ;;  %v2419_v19 = vmul.f32 0.00390625, %v2391_v62 }
 0x671   : > { %2578 = vst [vmem:[%s6685_s19] sm:$0xff] %v2546_v51  ;;  %2579 = vst [vmem:[%s6685_s19 + $0x8] sm:$0xff] %v2547_v54  ;;  %v2504_v46 = vmul.f32 %v6408_v20, %v2460_v57  ;;  %v2505_v24 = vmul.f32 %v6411_v52, %v2461_v10  ;;  %3520 = vrsqrt.f32 %v2434_v37  ;;  %v2420_v12 = vmul.f32 0.00390625, %v2394_v0 }
 0x672   : > { %v3511_v6 = vpop.eup %3510  ;;  %v2506_v47 = vmul.f32 %v6408_v20, %v2462_v5  ;;  %v2507_v13 = vmul.f32 %v6411_v52, %v2463_v18  ;;  %v2435_v55 = vadd.f32 1e-12, %v2419_v19 }
 0x673   : > { %v3513_v25 = vpop.eup %3512  ;;  %v2548_v58 = vadd.f32 %v6414_v31, %v2504_v46  ;;  %v2549_v17 = vadd.f32 %v6417_v59, %v2505_v24  ;;  %v2464_v40 = vmul.f32 %v3511_v6, %v6268_v8  ;;  %v2465_v41 = vmul.f32 %v3511_v6, %v6271_v11  ;;  %v2397_v30 = vpop.xlane.xlu1 %2396 }
 0x674   : > { %v2400_v39 = vpop.xlane.xlu0 %2399  ;;  %v2550_v42 = vadd.f32 %v6414_v31, %v2506_v47  ;;  %v2551_v43 = vadd.f32 %v6417_v59, %v2507_v13  ;;  %v2466_v44 = vmul.f32 %v3513_v25, %v6282_v63  ;;  %v2467_v34 = vmul.f32 %v3513_v25, %v6285_v26 }
 0x675   : > { %2580 = vst [vmem:[%s6685_s19 + $0x10] sm:$0xff] %v2548_v58  ;;  %2581 = vst [vmem:[%s6685_s19 + $0x18] sm:$0xff] %v2549_v17  ;;  %v2508_v3 = vmul.f32 %v6408_v20, %v2464_v40  ;;  %v2509_v4 = vmul.f32 %v6411_v52, %v2465_v41  ;;  %3522 = vrsqrt.f32 %v2435_v55  ;;  %v2436_v8 = vadd.f32 1e-12, %v2420_v12 }
 0x676   : > { %v3515_v48 = vpop.eup %3514  ;;  %2582 = vst [vmem:[%s6685_s19 + $0x20] sm:$0xff] %v2550_v42  ;;  %2583 = vst [vmem:[%s6685_s19 + $0x28] sm:$0xff] %v2551_v43  ;;  %v2510_v11 = vmul.f32 %v6408_v20, %v2466_v44  ;;  %v2511_v36 = vmul.f32 %v6411_v52, %v2467_v34  ;;  %v2421_v63 = vmul.f32 0.00390625, %v2397_v30  ;;  %v2422_v9 = vmul.f32 0.00390625, %v2400_v39 }
 0x677   : > { %v3517_v26 = vpop.eup %3516  ;;  %v2552_v37 = vadd.f32 %v6414_v31, %v2508_v3  ;;  %v2553_v56 = vadd.f32 %v6417_v59, %v2509_v4  ;;  %v2468_v51 = vmul.f32 %v3515_v48, %v6288_v28  ;;  %v2469_v54 = vmul.f32 %v3515_v48, %v6291_v29  ;;  %v2403_v57 = vpop.xlane.xlu1 %2402 }
 0x678   : > { %v2554_v10 = vadd.f32 %v6414_v31, %v2510_v11  ;;  %v2555_v62 = vadd.f32 %v6417_v59, %v2511_v36  ;;  %v2470_v0 = vmul.f32 %v3517_v26, %v6302_v49  ;;  %v2471_v5 = vmul.f32 %v3517_v26, %v6305_v50  ;;  %v2406_v25 = vpop.xlane.xlu0 %2405 }
 0x679   : > { %2584 = vst [vmem:[%s6685_s19 + $0x30] sm:$0xff] %v2552_v37  ;;  %2585 = vst [vmem:[%s6685_s19 + $0x38] sm:$0xff] %v2553_v56  ;;  %v2512_v18 = vmul.f32 %v6408_v20, %v2468_v51  ;;  %v2513_v19 = vmul.f32 %v6411_v52, %v2469_v54  ;;  %3524 = vrsqrt.f32 %v2436_v8  ;;  %v2437_v46 = vadd.f32 1e-12, %v2421_v63 }
 0x67a   : > { %v3519_v28 = vpop.eup %3518  ;;  %2586 = vst [vmem:[%s6685_s19 + $0x40] sm:$0xff] %v2554_v10  ;;  %2587 = vst [vmem:[%s6685_s19 + $0x48] sm:$0xff] %v2555_v62  ;;  %v2514_v29 = vmul.f32 %v6408_v20, %v2470_v0  ;;  %v2515_v24 = vmul.f32 %v6411_v52, %v2471_v5  ;;  %v2438_v49 = vadd.f32 1e-12, %v2422_v9  ;;  %v2423_v12 = vmul.f32 0.00390625, %v2403_v57 }
 0x67b   : > { %v3521_v50 = vpop.eup %3520  ;;  %v2556_v6 = vadd.f32 %v6414_v31, %v2512_v18  ;;  %v2557_v47 = vadd.f32 %v6417_v59, %v2513_v19  ;;  %v2472_v13 = vmul.f32 %v3519_v28, %v6308_v61  ;;  %v2473_v55 = vmul.f32 %v3519_v28, %v6311_v1  ;;  %v2409_v30 = vpop.xlane.xlu1 %2408 }
 0x67c   : > { %v2558_v58 = vadd.f32 %v6414_v31, %v2514_v29  ;;  %v2559_v17 = vadd.f32 %v6417_v59, %v2515_v24  ;;  %v2474_v40 = vmul.f32 %v3521_v50, %v6322_v7  ;;  %v2475_v41 = vmul.f32 %v3521_v50, %v6325_v14 }
 0x67d   : > { %2588 = vst [vmem:[%s6685_s19 + $0x50] sm:$0xff] %v2556_v6  ;;  %2589 = vst [vmem:[%s6685_s19 + $0x58] sm:$0xff] %v2557_v47  ;;  %v2516_v39 = vmul.f32 %v6408_v20, %v2472_v13  ;;  %v2517_v42 = vmul.f32 %v6411_v52, %v2473_v55  ;;  %3526 = vrsqrt.f32 %v2437_v46  ;;  %v2439_v61 = vadd.f32 1e-12, %v2423_v12 }
 0x67e   : > { %2590 = vst [vmem:[%s6685_s19 + $0x60] sm:$0xff] %v2558_v58  ;;  %2591 = vst [vmem:[%s6685_s19 + $0x68] sm:$0xff] %v2559_v17  ;;  %v2518_v1 = vmul.f32 %v6408_v20, %v2474_v40  ;;  %v2519_v43 = vmul.f32 %v6411_v52, %v2475_v41  ;;  %3528 = vrsqrt.f32 %v2438_v49  ;;  %v2424_v7 = vmul.f32 0.00390625, %v2406_v25 }
 0x67f   : > { %v3523_v14 = vpop.eup %3522  ;;  %v2560_v44 = vadd.f32 %v6414_v31, %v2516_v39  ;;  %v2561_v34 = vadd.f32 %v6417_v59, %v2517_v42  ;;  %3530 = vrsqrt.f32 %v2439_v61  ;;  %v2425_v3 = vmul.f32 0.00390625, %v2409_v30 }
 0x680   : > { %v2562_v4 = vadd.f32 %v6414_v31, %v2518_v1  ;;  %v2563_v8 = vadd.f32 %v6417_v59, %v2519_v43  ;;  %v2476_v48 = vmul.f32 %v3523_v14, %v6328_v16  ;;  %v2477_v11 = vmul.f32 %v3523_v14, %v6331_v21 }
 0x681   : > { %2592 = vst [vmem:[%s6685_s19 + $0x70] sm:$0xff] %v2560_v44  ;;  %2593 = vst [vmem:[%s6685_s19 + $0x78] sm:$0xff] %v2561_v34  ;;  %v2440_v36 = vadd.f32 1e-12, %v2424_v7  ;;  %v2441_v63 = vadd.f32 1e-12, %v2425_v3 }
 0x682   : > { %2594 = vst [vmem:[%s6685_s19 + $0x80] sm:$0xff] %v2562_v4  ;;  %2595 = vst [vmem:[%s6685_s19 + $0x88] sm:$0xff] %v2563_v8  ;;  %v2520_v9 = vmul.f32 %v6408_v20, %v2476_v48  ;;  %v2521_v26 = vmul.f32 %v6411_v52, %v2477_v11 }
 0x683   : > { %v3525_v37 = vpop.eup %3524  ;;  %3532 = vrsqrt.f32 %v2440_v36 }
 0x684   : > { %v2564_v56 = vadd.f32 %v6414_v31, %v2520_v9  ;;  %v2565_v16 = vadd.f32 %v6417_v59, %v2521_v26  ;;  %v2478_v21 = vmul.f32 %v3525_v37, %v6342_v27  ;;  %v2479_v51 = vmul.f32 %v3525_v37, %v6345_v32 }
 0x685   : > { %3534 = vrsqrt.f32 %v2441_v63 }
 0x686   : > { %2596 = vst [vmem:[%s6685_s19 + $0x90] sm:$0xff] %v2564_v56  ;;  %2597 = vst [vmem:[%s6685_s19 + $0x98] sm:$0xff] %v2565_v16  ;;  %v2522_v54 = vmul.f32 %v6408_v20, %v2478_v21  ;;  %v2523_v57 = vmul.f32 %v6411_v52, %v2479_v51 }
 0x687   : > { %v3527_v10 = vpop.eup %3526 }
 0x688   : > { %v3529_v62 = vpop.eup %3528  ;;  %v2566_v0 = vadd.f32 %v6414_v31, %v2522_v54  ;;  %v2567_v5 = vadd.f32 %v6417_v59, %v2523_v57  ;;  %v2480_v18 = vmul.f32 %v3527_v10, %v6348_v35  ;;  %v2481_v27 = vmul.f32 %v3527_v10, %v6351_v45 }
 0x689   : > { %v3531_v19 = vpop.eup %3530  ;;  %v2482_v32 = vmul.f32 %v3529_v62, %v6362_v60  ;;  %v2483_v46 = vmul.f32 %v3529_v62, %v6365_v2 }
 0x68a   : > { %2598 = vst [vmem:[%s6685_s19 + $0xa0] sm:$0xff] %v2566_v0  ;;  %2599 = vst [vmem:[%s6685_s19 + $0xa8] sm:$0xff] %v2567_v5  ;;  %v2524_v28 = vmul.f32 %v6408_v20, %v2480_v18  ;;  %v2525_v29 = vmul.f32 %v6411_v52, %v2481_v27  ;;  %v2484_v24 = vmul.f32 %v3531_v19, %v6368_v33 }
 0x68b   : > { %v2485_v49 = vmul.f32 %v3531_v19, %v6371_v38  ;;  %v2526_v35 = vmul.f32 %v6408_v20, %v2482_v32  ;;  %v2527_v45 = vmul.f32 %v6411_v52, %v2483_v46 }
 0x68c   : > { %v2568_v60 = vadd.f32 %v6414_v31, %v2524_v28  ;;  %v2569_v2 = vadd.f32 %v6417_v59, %v2525_v29  ;;  %v2528_v12 = vmul.f32 %v6408_v20, %v2484_v24 }
 0x68d   : > { %v2529_v50 = vmul.f32 %v6411_v52, %v2485_v49  ;;  %v3533_v6 = vpop.eup %3532  ;;  %v2570_v33 = vadd.f32 %v6414_v31, %v2526_v35  ;;  %v2571_v38 = vadd.f32 %v6417_v59, %v2527_v45 }
 0x68e   : > { %2600 = vst [vmem:[%s6685_s19 + $0xb0] sm:$0xff] %v2568_v60  ;;  %2601 = vst [vmem:[%s6685_s19 + $0xb8] sm:$0xff] %v2569_v2  ;;  %v2572_v47 = vadd.f32 %v6414_v31, %v2528_v12  ;;  %v2486_v55 = vmul.f32 %v3533_v6, %v6382_v15  ;;  %v2487_v25 = vmul.f32 %v3533_v6, %v6385_v22 }
 0x68f   : > { %v2573_v13 = vadd.f32 %v6417_v59, %v2529_v50  ;;  %v3535_v58 = vpop.eup %3534  ;;  %2602 = vst [vmem:[%s6685_s19 + $0xc0] sm:$0xff] %v2570_v33  ;;  %2603 = vst [vmem:[%s6685_s19 + $0xc8] sm:$0xff] %v2571_v38 }
 0x690   : > { %2604 = vst [vmem:[%s6685_s19 + $0xd0] sm:$0xff] %v2572_v47  ;;  %v2530_v17 = vmul.f32 %v6408_v20, %v2486_v55  ;;  %v2531_v40 = vmul.f32 %v6411_v52, %v2487_v25  ;;  %v2488_v41 = vmul.f32 %v3535_v58, %v6388_v53  ;;  %v2489_v15 = vmul.f32 %v3535_v58, %v6391_v23 }
 0x691   : > { %2605 = vst [vmem:[%s6685_s19 + $0xd8] sm:$0xff] %v2573_v13 }
 0x692   : > { %v2574_v22 = vadd.f32 %v6414_v31, %v2530_v17  ;;  %v2575_v30 = vadd.f32 %v6417_v59, %v2531_v40  ;;  %v2532_v39 = vmul.f32 %v6408_v20, %v2488_v41  ;;  %v2533_v42 = vmul.f32 %v6411_v52, %v2489_v15 }
 0x694   : > { %2606 = vst [vmem:[%s6685_s19 + $0xe0] sm:$0xff] %v2574_v22  ;;  %2607 = vst [vmem:[%s6685_s19 + $0xe8] sm:$0xff] %v2575_v30  ;;  %v2576_v53 = vadd.f32 %v6414_v31, %v2532_v39  ;;  %v2577_v23 = vadd.f32 %v6417_v59, %v2533_v42 }
 0x696   : > { %2608 = vst [vmem:[%s6685_s19 + $0xf0] sm:$0xff] %v2576_v53  ;;  %2609 = vst [vmem:[%s6685_s19 + $0xf8] sm:$0xff] %v2577_v23 }
 0x697   : > { %4549 = shalt.err (!%p4546_p4)
}
 0x698   : > { %s4550_s25 = scalar_lea.hbm %s6546_s10, 4096  ;;  %s4554_s14 = scalar_lea.hbm %s6689_s21, 8192 }
 0x699   : > { %p4551_p2 = scmp.ne.s32.totalorder %s6546_s10, %s4550_s25  ;;  %p4555_p11 = scmp.lt.u32.totalorder %s6546_s10, %s6689_s21 }
 0x69a   : > { %p4556_p10 = scmp.lt.u32.totalorder %s4554_s14, %s4550_s25  ;;  %p4558_p12 = scmp.lt.u32.totalorder %s4550_s25, %s6546_s10 }
 0x69b   : > { %p4552_p8 = pnand %p4551_p2, %p6691_p3 }
 0x69c   : > { %p4557_p0 = por %p4556_p10, %p4555_p11 }
 0x69d   : > { %p4553_p6 = pneg %p4552_p8 }
 0x69e   : > { %p4559_p5 = por %p4558_p12, %p4557_p0 }
 0x6a0   : > { %p4560_p9 = pnand %p4559_p5, %p4553_p6 }
 0x6a2   : > { %4563 = shalt.err (!%p4560_p9)
}
 0x6a3   : > { %s4750_s4 = smov 256   ;;  %s4751_s2 = smov 16  }
 0x6a4   : > { %3392 = dma.vmem_to_hbm [thread:$0]  (%p6691_p3), %s6548_s3, 4096, %s6546_s10, %s6558_s5, %s4750_s4, %s4750_s4, %s4751_s2  }
 0x6a5 PF: > { %s6692_s16 = sld [smem:[#allocation98_spill]]  ;;  %s6693_s28 = sld [smem:[#allocation94_spill]] }
 0x6a6   : > { %s6694_s20 = sld [smem:[#allocation101_spill]] }
 0x6ab   : > { %p3404_p7 = scmp.ge.s32.totalorder %s6692_s16, 2  ;;  %s2642_s24 = sand.u32 1, %s6693_s28  }
 0x6ac   : > { %p6695_p1 = scmp.ne.s32.totalorder %s6694_s20, 0  ;;  %s2643_s11 = scalar_lea.sflag [#allocation9], %s2642_s24 }
 0x6ae   : > { %p3399_p13 = pnand %p3404_p7, %p6695_p1 }
 0x6b0   : > { %4679 = dma.done.wait (!%p3399_p13), %s2643_s11, 4096  }
 0x6b1   : > { %4681 = vsyncadd (!%p3399_p13), %s2643_s11, 4294963200  ;;  %s27_s10 = sadd.s32 1, %s6692_s16   ;;  %s6696_s29 = sld [smem:[#allocation95_spill]] }
 0x6b2   : > { %p24_p4 = scmp.ge.s32.totalorder %s27_s10, 4   ;;  %s6697_s30 = sld [smem:[#allocation96_spill]] }
 0x6b3   : > { %s6698_s0 = sld [smem:[#allocation102_spill]]  ;;  %s6699_s8 = sld [smem:[#allocation97_spill]] }
 0x6b4   : > { %s6700_s9 = sld [smem:[#allocation99_spill]]  ;;  %26 = sbr.rel (!%p24_p4) target bundleno = 22 (0x16), region = 259 }
 0x6bb   :  { %2648 = vsyncpa [#allocation8], 1 }
 0x6bc   :  { %2650 = vsyncpa [#allocation8 + $0x1], 1 }
 0x6bd   :  { %2651 = vsyncpa [#allocation9], 1 }
 0x6be   :  { %2653 = vsyncpa [#allocation9 + $0x1], 1 }
 0x6bf   :  { %2654 = vsyncmov [#allocation4] }
 0x6c2   :  { %s2655_s18 = vpop.sfrf %2654 }
 0x6c3   :  { %p3354_p3 = scmp.ne.s32.totalorder %s2655_s18, 0 }
 0x6c5   :  { %2659 = shalt.err (%p3354_p3)  }
 0x6c6   :  { %2661 = vsyncmov [#allocation4 + $0x1] }
 0x6c9   :  { %s2662_s19 = vpop.sfrf %2661 }
 0x6ca   :  { %p3355_p2 = scmp.ne.s32.totalorder %s2662_s19, 0 }
 0x6cc   :  { %2666 = shalt.err (%p3355_p2)  }
 0x6cd   :  { %2668 = vsyncmov [#allocation4 + $0x2] }
 0x6d0   :  { %s2669_s27 = vpop.sfrf %2668 }
 0x6d1   :  { %p3356_p8 = scmp.ne.s32.totalorder %s2669_s27, 0 }
 0x6d3   :  { %2673 = shalt.err (%p3356_p8)  }
 0x6d4   :  { %2675 = vsyncmov [#allocation4 + $0x3] }
 0x6d7   :  { %s2676_s12 = vpop.sfrf %2675 }
 0x6d8   :  { %p3357_p6 = scmp.ne.s32.totalorder %s2676_s12, 0 }
 0x6da   :  { %2680 = shalt.err (%p3357_p6)  }
 0x6db   :  { %2682 = vsyncmov [#allocation4 + $0x4] }
 0x6de   :  { %s2683_s1 = vpop.sfrf %2682 }
 0x6df   :  { %p3358_p11 = scmp.ne.s32.totalorder %s2683_s1, 0 }
 0x6e1   :  { %2687 = shalt.err (%p3358_p11)  }
 0x6e2   :  { %2689 = vsyncmov [#allocation4 + $0x5] }
 0x6e5   :  { %s2690_s3 = vpop.sfrf %2689 }
 0x6e6   :  { %p3359_p10 = scmp.ne.s32.totalorder %s2690_s3, 0 }
 0x6e8   :  { %2694 = shalt.err (%p3359_p10)  }
 0x6e9   :  { %2696 = vsyncmov [#allocation4 + $0x6] }
 0x6ec   :  { %s2697_s23 = vpop.sfrf %2696 }
 0x6ed   :  { %p3360_p0 = scmp.ne.s32.totalorder %s2697_s23, 0 }
 0x6ef   :  { %2701 = shalt.err (%p3360_p0)  }
 0x6f0   :  { %2703 = vsyncmov [#allocation4 + $0x7] }
 0x6f3   :  { %s2704_s22 = vpop.sfrf %2703 }
 0x6f4   :  { %p3361_p12 = scmp.ne.s32.totalorder %s2704_s22, 0 }
 0x6f6   :  { %2708 = shalt.err (%p3361_p12)  }
 0x6f7   :  { %2710 = vsyncmov [#allocation4 + $0x8] }
 0x6fa   :  { %s2711_s30 = vpop.sfrf %2710 }
 0x6fb   :  { %p3362_p5 = scmp.ne.s32.totalorder %s2711_s30, 0 }
 0x6fd   :  { %2715 = shalt.err (%p3362_p5)  }
 0x6fe   :  { %2717 = vsyncmov [#allocation4 + $0x9] }
 0x701   :  { %s2718_s21 = vpop.sfrf %2717 }
 0x702   :  { %p3363_p9 = scmp.ne.s32.totalorder %s2718_s21, 0 }
 0x704   :  { %2722 = shalt.err (%p3363_p9)  }
 0x705   :  { %2724 = vsyncmov [#allocation4 + $0xa] }
 0x708   :  { %s2725_s29 = vpop.sfrf %2724 }
 0x709   :  { %p3364_p7 = scmp.ne.s32.totalorder %s2725_s29, 0 }
 0x70b   :  { %2729 = shalt.err (%p3364_p7)  }
 0x70c   :  { %2731 = vsyncmov [#allocation4 + $0xb] }
 0x70f   :  { %s2732_s10 = vpop.sfrf %2731 }
 0x710   :  { %p3365_p1 = scmp.ne.s32.totalorder %s2732_s10, 0 }
 0x712   :  { %2736 = shalt.err (%p3365_p1)  }
 0x713   :  { %2738 = vsyncmov [#allocation4 + $0xc] }
 0x716   :  { %s2739_s8 = vpop.sfrf %2738 }
 0x717   :  { %p3366_p13 = scmp.ne.s32.totalorder %s2739_s8, 0 }
 0x719   :  { %2743 = shalt.err (%p3366_p13)  }
 0x71a   :  { %2745 = vsyncmov [#allocation4 + $0xd] }
 0x71d   :  { %s2746_s5 = vpop.sfrf %2745 }
 0x71e   :  { %p3367_p4 = scmp.ne.s32.totalorder %s2746_s5, 0 }
 0x720   :  { %2750 = shalt.err (%p3367_p4)  }
 0x721   :  { %2752 = vsyncmov [#allocation4 + $0xe] }
 0x724   :  { %s2753_s17 = vpop.sfrf %2752 }
 0x725   :  { %p3368_p3 = scmp.ne.s32.totalorder %s2753_s17, 0 }
 0x727   :  { %2757 = shalt.err (%p3368_p3)  }
 0x728   :  { %2759 = vsyncmov [#allocation4 + $0xf] }
 0x72b   :  { %s2760_s6 = vpop.sfrf %2759 }
 0x72c   :  { %p3369_p2 = scmp.ne.s32.totalorder %s2760_s6, 0 }
 0x72e   :  { %2764 = shalt.err (%p3369_p2)  }
 0x72f   :  { %2766 = vsyncmov [#allocation4 + $0x10] }
 0x732   :  { %s2767_s7 = vpop.sfrf %2766 }
 0x733   :  { %p3370_p8 = scmp.ne.s32.totalorder %s2767_s7, 0 }
 0x735   :  { %2771 = shalt.err (%p3370_p8)  }
 0x736   :  { %2773 = vsyncmov [#allocation4 + $0x11] }
 0x739   :  { %s2774_s9 = vpop.sfrf %2773 }
 0x73a   :  { %p3371_p6 = scmp.ne.s32.totalorder %s2774_s9, 0 }
 0x73c   :  { %2778 = shalt.err (%p3371_p6)  }
 0x73d   :  { %2780 = vsyncmov [#allocation4 + $0x12] }
 0x740   :  { %s2781_s25 = vpop.sfrf %2780 }
 0x741   :  { %p3372_p11 = scmp.ne.s32.totalorder %s2781_s25, 0 }
 0x743   :  { %2785 = shalt.err (%p3372_p11)  }
 0x744   :  { %2787 = vsyncmov [#allocation4 + $0x13] }
 0x747   :  { %s2788_s15 = vpop.sfrf %2787 }
 0x748   :  { %p3373_p10 = scmp.ne.s32.totalorder %s2788_s15, 0 }
 0x74a   :  { %2792 = shalt.err (%p3373_p10)  }
 0x74b   :  { %2794 = vsyncmov [#allocation4 + $0x14] }
 0x74e   :  { %s2795_s0 = vpop.sfrf %2794 }
 0x74f   :  { %p3374_p0 = scmp.ne.s32.totalorder %s2795_s0, 0 }
 0x751   :  { %2799 = shalt.err (%p3374_p0)  }
 0x752   :  { %2801 = vsyncmov [#allocation4 + $0x15] }
 0x755   :  { %s2802_s14 = vpop.sfrf %2801 }
 0x756   :  { %p3375_p12 = scmp.ne.s32.totalorder %s2802_s14, 0 }
 0x758   :  { %2806 = shalt.err (%p3375_p12)  }
 0x759   :  { %2808 = vsyncmov [#allocation4 + $0x16] }
 0x75c   :  { %s2809_s13 = vpop.sfrf %2808 }
 0x75d   :  { %p3376_p5 = scmp.ne.s32.totalorder %s2809_s13, 0 }
 0x75f   :  { %2813 = shalt.err (%p3376_p5)  }
 0x760   :  { %2815 = vsyncmov [#allocation4 + $0x17] }
 0x763   :  { %s2816_s26 = vpop.sfrf %2815 }
 0x764   :  { %p3377_p9 = scmp.ne.s32.totalorder %s2816_s26, 0 }
 0x766   :  { %2820 = shalt.err (%p3377_p9)  }
 0x767   :  { %2822 = vsyncmov [#allocation4 + $0x18] }
 0x76a   :  { %s2823_s4 = vpop.sfrf %2822 }
 0x76b   :  { %p3378_p7 = scmp.ne.s32.totalorder %s2823_s4, 0 }
 0x76d   :  { %2827 = shalt.err (%p3378_p7)  }
 0x76e   :  { %2829 = vsyncmov [#allocation4 + $0x19] }
 0x771   :  { %s2830_s2 = vpop.sfrf %2829 }
 0x772   :  { %p3379_p1 = scmp.ne.s32.totalorder %s2830_s2, 0 }
 0x774   :  { %2834 = shalt.err (%p3379_p1)  }
 0x775   :  { %2836 = vsyncmov [#allocation4 + $0x1a] }
 0x778   :  { %s2837_s16 = vpop.sfrf %2836 }
 0x779   :  { %p3380_p13 = scmp.ne.s32.totalorder %s2837_s16, 0 }
 0x77b   :  { %2841 = shalt.err (%p3380_p13)  }
 0x77c   :  { %2843 = vsyncmov [#allocation4 + $0x1b] }
 0x77f   :  { %s2844_s28 = vpop.sfrf %2843 }
 0x780   :  { %p3381_p4 = scmp.ne.s32.totalorder %s2844_s28, 0 }
 0x782   :  { %2848 = shalt.err (%p3381_p4)  }
 0x783   :  { %2850 = vsyncmov [#allocation4 + $0x1c] }
 0x786   :  { %s2851_s20 = vpop.sfrf %2850 }
 0x787   :  { %p3382_p3 = scmp.ne.s32.totalorder %s2851_s20, 0 }
 0x789   :  { %2855 = shalt.err (%p3382_p3)  }
 0x78a   :  { %2857 = vsyncmov [#allocation4 + $0x1d] }
 0x78d   :  { %s2858_s24 = vpop.sfrf %2857 }
 0x78e   :  { %p3383_p2 = scmp.ne.s32.totalorder %s2858_s24, 0 }
 0x790   :  { %2862 = shalt.err (%p3383_p2)  }
 0x791   :  { %2864 = vsyncmov [#allocation4 + $0x1e] }
 0x794   :  { %s2865_s11 = vpop.sfrf %2864 }
 0x795   :  { %p3384_p8 = scmp.ne.s32.totalorder %s2865_s11, 0 }
 0x797   :  { %2869 = shalt.err (%p3384_p8)  }
 0x798   :  { %2871 = vsyncmov [#allocation4 + $0x1f] }
 0x79b   :  { %s2872_s18 = vpop.sfrf %2871 }
 0x79c   :  { %p3385_p6 = scmp.ne.s32.totalorder %s2872_s18, 0 }
 0x79e   :  { %2876 = shalt.err (%p3385_p6)  }

</bundles_post_ra>
